<compile_context>
chip_gen: v7x
topology: tpu7x:2x2x1
jax: 0.10.0
libtpu: 0.0.40
codegen_flags: <defaults>
</compile_context>

<pallas_src>
import functools
import math

import jax
import jax.numpy as jnp
from jax.experimental import pallas as pl
from jax.experimental.pallas import tpu as pltpu


_NEG_INF = -1e30                      # f32 mask sentinel (softmax math stays f32)
_VMEM_LIMIT = 32 * 1024 * 1024        # safe on v5e/v6e (128 MiB phys) and v7x (64 MiB phys)


def _cparams(n_parallel_axes=1):
    return pltpu.CompilerParams(
        dimension_semantics=("parallel",) * n_parallel_axes,
        vmem_limit_bytes=_VMEM_LIMIT,
    )


# ----------------------------- Pallas kernels -----------------------------

def _linear_kernel(x_ref, w_ref, b_ref, o_ref, *, relu):
    # (bm, K) @ (K, N) + (1, N); bf16 operands, f32 accumulate, f32 epilogue.
    x = x_ref[...].astype(jnp.bfloat16)
    w = w_ref[...].astype(jnp.bfloat16)
    acc = jnp.dot(x, w, preferred_element_type=jnp.float32)
    acc = acc + b_ref[...]
    if relu:
        acc = jnp.maximum(acc, 0.0)
    o_ref[...] = acc.astype(o_ref.dtype)


def linear(x, w, b, relu=False, block_m=256):
    """Row-tiled linear: grid over M so the call pipelines / shards across cores."""
    M, K = x.shape
    N = w.shape[1]
    bm = block_m if (M % block_m == 0) else M
    grid = (M // bm,)
    return pl.pallas_call(
        functools.partial(_linear_kernel, relu=relu),
        grid=grid,
        in_specs=[
            pl.BlockSpec((bm, K), lambda i: (i, 0)),
            pl.BlockSpec((K, N), lambda i: (0, 0)),
            pl.BlockSpec((1, N), lambda i: (0, 0)),
        ],
        out_specs=pl.BlockSpec((bm, N), lambda i: (i, 0)),
        out_shape=jax.ShapeDtypeStruct((M, N), jnp.float32),
        compiler_params=_cparams(1),
    )(x, w, b)


def _xattn_fuse_kernel(v_ref, l_ref, m_ref, wq_ref, wk_ref, wv_ref,
                       wf_ref, bf_ref, o_ref, *, scale):
    # Fused: masked cross-attention + residual + fusion linear + ReLU (per batch).
    v = v_ref[0]                                   # (N, Cv) f32
    l = l_ref[0]                                   # (L, Cl) f32
    m = m_ref[0]                                   # (1, L)  f32
    v16 = v.astype(jnp.bfloat16)
    l16 = l.astype(jnp.bfloat16)
    q = jnp.dot(v16, wq_ref[...].astype(jnp.bfloat16),
                preferred_element_type=jnp.float32)                 # (N, d)
    k = jnp.dot(l16, wk_ref[...].astype(jnp.bfloat16),
                preferred_element_type=jnp.float32)                 # (L, d)
    val = jnp.dot(l16, wv_ref[...].astype(jnp.bfloat16),
                  preferred_element_type=jnp.float32)               # (L, d)
    s = jax.lax.dot_general(q, k, (((1,), (1,)), ((), ())),
                            preferred_element_type=jnp.float32) * scale   # (N, L)
    s = jnp.where(m > 0.0, s, _NEG_INF)
    s = s - jnp.max(s, axis=-1, keepdims=True)
    p = jnp.exp(s)
    p = p * pl.reciprocal(jnp.sum(p, axis=-1, keepdims=True), approx=True)
    attn = jnp.dot(p.astype(jnp.bfloat16), val.astype(jnp.bfloat16),
                   preferred_element_type=jnp.float32)              # (N, d)
    fused = jnp.dot((v + attn).astype(jnp.bfloat16),
                    wf_ref[...].astype(jnp.bfloat16),
                    preferred_element_type=jnp.float32) + bf_ref[...]
    o_ref[0] = jnp.maximum(fused, 0.0).astype(o_ref.dtype)


def cross_attention_fuse(v, l, mask_1l, wq, wk, wv, wf, bf):
    B, N, Cv = v.shape
    _, L, Cl = l.shape
    d = wq.shape[1]
    scale = 1.0 / math.sqrt(d)
    return pl.pallas_call(
        functools.partial(_xattn_fuse_kernel, scale=scale),
        grid=(B,),
        in_specs=[
            pl.BlockSpec((1, N, Cv), lambda b: (b, 0, 0)),
            pl.BlockSpec((1, L, Cl), lambda b: (b, 0, 0)),
            pl.BlockSpec((1, 1, L), lambda b: (b, 0, 0)),
            pl.BlockSpec((Cv, d), lambda b: (0, 0)),
            pl.BlockSpec((Cl, d), lambda b: (0, 0)),
            pl.BlockSpec((Cl, d), lambda b: (0, 0)),
            pl.BlockSpec((d, d), lambda b: (0, 0)),
            pl.BlockSpec((1, d), lambda b: (0, 0)),
        ],
        out_specs=pl.BlockSpec((1, N, d), lambda b: (b, 0, 0)),
        out_shape=jax.ShapeDtypeStruct((B, N, d), jnp.float32),
        compiler_params=_cparams(1),
    )(v, l, mask_1l, wq, wk, wv, wf, bf)


def _upfuse_kernel(prev_ref, xc_ref, a_ref, w_ref, b_ref, o_ref):
    # Fused: bilinear upsample (as one matmul against the Kronecker interp matrix)
    # + per-scale projection (ReLU linear) + add.  One batch element per step.
    resized = jnp.dot(a_ref[...], prev_ref[0],
                      preferred_element_type=jnp.float32)           # (Nout, d)
    proj = jnp.dot(xc_ref[0].astype(jnp.bfloat16),
                   w_ref[...].astype(jnp.bfloat16),
                   preferred_element_type=jnp.float32) + b_ref[...]
    proj = jnp.maximum(proj, 0.0)
    o_ref[0] = (resized + proj).astype(o_ref.dtype)


def upsample_project_add(prev, xc, a, w, b):
    # prev: (B, Nin, d) NHWC-flat fused map; xc: (B, Nout, C); a: (Nout, Nin)
    B, Nin, d = prev.shape
    _, Nout, C = xc.shape
    return pl.pallas_call(
        _upfuse_kernel,
        grid=(B,),
        in_specs=[
            pl.BlockSpec((1, Nin, d), lambda i: (i, 0, 0)),
            pl.BlockSpec((1, Nout, C), lambda i: (i, 0, 0)),
            pl.BlockSpec((Nout, Nin), lambda i: (0, 0)),
            pl.BlockSpec((C, d), lambda i: (0, 0)),
            pl.BlockSpec((1, d), lambda i: (0, 0)),
        ],
        out_specs=pl.BlockSpec((1, Nout, d), lambda i: (i, 0, 0)),
        out_shape=jax.ShapeDtypeStruct((B, Nout, d), jnp.float32),
        compiler_params=_cparams(1),
    )(prev, xc, a, w, b)


def _head_resize_kernel(f_ref, wt_ref, bt_ref, a_ref, o_ref):
    # Fused classifier head + final bilinear resize, classes-in-sublane /
    # spatial-in-lane so every store is lane-dense and the result is NCHW-flat.
    # f: (1, N2, d); wt: (nc, d); bt: (nc, 1); a: (HW, N2) -> o: (1, nc, HW)
    f = f_ref[0].astype(jnp.bfloat16)                               # (N2, d)
    lg = jax.lax.dot_general(wt_ref[...].astype(jnp.bfloat16), f,
                             (((1,), (1,)), ((), ())),
                             preferred_element_type=jnp.float32)    # (nc, N2)
    lg = lg + bt_ref[...]
    out = jax.lax.dot_general(lg, a_ref[...], (((1,), (1,)), ((), ())),
                              preferred_element_type=jnp.float32)   # (nc, HW)
    o_ref[0] = out.astype(o_ref.dtype)


def head_and_resize(fused2, wclsT, bclsT, a_full):
    B, N2, d = fused2.shape
    nc = wclsT.shape[0]
    HW = a_full.shape[0]
    return pl.pallas_call(
        _head_resize_kernel,
        grid=(B,),
        in_specs=[
            pl.BlockSpec((1, N2, d), lambda i: (i, 0, 0)),
            pl.BlockSpec((nc, d), lambda i: (0, 0)),
            pl.BlockSpec((nc, 1), lambda i: (0, 0)),
            pl.BlockSpec((HW, N2), lambda i: (0, 0)),
        ],
        out_specs=pl.BlockSpec((1, nc, HW), lambda i: (i, 0, 0)),
        out_shape=jax.ShapeDtypeStruct((B, nc, HW), jnp.float32),
        compiler_params=_cparams(1),
    )(fused2, wclsT, bclsT, a_full)


# ------------------------ interpolation matrices ---------------------------

def _bilinear_matrix(out_size, in_size):
    """Row-interpolation matrix matching F.interpolate(bilinear, align_corners=True)."""
    if in_size == 1:
        return jnp.ones((out_size, 1), jnp.float32)
    if out_size == 1:
        src = jnp.zeros((1,), jnp.float32)
    else:
        src = jnp.arange(out_size, dtype=jnp.float32) * (in_size - 1) / (out_size - 1)
    lo = jnp.clip(jnp.floor(src), 0.0, float(in_size - 2))
    frac = src - lo
    j = jnp.arange(in_size, dtype=jnp.float32)
    a = (1.0 - frac)[:, None] * (j[None, :] == lo[:, None]).astype(jnp.float32)
    a = a + frac[:, None] * (j[None, :] == (lo[:, None] + 1.0)).astype(jnp.float32)
    return a


def _resize_matrix(out_hw, in_hw):
    # Separable bilinear as one (Hout*Wout, Hin*Win) matrix: Ah ⊗ Aw.
    ah = _bilinear_matrix(out_hw[0], in_hw[0])
    aw = _bilinear_matrix(out_hw[1], in_hw[1])
    return jnp.kron(ah, aw)


# ------------------------------- glue (JAX) --------------------------------

def _space_to_depth_nhwc(x, p):
    # (B, H, W, C) -> (B, (H//p)*(W//p), p*p*C)
    # TODO(synk): tiny reshape/transpose glue; a strided-load Pallas patch-embed
    #             would fold this into the per-stage linear.
    B, H, W, C = x.shape
    x = x.reshape(B, H // p, p, W // p, p, C)
    x = x.transpose(0, 1, 3, 2, 4, 5)
    return x.reshape(B, (H // p) * (W // p), p * p * C)


def text_encoder(text, params):
    # stand-in for BertModel(text, attention_mask=l_mask)[0] -> (B, L, Cl)
    B, L = text.shape
    emb = params["tok_emb"][text]                                  # (B, L, Cl)
    h = linear(emb.reshape(B * L, emb.shape[-1]),
               params["wt"], params["bt"], relu=True)
    return h.reshape(B, L, -1)


def backbone(x_nhwc, params):
    # NHWC patch-embedding pyramid: strides 4 / 8 / 16.
    B, H, W, _ = x_nhwc.shape
    p2 = _space_to_depth_nhwc(x_nhwc, 4)
    f2 = linear(p2.reshape(-1, p2.shape[-1]), params["w2"], params["b2"], relu=True)
    H2, W2 = H // 4, W // 4
    x_c2 = f2.reshape(B, H2, W2, -1)

    p3 = _space_to_depth_nhwc(x_c2, 2)
    f3 = linear(p3.reshape(-1, p3.shape[-1]), params["w3"], params["b3"], relu=True)
    H3, W3 = H // 8, W // 8
    x_c3 = f3.reshape(B, H3, W3, -1)

    p4 = _space_to_depth_nhwc(x_c3, 2)
    f4 = linear(p4.reshape(-1, p4.shape[-1]), params["w4"], params["b4"], relu=True)
    H4, W4 = H // 16, W // 16
    x_c4 = f4.reshape(B, H4, W4, -1)
    return x_c2, x_c3, x_c4


def classifier(x_c4, x_c3, x_c2, l_feats, l_mask, params, out_hw):
    # all feature maps NHWC; l_feats: (B, L, Cl); l_mask: (B, L)
    B, H4, W4, C4 = x_c4.shape
    _, H3, W3, C3 = x_c3.shape
    _, H2, W2, C2 = x_c2.shape

    v4 = x_c4.reshape(B, H4 * W4, C4)
    mask_1l = l_mask.reshape(B, 1, -1).astype(jnp.float32)

    # masked cross-attention + residual + fusion linear + ReLU (one kernel)
    fused4 = cross_attention_fuse(v4, l_feats, mask_1l,
                                  params["wq"], params["wk"], params["wv"],
                                  params["wf"], params["bf"])       # (B, N4, d)

    # upsample-to-c3 + project(c3) + add (one kernel)
    a3 = _resize_matrix((H3, W3), (H4, W4))
    fused3 = upsample_project_add(fused4, x_c3.reshape(B, H3 * W3, C3),
                                  a3, params["w3p"], params["b3p"])  # (B, N3, d)

    # upsample-to-c2 + project(c2) + add (one kernel)
    a2 = _resize_matrix((H2, W2), (H3, W3))
    fused2 = upsample_project_add(fused3, x_c2.reshape(B, H2 * W2, C2),
                                  a2, params["w2p"], params["b2p"])  # (B, N2, d)

    # classifier head + final bilinear resize to input resolution (one kernel),
    # output already (B, nc, H*W) -> reshape only, no transpose.
    a_full = _resize_matrix(out_hw, (H2, W2))
    out_t = head_and_resize(fused2, params["wclsT"], params["bclsT"], a_full)
    nc = params["wclsT"].shape[0]
    return out_t.reshape(B, nc, out_hw[0], out_hw[1])


def vlt_forward(x, text, l_mask, params):
    """Mirrors _VLT.forward(x, text, l_mask); final interpolate fused into the head."""
    input_shape = x.shape[-2:]
    l_feats = text_encoder(text, params)      # (B, L, Cl); the permute(0,2,1) and its
                                              # inverse inside the classifier cancel out
    x_nhwc = x.transpose(0, 2, 3, 1)          # single NCHW->NHWC at the boundary
    x_c2, x_c3, x_c4 = backbone(x_nhwc, params)
    return classifier(x_c4, x_c3, x_c2, l_feats, l_mask, params, input_shape)


# ------------------------------ parameters ---------------------------------

def init_params(key, *, vocab=1000, cl=32, c2=32, c3=64, c4=64, d=64, num_classes=2):
    ks = jax.random.split(key, 14)

    def w(k, shape):
        fan_in = shape[0]
        return jax.random.normal(k, shape, jnp.float32) / math.sqrt(fan_in)

    wcls = w(ks[11], (d, num_classes))
    return {
        # text encoder
        "tok_emb": 0.02 * jax.random.normal(ks[0], (vocab, cl), jnp.float32),
        "wt": w(ks[1], (cl, cl)), "bt": jnp.zeros((1, cl), jnp.float32),
        # backbone patch embeddings
        "w2": w(ks[2], (3 * 4 * 4, c2)), "b2": jnp.zeros((1, c2), jnp.float32),
        "w3": w(ks[3], (c2 * 2 * 2, c3)), "b3": jnp.zeros((1, c3), jnp.float32),
        "w4": w(ks[4], (c3 * 2 * 2, c4)), "b4": jnp.zeros((1, c4), jnp.float32),
        # classifier: cross attention + fusion + per-scale projections + head
        "wq": w(ks[5], (c4, d)), "wk": w(ks[6], (cl, d)), "wv": w(ks[7], (cl, d)),
        "wf": w(ks[8], (c4, d)), "bf": jnp.zeros((1, d), jnp.float32),
        "w3p": w(ks[9], (c3, d)), "b3p": jnp.zeros((1, d), jnp.float32),
        "w2p": w(ks[10], (c2, d)), "b2p": jnp.zeros((1, d), jnp.float32),
        # head stored transposed: classes in sublane, spatial in lane -> lane-dense
        "wclsT": wcls.T, "bclsT": jnp.zeros((num_classes, 1), jnp.float32),
    }


# --------------------------------- main -------------------------------------

if __name__ == "__main__":
    key = jax.random.PRNGKey(0)
    k_x, k_t, k_p = jax.random.split(key, 3)

    B, Cin, H, W = 2, 3, 64, 64
    L, vocab = 8, 1000

    x = jax.random.normal(k_x, (B, Cin, H, W), jnp.float32)
    text = jax.random.randint(k_t, (B, L), 0, vocab, dtype=jnp.int32)
    l_mask = jnp.ones((B, L), jnp.int32).at[1, 6:].set(0)   # pad last 2 tokens of sample 1

    params = init_params(k_p)

    fwd = jax.jit(functools.partial(vlt_forward, params=params))
    out = fwd(x, text, l_mask)
    out = jax.block_until_ready(out)

    assert out.shape == (B, 2, H, W), out.shape
    assert jnp.all(jnp.isfinite(out))
    print("KERNEL_OK")
</pallas_src>

<mosaic_0001>
module attributes {stable_mosaic.version = 11 : i64} {
  func.func @_linear_kernel(%arg0: i32, %arg1: memref<256x48xf32, #tpu.memory_space<vmem>>, %arg2: memref<48x32xf32, #tpu.memory_space<vmem>>, %arg3: memref<1x32xf32, #tpu.memory_space<vmem>>, %arg4: memref<256x32xf32, #tpu.memory_space<vmem>>) attributes {dimension_semantics = [#tpu.dimension_semantics<parallel>], iteration_bounds = array<i64: 2>, scalar_prefetch = 0 : i64, scratch_operands = 0 : i64, tpu.core_type = #tpu.core_type<tc>, window_params = [{transform_indices = @transform_0, window_bounds = array<i64: 256, 48>}, {pipeline_mode = #tpu.pipeline_mode<synchronous>, transform_indices = @transform_1, window_bounds = array<i64: 48, 32>}, {pipeline_mode = #tpu.pipeline_mode<synchronous>, transform_indices = @transform_2, window_bounds = array<i64: 1, 32>}, {transform_indices = @transform_3, window_bounds = array<i64: 256, 32>}]} {
    %c0 = arith.constant 0 : index
    %c0_0 = arith.constant 0 : index
    %0 = vector.load %arg1[%c0, %c0_0] : memref<256x48xf32, #tpu.memory_space<vmem>>, vector<256x48xf32>
    %1 = arith.truncf %0 : vector<256x48xf32> to vector<256x48xbf16>
    %c0_1 = arith.constant 0 : index
    %c0_2 = arith.constant 0 : index
    %2 = vector.load %arg2[%c0_1, %c0_2] : memref<48x32xf32, #tpu.memory_space<vmem>>, vector<48x32xf32>
    %3 = arith.truncf %2 : vector<48x32xf32> to vector<48x32xbf16>
    %cst = arith.constant dense<0.000000e+00> : vector<256x32xf32>
    %4 = tpu.matmul %1, %3, %cst {dimension_numbers = #tpu.dot_dimension_numbers<[1], [0], [0], [1], [0, 0, 1, 1], [], []>} : vector<256x48xbf16>, vector<48x32xbf16>, vector<256x32xf32> -> vector<256x32xf32>
    %c0_3 = arith.constant 0 : index
    %c0_4 = arith.constant 0 : index
    %5 = vector.load %arg3[%c0_3, %c0_4] : memref<1x32xf32, #tpu.memory_space<vmem>>, vector<1x32xf32>
    %6 = vector.broadcast %5 : vector<1x32xf32> to vector<256x32xf32>
    %7 = arith.addf %4, %6 : vector<256x32xf32>
    %cst_5 = arith.constant 0.000000e+00 : f32
    %8 = vector.broadcast %cst_5 : f32 to vector<256x32xf32>
    %9 = arith.maximumf %7, %8 : vector<256x32xf32>
    %c0_6 = arith.constant 0 : index
    %c0_7 = arith.constant 0 : index
    %10 = vector.load %arg4[%c0_6, %c0_7] : memref<256x32xf32, #tpu.memory_space<vmem>>, vector<256x32xf32>
    tpu.vector_store %arg4[%c0_6, %c0_7], %9 {strides = array<i32>} : memref<256x32xf32, #tpu.memory_space<vmem>>, vector<256x32xf32>,
    return
  }
  func.func @transform_0(%arg0: i32) -> (i32, i32) {
    %c0_i32 = arith.constant 0 : i32
    %c0_i32_0 = arith.constant 0 : i32
    return %arg0, %c0_i32 : i32, i32
  }
  func.func @transform_1(%arg0: i32) -> (i32, i32) {
    %c0_i32 = arith.constant 0 : i32
    %c0_i32_0 = arith.constant 0 : i32
    %c0_i32_1 = arith.constant 0 : i32
    return %c0_i32, %c0_i32_0 : i32, i32
  }
  func.func @transform_2(%arg0: i32) -> (i32, i32) {
    %c0_i32 = arith.constant 0 : i32
    %c0_i32_0 = arith.constant 0 : i32
    %c0_i32_1 = arith.constant 0 : i32
    return %c0_i32, %c0_i32_0 : i32, i32
  }
  func.func @transform_3(%arg0: i32) -> (i32, i32) {
    %c0_i32 = arith.constant 0 : i32
    %c0_i32_0 = arith.constant 0 : i32
    return %arg0, %c0_i32 : i32, i32
  }
}

module attributes {stable_mosaic.version = 11 : i64} {
  func.func @_linear_kernel(%arg0: i32, %arg1: memref<128x128xf32, #tpu.memory_space<vmem>>, %arg2: memref<128x64xf32, #tpu.memory_space<vmem>>, %arg3: memref<1x64xf32, #tpu.memory_space<vmem>>, %arg4: memref<128x64xf32, #tpu.memory_space<vmem>>) attributes {dimension_semantics = [#tpu.dimension_semantics<parallel>], iteration_bounds = array<i64: 1>, scalar_prefetch = 0 : i64, scratch_operands = 0 : i64, tpu.core_type = #tpu.core_type<tc>, window_params = [{transform_indices = @transform_0, window_bounds = array<i64: 128, 128>}, {pipeline_mode = #tpu.pipeline_mode<synchronous>, transform_indices = @transform_1, window_bounds = array<i64: 128, 64>}, {pipeline_mode = #tpu.pipeline_mode<synchronous>, transform_indices = @transform_2, window_bounds = array<i64: 1, 64>}, {transform_indices = @transform_3, window_bounds = array<i64: 128, 64>}]} {
    %c0 = arith.constant 0 : index
    %c0_0 = arith.constant 0 : index
    %0 = vector.load %arg1[%c0, %c0_0] : memref<128x128xf32, #tpu.memory_space<vmem>>, vector<128x128xf32>
    %1 = arith.truncf %0 : vector<128x128xf32> to vector<128x128xbf16>
    %c0_1 = arith.constant 0 : index
    %c0_2 = arith.constant 0 : index
    %2 = vector.load %arg2[%c0_1, %c0_2] : memref<128x64xf32, #tpu.memory_space<vmem>>, vector<128x64xf32>
    %3 = arith.truncf %2 : vector<128x64xf32> to vector<128x64xbf16>
    %cst = arith.constant dense<0.000000e+00> : vector<128x64xf32>
    %4 = tpu.matmul %1, %3, %cst {dimension_numbers = #tpu.dot_dimension_numbers<[1], [0], [0], [1], [0, 0, 1, 1], [], []>} : vector<128x128xbf16>, vector<128x64xbf16>, vector<128x64xf32> -> vector<128x64xf32>
    %c0_3 = arith.constant 0 : index
    %c0_4 = arith.constant 0 : index
    %5 = vector.load %arg3[%c0_3, %c0_4] : memref<1x64xf32, #tpu.memory_space<vmem>>, vector<1x64xf32>
    %6 = vector.broadcast %5 : vector<1x64xf32> to vector<128x64xf32>
    %7 = arith.addf %4, %6 : vector<128x64xf32>
    %cst_5 = arith.constant 0.000000e+00 : f32
    %8 = vector.broadcast %cst_5 : f32 to vector<128x64xf32>
    %9 = arith.maximumf %7, %8 : vector<128x64xf32>
    %c0_6 = arith.constant 0 : index
    %c0_7 = arith.constant 0 : index
    %10 = vector.load %arg4[%c0_6, %c0_7] : memref<128x64xf32, #tpu.memory_space<vmem>>, vector<128x64xf32>
    tpu.vector_store %arg4[%c0_6, %c0_7], %9 {strides = array<i32>} : memref<128x64xf32, #tpu.memory_space<vmem>>, vector<128x64xf32>,
    return
  }
  func.func @transform_0(%arg0: i32) -> (i32, i32) {
    %c0_i32 = arith.constant 0 : i32
    %c0_i32_0 = arith.constant 0 : i32
    return %arg0, %c0_i32 : i32, i32
  }
  func.func @transform_1(%arg0: i32) -> (i32, i32) {
    %c0_i32 = arith.constant 0 : i32
    %c0_i32_0 = arith.constant 0 : i32
    %c0_i32_1 = arith.constant 0 : i32
    return %c0_i32, %c0_i32_0 : i32, i32
  }
  func.func @transform_2(%arg0: i32) -> (i32, i32) {
    %c0_i32 = arith.constant 0 : i32
    %c0_i32_0 = arith.constant 0 : i32
    %c0_i32_1 = arith.constant 0 : i32
    return %c0_i32, %c0_i32_0 : i32, i32
  }
  func.func @transform_3(%arg0: i32) -> (i32, i32) {
    %c0_i32 = arith.constant 0 : i32
    %c0_i32_0 = arith.constant 0 : i32
    return %arg0, %c0_i32 : i32, i32
  }
}

module attributes {stable_mosaic.version = 11 : i64} {
  func.func @_linear_kernel(%arg0: i32, %arg1: memref<16x32xf32, #tpu.memory_space<vmem>>, %arg2: memref<32x32xf32, #tpu.memory_space<vmem>>, %arg3: memref<1x32xf32, #tpu.memory_space<vmem>>, %arg4: memref<16x32xf32, #tpu.memory_space<vmem>>) attributes {dimension_semantics = [#tpu.dimension_semantics<parallel>], iteration_bounds = array<i64: 1>, scalar_prefetch = 0 : i64, scratch_operands = 0 : i64, tpu.core_type = #tpu.core_type<tc>, window_params = [{transform_indices = @transform_0, window_bounds = array<i64: 16, 32>}, {pipeline_mode = #tpu.pipeline_mode<synchronous>, transform_indices = @transform_1, window_bounds = array<i64: 32, 32>}, {pipeline_mode = #tpu.pipeline_mode<synchronous>, transform_indices = @transform_2, window_bounds = array<i64: 1, 32>}, {transform_indices = @transform_3, window_bounds = array<i64: 16, 32>}]} {
    %c0 = arith.constant 0 : index
    %c0_0 = arith.constant 0 : index
    %0 = vector.load %arg1[%c0, %c0_0] : memref<16x32xf32, #tpu.memory_space<vmem>>, vector<16x32xf32>
    %1 = arith.truncf %0 : vector<16x32xf32> to vector<16x32xbf16>
    %c0_1 = arith.constant 0 : index
    %c0_2 = arith.constant 0 : index
    %2 = vector.load %arg2[%c0_1, %c0_2] : memref<32x32xf32, #tpu.memory_space<vmem>>, vector<32x32xf32>
    %3 = arith.truncf %2 : vector<32x32xf32> to vector<32x32xbf16>
    %cst = arith.constant dense<0.000000e+00> : vector<16x32xf32>
    %4 = tpu.matmul %1, %3, %cst {dimension_numbers = #tpu.dot_dimension_numbers<[1], [0], [0], [1], [0, 0, 1, 1], [], []>} : vector<16x32xbf16>, vector<32x32xbf16>, vector<16x32xf32> -> vector<16x32xf32>
    %c0_3 = arith.constant 0 : index
    %c0_4 = arith.constant 0 : index
    %5 = vector.load %arg3[%c0_3, %c0_4] : memref<1x32xf32, #tpu.memory_space<vmem>>, vector<1x32xf32>
    %6 = vector.broadcast %5 : vector<1x32xf32> to vector<16x32xf32>
    %7 = arith.addf %4, %6 : vector<16x32xf32>
    %cst_5 = arith.constant 0.000000e+00 : f32
    %8 = vector.broadcast %cst_5 : f32 to vector<16x32xf32>
    %9 = arith.maximumf %7, %8 : vector<16x32xf32>
    %c0_6 = arith.constant 0 : index
    %c0_7 = arith.constant 0 : index
    %10 = vector.load %arg4[%c0_6, %c0_7] : memref<16x32xf32, #tpu.memory_space<vmem>>, vector<16x32xf32>
    tpu.vector_store %arg4[%c0_6, %c0_7], %9 {strides = array<i32>} : memref<16x32xf32, #tpu.memory_space<vmem>>, vector<16x32xf32>,
    return
  }
  func.func @transform_0(%arg0: i32) -> (i32, i32) {
    %c0_i32 = arith.constant 0 : i32
    %c0_i32_0 = arith.constant 0 : i32
    return %arg0, %c0_i32 : i32, i32
  }
  func.func @transform_1(%arg0: i32) -> (i32, i32) {
    %c0_i32 = arith.constant 0 : i32
    %c0_i32_0 = arith.constant 0 : i32
    %c0_i32_1 = arith.constant 0 : i32
    return %c0_i32, %c0_i32_0 : i32, i32
  }
  func.func @transform_2(%arg0: i32) -> (i32, i32) {
    %c0_i32 = arith.constant 0 : i32
    %c0_i32_0 = arith.constant 0 : i32
    %c0_i32_1 = arith.constant 0 : i32
    return %c0_i32, %c0_i32_0 : i32, i32
  }
  func.func @transform_3(%arg0: i32) -> (i32, i32) {
    %c0_i32 = arith.constant 0 : i32
    %c0_i32_0 = arith.constant 0 : i32
    return %arg0, %c0_i32 : i32, i32
  }
}

module attributes {stable_mosaic.version = 11 : i64} {
  func.func @_xattn_fuse_kernel(%arg0: i32, %arg1: memref<1x16x64xf32, #tpu.memory_space<vmem>>, %arg2: memref<1x8x32xf32, #tpu.memory_space<vmem>>, %arg3: memref<1x1x8xf32, #tpu.memory_space<vmem>>, %arg4: memref<64x64xf32, #tpu.memory_space<vmem>>, %arg5: memref<32x64xf32, #tpu.memory_space<vmem>>, %arg6: memref<32x64xf32, #tpu.memory_space<vmem>>, %arg7: memref<64x64xf32, #tpu.memory_space<vmem>>, %arg8: memref<1x64xf32, #tpu.memory_space<vmem>>, %arg9: memref<1x16x64xf32, #tpu.memory_space<vmem>>) attributes {dimension_semantics = [#tpu.dimension_semantics<parallel>], iteration_bounds = array<i64: 2>, scalar_prefetch = 0 : i64, scratch_operands = 0 : i64, tpu.core_type = #tpu.core_type<tc>, window_params = [{transform_indices = @transform_0, window_bounds = array<i64: 1, 16, 64>}, {transform_indices = @transform_1, window_bounds = array<i64: 1, 8, 32>}, {transform_indices = @transform_2, window_bounds = array<i64: 1, 1, 8>}, {pipeline_mode = #tpu.pipeline_mode<synchronous>, transform_indices = @transform_3, window_bounds = array<i64: 64, 64>}, {pipeline_mode = #tpu.pipeline_mode<synchronous>, transform_indices = @transform_4, window_bounds = array<i64: 32, 64>}, {pipeline_mode = #tpu.pipeline_mode<synchronous>, transform_indices = @transform_5, window_bounds = array<i64: 32, 64>}, {pipeline_mode = #tpu.pipeline_mode<synchronous>, transform_indices = @transform_6, window_bounds = array<i64: 64, 64>}, {pipeline_mode = #tpu.pipeline_mode<synchronous>, transform_indices = @transform_7, window_bounds = array<i64: 1, 64>}, {transform_indices = @transform_8, window_bounds = array<i64: 1, 16, 64>}]} {
    %c0 = arith.constant 0 : index
    %c0_0 = arith.constant 0 : index
    %c0_1 = arith.constant 0 : index
    %0 = vector.load %arg1[%c0, %c0_0, %c0_1] : memref<1x16x64xf32, #tpu.memory_space<vmem>>, vector<1x16x64xf32>
    %1 = vector.shape_cast %0 : vector<1x16x64xf32> to vector<16x64xf32>
    %c0_2 = arith.constant 0 : index
    %c0_3 = arith.constant 0 : index
    %c0_4 = arith.constant 0 : index
    %2 = vector.load %arg2[%c0_2, %c0_3, %c0_4] : memref<1x8x32xf32, #tpu.memory_space<vmem>>, vector<1x8x32xf32>
    %3 = vector.shape_cast %2 : vector<1x8x32xf32> to vector<8x32xf32>
    %c0_5 = arith.constant 0 : index
    %c0_6 = arith.constant 0 : index
    %c0_7 = arith.constant 0 : index
    %4 = vector.load %arg3[%c0_5, %c0_6, %c0_7] : memref<1x1x8xf32, #tpu.memory_space<vmem>>, vector<1x1x8xf32>
    %5 = vector.shape_cast %4 : vector<1x1x8xf32> to vector<1x8xf32>
    %6 = arith.truncf %1 : vector<16x64xf32> to vector<16x64xbf16>
    %7 = arith.truncf %3 : vector<8x32xf32> to vector<8x32xbf16>
    %c0_8 = arith.constant 0 : index
    %c0_9 = arith.constant 0 : index
    %8 = vector.load %arg4[%c0_8, %c0_9] : memref<64x64xf32, #tpu.memory_space<vmem>>, vector<64x64xf32>
    %9 = arith.truncf %8 : vector<64x64xf32> to vector<64x64xbf16>
    %cst = arith.constant dense<0.000000e+00> : vector<16x64xf32>
    %10 = tpu.matmul %6, %9, %cst {dimension_numbers = #tpu.dot_dimension_numbers<[1], [0], [0], [1], [0, 0, 1, 1], [], []>} : vector<16x64xbf16>, vector<64x64xbf16>, vector<16x64xf32> -> vector<16x64xf32>
    %c0_10 = arith.constant 0 : index
    %c0_11 = arith.constant 0 : index
    %11 = vector.load %arg5[%c0_10, %c0_11] : memref<32x64xf32, #tpu.memory_space<vmem>>, vector<32x64xf32>
    %12 = arith.truncf %11 : vector<32x64xf32> to vector<32x64xbf16>
    %cst_12 = arith.constant dense<0.000000e+00> : vector<8x64xf32>
    %13 = tpu.matmul %7, %12, %cst_12 {dimension_numbers = #tpu.dot_dimension_numbers<[1], [0], [0], [1], [0, 0, 1, 1], [], []>} : vector<8x32xbf16>, vector<32x64xbf16>, vector<8x64xf32> -> vector<8x64xf32>
    %c0_13 = arith.constant 0 : index
    %c0_14 = arith.constant 0 : index
    %14 = vector.load %arg6[%c0_13, %c0_14] : memref<32x64xf32, #tpu.memory_space<vmem>>, vector<32x64xf32>
    %15 = arith.truncf %14 : vector<32x64xf32> to vector<32x64xbf16>
    %cst_15 = arith.constant dense<0.000000e+00> : vector<8x64xf32>
    %16 = tpu.matmul %7, %15, %cst_15 {dimension_numbers = #tpu.dot_dimension_numbers<[1], [0], [0], [1], [0, 0, 1, 1], [], []>} : vector<8x32xbf16>, vector<32x64xbf16>, vector<8x64xf32> -> vector<8x64xf32>
    %cst_16 = arith.constant dense<0.000000e+00> : vector<16x8xf32>
    %17 = tpu.matmul %10, %13, %cst_16 {dimension_numbers = #tpu.dot_dimension_numbers<[1], [1], [0], [0], [0, 0, 1, 0], [], []>} : vector<16x64xf32>, vector<8x64xf32>, vector<16x8xf32> -> vector<16x8xf32>
    %cst_17 = arith.constant 1.250000e-01 : f32
    %18 = vector.broadcast %cst_17 : f32 to vector<16x8xf32>
    %19 = arith.mulf %17, %18 : vector<16x8xf32>
    %cst_18 = arith.constant 0.000000e+00 : f32
    %20 = vector.broadcast %cst_18 : f32 to vector<1x8xf32>
    %21 = arith.cmpf ogt, %5, %20 : vector<1x8xf32>
    %cst_19 = arith.constant -1.000000e+30 : f32
    %22 = vector.shape_cast %21 : vector<1x8xi1> to vector<1x8xi1>
    %23 = vector.broadcast %22 : vector<1x8xi1> to vector<16x8xi1>
    %24 = vector.broadcast %cst_19 : f32 to vector<16x8xf32>
    %25 = arith.select %23, %19, %24 : vector<16x8xi1>, vector<16x8xf32>
    %cst_20 = arith.constant dense<0xFF800000> : vector<16xf32>
    %26 = vector.multi_reduction <maximumf>, %25, %cst_20 [1] : vector<16x8xf32> to vector<16xf32>
    %27 = vector.shape_cast %26 : vector<16xf32> to vector<16x1xf32>
    %28 = vector.broadcast %27 : vector<16x1xf32> to vector<16x8xf32>
    %29 = arith.subf %25, %28 : vector<16x8xf32>
    %30 = math.exp %29 : vector<16x8xf32>
    %cst_21 = arith.constant dense<0.000000e+00> : vector<16xf32>
    %31 = vector.multi_reduction <add>, %30, %cst_21 [1] : vector<16x8xf32> to vector<16xf32>
    %32 = vector.shape_cast %31 : vector<16xf32> to vector<16x1xf32>
    %33 = tpu.reciprocal %32 {approx = true} : vector<16x1xf32> -> vector<16x1xf32>
    %34 = vector.broadcast %33 : vector<16x1xf32> to vector<16x8xf32>
    %35 = arith.mulf %30, %34 : vector<16x8xf32>
    %36 = arith.truncf %35 : vector<16x8xf32> to vector<16x8xbf16>
    %37 = arith.truncf %16 : vector<8x64xf32> to vector<8x64xbf16>
    %cst_22 = arith.constant dense<0.000000e+00> : vector<16x64xf32>
    %38 = tpu.matmul %36, %37, %cst_22 {dimension_numbers = #tpu.dot_dimension_numbers<[1], [0], [0], [1], [0, 0, 1, 1], [], []>} : vector<16x8xbf16>, vector<8x64xbf16>, vector<16x64xf32> -> vector<16x64xf32>
    %39 = arith.addf %1, %38 : vector<16x64xf32>
    %40 = arith.truncf %39 : vector<16x64xf32> to vector<16x64xbf16>
    %c0_23 = arith.constant 0 : index
    %c0_24 = arith.constant 0 : index
    %41 = vector.load %arg7[%c0_23, %c0_24] : memref<64x64xf32, #tpu.memory_space<vmem>>, vector<64x64xf32>
    %42 = arith.truncf %41 : vector<64x64xf32> to vector<64x64xbf16>
    %cst_25 = arith.constant dense<0.000000e+00> : vector<16x64xf32>
    %43 = tpu.matmul %40, %42, %cst_25 {dimension_numbers = #tpu.dot_dimension_numbers<[1], [0], [0], [1], [0, 0, 1, 1], [], []>} : vector<16x64xbf16>, vector<64x64xbf16>, vector<16x64xf32> -> vector<16x64xf32>
    %c0_26 = arith.constant 0 : index
    %c0_27 = arith.constant 0 : index
    %44 = vector.load %arg8[%c0_26, %c0_27] : memref<1x64xf32, #tpu.memory_space<vmem>>, vector<1x64xf32>
    %45 = vector.broadcast %44 : vector<1x64xf32> to vector<16x64xf32>
    %46 = arith.addf %43, %45 : vector<16x64xf32>
    %cst_28 = arith.constant 0.000000e+00 : f32
    %47 = vector.broadcast %cst_28 : f32 to vector<16x64xf32>
    %48 = arith.maximumf %46, %47 : vector<16x64xf32>
    %c0_29 = arith.constant 0 : index
    %c0_30 = arith.constant 0 : index
    %c0_31 = arith.constant 0 : index
    %49 = vector.load %arg9[%c0_29, %c0_30, %c0_31] : memref<1x16x64xf32, #tpu.memory_space<vmem>>, vector<1x16x64xf32>
    %50 = vector.shape_cast %49 : vector<1x16x64xf32> to vector<16x64xf32>
    %51 = vector.shape_cast %48 : vector<16x64xf32> to vector<1x16x64xf32>
    tpu.vector_store %arg9[%c0_29, %c0_30, %c0_31], %51 {strides = array<i32>} : memref<1x16x64xf32, #tpu.memory_space<vmem>>, vector<1x16x64xf32>,
    return
  }
  func.func @transform_0(%arg0: i32) -> (i32, i32, i32) {
    %c0_i32 = arith.constant 0 : i32
    %c0_i32_0 = arith.constant 0 : i32
    %c0_i32_1 = arith.constant 0 : i32
    return %arg0, %c0_i32, %c0_i32_0 : i32, i32, i32
  }
  func.func @transform_1(%arg0: i32) -> (i32, i32, i32) {
    %c0_i32 = arith.constant 0 : i32
    %c0_i32_0 = arith.constant 0 : i32
    %c0_i32_1 = arith.constant 0 : i32
    return %arg0, %c0_i32, %c0_i32_0 : i32, i32, i32
  }
  func.func @transform_2(%arg0: i32) -> (i32, i32, i32) {
    %c0_i32 = arith.constant 0 : i32
    %c0_i32_0 = arith.constant 0 : i32
    %c0_i32_1 = arith.constant 0 : i32
    return %arg0, %c0_i32, %c0_i32_0 : i32, i32, i32
  }
  func.func @transform_3(%arg0: i32) -> (i32, i32) {
    %c0_i32 = arith.constant 0 : i32
    %c0_i32_0 = arith.constant 0 : i32
    %c0_i32_1 = arith.constant 0 : i32
    return %c0_i32, %c0_i32_0 : i32, i32
  }
  func.func @transform_4(%arg0: i32) -> (i32, i32) {
    %c0_i32 = arith.constant 0 : i32
    %c0_i32_0 = arith.constant 0 : i32
    %c0_i32_1 = arith.constant 0 : i32
    return %c0_i32, %c0_i32_0 : i32, i32
  }
  func.func @transform_5(%arg0: i32) -> (i32, i32) {
    %c0_i32 = arith.constant 0 : i32
    %c0_i32_0 = arith.constant 0 : i32
    %c0_i32_1 = arith.constant 0 : i32
    return %c0_i32, %c0_i32_0 : i32, i32
  }
  func.func @transform_6(%arg0: i32) -> (i32, i32) {
    %c0_i32 = arith.constant 0 : i32
    %c0_i32_0 = arith.constant 0 : i32
    %c0_i32_1 = arith.constant 0 : i32
    return %c0_i32, %c0_i32_0 : i32, i32
  }
  func.func @transform_7(%arg0: i32) -> (i32, i32) {
    %c0_i32 = arith.constant 0 : i32
    %c0_i32_0 = arith.constant 0 : i32
    %c0_i32_1 = arith.constant 0 : i32
    return %c0_i32, %c0_i32_0 : i32, i32
  }
  func.func @transform_8(%arg0: i32) -> (i32, i32, i32) {
    %c0_i32 = arith.constant 0 : i32
    %c0_i32_0 = arith.constant 0 : i32
    %c0_i32_1 = arith.constant 0 : i32
    return %arg0, %c0_i32, %c0_i32_0 : i32, i32, i32
  }
}

module attributes {stable_mosaic.version = 11 : i64} {
  func.func @_linear_kernel(%arg0: i32, %arg1: memref<32x256xf32, #tpu.memory_space<vmem>>, %arg2: memref<256x64xf32, #tpu.memory_space<vmem>>, %arg3: memref<1x64xf32, #tpu.memory_space<vmem>>, %arg4: memref<32x64xf32, #tpu.memory_space<vmem>>) attributes {dimension_semantics = [#tpu.dimension_semantics<parallel>], iteration_bounds = array<i64: 1>, scalar_prefetch = 0 : i64, scratch_operands = 0 : i64, tpu.core_type = #tpu.core_type<tc>, window_params = [{transform_indices = @transform_0, window_bounds = array<i64: 32, 256>}, {pipeline_mode = #tpu.pipeline_mode<synchronous>, transform_indices = @transform_1, window_bounds = array<i64: 256, 64>}, {pipeline_mode = #tpu.pipeline_mode<synchronous>, transform_indices = @transform_2, window_bounds = array<i64: 1, 64>}, {transform_indices = @transform_3, window_bounds = array<i64: 32, 64>}]} {
    %c0 = arith.constant 0 : index
    %c0_0 = arith.constant 0 : index
    %0 = vector.load %arg1[%c0, %c0_0] : memref<32x256xf32, #tpu.memory_space<vmem>>, vector<32x256xf32>
    %1 = arith.truncf %0 : vector<32x256xf32> to vector<32x256xbf16>
    %c0_1 = arith.constant 0 : index
    %c0_2 = arith.constant 0 : index
    %2 = vector.load %arg2[%c0_1, %c0_2] : memref<256x64xf32, #tpu.memory_space<vmem>>, vector<256x64xf32>
    %3 = arith.truncf %2 : vector<256x64xf32> to vector<256x64xbf16>
    %cst = arith.constant dense<0.000000e+00> : vector<32x64xf32>
    %4 = tpu.matmul %1, %3, %cst {dimension_numbers = #tpu.dot_dimension_numbers<[1], [0], [0], [1], [0, 0, 1, 1], [], []>} : vector<32x256xbf16>, vector<256x64xbf16>, vector<32x64xf32> -> vector<32x64xf32>
    %c0_3 = arith.constant 0 : index
    %c0_4 = arith.constant 0 : index
    %5 = vector.load %arg3[%c0_3, %c0_4] : memref<1x64xf32, #tpu.memory_space<vmem>>, vector<1x64xf32>
    %6 = vector.broadcast %5 : vector<1x64xf32> to vector<32x64xf32>
    %7 = arith.addf %4, %6 : vector<32x64xf32>
    %cst_5 = arith.constant 0.000000e+00 : f32
    %8 = vector.broadcast %cst_5 : f32 to vector<32x64xf32>
    %9 = arith.maximumf %7, %8 : vector<32x64xf32>
    %c0_6 = arith.constant 0 : index
    %c0_7 = arith.constant 0 : index
    %10 = vector.load %arg4[%c0_6, %c0_7] : memref<32x64xf32, #tpu.memory_space<vmem>>, vector<32x64xf32>
    tpu.vector_store %arg4[%c0_6, %c0_7], %9 {strides = array<i32>} : memref<32x64xf32, #tpu.memory_space<vmem>>, vector<32x64xf32>,
    return
  }
  func.func @transform_0(%arg0: i32) -> (i32, i32) {
    %c0_i32 = arith.constant 0 : i32
    %c0_i32_0 = arith.constant 0 : i32
    return %arg0, %c0_i32 : i32, i32
  }
  func.func @transform_1(%arg0: i32) -> (i32, i32) {
    %c0_i32 = arith.constant 0 : i32
    %c0_i32_0 = arith.constant 0 : i32
    %c0_i32_1 = arith.constant 0 : i32
    return %c0_i32, %c0_i32_0 : i32, i32
  }
  func.func @transform_2(%arg0: i32) -> (i32, i32) {
    %c0_i32 = arith.constant 0 : i32
    %c0_i32_0 = arith.constant 0 : i32
    %c0_i32_1 = arith.constant 0 : i32
    return %c0_i32, %c0_i32_0 : i32, i32
  }
  func.func @transform_3(%arg0: i32) -> (i32, i32) {
    %c0_i32 = arith.constant 0 : i32
    %c0_i32_0 = arith.constant 0 : i32
    return %arg0, %c0_i32 : i32, i32
  }
}

module attributes {stable_mosaic.version = 11 : i64} {
  func.func @_upfuse_kernel(%arg0: i32, %arg1: memref<1x16x64xf32, #tpu.memory_space<vmem>>, %arg2: memref<1x64x64xf32, #tpu.memory_space<vmem>>, %arg3: memref<64x16xf32, #tpu.memory_space<vmem>>, %arg4: memref<64x64xf32, #tpu.memory_space<vmem>>, %arg5: memref<1x64xf32, #tpu.memory_space<vmem>>, %arg6: memref<1x64x64xf32, #tpu.memory_space<vmem>>) attributes {dimension_semantics = [#tpu.dimension_semantics<parallel>], iteration_bounds = array<i64: 2>, scalar_prefetch = 0 : i64, scratch_operands = 0 : i64, tpu.core_type = #tpu.core_type<tc>, window_params = [{transform_indices = @transform_0, window_bounds = array<i64: 1, 16, 64>}, {transform_indices = @transform_1, window_bounds = array<i64: 1, 64, 64>}, {pipeline_mode = #tpu.pipeline_mode<synchronous>, transform_indices = @transform_2, window_bounds = array<i64: 64, 16>}, {pipeline_mode = #tpu.pipeline_mode<synchronous>, transform_indices = @transform_3, window_bounds = array<i64: 64, 64>}, {pipeline_mode = #tpu.pipeline_mode<synchronous>, transform_indices = @transform_4, window_bounds = array<i64: 1, 64>}, {transform_indices = @transform_5, window_bounds = array<i64: 1, 64, 64>}]} {
    %c0 = arith.constant 0 : index
    %c0_0 = arith.constant 0 : index
    %0 = vector.load %arg3[%c0, %c0_0] : memref<64x16xf32, #tpu.memory_space<vmem>>, vector<64x16xf32>
    %c0_1 = arith.constant 0 : index
    %c0_2 = arith.constant 0 : index
    %c0_3 = arith.constant 0 : index
    %1 = vector.load %arg1[%c0_1, %c0_2, %c0_3] : memref<1x16x64xf32, #tpu.memory_space<vmem>>, vector<1x16x64xf32>
    %2 = vector.shape_cast %1 : vector<1x16x64xf32> to vector<16x64xf32>
    %cst = arith.constant dense<0.000000e+00> : vector<64x64xf32>
    %3 = tpu.matmul %0, %2, %cst {dimension_numbers = #tpu.dot_dimension_numbers<[1], [0], [0], [1], [0, 0, 1, 1], [], []>} : vector<64x16xf32>, vector<16x64xf32>, vector<64x64xf32> -> vector<64x64xf32>
    %c0_4 = arith.constant 0 : index
    %c0_5 = arith.constant 0 : index
    %c0_6 = arith.constant 0 : index
    %4 = vector.load %arg2[%c0_4, %c0_5, %c0_6] : memref<1x64x64xf32, #tpu.memory_space<vmem>>, vector<1x64x64xf32>
    %5 = vector.shape_cast %4 : vector<1x64x64xf32> to vector<64x64xf32>
    %6 = arith.truncf %5 : vector<64x64xf32> to vector<64x64xbf16>
    %c0_7 = arith.constant 0 : index
    %c0_8 = arith.constant 0 : index
    %7 = vector.load %arg4[%c0_7, %c0_8] : memref<64x64xf32, #tpu.memory_space<vmem>>, vector<64x64xf32>
    %8 = arith.truncf %7 : vector<64x64xf32> to vector<64x64xbf16>
    %cst_9 = arith.constant dense<0.000000e+00> : vector<64x64xf32>
    %9 = tpu.matmul %6, %8, %cst_9 {dimension_numbers = #tpu.dot_dimension_numbers<[1], [0], [0], [1], [0, 0, 1, 1], [], []>} : vector<64x64xbf16>, vector<64x64xbf16>, vector<64x64xf32> -> vector<64x64xf32>
    %c0_10 = arith.constant 0 : index
    %c0_11 = arith.constant 0 : index
    %10 = vector.load %arg5[%c0_10, %c0_11] : memref<1x64xf32, #tpu.memory_space<vmem>>, vector<1x64xf32>
    %11 = vector.broadcast %10 : vector<1x64xf32> to vector<64x64xf32>
    %12 = arith.addf %9, %11 : vector<64x64xf32>
    %cst_12 = arith.constant 0.000000e+00 : f32
    %13 = vector.broadcast %cst_12 : f32 to vector<64x64xf32>
    %14 = arith.maximumf %12, %13 : vector<64x64xf32>
    %15 = arith.addf %3, %14 : vector<64x64xf32>
    %c0_13 = arith.constant 0 : index
    %c0_14 = arith.constant 0 : index
    %c0_15 = arith.constant 0 : index
    %16 = vector.load %arg6[%c0_13, %c0_14, %c0_15] : memref<1x64x64xf32, #tpu.memory_space<vmem>>, vector<1x64x64xf32>
    %17 = vector.shape_cast %16 : vector<1x64x64xf32> to vector<64x64xf32>
    %18 = vector.shape_cast %15 : vector<64x64xf32> to vector<1x64x64xf32>
    tpu.vector_store %arg6[%c0_13, %c0_14, %c0_15], %18 {strides = array<i32>} : memref<1x64x64xf32, #tpu.memory_space<vmem>>, vector<1x64x64xf32>,
    return
  }
  func.func @transform_0(%arg0: i32) -> (i32, i32, i32) {
    %c0_i32 = arith.constant 0 : i32
    %c0_i32_0 = arith.constant 0 : i32
    %c0_i32_1 = arith.constant 0 : i32
    return %arg0, %c0_i32, %c0_i32_0 : i32, i32, i32
  }
  func.func @transform_1(%arg0: i32) -> (i32, i32, i32) {
    %c0_i32 = arith.constant 0 : i32
    %c0_i32_0 = arith.constant 0 : i32
    %c0_i32_1 = arith.constant 0 : i32
    return %arg0, %c0_i32, %c0_i32_0 : i32, i32, i32
  }
  func.func @transform_2(%arg0: i32) -> (i32, i32) {
    %c0_i32 = arith.constant 0 : i32
    %c0_i32_0 = arith.constant 0 : i32
    %c0_i32_1 = arith.constant 0 : i32
    return %c0_i32, %c0_i32_0 : i32, i32
  }
  func.func @transform_3(%arg0: i32) -> (i32, i32) {
    %c0_i32 = arith.constant 0 : i32
    %c0_i32_0 = arith.constant 0 : i32
    %c0_i32_1 = arith.constant 0 : i32
    return %c0_i32, %c0_i32_0 : i32, i32
  }
  func.func @transform_4(%arg0: i32) -> (i32, i32) {
    %c0_i32 = arith.constant 0 : i32
    %c0_i32_0 = arith.constant 0 : i32
    %c0_i32_1 = arith.constant 0 : i32
    return %c0_i32, %c0_i32_0 : i32, i32
  }
  func.func @transform_5(%arg0: i32) -> (i32, i32, i32) {
    %c0_i32 = arith.constant 0 : i32
    %c0_i32_0 = arith.constant 0 : i32
    %c0_i32_1 = arith.constant 0 : i32
    return %arg0, %c0_i32, %c0_i32_0 : i32, i32, i32
  }
}

module attributes {stable_mosaic.version = 11 : i64} {
  func.func @_upfuse_kernel(%arg0: i32, %arg1: memref<1x64x64xf32, #tpu.memory_space<vmem>>, %arg2: memref<1x256x32xf32, #tpu.memory_space<vmem>>, %arg3: memref<256x64xf32, #tpu.memory_space<vmem>>, %arg4: memref<32x64xf32, #tpu.memory_space<vmem>>, %arg5: memref<1x64xf32, #tpu.memory_space<vmem>>, %arg6: memref<1x256x64xf32, #tpu.memory_space<vmem>>) attributes {dimension_semantics = [#tpu.dimension_semantics<parallel>], iteration_bounds = array<i64: 2>, scalar_prefetch = 0 : i64, scratch_operands = 0 : i64, tpu.core_type = #tpu.core_type<tc>, window_params = [{transform_indices = @transform_0, window_bounds = array<i64: 1, 64, 64>}, {transform_indices = @transform_1, window_bounds = array<i64: 1, 256, 32>}, {pipeline_mode = #tpu.pipeline_mode<synchronous>, transform_indices = @transform_2, window_bounds = array<i64: 256, 64>}, {pipeline_mode = #tpu.pipeline_mode<synchronous>, transform_indices = @transform_3, window_bounds = array<i64: 32, 64>}, {pipeline_mode = #tpu.pipeline_mode<synchronous>, transform_indices = @transform_4, window_bounds = array<i64: 1, 64>}, {transform_indices = @transform_5, window_bounds = array<i64: 1, 256, 64>}]} {
    %c0 = arith.constant 0 : index
    %c0_0 = arith.constant 0 : index
    %0 = vector.load %arg3[%c0, %c0_0] : memref<256x64xf32, #tpu.memory_space<vmem>>, vector<256x64xf32>
    %c0_1 = arith.constant 0 : index
    %c0_2 = arith.constant 0 : index
    %c0_3 = arith.constant 0 : index
    %1 = vector.load %arg1[%c0_1, %c0_2, %c0_3] : memref<1x64x64xf32, #tpu.memory_space<vmem>>, vector<1x64x64xf32>
    %2 = vector.shape_cast %1 : vector<1x64x64xf32> to vector<64x64xf32>
    %cst = arith.constant dense<0.000000e+00> : vector<256x64xf32>
    %3 = tpu.matmul %0, %2, %cst {dimension_numbers = #tpu.dot_dimension_numbers<[1], [0], [0], [1], [0, 0, 1, 1], [], []>} : vector<256x64xf32>, vector<64x64xf32>, vector<256x64xf32> -> vector<256x64xf32>
    %c0_4 = arith.constant 0 : index
    %c0_5 = arith.constant 0 : index
    %c0_6 = arith.constant 0 : index
    %4 = vector.load %arg2[%c0_4, %c0_5, %c0_6] : memref<1x256x32xf32, #tpu.memory_space<vmem>>, vector<1x256x32xf32>
    %5 = vector.shape_cast %4 : vector<1x256x32xf32> to vector<256x32xf32>
    %6 = arith.truncf %5 : vector<256x32xf32> to vector<256x32xbf16>
    %c0_7 = arith.constant 0 : index
    %c0_8 = arith.constant 0 : index
    %7 = vector.load %arg4[%c0_7, %c0_8] : memref<32x64xf32, #tpu.memory_space<vmem>>, vector<32x64xf32>
    %8 = arith.truncf %7 : vector<32x64xf32> to vector<32x64xbf16>
    %cst_9 = arith.constant dense<0.000000e+00> : vector<256x64xf32>
    %9 = tpu.matmul %6, %8, %cst_9 {dimension_numbers = #tpu.dot_dimension_numbers<[1], [0], [0], [1], [0, 0, 1, 1], [], []>} : vector<256x32xbf16>, vector<32x64xbf16>, vector<256x64xf32> -> vector<256x64xf32>
    %c0_10 = arith.constant 0 : index
    %c0_11 = arith.constant 0 : index
    %10 = vector.load %arg5[%c0_10, %c0_11] : memref<1x64xf32, #tpu.memory_space<vmem>>, vector<1x64xf32>
    %11 = vector.broadcast %10 : vector<1x64xf32> to vector<256x64xf32>
    %12 = arith.addf %9, %11 : vector<256x64xf32>
    %cst_12 = arith.constant 0.000000e+00 : f32
    %13 = vector.broadcast %cst_12 : f32 to vector<256x64xf32>
    %14 = arith.maximumf %12, %13 : vector<256x64xf32>
    %15 = arith.addf %3, %14 : vector<256x64xf32>
    %c0_13 = arith.constant 0 : index
    %c0_14 = arith.constant 0 : index
    %c0_15 = arith.constant 0 : index
    %16 = vector.load %arg6[%c0_13, %c0_14, %c0_15] : memref<1x256x64xf32, #tpu.memory_space<vmem>>, vector<1x256x64xf32>
    %17 = vector.shape_cast %16 : vector<1x256x64xf32> to vector<256x64xf32>
    %18 = vector.shape_cast %15 : vector<256x64xf32> to vector<1x256x64xf32>
    tpu.vector_store %arg6[%c0_13, %c0_14, %c0_15], %18 {strides = array<i32>} : memref<1x256x64xf32, #tpu.memory_space<vmem>>, vector<1x256x64xf32>,
    return
  }
  func.func @transform_0(%arg0: i32) -> (i32, i32, i32) {
    %c0_i32 = arith.constant 0 : i32
    %c0_i32_0 = arith.constant 0 : i32
    %c0_i32_1 = arith.constant 0 : i32
    return %arg0, %c0_i32, %c0_i32_0 : i32, i32, i32
  }
  func.func @transform_1(%arg0: i32) -> (i32, i32, i32) {
    %c0_i32 = arith.constant 0 : i32
    %c0_i32_0 = arith.constant 0 : i32
    %c0_i32_1 = arith.constant 0 : i32
    return %arg0, %c0_i32, %c0_i32_0 : i32, i32, i32
  }
  func.func @transform_2(%arg0: i32) -> (i32, i32) {
    %c0_i32 = arith.constant 0 : i32
    %c0_i32_0 = arith.constant 0 : i32
    %c0_i32_1 = arith.constant 0 : i32
    return %c0_i32, %c0_i32_0 : i32, i32
  }
  func.func @transform_3(%arg0: i32) -> (i32, i32) {
    %c0_i32 = arith.constant 0 : i32
    %c0_i32_0 = arith.constant 0 : i32
    %c0_i32_1 = arith.constant 0 : i32
    return %c0_i32, %c0_i32_0 : i32, i32
  }
  func.func @transform_4(%arg0: i32) -> (i32, i32) {
    %c0_i32 = arith.constant 0 : i32
    %c0_i32_0 = arith.constant 0 : i32
    %c0_i32_1 = arith.constant 0 : i32
    return %c0_i32, %c0_i32_0 : i32, i32
  }
  func.func @transform_5(%arg0: i32) -> (i32, i32, i32) {
    %c0_i32 = arith.constant 0 : i32
    %c0_i32_0 = arith.constant 0 : i32
    %c0_i32_1 = arith.constant 0 : i32
    return %arg0, %c0_i32, %c0_i32_0 : i32, i32, i32
  }
}

module attributes {stable_mosaic.version = 11 : i64} {
  func.func @_head_resize_kernel(%arg0: i32, %arg1: memref<1x256x64xf32, #tpu.memory_space<vmem>>, %arg2: memref<2x64xf32, #tpu.memory_space<vmem>>, %arg3: memref<2x1xf32, #tpu.memory_space<vmem>>, %arg4: memref<4096x256xf32, #tpu.memory_space<vmem>>, %arg5: memref<1x2x4096xf32, #tpu.memory_space<vmem>>) attributes {dimension_semantics = [#tpu.dimension_semantics<parallel>], iteration_bounds = array<i64: 2>, scalar_prefetch = 0 : i64, scratch_operands = 0 : i64, tpu.core_type = #tpu.core_type<tc>, window_params = [{transform_indices = @transform_0, window_bounds = array<i64: 1, 256, 64>}, {pipeline_mode = #tpu.pipeline_mode<synchronous>, transform_indices = @transform_1, window_bounds = array<i64: 2, 64>}, {pipeline_mode = #tpu.pipeline_mode<synchronous>, transform_indices = @transform_2, window_bounds = array<i64: 2, 1>}, {pipeline_mode = #tpu.pipeline_mode<synchronous>, transform_indices = @transform_3, window_bounds = array<i64: 4096, 256>}, {transform_indices = @transform_4, window_bounds = array<i64: 1, 2, 4096>}]} {
    %c0 = arith.constant 0 : index
    %c0_0 = arith.constant 0 : index
    %c0_1 = arith.constant 0 : index
    %0 = vector.load %arg1[%c0, %c0_0, %c0_1] : memref<1x256x64xf32, #tpu.memory_space<vmem>>, vector<1x256x64xf32>
    %1 = vector.shape_cast %0 : vector<1x256x64xf32> to vector<256x64xf32>
    %2 = arith.truncf %1 : vector<256x64xf32> to vector<256x64xbf16>
    %c0_2 = arith.constant 0 : index
    %c0_3 = arith.constant 0 : index
    %3 = vector.load %arg2[%c0_2, %c0_3] : memref<2x64xf32, #tpu.memory_space<vmem>>, vector<2x64xf32>
    %4 = arith.truncf %3 : vector<2x64xf32> to vector<2x64xbf16>
    %cst = arith.constant dense<0.000000e+00> : vector<2x256xf32>
    %5 = tpu.matmul %4, %2, %cst {dimension_numbers = #tpu.dot_dimension_numbers<[1], [1], [0], [0], [0, 0, 1, 0], [], []>} : vector<2x64xbf16>, vector<256x64xbf16>, vector<2x256xf32> -> vector<2x256xf32>
    %c0_4 = arith.constant 0 : index
    %c0_5 = arith.constant 0 : index
    %6 = vector.load %arg3[%c0_4, %c0_5] : memref<2x1xf32, #tpu.memory_space<vmem>>, vector<2x1xf32>
    %7 = vector.broadcast %6 : vector<2x1xf32> to vector<2x256xf32>
    %8 = arith.addf %5, %7 : vector<2x256xf32>
    %c0_6 = arith.constant 0 : index
    %c0_7 = arith.constant 0 : index
    %9 = vector.load %arg4[%c0_6, %c0_7] : memref<4096x256xf32, #tpu.memory_space<vmem>>, vector<4096x256xf32>
    %cst_8 = arith.constant dense<0.000000e+00> : vector<2x4096xf32>
    %10 = tpu.matmul %8, %9, %cst_8 {dimension_numbers = #tpu.dot_dimension_numbers<[1], [1], [0], [0], [0, 0, 1, 0], [], []>} : vector<2x256xf32>, vector<4096x256xf32>, vector<2x4096xf32> -> vector<2x4096xf32>
    %c0_9 = arith.constant 0 : index
    %c0_10 = arith.constant 0 : index
    %c0_11 = arith.constant 0 : index
    %11 = vector.load %arg5[%c0_9, %c0_10, %c0_11] : memref<1x2x4096xf32, #tpu.memory_space<vmem>>, vector<1x2x4096xf32>
    %12 = vector.shape_cast %11 : vector<1x2x4096xf32> to vector<2x4096xf32>
    %13 = vector.shape_cast %10 : vector<2x4096xf32> to vector<1x2x4096xf32>
    tpu.vector_store %arg5[%c0_9, %c0_10, %c0_11], %13 {strides = array<i32>} : memref<1x2x4096xf32, #tpu.memory_space<vmem>>, vector<1x2x4096xf32>,
    return
  }
  func.func @transform_0(%arg0: i32) -> (i32, i32, i32) {
    %c0_i32 = arith.constant 0 : i32
    %c0_i32_0 = arith.constant 0 : i32
    %c0_i32_1 = arith.constant 0 : i32
    return %arg0, %c0_i32, %c0_i32_0 : i32, i32, i32
  }
  func.func @transform_1(%arg0: i32) -> (i32, i32) {
    %c0_i32 = arith.constant 0 : i32
    %c0_i32_0 = arith.constant 0 : i32
    %c0_i32_1 = arith.constant 0 : i32
    return %c0_i32, %c0_i32_0 : i32, i32
  }
  func.func @transform_2(%arg0: i32) -> (i32, i32) {
    %c0_i32 = arith.constant 0 : i32
    %c0_i32_0 = arith.constant 0 : i32
    %c0_i32_1 = arith.constant 0 : i32
    return %c0_i32, %c0_i32_0 : i32, i32
  }
  func.func @transform_3(%arg0: i32) -> (i32, i32) {
    %c0_i32 = arith.constant 0 : i32
    %c0_i32_0 = arith.constant 0 : i32
    %c0_i32_1 = arith.constant 0 : i32
    return %c0_i32, %c0_i32_0 : i32, i32
  }
  func.func @transform_4(%arg0: i32) -> (i32, i32, i32) {
    %c0_i32 = arith.constant 0 : i32
    %c0_i32_0 = arith.constant 0 : i32
    %c0_i32_1 = arith.constant 0 : i32
    return %arg0, %c0_i32, %c0_i32_0 : i32, i32, i32
  }
}

</mosaic_0001>

<bundles_post_ra>
// kernel: vlt_forward.9
= control target key start
LH: loop header
LB: loop body
LE: loop exit
PB: predicated region body
PF: predicated region fallthrough
CT: control target
= control target key end

     0   :  { %s697_s12 = smov 0   ;;  %s892_s0 = inlined_call_operand.vmem [shape: f32[512,48], index: 0, kind: input, shape index: {}]   ;;  %s893_s1 = inlined_call_operand.vmem [shape: f32[48,32], index: 1, kind: input, shape index: {}]   ;;  %s894_s2 = inlined_call_operand.vmem [shape: f32[1,32], index: 2, kind: input, shape index: {}]   ;;  %s895_s3 = inlined_call_operand.vmem [shape: f32[512,32], index: 3, kind: output, shape index: {}]  }
   0x1 LB: > { %s570_s13 = sadd.s32 4294967295, %s675_s12   ;;  %p574_p0 = scmp.ge.s32.totalorder %s675_s12, 1  ;;  %s675_s12 = sphi %s697_s12, %s13_s12  }
   0x2   : > { %p138_p1 = scmp.lt.s32.totalorder %s675_s12, 3 }
   0x4   : > { %p139_p2 = pnand %p574_p0, %p138_p1 }
   0x5   : > { %v223_v0 = vld [vmem:[%s893_s1] sm:$0xff] (!%p139_p2)  ;;  %v224_v1 = vld [vmem:[%s893_s1 + $0x8] sm:$0xff] (!%p139_p2)  ;;  %v225_v2 = vld [vmem:[%s893_s1 + $0x10] sm:$0xff] (!%p139_p2)  ;;  %s575_s20 = sshll.u32 (!%p139_p2), %s570_s13, 5  ;;  %vm239_vm0 = vcmask (!%p139_p2), 392192   ;;  %vm481_vm1 = vcmask (!%p139_p2), 261120  }
   0x6   : > { %142 = sbr.rel (%p139_p2) target bundleno = 265 (0x109), region = 32  ;;  %v229_v3 = vpack.c.bf16 (!%p139_p2), %v224_v1, %v223_v0  ;;  %v226_v4 = vld [vmem:[%s893_s1 + $0x18] sm:$0xff] (!%p139_p2)  ;;  %p163_p3 = scmp.lt.s32.totalorder (!%p139_p2), %s575_s20, 63  ;;  %v227_v6 = vld [vmem:[%s893_s1 + $0x20] sm:$0xff] (!%p139_p2)  ;;  %v228_v7 = vld [vmem:[%s893_s1 + $0x28] sm:$0xff] (!%p139_p2) }
   0x7   : > { %v230_v5 = vpack.c.bf16 (!%p139_p2), %v226_v4, %v225_v2  ;;  %v231_v8 = vpack.c.bf16 (!%p139_p2), %v228_v7, %v227_v6  ;;  %v784_v57 = vld [vmem:[%s894_s2] ss:$0 sm:$0xff] (!%p139_p2) }
   0x8   : > { %617 = vmatprep.subr.bf16.mxu0 (!%p139_p2), %v229_v3  ;;  %655 = vmatprep.subr.bf16.mxu1 (!%p139_p2), %v229_v3 }
   0x9   : > { %618 = vmatpush3.bf16.msra.mxu0 (!%p139_p2), %v229_v3  ;;  %658 = vmatpush3.bf16.msra.mxu1 (!%p139_p2), %v229_v3 }
   0xa   : > { %619 = vmatprep.subr.bf16.mxu0 (!%p139_p2), %v230_v5  ;;  %656 = vmatprep.subr.bf16.mxu1 (!%p139_p2), %v230_v5 }
   0xd   : > { %s897_s20 = smov (!%p163_p3, %s575_s20), 63  ;;  %620 = vmatpush3.bf16.msra.mxu0 %v230_v5  ;;  %659 = vmatpush3.bf16.msra.mxu1 %v230_v5 }
   0xe   : > { %s576_s27 = sshll.u32 %s897_s20, 3  ;;  %621 = vmatprep.subr.bf16.mxu0 %v231_v8  ;;  %657 = vmatprep.subr.bf16.mxu1 %v231_v8 }
   0xf   : > { %s731_s30 = scalar_lea.vmem %s892_s0, %s576_s27  ;;  %s793_s8 = scalar_lea.vmem %s895_s3, %s576_s27 }
  0x10   : > { %v175_v9 = vld [vmem:[%s731_s30] sm:$0xff]  ;;  %v176_v10 = vld [vmem:[%s731_s30 + $0x8] sm:$0xff]  ;;  %v177_v14 = vld [vmem:[%s731_s30 + $0x10] sm:$0xff] }
  0x11   : > { %v191_v11 = vld [vmem:[%s731_s30 + $0x80] sm:$0xff]  ;;  %v207_v12 = vpack.c.bf16 %v176_v10, %v175_v9  ;;  %v192_v13 = vld [vmem:[%s731_s30 + $0x88] sm:$0xff]  ;;  %v178_v15 = vld [vmem:[%s731_s30 + $0x18] sm:$0xff]  ;;  %622 = vmatpush3.bf16.msra.mxu0 %v231_v8  ;;  %660 = vmatpush3.bf16.msra.mxu1 %v231_v8 }
  0x12   : > { %v215_v16 = vpack.c.bf16 %v192_v13, %v191_v11  ;;  %v193_v17 = vld [vmem:[%s731_s30 + $0x90] sm:$0xff]  ;;  %v194_v18 = vld [vmem:[%s731_s30 + $0x98] sm:$0xff]  ;;  %v179_v19 = vld [vmem:[%s731_s30 + $0x20] sm:$0xff]  ;;  %v208_v23 = vpack.c.bf16 %v178_v15, %v177_v14 }
  0x13   : > { %623 = vmatprep.mubr.msk.bf16.mxu0 %vm239_vm0, %v207_v12  ;;  %v180_v20 = vld [vmem:[%s731_s30 + $0x28] sm:$0xff]  ;;  %v195_v21 = vld [vmem:[%s731_s30 + $0xa0] sm:$0xff]  ;;  %v216_v24 = vpack.c.bf16 %v194_v18, %v193_v17  ;;  %v181_v27 = vld [vmem:[%s731_s30 + $0x30] sm:$0xff] }
  0x14   : > { %v196_v22 = vld [vmem:[%s731_s30 + $0xa8] sm:$0xff]  ;;  %639 = vmatprep.mubr.msk.bf16.mxu1 %vm239_vm0, %v215_v16  ;;  %v209_v25 = vpack.c.bf16 %v180_v20, %v179_v19  ;;  %624 = vmatmul.mubr.msk.bf16.vlgmr.msra.gmra.mrb[0].mxu0 %vm239_vm0, %v208_v23  ;;  %v182_v28 = vld [vmem:[%s731_s30 + $0x38] sm:$0xff]  ;;  %v197_v29 = vld [vmem:[%s731_s30 + $0xb0] sm:$0xff] }
  0x15   : > { %v217_v26 = vpack.c.bf16 %v196_v22, %v195_v21  ;;  %640 = vmatmul.mubr.msk.bf16.vlgmr.msra.gmra.mrb[0].mxu1 %vm239_vm0, %v216_v24  ;;  %v198_v30 = vld [vmem:[%s731_s30 + $0xb8] sm:$0xff]  ;;  %v183_v31 = vld [vmem:[%s731_s30 + $0x40] sm:$0xff]  ;;  %v184_v32 = vld [vmem:[%s731_s30 + $0x48] sm:$0xff]  ;;  %v210_v35 = vpack.c.bf16 %v182_v28, %v181_v27 }
  0x16   : > { %627 = vmatprep.mubr.msk.bf16.mxu0 %vm239_vm0, %v209_v25  ;;  %v199_v33 = vld [vmem:[%s731_s30 + $0xc0] sm:$0xff]  ;;  %v200_v34 = vld [vmem:[%s731_s30 + $0xc8] sm:$0xff]  ;;  %v218_v36 = vpack.c.bf16 %v198_v30, %v197_v29  ;;  %v211_v37 = vpack.c.bf16 %v184_v32, %v183_v31  ;;  %v185_v39 = vld [vmem:[%s731_s30 + $0x50] sm:$0xff] }
  0x17   : > { %643 = vmatprep.mubr.msk.bf16.mxu1 %vm239_vm0, %v217_v26  ;;  %v219_v38 = vpack.c.bf16 %v200_v34, %v199_v33  ;;  %v186_v40 = vld [vmem:[%s731_s30 + $0x58] sm:$0xff]  ;;  %v201_v41 = vld [vmem:[%s731_s30 + $0xd0] sm:$0xff]  ;;  %v187_v43 = vld [vmem:[%s731_s30 + $0x60] sm:$0xff] }
  0x18   : > { %v202_v42 = vld [vmem:[%s731_s30 + $0xd8] sm:$0xff]  ;;  %v188_v44 = vld [vmem:[%s731_s30 + $0x68] sm:$0xff]  ;;  %v203_v45 = vld [vmem:[%s731_s30 + $0xe0] sm:$0xff]  ;;  %v212_v47 = vpack.c.bf16 %v186_v40, %v185_v39 }
  0x19   : > { %v204_v46 = vld [vmem:[%s731_s30 + $0xe8] sm:$0xff]  ;;  %v220_v48 = vpack.c.bf16 %v202_v42, %v201_v41  ;;  %v213_v49 = vpack.c.bf16 %v188_v44, %v187_v43  ;;  %v189_v51 = vld [vmem:[%s731_s30 + $0x70] sm:$0xff]  ;;  %v190_v52 = vld [vmem:[%s731_s30 + $0x78] sm:$0xff] }
  0x1a   : > { %v221_v50 = vpack.c.bf16 %v204_v46, %v203_v45  ;;  %v205_v53 = vld [vmem:[%s731_s30 + $0xf0] sm:$0xff]  ;;  %v206_v54 = vld [vmem:[%s731_s30 + $0xf8] sm:$0xff]  ;;  %v214_v55 = vpack.c.bf16 %v190_v52, %v189_v51 }
  0x1b   : > { %v222_v56 = vpack.c.bf16 %v206_v54, %v205_v53 }
  0x1c   : > { %628 = vmatmul.mubr.msk.bf16.gmra.mrb[4].mxu0 %vm239_vm0, %v210_v35 }
  0x1d   : > { %644 = vmatmul.mubr.msk.bf16.gmra.mrb[4].mxu1 %vm239_vm0, %v218_v36  ;;  %631 = vmatprep.mubr.msk.bf16.mxu0 %vm239_vm0, %v211_v37 }
  0x1e   : > { %647 = vmatprep.mubr.msk.bf16.mxu1 %vm239_vm0, %v219_v38 }
  0x24   : > { %632 = vmatmul.mubr.msk.bf16.gmra.mrb[8].mxu0 %vm239_vm0, %v212_v47 }
  0x25   : > { %648 = vmatmul.mubr.msk.bf16.gmra.mrb[8].mxu1 %vm239_vm0, %v220_v48  ;;  %635 = vmatprep.mubr.msk.bf16.mxu0 %vm239_vm0, %v213_v49 }
  0x26   : > { %651 = vmatprep.mubr.msk.bf16.mxu1 %vm239_vm0, %v221_v50 }
  0x2c   : > { %636 = vmatmul.mubr.msk.bf16.gmra.mrb[12].mxu0 %vm239_vm0, %v214_v55 }
  0x2d   : > { %652 = vmatmul.mubr.msk.bf16.gmra.mrb[12].mxu1 %vm239_vm0, %v222_v56 }
  0xe7   : > { %v625_v58 = vpop.f32.mrb[0].mxu0 }
  0xe8   : > { %v641_v59 = vpop.f32.mrb[0].mxu1  ;;  %v331_v60 = vadd.f32 %v625_v58, %v784_v57  ;;  %v322_v62 = vpop.f32.mrb[1].mxu0 }
  0xe9   : > { %v395_v61 = vadd.f32 %v641_v59, %v784_v57  ;;  %v386_v63 = vpop.f32.mrb[1].mxu1  ;;  %v323_v0 = vadd.f32 %v784_v57, %v322_v62  ;;  %v626_v2 = vpop.f32.mrb[2].mxu0 }
  0xea   : > { %v387_v1 = vadd.f32 %v784_v57, %v386_v63  ;;  %v642_v3 = vpop.f32.mrb[2].mxu1  ;;  %v451_v4 = vmax.f32 %v331_v60, 0.0  ;;  %v334_v6 = vadd.f32 %v626_v2, %v784_v57  ;;  %v325_v8 = vpop.f32.mrb[3].mxu0 }
  0xeb   : > { %v467_v5 = vmax.f32 %v395_v61, 0.0  ;;  %v398_v7 = vadd.f32 %v642_v3, %v784_v57  ;;  %v389_v9 = vpop.f32.mrb[3].mxu1  ;;  %v449_v10 = vmax.f32 %v323_v0, 0.0  ;;  %v326_v12 = vadd.f32 %v784_v57, %v325_v8 }
  0xec   : > { %v465_v11 = vmax.f32 %v387_v1, 0.0  ;;  %v390_v13 = vadd.f32 %v784_v57, %v389_v9  ;;  %484 = vst.msk [vmem:[%s793_s8 + $0x10] sm:$0xff] %vm481_vm1, %v451_v4  ;;  %v452_v14 = vmax.f32 %v334_v6, 0.0 }
  0xed   : > { %500 = vst.msk [vmem:[%s793_s8 + $0x90] sm:$0xff] %vm481_vm1, %v467_v5  ;;  %v468_v15 = vmax.f32 %v398_v7, 0.0  ;;  %482 = vst.msk [vmem:[%s793_s8] sm:$0xff] %vm481_vm1, %v449_v10  ;;  %v450_v16 = vmax.f32 %v326_v12, 0.0 }
  0xee   : > { %498 = vst.msk [vmem:[%s793_s8 + $0x80] sm:$0xff] %vm481_vm1, %v465_v11  ;;  %v466_v17 = vmax.f32 %v390_v13, 0.0  ;;  %485 = vst.msk [vmem:[%s793_s8 + $0x18] sm:$0xff] %vm481_vm1, %v452_v14 }
  0xef   : > { %501 = vst.msk [vmem:[%s793_s8 + $0x98] sm:$0xff] %vm481_vm1, %v468_v15  ;;  %483 = vst.msk [vmem:[%s793_s8 + $0x8] sm:$0xff] %vm481_vm1, %v450_v16  ;;  %v629_v18 = vpop.f32.mrb[4].mxu0 }
  0xf0   : > { %499 = vst.msk [vmem:[%s793_s8 + $0x88] sm:$0xff] %vm481_vm1, %v466_v17  ;;  %v645_v19 = vpop.f32.mrb[4].mxu1  ;;  %v347_v20 = vadd.f32 %v629_v18, %v784_v57  ;;  %v338_v22 = vpop.f32.mrb[5].mxu0 }
  0xf1   : > { %v411_v21 = vadd.f32 %v645_v19, %v784_v57  ;;  %v402_v23 = vpop.f32.mrb[5].mxu1  ;;  %v339_v24 = vadd.f32 %v784_v57, %v338_v22  ;;  %v630_v26 = vpop.f32.mrb[6].mxu0 }
  0xf2   : > { %v403_v25 = vadd.f32 %v784_v57, %v402_v23  ;;  %v646_v27 = vpop.f32.mrb[6].mxu1  ;;  %v455_v28 = vmax.f32 %v347_v20, 0.0  ;;  %v350_v30 = vadd.f32 %v630_v26, %v784_v57  ;;  %v341_v32 = vpop.f32.mrb[7].mxu0 }
  0xf3   : > { %v471_v29 = vmax.f32 %v411_v21, 0.0  ;;  %v414_v31 = vadd.f32 %v646_v27, %v784_v57  ;;  %v405_v33 = vpop.f32.mrb[7].mxu1  ;;  %v453_v34 = vmax.f32 %v339_v24, 0.0  ;;  %v342_v36 = vadd.f32 %v784_v57, %v341_v32 }
  0xf4   : > { %v469_v35 = vmax.f32 %v403_v25, 0.0  ;;  %v406_v37 = vadd.f32 %v784_v57, %v405_v33  ;;  %488 = vst.msk [vmem:[%s793_s8 + $0x30] sm:$0xff] %vm481_vm1, %v455_v28  ;;  %v456_v38 = vmax.f32 %v350_v30, 0.0 }
  0xf5   : > { %504 = vst.msk [vmem:[%s793_s8 + $0xb0] sm:$0xff] %vm481_vm1, %v471_v29  ;;  %v472_v39 = vmax.f32 %v414_v31, 0.0  ;;  %486 = vst.msk [vmem:[%s793_s8 + $0x20] sm:$0xff] %vm481_vm1, %v453_v34  ;;  %v454_v40 = vmax.f32 %v342_v36, 0.0 }
  0xf6   : > { %502 = vst.msk [vmem:[%s793_s8 + $0xa0] sm:$0xff] %vm481_vm1, %v469_v35  ;;  %v470_v41 = vmax.f32 %v406_v37, 0.0  ;;  %489 = vst.msk [vmem:[%s793_s8 + $0x38] sm:$0xff] %vm481_vm1, %v456_v38 }
  0xf7   : > { %505 = vst.msk [vmem:[%s793_s8 + $0xb8] sm:$0xff] %vm481_vm1, %v472_v39  ;;  %487 = vst.msk [vmem:[%s793_s8 + $0x28] sm:$0xff] %vm481_vm1, %v454_v40  ;;  %v633_v42 = vpop.f32.mrb[8].mxu0 }
  0xf8   : > { %503 = vst.msk [vmem:[%s793_s8 + $0xa8] sm:$0xff] %vm481_vm1, %v470_v41  ;;  %v649_v43 = vpop.f32.mrb[8].mxu1  ;;  %v363_v44 = vadd.f32 %v633_v42, %v784_v57  ;;  %v354_v46 = vpop.f32.mrb[9].mxu0 }
  0xf9   : > { %v427_v45 = vadd.f32 %v649_v43, %v784_v57  ;;  %v418_v47 = vpop.f32.mrb[9].mxu1  ;;  %v355_v48 = vadd.f32 %v784_v57, %v354_v46  ;;  %v634_v50 = vpop.f32.mrb[10].mxu0 }
  0xfa   : > { %v419_v49 = vadd.f32 %v784_v57, %v418_v47  ;;  %v650_v51 = vpop.f32.mrb[10].mxu1  ;;  %v459_v52 = vmax.f32 %v363_v44, 0.0  ;;  %v366_v54 = vadd.f32 %v634_v50, %v784_v57  ;;  %v357_v56 = vpop.f32.mrb[11].mxu0 }
  0xfb   : > { %v475_v53 = vmax.f32 %v427_v45, 0.0  ;;  %v430_v55 = vadd.f32 %v650_v51, %v784_v57  ;;  %v421_v58 = vpop.f32.mrb[11].mxu1  ;;  %v457_v59 = vmax.f32 %v355_v48, 0.0  ;;  %v358_v61 = vadd.f32 %v784_v57, %v357_v56 }
  0xfc   : > { %v473_v60 = vmax.f32 %v419_v49, 0.0  ;;  %v422_v62 = vadd.f32 %v784_v57, %v421_v58  ;;  %492 = vst.msk [vmem:[%s793_s8 + $0x50] sm:$0xff] %vm481_vm1, %v459_v52  ;;  %v460_v63 = vmax.f32 %v366_v54, 0.0 }
  0xfd   : > { %508 = vst.msk [vmem:[%s793_s8 + $0xd0] sm:$0xff] %vm481_vm1, %v475_v53  ;;  %v476_v0 = vmax.f32 %v430_v55, 0.0  ;;  %490 = vst.msk [vmem:[%s793_s8 + $0x40] sm:$0xff] %vm481_vm1, %v457_v59  ;;  %v458_v1 = vmax.f32 %v358_v61, 0.0 }
  0xfe   : > { %506 = vst.msk [vmem:[%s793_s8 + $0xc0] sm:$0xff] %vm481_vm1, %v473_v60  ;;  %v474_v2 = vmax.f32 %v422_v62, 0.0  ;;  %493 = vst.msk [vmem:[%s793_s8 + $0x58] sm:$0xff] %vm481_vm1, %v460_v63 }
  0xff   : > { %509 = vst.msk [vmem:[%s793_s8 + $0xd8] sm:$0xff] %vm481_vm1, %v476_v0  ;;  %491 = vst.msk [vmem:[%s793_s8 + $0x48] sm:$0xff] %vm481_vm1, %v458_v1  ;;  %v637_v3 = vpop.f32.mrb[12].mxu0 }
 0x100   : > { %507 = vst.msk [vmem:[%s793_s8 + $0xc8] sm:$0xff] %vm481_vm1, %v474_v2  ;;  %v653_v4 = vpop.f32.mrb[12].mxu1  ;;  %v379_v5 = vadd.f32 %v637_v3, %v784_v57  ;;  %v370_v7 = vpop.f32.mrb[13].mxu0 }
 0x101   : > { %v443_v6 = vadd.f32 %v653_v4, %v784_v57  ;;  %v434_v8 = vpop.f32.mrb[13].mxu1  ;;  %v371_v9 = vadd.f32 %v784_v57, %v370_v7  ;;  %v638_v11 = vpop.f32.mrb[14].mxu0 }
 0x102   : > { %v435_v10 = vadd.f32 %v784_v57, %v434_v8  ;;  %v654_v12 = vpop.f32.mrb[14].mxu1  ;;  %v463_v13 = vmax.f32 %v379_v5, 0.0  ;;  %v382_v15 = vadd.f32 %v638_v11, %v784_v57  ;;  %v373_v17 = vpop.f32.mrb[15].mxu0 }
 0x103   : > { %v479_v14 = vmax.f32 %v443_v6, 0.0  ;;  %v446_v16 = vadd.f32 %v654_v12, %v784_v57  ;;  %v437_v18 = vpop.f32.mrb[15].mxu1  ;;  %v461_v19 = vmax.f32 %v371_v9, 0.0  ;;  %v374_v21 = vadd.f32 %v784_v57, %v373_v17 }
 0x104   : > { %v477_v20 = vmax.f32 %v435_v10, 0.0  ;;  %v438_v22 = vadd.f32 %v784_v57, %v437_v18  ;;  %496 = vst.msk [vmem:[%s793_s8 + $0x70] sm:$0xff] %vm481_vm1, %v463_v13  ;;  %v464_v23 = vmax.f32 %v382_v15, 0.0 }
 0x105   : > { %512 = vst.msk [vmem:[%s793_s8 + $0xf0] sm:$0xff] %vm481_vm1, %v479_v14  ;;  %v480_v24 = vmax.f32 %v446_v16, 0.0  ;;  %494 = vst.msk [vmem:[%s793_s8 + $0x60] sm:$0xff] %vm481_vm1, %v461_v19  ;;  %v462_v25 = vmax.f32 %v374_v21, 0.0 }
 0x106   : > { %510 = vst.msk [vmem:[%s793_s8 + $0xe0] sm:$0xff] %vm481_vm1, %v477_v20  ;;  %v478_v26 = vmax.f32 %v438_v22, 0.0  ;;  %497 = vst.msk [vmem:[%s793_s8 + $0x78] sm:$0xff] %vm481_vm1, %v464_v23 }
 0x107   : > { %513 = vst.msk [vmem:[%s793_s8 + $0xf8] sm:$0xff] %vm481_vm1, %v480_v24  ;;  %495 = vst.msk [vmem:[%s793_s8 + $0x68] sm:$0xff] %vm481_vm1, %v462_v25 }
 0x108   : > { %511 = vst.msk [vmem:[%s793_s8 + $0xe8] sm:$0xff] %vm481_vm1, %v478_v26 }
 0x109 PF: > { %s13_s12 = sadd.s32 1, %s675_s12  }
 0x10a   : > { %p10_p4 = scmp.ge.s32.totalorder %s13_s12, 4  }
 0x10c   :  { %12 = sbr.rel (!%p10_p4) target bundleno = 1 (0x1), region = 62 }

// kernel: vlt_forward.10
= control target key start
LH: loop header
LB: loop body
LE: loop exit
PB: predicated region body
PF: predicated region fallthrough
CT: control target
= control target key end

     0   :  { %vm183_vm0 = vcmask 523264   ;;  %s452_s1 = inlined_call_operand.vmem [shape: f32[128,64], index: 1, kind: input, shape index: {}]   ;;  %s453_s0 = inlined_call_operand.vmem [shape: f32[128,128], index: 0, kind: input, shape index: {}]   ;;  %s454_s2 = inlined_call_operand.vmem [shape: f32[1,64], index: 2, kind: input, shape index: {}]   ;;  %s455_s3 = inlined_call_operand.vmem [shape: f32[128,64], index: 3, kind: output, shape index: {}]  }
   0x1   :  { %v39_v0 = vld [vmem:[%s452_s1] sm:$0xff]  ;;  %v40_v1 = vld [vmem:[%s452_s1 + $0x8] sm:$0xff]  ;;  %v41_v2 = vld [vmem:[%s452_s1 + $0x10] sm:$0xff] }
   0x2   :  { %v55_v3 = vpack.c.bf16 %v40_v1, %v39_v0  ;;  %v42_v4 = vld [vmem:[%s452_s1 + $0x18] sm:$0xff]  ;;  %v43_v6 = vld [vmem:[%s452_s1 + $0x20] sm:$0xff]  ;;  %v44_v7 = vld [vmem:[%s452_s1 + $0x28] sm:$0xff] }
   0x3   :  { %v56_v5 = vpack.c.bf16 %v42_v4, %v41_v2  ;;  %v57_v8 = vpack.c.bf16 %v44_v7, %v43_v6  ;;  %v45_v9 = vld [vmem:[%s452_s1 + $0x30] sm:$0xff]  ;;  %v15_v10 = vld [vmem:[%s453_s0] sm:$0xff]  ;;  %v16_v11 = vld [vmem:[%s453_s0 + $0x8] sm:$0xff] }
   0x4   :  { %221 = vmatprep.subr.bf16.mxu0 %v55_v3  ;;  %253 = vmatprep.subr.bf16.mxu1 %v55_v3  ;;  %v46_v12 = vld [vmem:[%s452_s1 + $0x38] sm:$0xff]  ;;  %v31_v13 = vpack.c.bf16 %v16_v11, %v15_v10  ;;  %v23_v14 = vld [vmem:[%s453_s0 + $0x40] sm:$0xff]  ;;  %v24_v15 = vld [vmem:[%s453_s0 + $0x48] sm:$0xff] }
   0x5   :  { %222 = vmatpush3.bf16.msra.mxu0 %v55_v3  ;;  %261 = vmatpush3.bf16.msra.mxu1 %v55_v3  ;;  %v35_v16 = vpack.c.bf16 %v24_v15, %v23_v14  ;;  %v58_v17 = vpack.c.bf16 %v46_v12, %v45_v9  ;;  %v47_v18 = vld [vmem:[%s452_s1 + $0x40] sm:$0xff]  ;;  %v48_v19 = vld [vmem:[%s452_s1 + $0x48] sm:$0xff]  ;;  %v49_v21 = vld [vmem:[%s452_s1 + $0x50] sm:$0xff] }
   0x6   :  { %223 = vmatprep.subr.bf16.mxu0 %v56_v5  ;;  %254 = vmatprep.subr.bf16.mxu1 %v56_v5  ;;  %v59_v20 = vpack.c.bf16 %v48_v19, %v47_v18  ;;  %v50_v22 = vld [vmem:[%s452_s1 + $0x58] sm:$0xff]  ;;  %v51_v24 = vld [vmem:[%s452_s1 + $0x60] sm:$0xff]  ;;  %v52_v25 = vld [vmem:[%s452_s1 + $0x68] sm:$0xff] }
   0x7   :  { %237 = vmatprep.mubr.bf16.mxu0 %v31_v13  ;;  %245 = vmatprep.mubr.bf16.mxu1 %v35_v16  ;;  %v60_v23 = vpack.c.bf16 %v50_v22, %v49_v21  ;;  %v61_v26 = vpack.c.bf16 %v52_v25, %v51_v24  ;;  %v53_v27 = vld [vmem:[%s452_s1 + $0x70] sm:$0xff]  ;;  %v54_v28 = vld [vmem:[%s452_s1 + $0x78] sm:$0xff]  ;;  %v19_v34 = vld [vmem:[%s453_s0 + $0x20] sm:$0xff] }
   0x8   :  { %v62_v29 = vpack.c.bf16 %v54_v28, %v53_v27  ;;  %v17_v30 = vld [vmem:[%s453_s0 + $0x10] sm:$0xff]  ;;  %v18_v31 = vld [vmem:[%s453_s0 + $0x18] sm:$0xff]  ;;  %v20_v35 = vld [vmem:[%s453_s0 + $0x28] sm:$0xff] }
   0x9   :  { %224 = vmatpush3.bf16.msra.mxu0 %v56_v5  ;;  %262 = vmatpush3.bf16.msra.mxu1 %v56_v5  ;;  %v25_v32 = vld [vmem:[%s453_s0 + $0x50] sm:$0xff]  ;;  %v26_v33 = vld [vmem:[%s453_s0 + $0x58] sm:$0xff]  ;;  %v27_v36 = vld [vmem:[%s453_s0 + $0x60] sm:$0xff]  ;;  %v32_v38 = vpack.c.bf16 %v18_v31, %v17_v30  ;;  %v33_v40 = vpack.c.bf16 %v20_v35, %v19_v34 }
   0xa   :  { %225 = vmatprep.subr.bf16.mxu0 %v57_v8  ;;  %255 = vmatprep.subr.bf16.mxu1 %v57_v8  ;;  %v28_v37 = vld [vmem:[%s453_s0 + $0x68] sm:$0xff]  ;;  %v36_v39 = vpack.c.bf16 %v26_v33, %v25_v32  ;;  %v21_v42 = vld [vmem:[%s453_s0 + $0x30] sm:$0xff]  ;;  %v22_v43 = vld [vmem:[%s453_s0 + $0x38] sm:$0xff] }
   0xb   :  { %v37_v41 = vpack.c.bf16 %v28_v37, %v27_v36  ;;  %v29_v44 = vld [vmem:[%s453_s0 + $0x70] sm:$0xff]  ;;  %v30_v45 = vld [vmem:[%s453_s0 + $0x78] sm:$0xff]  ;;  %v34_v46 = vpack.c.bf16 %v22_v43, %v21_v42  ;;  %v204_v48 = vld [vmem:[%s454_s2] ss:$0 sm:$0xff] }
   0xc   :  { %v38_v47 = vpack.c.bf16 %v30_v45, %v29_v44 }
   0xd   :  { %226 = vmatpush3.bf16.msra.mxu0 %v57_v8  ;;  %263 = vmatpush3.bf16.msra.mxu1 %v57_v8 }
   0xe   :  { %227 = vmatprep.subr.bf16.mxu0 %v58_v17  ;;  %256 = vmatprep.subr.bf16.mxu1 %v58_v17 }
  0x11   :  { %228 = vmatpush3.bf16.msra.mxu0 %v58_v17  ;;  %264 = vmatpush3.bf16.msra.mxu1 %v58_v17 }
  0x12   :  { %229 = vmatprep.subr.bf16.mxu0 %v59_v20  ;;  %257 = vmatprep.subr.bf16.mxu1 %v59_v20 }
  0x15   :  { %230 = vmatpush3.bf16.msra.mxu0 %v59_v20  ;;  %265 = vmatpush3.bf16.msra.mxu1 %v59_v20 }
  0x16   :  { %231 = vmatprep.subr.bf16.mxu0 %v60_v23  ;;  %258 = vmatprep.subr.bf16.mxu1 %v60_v23 }
  0x19   :  { %232 = vmatpush3.bf16.msra.mxu0 %v60_v23  ;;  %266 = vmatpush3.bf16.msra.mxu1 %v60_v23 }
  0x1a   :  { %233 = vmatprep.subr.bf16.mxu0 %v61_v26  ;;  %259 = vmatprep.subr.bf16.mxu1 %v61_v26 }
  0x1d   :  { %234 = vmatpush3.bf16.msra.mxu0 %v61_v26  ;;  %267 = vmatpush3.bf16.msra.mxu1 %v61_v26 }
  0x1e   :  { %235 = vmatprep.subr.bf16.mxu0 %v62_v29  ;;  %260 = vmatprep.subr.bf16.mxu1 %v62_v29 }
  0x21   :  { %236 = vmatpush3.bf16.msra.mxu0 %v62_v29  ;;  %268 = vmatpush3.bf16.msra.mxu1 %v62_v29 }
  0x24   :  { %238 = vmatmul.mubr.bf16.vlgmr.msra.gmra.mrb[0].mxu0 %v32_v38  ;;  %246 = vmatmul.mubr.bf16.vlgmr.msra.gmra.mrb[0].mxu1 %v36_v39 }
  0x25   :  { %241 = vmatprep.mubr.bf16.mxu0 %v33_v40  ;;  %249 = vmatprep.mubr.bf16.mxu1 %v37_v41 }
  0x2c   :  { %242 = vmatmul.mubr.bf16.gmra.mrb[4].mxu0 %v34_v46  ;;  %250 = vmatmul.mubr.bf16.gmra.mrb[4].mxu1 %v38_v47 }
  0xf7   :  { %v239_v49 = vpop.f32.mrb[0].mxu0  ;;  %v247_v50 = vpop.f32.mrb[0].mxu1 }
  0xf8   :  { %v113_v51 = vadd.f32 %v239_v49, %v204_v48  ;;  %v145_v52 = vadd.f32 %v247_v50, %v204_v48  ;;  %v104_v53 = vpop.f32.mrb[1].mxu0  ;;  %v136_v54 = vpop.f32.mrb[1].mxu1 }
  0xf9   :  { %v105_v55 = vadd.f32 %v204_v48, %v104_v53  ;;  %v137_v56 = vadd.f32 %v204_v48, %v136_v54  ;;  %v240_v57 = vpop.f32.mrb[2].mxu0  ;;  %v248_v58 = vpop.f32.mrb[2].mxu1 }
  0xfa   :  { %v169_v59 = vmax.f32 %v113_v51, 0.0  ;;  %v177_v60 = vmax.f32 %v145_v52, 0.0  ;;  %v116_v61 = vadd.f32 %v240_v57, %v204_v48  ;;  %v148_v62 = vadd.f32 %v248_v58, %v204_v48  ;;  %v107_v63 = vpop.f32.mrb[3].mxu0  ;;  %v139_v0 = vpop.f32.mrb[3].mxu1 }
  0xfb   :  { %v167_v1 = vmax.f32 %v105_v55, 0.0  ;;  %v175_v2 = vmax.f32 %v137_v56, 0.0  ;;  %v108_v3 = vadd.f32 %v204_v48, %v107_v63  ;;  %v140_v4 = vadd.f32 %v204_v48, %v139_v0 }
  0xfc   :  { %186 = vst.msk [vmem:[%s455_s3 + $0x10] sm:$0xff] %vm183_vm0, %v169_v59  ;;  %194 = vst.msk [vmem:[%s455_s3 + $0x50] sm:$0xff] %vm183_vm0, %v177_v60  ;;  %v170_v5 = vmax.f32 %v116_v61, 0.0  ;;  %v178_v6 = vmax.f32 %v148_v62, 0.0 }
  0xfd   :  { %184 = vst.msk [vmem:[%s455_s3] sm:$0xff] %vm183_vm0, %v167_v1  ;;  %192 = vst.msk [vmem:[%s455_s3 + $0x40] sm:$0xff] %vm183_vm0, %v175_v2  ;;  %v168_v7 = vmax.f32 %v108_v3, 0.0  ;;  %v176_v8 = vmax.f32 %v140_v4, 0.0 }
  0xfe   :  { %187 = vst.msk [vmem:[%s455_s3 + $0x18] sm:$0xff] %vm183_vm0, %v170_v5  ;;  %195 = vst.msk [vmem:[%s455_s3 + $0x58] sm:$0xff] %vm183_vm0, %v178_v6 }
  0xff   :  { %185 = vst.msk [vmem:[%s455_s3 + $0x8] sm:$0xff] %vm183_vm0, %v168_v7  ;;  %193 = vst.msk [vmem:[%s455_s3 + $0x48] sm:$0xff] %vm183_vm0, %v176_v8  ;;  %v243_v9 = vpop.f32.mrb[4].mxu0  ;;  %v251_v10 = vpop.f32.mrb[4].mxu1 }
 0x100   :  { %v129_v11 = vadd.f32 %v243_v9, %v204_v48  ;;  %v161_v12 = vadd.f32 %v251_v10, %v204_v48  ;;  %v120_v13 = vpop.f32.mrb[5].mxu0  ;;  %v152_v14 = vpop.f32.mrb[5].mxu1 }
 0x101   :  { %v121_v15 = vadd.f32 %v204_v48, %v120_v13  ;;  %v153_v16 = vadd.f32 %v204_v48, %v152_v14  ;;  %v244_v17 = vpop.f32.mrb[6].mxu0  ;;  %v252_v18 = vpop.f32.mrb[6].mxu1 }
 0x102   :  { %v173_v19 = vmax.f32 %v129_v11, 0.0  ;;  %v181_v20 = vmax.f32 %v161_v12, 0.0  ;;  %v132_v21 = vadd.f32 %v244_v17, %v204_v48  ;;  %v164_v22 = vadd.f32 %v252_v18, %v204_v48  ;;  %v123_v23 = vpop.f32.mrb[7].mxu0  ;;  %v155_v24 = vpop.f32.mrb[7].mxu1 }
 0x103   :  { %v171_v25 = vmax.f32 %v121_v15, 0.0  ;;  %v179_v26 = vmax.f32 %v153_v16, 0.0  ;;  %v124_v27 = vadd.f32 %v204_v48, %v123_v23  ;;  %v156_v28 = vadd.f32 %v204_v48, %v155_v24 }
 0x104   :  { %190 = vst.msk [vmem:[%s455_s3 + $0x30] sm:$0xff] %vm183_vm0, %v173_v19  ;;  %198 = vst.msk [vmem:[%s455_s3 + $0x70] sm:$0xff] %vm183_vm0, %v181_v20  ;;  %v174_v29 = vmax.f32 %v132_v21, 0.0  ;;  %v182_v30 = vmax.f32 %v164_v22, 0.0 }
 0x105   :  { %188 = vst.msk [vmem:[%s455_s3 + $0x20] sm:$0xff] %vm183_vm0, %v171_v25  ;;  %196 = vst.msk [vmem:[%s455_s3 + $0x60] sm:$0xff] %vm183_vm0, %v179_v26  ;;  %v172_v31 = vmax.f32 %v124_v27, 0.0  ;;  %v180_v32 = vmax.f32 %v156_v28, 0.0 }
 0x106   :  { %191 = vst.msk [vmem:[%s455_s3 + $0x38] sm:$0xff] %vm183_vm0, %v174_v29  ;;  %199 = vst.msk [vmem:[%s455_s3 + $0x78] sm:$0xff] %vm183_vm0, %v182_v30 }
 0x107   :  { %189 = vst.msk [vmem:[%s455_s3 + $0x28] sm:$0xff] %vm183_vm0, %v172_v31  ;;  %197 = vst.msk [vmem:[%s455_s3 + $0x68] sm:$0xff] %vm183_vm0, %v180_v32 }

// kernel: vlt_forward.8
= control target key start
LH: loop header
LB: loop body
LE: loop exit
PB: predicated region body
PF: predicated region fallthrough
CT: control target
= control target key end

     0   :  { %v99_v0 = vmov 0.0   ;;  %vm100_vm0 = vmmov 0   ;;  %vm31_vm1 = vcmask 261120   ;;  %s148_s1 = inlined_call_operand.vmem [shape: f32[32,32], index: 1, kind: input, shape index: {}]   ;;  %s149_s0 = inlined_call_operand.vmem [shape: f32[16,32], index: 0, kind: input, shape index: {}]   ;;  %s150_s2 = inlined_call_operand.vmem [shape: f32[1,32], index: 2, kind: input, shape index: {}]   ;;  %s151_s3 = inlined_call_operand.vmem [shape: f32[16,32], index: 3, kind: output, shape index: {}]  }
   0x1   :  { %89 = vmatprep.subr.bf16.mxu0 %v99_v0  ;;  %v18_v1 = vld [vmem:[%s148_s1] sm:$0xff]  ;;  %v19_v2 = vld [vmem:[%s148_s1 + $0x8] sm:$0xff]  ;;  %v20_v3 = vld [vmem:[%s148_s1 + $0x10] sm:$0xff]  ;;  %93 = vmatprep.mubr.msk.bf16.mxu0 %vm100_vm0, %v99_v0 }
   0x2   :  { %v22_v4 = vpack.c.bf16 %v19_v2, %v18_v1  ;;  %v21_v5 = vld [vmem:[%s148_s1 + $0x18] sm:$0xff]  ;;  %v15_v7 = vld [vmem:[%s149_s0] sm:$0xff]  ;;  %v16_v8 = vld [vmem:[%s149_s0 + $0x8] sm:$0xff] }
   0x3   :  { %v23_v6 = vpack.c.bf16 %v21_v5, %v20_v3  ;;  %v17_v9 = vpack.c.bf16 %v16_v8, %v15_v7  ;;  %v84_v10 = vld [vmem:[%s150_s2] ss:$0 sm:$0xff] }
   0x4   :  { %90 = vmatpush3.bf16.msra.mxu0 %v22_v4 }
   0x5   :  { %91 = vmatprep.subr.bf16.mxu0 %v99_v0 }
   0x8   :  { %92 = vmatpush3.bf16.msra.mxu0 %v23_v6 }
   0xb   :  { %94 = vmatmul.mubr.msk.bf16.vlgmr.msra.gmra.mrb[0].mxu0 %vm31_vm1, %v17_v9 }
  0xde   :  { %v69_v11 = vpop.f32.mrb[0].mxu0 }
  0xdf   :  { %v70_v12 = vadd.f32 %v84_v10, %v69_v11  ;;  %v95_v13 = vpop.f32.mrb[1].mxu0 }
  0xe0   :  { %v72_v14 = vpop.f32.mrb[2].mxu0 }
  0xe1   :  { %v76_v15 = vmax.f32 %v70_v12, 0.0  ;;  %v73_v16 = vadd.f32 %v84_v10, %v72_v14  ;;  %v96_v17 = vpop.f32.mrb[3].mxu0 }
  0xe3   :  { %78 = vst.msk [vmem:[%s151_s3] sm:$0xff] %vm31_vm1, %v76_v15  ;;  %v77_v18 = vmax.f32 %v73_v16, 0.0 }
  0xe5   :  { %79 = vst.msk [vmem:[%s151_s3 + $0x8] sm:$0xff] %vm31_vm1, %v77_v18 }

// kernel: vlt_forward.11
= control target key start
LH: loop header
LB: loop body
LE: loop exit
PB: predicated region body
PF: predicated region fallthrough
CT: control target
= control target key end

     0   :  { %vm135_vm0 = vcmask 523264   ;;  %s344_s1 = inlined_call_operand.vmem [shape: f32[256,64], index: 1, kind: input, shape index: {}]   ;;  %s345_s0 = inlined_call_operand.vmem [shape: f32[32,256], index: 0, kind: input, shape index: {}]   ;;  %s346_s2 = inlined_call_operand.vmem [shape: f32[1,64], index: 2, kind: input, shape index: {}]   ;;  %s347_s3 = inlined_call_operand.vmem [shape: f32[32,64], index: 3, kind: output, shape index: {}]  }
   0x1   :  { %v43_v0 = vld [vmem:[%s344_s1 + $0x80] sm:$0xff]  ;;  %v44_v1 = vld [vmem:[%s344_s1 + $0x88] sm:$0xff]  ;;  %v45_v5 = vld [vmem:[%s344_s1 + $0x90] sm:$0xff] }
   0x2   :  { %v27_v2 = vld [vmem:[%s344_s1] sm:$0xff]  ;;  %v67_v3 = vpack.c.bf16 %v44_v1, %v43_v0  ;;  %v28_v4 = vld [vmem:[%s344_s1 + $0x8] sm:$0xff]  ;;  %v46_v6 = vld [vmem:[%s344_s1 + $0x98] sm:$0xff] }
   0x3   :  { %v59_v7 = vpack.c.bf16 %v28_v4, %v27_v2  ;;  %v68_v8 = vpack.c.bf16 %v46_v6, %v45_v5  ;;  %v29_v9 = vld [vmem:[%s344_s1 + $0x10] sm:$0xff]  ;;  %v30_v10 = vld [vmem:[%s344_s1 + $0x18] sm:$0xff]  ;;  %v47_v11 = vld [vmem:[%s344_s1 + $0xa0] sm:$0xff] }
   0x4   :  { %145 = vmatprep.subr.bf16.mxu0 %v67_v3  ;;  %173 = vmatprep.subr.bf16.mxu1 %v67_v3  ;;  %v48_v12 = vld [vmem:[%s344_s1 + $0xa8] sm:$0xff]  ;;  %v60_v13 = vpack.c.bf16 %v30_v10, %v29_v9  ;;  %v31_v15 = vld [vmem:[%s344_s1 + $0x20] sm:$0xff]  ;;  %v49_v17 = vld [vmem:[%s344_s1 + $0xb0] sm:$0xff] }
   0x5   :  { %146 = vmatpush3.bf16.msra.mxu0 %v59_v7  ;;  %181 = vmatpush3.bf16.msra.mxu1 %v59_v7  ;;  %v69_v14 = vpack.c.bf16 %v48_v12, %v47_v11  ;;  %v32_v16 = vld [vmem:[%s344_s1 + $0x28] sm:$0xff]  ;;  %v50_v18 = vld [vmem:[%s344_s1 + $0xb8] sm:$0xff]  ;;  %v33_v21 = vld [vmem:[%s344_s1 + $0x30] sm:$0xff] }
   0x6   :  { %147 = vmatprep.subr.bf16.mxu0 %v68_v8  ;;  %174 = vmatprep.subr.bf16.mxu1 %v68_v8  ;;  %v61_v19 = vpack.c.bf16 %v32_v16, %v31_v15  ;;  %v70_v20 = vpack.c.bf16 %v50_v18, %v49_v17  ;;  %v34_v22 = vld [vmem:[%s344_s1 + $0x38] sm:$0xff]  ;;  %v51_v23 = vld [vmem:[%s344_s1 + $0xc0] sm:$0xff]  ;;  %v52_v24 = vld [vmem:[%s344_s1 + $0xc8] sm:$0xff] }
   0x7   :  { %v16_v25 = vld [vmem:[%s345_s0 + $0x8] sm:$0xff]  ;;  %v18_v26 = vld [vmem:[%s345_s0 + $0x18] sm:$0xff]  ;;  %v62_v29 = vpack.c.bf16 %v34_v22, %v33_v21  ;;  %v71_v32 = vpack.c.bf16 %v52_v24, %v51_v23  ;;  %v35_v33 = vld [vmem:[%s344_s1 + $0x40] sm:$0xff] }
   0x8   :  { %v20_v27 = vld [vmem:[%s345_s0 + $0x28] sm:$0xff]  ;;  %v22_v28 = vld [vmem:[%s345_s0 + $0x38] sm:$0xff]  ;;  %v24_v30 = vpack.c.bf16 %v18_v26, %v16_v25  ;;  %v53_v35 = vld [vmem:[%s344_s1 + $0xd0] sm:$0xff] }
   0x9   :  { %148 = vmatpush3.bf16.msra.mxu0 %v60_v13  ;;  %182 = vmatpush3.bf16.msra.mxu1 %v60_v13  ;;  %v26_v31 = vpack.c.bf16 %v22_v28, %v20_v27  ;;  %v36_v34 = vld [vmem:[%s344_s1 + $0x48] sm:$0xff]  ;;  %v54_v36 = vld [vmem:[%s344_s1 + $0xd8] sm:$0xff]  ;;  %v37_v39 = vld [vmem:[%s344_s1 + $0x50] sm:$0xff] }
   0xa   :  { %149 = vmatprep.subr.bf16.mxu0 %v69_v14  ;;  %175 = vmatprep.subr.bf16.mxu1 %v69_v14  ;;  %v63_v37 = vpack.c.bf16 %v36_v34, %v35_v33  ;;  %v72_v38 = vpack.c.bf16 %v54_v36, %v53_v35  ;;  %v38_v40 = vld [vmem:[%s344_s1 + $0x58] sm:$0xff]  ;;  %v55_v41 = vld [vmem:[%s344_s1 + $0xe0] sm:$0xff]  ;;  %v56_v42 = vld [vmem:[%s344_s1 + $0xe8] sm:$0xff] }
   0xb   :  { %114 = vmatprep.mubr.bf16.mxu0 %v24_v30  ;;  %122 = vmatprep.mubr.bf16.mxu1 %v26_v31  ;;  %v64_v43 = vpack.c.bf16 %v38_v40, %v37_v39  ;;  %v73_v44 = vpack.c.bf16 %v56_v42, %v55_v41  ;;  %v39_v45 = vld [vmem:[%s344_s1 + $0x60] sm:$0xff]  ;;  %v40_v46 = vld [vmem:[%s344_s1 + $0x68] sm:$0xff]  ;;  %v57_v47 = vld [vmem:[%s344_s1 + $0xf0] sm:$0xff] }
   0xc   :  { %v58_v48 = vld [vmem:[%s344_s1 + $0xf8] sm:$0xff]  ;;  %v65_v49 = vpack.c.bf16 %v40_v46, %v39_v45  ;;  %v41_v51 = vld [vmem:[%s344_s1 + $0x70] sm:$0xff]  ;;  %v15_v53 = vld [vmem:[%s345_s0] sm:$0xff] }
   0xd   :  { %150 = vmatpush3.bf16.msra.mxu0 %v61_v19  ;;  %183 = vmatpush3.bf16.msra.mxu1 %v61_v19  ;;  %v74_v50 = vpack.c.bf16 %v58_v48, %v57_v47  ;;  %v42_v52 = vld [vmem:[%s344_s1 + $0x78] sm:$0xff]  ;;  %v17_v55 = vld [vmem:[%s345_s0 + $0x10] sm:$0xff]  ;;  %v19_v56 = vld [vmem:[%s345_s0 + $0x20] sm:$0xff] }
   0xe   :  { %151 = vmatprep.subr.bf16.mxu0 %v70_v20  ;;  %176 = vmatprep.subr.bf16.mxu1 %v70_v20  ;;  %v66_v54 = vpack.c.bf16 %v42_v52, %v41_v51  ;;  %v21_v57 = vld [vmem:[%s345_s0 + $0x30] sm:$0xff]  ;;  %v23_v58 = vpack.c.bf16 %v17_v55, %v15_v53  ;;  %v144_v62 = vld [vmem:[%s346_s2] ss:$0 sm:$0xff] }
   0xf   :  { %v25_v59 = vpack.c.bf16 %v21_v57, %v19_v56 }
  0x11   :  { %152 = vmatpush3.bf16.msra.mxu0 %v62_v29  ;;  %184 = vmatpush3.bf16.msra.mxu1 %v62_v29 }
  0x12   :  { %153 = vmatprep.subr.bf16.mxu0 %v71_v32  ;;  %177 = vmatprep.subr.bf16.mxu1 %v71_v32 }
  0x15   :  { %154 = vmatpush3.bf16.msra.mxu0 %v63_v37  ;;  %185 = vmatpush3.bf16.msra.mxu1 %v63_v37 }
  0x16   :  { %155 = vmatprep.subr.bf16.mxu0 %v72_v38  ;;  %178 = vmatprep.subr.bf16.mxu1 %v72_v38 }
  0x19   :  { %156 = vmatpush3.bf16.msra.mxu0 %v64_v43  ;;  %186 = vmatpush3.bf16.msra.mxu1 %v64_v43 }
  0x1a   :  { %157 = vmatprep.subr.bf16.mxu0 %v73_v44  ;;  %179 = vmatprep.subr.bf16.mxu1 %v73_v44 }
  0x1d   :  { %158 = vmatpush3.bf16.msra.mxu0 %v65_v49  ;;  %187 = vmatpush3.bf16.msra.mxu1 %v65_v49 }
  0x1e   :  { %159 = vmatprep.subr.bf16.mxu0 %v74_v50  ;;  %180 = vmatprep.subr.bf16.mxu1 %v74_v50 }
  0x21   :  { %160 = vmatpush3.bf16.msra.mxu0 %v66_v54  ;;  %188 = vmatpush3.bf16.msra.mxu1 %v66_v54 }
  0x24   :  { %115 = vmatmul.mubr.bf16.vlgmr.msra.gmra.mrb[0].mxu0 %v23_v58  ;;  %123 = vmatmul.mubr.bf16.vlgmr.msra.gmra.mrb[0].mxu1 %v25_v59 }
  0xf7   :  { %v161_v60 = vpop.f32.mrb[0].mxu0  ;;  %v167_v61 = vpop.f32.mrb[0].mxu1 }
  0xf8   :  { %v162_v63 = vpop.f32.mrb[1].mxu0  ;;  %v168_v0 = vpop.f32.mrb[1].mxu1 }
  0xf9   :  { %v163_v1 = vadd.f32 %v162_v63, %v161_v60  ;;  %v169_v2 = vadd.f32 %v168_v0, %v167_v61  ;;  %v164_v3 = vpop.f32.mrb[2].mxu0  ;;  %v170_v4 = vpop.f32.mrb[2].mxu1 }
  0xfa   :  { %v165_v5 = vpop.f32.mrb[3].mxu0  ;;  %v171_v6 = vpop.f32.mrb[3].mxu1 }
  0xfb   :  { %v117_v7 = vadd.f32 %v163_v1, %v144_v62  ;;  %v125_v8 = vadd.f32 %v169_v2, %v144_v62  ;;  %v166_v9 = vadd.f32 %v165_v5, %v164_v3  ;;  %v172_v10 = vadd.f32 %v171_v6, %v170_v4 }
  0xfd   :  { %v131_v11 = vmax.f32 %v117_v7, 0.0  ;;  %v133_v12 = vmax.f32 %v125_v8, 0.0  ;;  %v120_v13 = vadd.f32 %v166_v9, %v144_v62  ;;  %v128_v14 = vadd.f32 %v172_v10, %v144_v62 }
  0xff   :  { %136 = vst.msk [vmem:[%s347_s3] sm:$0xff] %vm135_vm0, %v131_v11  ;;  %138 = vst.msk [vmem:[%s347_s3 + $0x10] sm:$0xff] %vm135_vm0, %v133_v12  ;;  %v132_v15 = vmax.f32 %v120_v13, 0.0  ;;  %v134_v16 = vmax.f32 %v128_v14, 0.0 }
 0x101   :  { %137 = vst.msk [vmem:[%s347_s3 + $0x8] sm:$0xff] %vm135_vm0, %v132_v15  ;;  %139 = vst.msk [vmem:[%s347_s3 + $0x18] sm:$0xff] %vm135_vm0, %v134_v16 }

// kernel: vlt_forward.12
= control target key start
LH: loop header
LB: loop body
LE: loop exit
PB: predicated region body
PF: predicated region fallthrough
CT: control target
= control target key end

     0   :  { %s981_s27 = smov 0   ;;  %s1134_s0 = inlined_call_operand.vmem [shape: f32[2,16,64], index: 0, kind: input, shape index: {}]   ;;  %s1135_s1 = inlined_call_operand.vmem [shape: f32[2,8,32], index: 1, kind: input, shape index: {}]   ;;  %s1136_s2 = inlined_call_operand.vmem [shape: f32[2,1,8], index: 2, kind: input, shape index: {}]   ;;  %s1137_s3 = inlined_call_operand.vmem [shape: f32[64,64], index: 3, kind: input, shape index: {}]   ;;  %s1138_s4 = inlined_call_operand.vmem [shape: f32[32,64], index: 4, kind: input, shape index: {}]   ;;  %s1139_s5 = inlined_call_operand.vmem [shape: f32[32,64], index: 5, kind: input, shape index: {}]   ;;  %s1140_s6 = inlined_call_operand.vmem [shape: f32[64,64], index: 6, kind: input, shape index: {}]   ;;  %s1141_s7 = inlined_call_operand.vmem [shape: f32[1,64], index: 7, kind: input, shape index: {}]   ;;  %s1142_s8 = inlined_call_operand.vmem [shape: f32[2,16,64], index: 8, kind: output, shape index: {}]  }
   0x1 LB: > { %s811_s28 = sadd.s32 4294967295, %s931_s27   ;;  %p815_p0 = scmp.ge.s32.totalorder %s931_s27, 1  ;;  %s931_s27 = sphi %s981_s27, %s18_s27  }
   0x2   : > { %p279_p1 = scmp.lt.s32.totalorder %s931_s27, 3 }
   0x4   : > { %p280_p2 = pnand %p815_p0, %p279_p1 }
   0x5   : > { %v344_v0 = vld [vmem:[%s1137_s3] sm:$0xff] (!%p280_p2)  ;;  %v345_v1 = vld [vmem:[%s1137_s3 + $0x8] sm:$0xff] (!%p280_p2)  ;;  %p320_p3 = scmp.lt.s32.totalorder (!%p280_p2), %s811_s28, 1  ;;  %v933_v3 = vmov (!%p280_p2), 0.0   ;;  %v346_v6 = vld [vmem:[%s1137_s3 + $0x10] sm:$0xff] (!%p280_p2)  ;;  %vm934_vm0 = vmmov (!%p280_p2), 0   ;;  %v585_v44 = vlaneseq (!%p280_p2) }
   0x6   : > { %283 = sbr.rel (%p280_p2) target bundleno = 1211 (0x4bb), region = 52  ;;  %v401_v2 = vld [vmem:[%s1138_s4] sm:$0xff] (!%p280_p2)  ;;  %855 = vmatprep.subr.bf16.mxu0 (!%p280_p2), %v933_v3  ;;  %867 = vmatprep.subr.bf16.mxu1 (!%p280_p2), %v933_v3  ;;  %v352_v4 = vpack.c.bf16 (!%p280_p2), %v345_v1, %v344_v0  ;;  %v402_v5 = vld [vmem:[%s1138_s4 + $0x8] sm:$0xff] (!%p280_p2)  ;;  %v347_v7 = vld [vmem:[%s1137_s3 + $0x18] sm:$0xff] (!%p280_p2)  ;;  %vm407_vm1 = vcmask (!%p280_p2), 261120   ;;  %vm356_vm2 = vcmask (!%p280_p2), 523264  }
   0x7   : > { %v405_v8 = vpack.c.bf16 (!%p280_p2), %v402_v5, %v401_v2  ;;  %v403_v9 = vld [vmem:[%s1138_s4 + $0x10] sm:$0xff] (!%p280_p2)  ;;  %v404_v10 = vld [vmem:[%s1138_s4 + $0x18] sm:$0xff] (!%p280_p2)  ;;  %871 = vmatprep.mubr.msk.bf16.mxu1 (!%p280_p2), %vm934_vm0, %v933_v3  ;;  %863 = vmatprep.mubr.msk.bf16.mxu0 (!%p280_p2), %vm934_vm0, %v933_v3  ;;  %v353_v11 = vpack.c.bf16 (!%p280_p2), %v347_v7, %v346_v6  ;;  %v348_v13 = vld [vmem:[%s1137_s3 + $0x20] sm:$0xff] (!%p280_p2)  ;;  %vm620_vm3 = vcmask (!%p280_p2), 1043456   ;;  %v586_v46 = vshrl.u32 (!%p280_p2), %v585_v44, 7 }
   0x8   : > { %856 = vmatpush3.bf16.msra.mxu0 (!%p280_p2), %v352_v4  ;;  %v406_v12 = vpack.c.bf16 (!%p280_p2), %v404_v10, %v403_v9  ;;  %v349_v14 = vld [vmem:[%s1137_s3 + $0x28] sm:$0xff] (!%p280_p2)  ;;  %v451_v15 = vld [vmem:[%s1139_s5] sm:$0xff] (!%p280_p2)  ;;  %v350_v20 = vld [vmem:[%s1137_s3 + $0x30] sm:$0xff] (!%p280_p2)  ;;  %v935_v48 = vmov (!%p280_p2), 0   ;;  %vm592_vm6 = vcmask (!%p280_p2), 64512  }
   0x9   : > { %868 = vmatpush3.bf16.msra.mxu1 (!%p280_p2), %v405_v8  ;;  %857 = vmatprep.subr.bf16.mxu0 (!%p280_p2), %v933_v3  ;;  %v452_v16 = vld [vmem:[%s1139_s5 + $0x8] sm:$0xff] (!%p280_p2)  ;;  %v354_v19 = vpack.c.bf16 (!%p280_p2), %v349_v14, %v348_v13  ;;  %v351_v21 = vld [vmem:[%s1137_s3 + $0x38] sm:$0xff] (!%p280_p2)  ;;  %v453_v23 = vld [vmem:[%s1139_s5 + $0x10] sm:$0xff] (!%p280_p2)  ;;  %v587_v47 = vsub.s32 (!%p280_p2), 0, %v586_v46 }
   0xa   : > { %869 = vmatprep.subr.bf16.mxu1 (!%p280_p2), %v933_v3  ;;  %v455_v22 = vpack.c.bf16 (!%p280_p2), %v452_v16, %v451_v15  ;;  %v454_v24 = vld [vmem:[%s1139_s5 + $0x18] sm:$0xff] (!%p280_p2)  ;;  %v355_v25 = vpack.c.bf16 (!%p280_p2), %v351_v21, %v350_v20  ;;  %v668_v6 = vld [vmem:[%s1140_s6] sm:$0xff] (!%p280_p2)  ;;  %v669_v7 = vld [vmem:[%s1140_s6 + $0x8] sm:$0xff] (!%p280_p2) }
   0xb   : > { %v456_v28 = vpack.c.bf16 (!%p280_p2), %v454_v24, %v453_v23  ;;  %v670_v8 = vld [vmem:[%s1140_s6 + $0x10] sm:$0xff] (!%p280_p2)  ;;  %v676_v9 = vpack.c.bf16 (!%p280_p2), %v669_v7, %v668_v6  ;;  %v671_v10 = vld [vmem:[%s1140_s6 + $0x18] sm:$0xff] (!%p280_p2)  ;;  %v673_v20 = vld [vmem:[%s1140_s6 + $0x28] sm:$0xff] (!%p280_p2) }
   0xc   : > { %858 = vmatpush3.bf16.msra.mxu0 (!%p280_p2), %v353_v11  ;;  %v677_v11 = vpack.c.bf16 (!%p280_p2), %v671_v10, %v670_v8  ;;  %v675_v23 = vld [vmem:[%s1140_s6 + $0x38] sm:$0xff] (!%p280_p2) }
   0xd   : > { %s1144_s28 = smov (!%p320_p3, %s811_s28), 1  ;;  %870 = vmatpush3.bf16.msra.mxu1 %v406_v12  ;;  %859 = vmatprep.subr.bf16.mxu0 %v933_v3 }
   0xe   : > { %s818_s23 = sshll.u32 %s1144_s28, 3  ;;  %s832_s11 = sshll.u32 %s1144_s28, 4  ;;  %875 = vmatprep.subr.bf16.mxu1 %v933_v3 }
   0xf   : > { %s328_s10 = scalar_lea.vmem %s1135_s1, %s818_s23  ;;  %s324_s22 = scalar_lea.vmem %s1134_s0, %s832_s11 }
  0x10   : > { %v340_v17 = vld [vmem:[%s328_s10] sm:$0xff]  ;;  %860 = vmatpush3.bf16.msra.mxu0 %v354_v19  ;;  %v1062_v27 = vld [vmem:[%s324_s22 + $0x8] sm:$0xff]  ;;  %s331_s9 = scalar_lea.vmem %s1136_s2, %s1144_s28  ;;  %s336_s12 = scalar_lea.vmem %s1142_s8, %s832_s11 }
  0x11   : > { %v343_v18 = vpack.c.bf16 %v340_v17, %v340_v17  ;;  %v1060_v26 = vld [vmem:[%s324_s22] sm:$0xff]  ;;  %861 = vmatprep.subr.bf16.mxu0 %v933_v3 }
  0x12   : > { %v342_v29 = vpack.c.bf16 %v1062_v27, %v1060_v26  ;;  %v341_v45 = vld [vmem:[%s331_s9] sm:$0x1] }
  0x13   : > { %872 = vmatmul.mubr.msk.bf16.vlgmr.msra.gmra.mrb[0].mxu1 %vm407_vm1, %v343_v18  ;;  %vm583_vm4 = vcmp.gt.f32.partialorder %v341_v45, 0.0  ;;  %v672_v19 = vld [vmem:[%s1140_s6 + $0x20] sm:$0xff] }
  0x14   : > { %876 = vmatpush3.bf16.msra.mxu1 %v455_v22  ;;  %879 = vmatprep.mubr.msk.bf16.mxu1 %vm934_vm0, %v933_v3  ;;  %v584_v49 = vsel %vm583_vm4, 1, %v935_v48  ;;  %v678_v21 = vpack.c.bf16 %v673_v20, %v672_v19  ;;  %v674_v22 = vld [vmem:[%s1140_s6 + $0x30] sm:$0xff] }
  0x15   : > { %877 = vmatprep.subr.bf16.mxu1 %v933_v3  ;;  %862 = vmatpush3.bf16.msra.mxu0 %v355_v25  ;;  %v588_v50 = vrot.slane %v584_v49, %v587_v47  ;;  %v679_v24 = vpack.c.bf16 %v675_v23, %v674_v22 }
  0x16   : > { %894 = vmatprep.subr.bf16.mxu0 %v933_v3 }
  0x17   : > { %vm589_vm5 = vcmp.eq.s32.totalorder %v588_v50, 1 }
  0x18   : > { %878 = vmatpush3.bf16.msra.mxu1 %v456_v28  ;;  %864 = vmatmul.mubr.msk.bf16.vlgmr.msra.gmra.mrb[0].mxu0 %vm356_vm2, %v342_v29 }
  0x19   : > { %902 = vmatprep.mubr.msk.bf16.mxu0 %vm934_vm0, %v933_v3  ;;  %895 = vmatpush3.bf16.msra.mxu0 %v676_v9 }
  0x1a   : > { %896 = vmatprep.subr.bf16.mxu0 %v933_v3 }
  0x1b   : > { %880 = vmatmul.mubr.msk.bf16.vlgmr.msra.gmra.mrb[4].mxu1 %vm407_vm1, %v343_v18 }
  0x1d   : > { %897 = vmatpush3.bf16.msra.mxu0 %v677_v11 }
  0x1e   : > { %898 = vmatprep.subr.bf16.mxu0 %v933_v3 }
  0x21   : > { %899 = vmatpush3.bf16.msra.mxu0 %v678_v21 }
  0x22   : > { %900 = vmatprep.subr.bf16.mxu0 %v933_v3 }
  0x25   : > { %901 = vmatpush3.bf16.msra.mxu0 %v679_v24 }
  0xe6   : > { %v445_v30 = vpop.f32.mrb[0].mxu1 }
  0xe7   : > { %v873_v31 = vpop.f32.mrb[1].mxu1  ;;  %883 = vmatprep.subr.msk.mxu1 %vm356_vm2, %v445_v30 }
  0xe8   : > { %v448_v32 = vpop.f32.mrb[2].mxu1  ;;  %884 = vmatpush3.xpose.msk.msra.mxu1 %vm356_vm2, %v445_v30 }
  0xe9   : > { %v874_v33 = vpop.f32.mrb[3].mxu1  ;;  %888 = vmatprep.subr.bf16.mxu1 %v933_v3 }
  0xea   : > { %v828_v33 = vld [vmem:[%s1141_s7] ss:$0 sm:$0xff] }
  0xeb   : > { %v394_v34 = vpop.f32.mrb[0].mxu0 }
  0xec   : > { %v865_v35 = vpop.f32.mrb[1].mxu0  ;;  %885 = vmatprep.mubr.msk.f32.mxu1 %vm356_vm2, %v394_v34 }
  0xed   : > { %v397_v37 = vpop.f32.mrb[2].mxu0 }
  0xee   : > { %v491_v36 = vpop.f32.mrb[4].mxu1  ;;  %v866_v40 = vpop.f32.mrb[3].mxu0  ;;  %886 = vmatmul.mubr.msk.f32.vlgmr.msra.gmra.mrb[8].mxu1 %vm356_vm2, %v397_v37 }
  0xef   : > { %v616_v38 = vpack.c.bf16 %v491_v36, %v491_v36  ;;  %v881_v39 = vpop.f32.mrb[5].mxu1  ;;  %890 = vmatprep.mubr.msk.bf16.mxu1 %vm934_vm0, %v933_v3 }
  0xf0   : > { %v494_v41 = vpop.f32.mrb[6].mxu1 }
  0xf1   : > { %v622_v42 = vsel %vm620_vm3, %v616_v38, 0  ;;  %v882_v43 = vpop.f32.mrb[7].mxu1 }
  0xf2   : > { %889 = vmatpush3.bf16.msra.mxu1 %v622_v42 }
 0x1c1   : > { %v887_v51 = vpop.f32.mrb[8].mxu1 }
 0x1c2   : > { %v572_v52 = vpop.f32.mrb[9].mxu1  ;;  %v582_v53 = vmul.f32 0.125, %v887_v51 }
 0x1c3   : > { %v581_v54 = vmul.f32 0.125, %v572_v52 }
 0x1c4   : > { %v591_v57 = vsel %vm589_vm5, %v582_v53, -1e+30 }
 0x1c5   : > { %v590_v55 = vsel %vm589_vm5, %v581_v54, -1e+30  ;;  %v596_v58 = vsel %vm592_vm6, %v591_v57, -inf }
 0x1c6   : > { %v593_v56 = vsel %vm592_vm6, %v590_v55, -inf }
 0x1c7   : > { %594 = vmax.xlane.f32.xlu0 %v593_v56 }
 0x1cb   : > { %597 = vmax.xlane.f32.xlu0 %v596_v58 }
 0x254   : > { %v595_v59 = vpop.xlane.xlu0 %594 }
 0x255   : > { %v599_v60 = vsub.f32 %v590_v55, %v595_v59 }
 0x257   : > { %v601_v61 = vmul.f32 1.442695, %v599_v60 }
 0x258   : > { %v598_v62 = vpop.xlane.xlu0 %597 }
 0x259   : > { %917 = vpow2.f32 %v601_v61  ;;  %v600_v63 = vsub.f32 %v591_v57, %v598_v62 }
 0x25b   : > { %v603_v0 = vmul.f32 1.442695, %v600_v63 }
 0x25d   : > { %919 = vpow2.f32 %v603_v0 }
 0x263   : > { %v918_v1 = vpop.eup %917 }
 0x264   : > { %v605_v2 = vsel %vm592_vm6, %v918_v1, 0.0 }
 0x265   : > { %606 = vadd.xlane.f32.xlu1 %v605_v2 }
 0x267   : > { %v920_v4 = vpop.eup %919 }
 0x268   : > { %v608_v5 = vsel %vm592_vm6, %v920_v4, 0.0 }
 0x269   : > { %609 = vadd.xlane.f32.xlu1 %v608_v5 }
 0x2f2   : > { %v607_v12 = vpop.xlane.xlu1 %606 }
 0x2f3   : > { %921 = vrcp.f32 %v607_v12 }
 0x2f6   : > { %v610_v13 = vpop.xlane.xlu1 %609 }
 0x2f7   : > { %923 = vrcp.f32 %v610_v13 }
 0x2fd   : > { %v922_v14 = vpop.eup %921 }
 0x2fe   : > { %v613_v16 = vmul.f32 %v922_v14, %v918_v1 }
 0x301   : > { %v924_v15 = vpop.eup %923 }
 0x302   : > { %v614_v17 = vmul.f32 %v924_v15, %v920_v4 }
 0x304   : > { %v615_v18 = vpack.c.bf16 %v614_v17, %v613_v16 }
 0x306   : > { %891 = vmatmul.mubr.msk.bf16.vlgmr.msra.gmra.mrb[12].mxu1 %vm592_vm6, %v615_v18 }
 0x3d9   : > { %v658_v25 = vpop.f32.mrb[12].mxu1 }
 0x3da   : > { %v892_v28 = vpop.f32.mrb[13].mxu1  ;;  %v665_v30 = vadd.f32 %v658_v25, %v1060_v26 }
 0x3db   : > { %v661_v29 = vpop.f32.mrb[14].mxu1 }
 0x3dc   : > { %v666_v31 = vadd.f32 %v661_v29, %v1062_v27  ;;  %v893_v32 = vpop.f32.mrb[15].mxu1 }
 0x3de   : > { %v667_v3 = vpack.c.bf16 %v666_v31, %v665_v30 }
 0x3e0   : > { %903 = vmatmul.mubr.msk.bf16.vlgmr.msra.gmra.mrb[4].mxu0 %vm356_vm2, %v667_v3 }
 0x4b3   : > { %v724_v34 = vpop.f32.mrb[4].mxu0 }
 0x4b4   : > { %v725_v35 = vadd.f32 %v828_v33, %v724_v34  ;;  %v904_v36 = vpop.f32.mrb[5].mxu0 }
 0x4b5   : > { %v727_v37 = vpop.f32.mrb[6].mxu0 }
 0x4b6   : > { %v731_v26 = vmax.f32 %v725_v35, 0.0  ;;  %v728_v38 = vadd.f32 %v828_v33, %v727_v37  ;;  %v905_v27 = vpop.f32.mrb[7].mxu0 }
 0x4b8   : > { %733 = vst.msk [vmem:[%s336_s12] sm:$0xff] %vm356_vm2, %v731_v26  ;;  %v732_v39 = vmax.f32 %v728_v38, 0.0 }
 0x4ba   : > { %734 = vst.msk [vmem:[%s336_s12 + $0x8] sm:$0xff] %vm356_vm2, %v732_v39 }
 0x4bb PF: > { %s18_s27 = sadd.s32 1, %s931_s27  }
 0x4bc   : > { %p15_p4 = scmp.ge.s32.totalorder %s18_s27, 4  }
 0x4be   :  { %17 = sbr.rel (!%p15_p4) target bundleno = 1 (0x1), region = 88 }

// kernel: vlt_forward.13
= control target key start
LH: loop header
LB: loop body
LE: loop exit
PB: predicated region body
PF: predicated region fallthrough
CT: control target
= control target key end

     0   :  { %s707_s18 = smov 0   ;;  %s826_s0 = inlined_call_operand.vmem [shape: f32[2,16,64], index: 0, kind: input, shape index: {}]   ;;  %s827_s1 = inlined_call_operand.vmem [shape: f32[2,64,64], index: 1, kind: input, shape index: {}]   ;;  %s828_s2 = inlined_call_operand.vmem [shape: f32[64,16], index: 2, kind: input, shape index: {}]   ;;  %s829_s3 = inlined_call_operand.vmem [shape: f32[64,64], index: 3, kind: input, shape index: {}]   ;;  %s830_s4 = inlined_call_operand.vmem [shape: f32[1,64], index: 4, kind: input, shape index: {}]   ;;  %s831_s5 = inlined_call_operand.vmem [shape: f32[2,64,64], index: 5, kind: output, shape index: {}]  }
   0x1 LB: > { %s578_s19 = sadd.s32 4294967295, %s675_s18   ;;  %p582_p0 = scmp.ge.s32.totalorder %s675_s18, 1  ;;  %s675_s18 = sphi %s707_s18, %s15_s18  }
   0x2   : > { %p197_p1 = scmp.lt.s32.totalorder %s675_s18, 3 }
   0x4   : > { %p198_p2 = pnand %p582_p0, %p197_p1 }
   0x5   : > { %v268_v0 = vld [vmem:[%s829_s3] sm:$0xff] (!%p198_p2)  ;;  %v269_v1 = vld [vmem:[%s829_s3 + $0x8] sm:$0xff] (!%p198_p2)  ;;  %v270_v2 = vld [vmem:[%s829_s3 + $0x10] sm:$0xff] (!%p198_p2)  ;;  %p230_p3 = scmp.lt.s32.totalorder (!%p198_p2), %s578_s19, 1  ;;  %vm373_vm0 = vcmask (!%p198_p2), 130048   ;;  %vm287_vm1 = vcmask (!%p198_p2), 523264  }
   0x6   : > { %201 = sbr.rel (%p198_p2) target bundleno = 254 (0xfe), region = 40  ;;  %v276_v3 = vpack.c.bf16 (!%p198_p2), %v269_v1, %v268_v0  ;;  %v271_v4 = vld [vmem:[%s829_s3 + $0x18] sm:$0xff] (!%p198_p2)  ;;  %v272_v6 = vld [vmem:[%s829_s3 + $0x20] sm:$0xff] (!%p198_p2)  ;;  %v273_v7 = vld [vmem:[%s829_s3 + $0x28] sm:$0xff] (!%p198_p2) }
   0x7   : > { %v277_v5 = vpack.c.bf16 (!%p198_p2), %v271_v4, %v270_v2  ;;  %v246_v8 = vld [vmem:[%s828_s2] sm:$0xff] (!%p198_p2)  ;;  %v278_v9 = vpack.c.bf16 (!%p198_p2), %v273_v7, %v272_v6  ;;  %v274_v10 = vld [vmem:[%s829_s3 + $0x30] sm:$0xff] (!%p198_p2)  ;;  %v275_v11 = vld [vmem:[%s829_s3 + $0x38] sm:$0xff] (!%p198_p2) }
   0x8   : > { %625 = vmatprep.subr.bf16.mxu0 (!%p198_p2), %v276_v3  ;;  %645 = vmatprep.mubr.msk.f32.mxu1 (!%p198_p2), %vm373_vm0, %v246_v8  ;;  %v279_v18 = vpack.c.bf16 (!%p198_p2), %v275_v11, %v274_v10  ;;  %v247_v19 = vld [vmem:[%s828_s2 + $0x8] sm:$0xff] (!%p198_p2)  ;;  %v248_v20 = vld [vmem:[%s828_s2 + $0x10] sm:$0xff] (!%p198_p2)  ;;  %v249_v25 = vld [vmem:[%s828_s2 + $0x18] sm:$0xff] (!%p198_p2) }
   0x9   : > { %626 = vmatpush3.bf16.msra.mxu0 (!%p198_p2), %v276_v3  ;;  %v250_v27 = vld [vmem:[%s828_s2 + $0x20] sm:$0xff] (!%p198_p2)  ;;  %v251_v29 = vld [vmem:[%s828_s2 + $0x28] sm:$0xff] (!%p198_p2)  ;;  %v252_v30 = vld [vmem:[%s828_s2 + $0x30] sm:$0xff] (!%p198_p2) }
   0xa   : > { %627 = vmatprep.subr.bf16.mxu0 (!%p198_p2), %v277_v5  ;;  %v253_v33 = vld [vmem:[%s828_s2 + $0x38] sm:$0xff] (!%p198_p2)  ;;  %v589_v37 = vld [vmem:[%s830_s4] ss:$0 sm:$0xff] (!%p198_p2) }
   0xd   : > { %s833_s19 = smov (!%p230_p3, %s578_s19), 1  ;;  %628 = vmatpush3.bf16.msra.mxu0 %v277_v5 }
   0xe   : > { %s604_s9 = sshll.u32 %s833_s19, 4  ;;  %s605_s10 = sshll.u32 %s833_s19, 6  ;;  %629 = vmatprep.subr.bf16.mxu0 %v278_v9 }
   0xf   : > { %s234_s13 = scalar_lea.vmem %s826_s0, %s604_s9  ;;  %s749_s16 = scalar_lea.vmem %s827_s1, %s605_s10 }
  0x10   : > { %v254_v12 = vld [vmem:[%s234_s13] sm:$0xff]  ;;  %v255_v13 = vld [vmem:[%s234_s13 + $0x8] sm:$0xff]  ;;  %v258_v21 = vld [vmem:[%s749_s16 + $0x10] sm:$0xff]  ;;  %s805_s17 = scalar_lea.vmem %s831_s5, %s605_s10 }
  0x11   : > { %v256_v14 = vld [vmem:[%s749_s16] sm:$0xff]  ;;  %v657_v15 = vpack.c.bf16 %v255_v13, %v254_v12  ;;  %v257_v16 = vld [vmem:[%s749_s16 + $0x8] sm:$0xff]  ;;  %630 = vmatpush3.bf16.msra.mxu0 %v278_v9  ;;  %v259_v22 = vld [vmem:[%s749_s16 + $0x18] sm:$0xff] }
  0x12   : > { %v264_v17 = vpack.c.bf16 %v257_v16, %v256_v14  ;;  %631 = vmatprep.subr.bf16.mxu0 %v279_v18  ;;  %v260_v23 = vld [vmem:[%s749_s16 + $0x20] sm:$0xff]  ;;  %v261_v24 = vld [vmem:[%s749_s16 + $0x28] sm:$0xff]  ;;  %v265_v26 = vpack.c.bf16 %v259_v22, %v258_v21  ;;  %v262_v31 = vld [vmem:[%s749_s16 + $0x30] sm:$0xff] }
  0x13   : > { %658 = vmatprep.subr.bf16.mxu1 %v657_v15  ;;  %v266_v28 = vpack.c.bf16 %v261_v24, %v260_v23  ;;  %v263_v32 = vld [vmem:[%s749_s16 + $0x38] sm:$0xff] }
  0x14   : > { %660 = vmatpush3.bf16.msra.mxu1 %v657_v15  ;;  %633 = vmatprep.mubr.msk.bf16.mxu0 %vm287_vm1, %v264_v17  ;;  %v267_v34 = vpack.c.bf16 %v263_v32, %v262_v31 }
  0x15   : > { %632 = vmatpush3.bf16.msra.mxu0 %v279_v18 }
  0x17   : > { %646 = vmatmul.mubr.msk.f32.vlgmr.msra.gmra.mrb[0].mxu1 %vm373_vm0, %v247_v19 }
  0x18   : > { %648 = vmatprep.mubr.msk.f32.mxu1 %vm373_vm0, %v248_v20  ;;  %634 = vmatmul.mubr.msk.bf16.vlgmr.msra.gmra.mrb[0].mxu0 %vm287_vm1, %v265_v26 }
  0x19   : > { %637 = vmatprep.mubr.msk.bf16.mxu0 %vm287_vm1, %v266_v28 }
  0x1b   : > { %649 = vmatmul.mubr.msk.f32.gmra.mrb[2].mxu1 %vm373_vm0, %v249_v25 }
  0x1c   : > { %651 = vmatprep.mubr.msk.f32.mxu1 %vm373_vm0, %v250_v27 }
  0x1f   : > { %652 = vmatmul.mubr.msk.f32.gmra.mrb[4].mxu1 %vm373_vm0, %v251_v29 }
  0x20   : > { %654 = vmatprep.mubr.msk.f32.mxu1 %vm373_vm0, %v252_v30  ;;  %638 = vmatmul.mubr.msk.bf16.gmra.mrb[4].mxu0 %vm287_vm1, %v267_v34 }
  0x23   : > { %655 = vmatmul.mubr.msk.f32.gmra.mrb[6].mxu1 %vm373_vm0, %v253_v33 }
  0xea   : > { %v647_v35 = vpop.f32.mrb[0].mxu1 }
  0xeb   : > { %v464_v36 = vpop.f32.mrb[1].mxu1  ;;  %v635_v40 = vpop.f32.mrb[0].mxu0 }
  0xec   : > { %v343_v41 = vadd.f32 %v635_v40, %v589_v37  ;;  %v334_v42 = vpop.f32.mrb[1].mxu0 }
  0xed   : > { %v335_v43 = vadd.f32 %v589_v37, %v334_v42  ;;  %v636_v44 = vpop.f32.mrb[2].mxu0 }
  0xee   : > { %v650_v38 = vpop.f32.mrb[2].mxu1  ;;  %v367_v46 = vmax.f32 %v343_v41, 0.0  ;;  %v346_v47 = vadd.f32 %v636_v44, %v589_v37  ;;  %v337_v48 = vpop.f32.mrb[3].mxu0 }
  0xef   : > { %v474_v39 = vpop.f32.mrb[3].mxu1  ;;  %v365_v50 = vmax.f32 %v335_v43, 0.0  ;;  %v338_v51 = vadd.f32 %v589_v37, %v337_v48 }
  0xf0   : > { %v368_v52 = vmax.f32 %v346_v47, 0.0  ;;  %v475_v53 = vadd.f32 %v474_v39, %v367_v46 }
  0xf1   : > { %v465_v54 = vadd.f32 %v464_v36, %v365_v50  ;;  %v366_v55 = vmax.f32 %v338_v51, 0.0 }
  0xf2   : > { %v653_v45 = vpop.f32.mrb[4].mxu1  ;;  %v480_v57 = vadd.f32 %v650_v38, %v368_v52  ;;  %505 = vst.msk [vmem:[%s805_s17 + $0x10] sm:$0xff] %vm287_vm1, %v475_v53 }
  0xf3   : > { %v484_v49 = vpop.f32.mrb[5].mxu1  ;;  %503 = vst.msk [vmem:[%s805_s17] sm:$0xff] %vm287_vm1, %v465_v54  ;;  %v470_v59 = vadd.f32 %v647_v35, %v366_v55  ;;  %v639_v60 = vpop.f32.mrb[4].mxu0 }
  0xf4   : > { %506 = vst.msk [vmem:[%s805_s17 + $0x18] sm:$0xff] %vm287_vm1, %v480_v57  ;;  %v359_v61 = vadd.f32 %v639_v60, %v589_v37  ;;  %v350_v62 = vpop.f32.mrb[5].mxu0 }
  0xf5   : > { %504 = vst.msk [vmem:[%s805_s17 + $0x8] sm:$0xff] %vm287_vm1, %v470_v59  ;;  %v351_v63 = vadd.f32 %v589_v37, %v350_v62  ;;  %v640_v0 = vpop.f32.mrb[6].mxu0 }
  0xf6   : > { %v656_v56 = vpop.f32.mrb[6].mxu1  ;;  %v371_v1 = vmax.f32 %v359_v61, 0.0  ;;  %v362_v2 = vadd.f32 %v640_v0, %v589_v37  ;;  %v353_v3 = vpop.f32.mrb[7].mxu0 }
  0xf7   : > { %v494_v58 = vpop.f32.mrb[7].mxu1  ;;  %v369_v4 = vmax.f32 %v351_v63, 0.0  ;;  %v354_v5 = vadd.f32 %v589_v37, %v353_v3 }
  0xf8   : > { %v372_v6 = vmax.f32 %v362_v2, 0.0  ;;  %v495_v7 = vadd.f32 %v494_v58, %v371_v1 }
  0xf9   : > { %v485_v8 = vadd.f32 %v484_v49, %v369_v4  ;;  %v370_v9 = vmax.f32 %v354_v5, 0.0 }
  0xfa   : > { %v500_v10 = vadd.f32 %v656_v56, %v372_v6  ;;  %509 = vst.msk [vmem:[%s805_s17 + $0x30] sm:$0xff] %vm287_vm1, %v495_v7 }
  0xfb   : > { %507 = vst.msk [vmem:[%s805_s17 + $0x20] sm:$0xff] %vm287_vm1, %v485_v8  ;;  %v490_v11 = vadd.f32 %v653_v45, %v370_v9 }
  0xfc   : > { %510 = vst.msk [vmem:[%s805_s17 + $0x38] sm:$0xff] %vm287_vm1, %v500_v10 }
  0xfd   : > { %508 = vst.msk [vmem:[%s805_s17 + $0x28] sm:$0xff] %vm287_vm1, %v490_v11 }
  0xfe PF: > { %s15_s18 = sadd.s32 1, %s675_s18  }
  0xff   : > { %p12_p4 = scmp.ge.s32.totalorder %s15_s18, 4  }
 0x101   :  { %14 = sbr.rel (!%p12_p4) target bundleno = 1 (0x1), region = 73 }

// kernel: vlt_forward.14
= control target key start
LH: loop header
LB: loop body
LE: loop exit
PB: predicated region body
PF: predicated region fallthrough
CT: control target
= control target key end

     0   :  { %s1303_s18 = smov 0   ;;  %s1640_s0 = inlined_call_operand.vmem [shape: f32[2,64,64], index: 0, kind: input, shape index: {}]   ;;  %s1641_s1 = inlined_call_operand.vmem [shape: f32[2,256,32], index: 1, kind: input, shape index: {}]   ;;  %s1642_s2 = inlined_call_operand.vmem [shape: f32[256,64], index: 2, kind: input, shape index: {}]   ;;  %s1643_s3 = inlined_call_operand.vmem [shape: f32[32,64], index: 3, kind: input, shape index: {}]   ;;  %s1644_s4 = inlined_call_operand.vmem [shape: f32[1,64], index: 4, kind: input, shape index: {}]   ;;  %s1645_s5 = inlined_call_operand.vmem [shape: f32[2,256,64], index: 5, kind: output, shape index: {}]  }
   0x1 LB: > { %s1010_s19 = sadd.s32 4294967295, %s1271_s18   ;;  %p1014_p0 = scmp.ge.s32.totalorder %s1271_s18, 1  ;;  %s1271_s18 = sphi %s1303_s18, %s15_s18  }
   0x2   : > { %p197_p1 = scmp.lt.s32.totalorder %s1271_s18, 3 }
   0x4   : > { %p198_p2 = pnand %p1014_p0, %p197_p1 }
   0x5   : > { %v334_v0 = vld [vmem:[%s1643_s3] sm:$0xff] (!%p198_p2)  ;;  %v335_v1 = vld [vmem:[%s1643_s3 + $0x8] sm:$0xff] (!%p198_p2)  ;;  %v336_v2 = vld [vmem:[%s1643_s3 + $0x10] sm:$0xff] (!%p198_p2)  ;;  %p230_p3 = scmp.lt.s32.totalorder (!%p198_p2), %s1010_s19, 1  ;;  %vm589_vm0 = vcmask (!%p198_p2), 523264   ;;  %vm347_vm1 = vcmask (!%p198_p2), 261120  }
   0x6   : > { %201 = sbr.rel (%p198_p2) target bundleno = 307 (0x133), region = 40  ;;  %v338_v3 = vpack.c.bf16 (!%p198_p2), %v335_v1, %v334_v0  ;;  %v337_v4 = vld [vmem:[%s1643_s3 + $0x18] sm:$0xff] (!%p198_p2)  ;;  %v248_v5 = vld [vmem:[%s1642_s2 + $0x10] sm:$0xff] (!%p198_p2)  ;;  %v250_v40 = vld [vmem:[%s1642_s2 + $0x20] sm:$0xff] (!%p198_p2) }
   0x7   : > { %v339_v6 = vpack.c.bf16 (!%p198_p2), %v337_v4, %v336_v2  ;;  %1188 = vmatprep.mubr.msk.f32.mxu1 (!%p198_p2), %vm589_vm0, %v248_v5  ;;  %v249_v38 = vld [vmem:[%s1642_s2 + $0x18] sm:$0xff] (!%p198_p2)  ;;  %v251_v42 = vld [vmem:[%s1642_s2 + $0x28] sm:$0xff] (!%p198_p2)  ;;  %v252_v43 = vld [vmem:[%s1642_s2 + $0x30] sm:$0xff] (!%p198_p2) }
   0x8   : > { %1133 = vmatprep.subr.bf16.mxu0 (!%p198_p2), %v338_v3  ;;  %v253_v48 = vld [vmem:[%s1642_s2 + $0x38] sm:$0xff] (!%p198_p2)  ;;  %v254_v50 = vld [vmem:[%s1642_s2 + $0x40] sm:$0xff] (!%p198_p2)  ;;  %v255_v52 = vld [vmem:[%s1642_s2 + $0x48] sm:$0xff] (!%p198_p2) }
   0x9   : > { %1134 = vmatpush3.bf16.msra.mxu0 (!%p198_p2), %v338_v3  ;;  %v256_v53 = vld [vmem:[%s1642_s2 + $0x50] sm:$0xff] (!%p198_p2)  ;;  %v257_v58 = vld [vmem:[%s1642_s2 + $0x58] sm:$0xff] (!%p198_p2)  ;;  %v258_v60 = vld [vmem:[%s1642_s2 + $0x60] sm:$0xff] (!%p198_p2) }
   0xa   : > { %1135 = vmatprep.subr.bf16.mxu0 (!%p198_p2), %v339_v6  ;;  %v259_v62 = vld [vmem:[%s1642_s2 + $0x68] sm:$0xff] (!%p198_p2)  ;;  %v260_v63 = vld [vmem:[%s1642_s2 + $0x70] sm:$0xff] (!%p198_p2)  ;;  %v261_v4 = vld [vmem:[%s1642_s2 + $0x78] sm:$0xff] (!%p198_p2) }
   0xd   : > { %s1647_s19 = smov (!%p230_p3, %s1010_s19), 1  ;;  %1136 = vmatpush3.bf16.msra.mxu0 %v339_v6  ;;  %v262_v6 = vld [vmem:[%s1642_s2 + $0x80] sm:$0xff] }
   0xe   : > { %s1072_s30 = sshll.u32 %s1647_s19, 6  ;;  %s1073_s6 = sshll.u32 %s1647_s19, 8 }
   0xf   : > { %s1334_s9 = scalar_lea.vmem %s1640_s0, %s1072_s30  ;;  %s1341_s12 = scalar_lea.vmem %s1641_s1, %s1073_s6 }
  0x10   : > { %v278_v7 = vld [vmem:[%s1334_s9] sm:$0xff]  ;;  %v279_v8 = vld [vmem:[%s1334_s9 + $0x8] sm:$0xff]  ;;  %v288_v12 = vld [vmem:[%s1341_s12 + $0x10] sm:$0xff]  ;;  %s1541_s15 = scalar_lea.vmem %s1645_s5, %s1073_s6 }
  0x11   : > { %v286_v9 = vld [vmem:[%s1341_s12] sm:$0xff]  ;;  %v1233_v10 = vpack.c.bf16 %v279_v8, %v278_v7  ;;  %v287_v11 = vld [vmem:[%s1341_s12 + $0x8] sm:$0xff]  ;;  %v289_v13 = vld [vmem:[%s1341_s12 + $0x18] sm:$0xff] }
  0x12   : > { %v318_v14 = vpack.c.bf16 %v287_v11, %v286_v9  ;;  %v319_v15 = vpack.c.bf16 %v289_v13, %v288_v12  ;;  %v280_v16 = vld [vmem:[%s1334_s9 + $0x10] sm:$0xff]  ;;  %v281_v17 = vld [vmem:[%s1334_s9 + $0x18] sm:$0xff]  ;;  %v282_v18 = vld [vmem:[%s1334_s9 + $0x20] sm:$0xff] }
  0x13   : > { %1249 = vmatprep.subr.bf16.mxu1 %v1233_v10  ;;  %v1237_v19 = vpack.c.bf16 %v281_v17, %v280_v16  ;;  %1234 = vmatprep.subr.bf16.mxu0 %v1233_v10  ;;  %v283_v20 = vld [vmem:[%s1334_s9 + $0x28] sm:$0xff]  ;;  %v290_v21 = vld [vmem:[%s1341_s12 + $0x20] sm:$0xff]  ;;  %v292_v25 = vld [vmem:[%s1341_s12 + $0x30] sm:$0xff] }
  0x14   : > { %v291_v22 = vld [vmem:[%s1341_s12 + $0x28] sm:$0xff]  ;;  %1137 = vmatprep.mubr.msk.bf16.mxu0 %vm347_vm1, %v318_v14  ;;  %1253 = vmatpush3.bf16.msra.mxu1 %v1233_v10  ;;  %v1241_v24 = vpack.c.bf16 %v283_v20, %v282_v18  ;;  %v293_v26 = vld [vmem:[%s1341_s12 + $0x38] sm:$0xff]  ;;  %v284_v27 = vld [vmem:[%s1334_s9 + $0x30] sm:$0xff] }
  0x15   : > { %v320_v23 = vpack.c.bf16 %v291_v22, %v290_v21  ;;  %1138 = vmatmul.mubr.msk.bf16.vlgmr.msra.gmra.mrb[0].mxu0 %vm347_vm1, %v319_v15  ;;  %1250 = vmatprep.subr.bf16.mxu1 %v1237_v19  ;;  %v285_v28 = vld [vmem:[%s1334_s9 + $0x38] sm:$0xff]  ;;  %v294_v29 = vld [vmem:[%s1341_s12 + $0x40] sm:$0xff]  ;;  %v295_v30 = vld [vmem:[%s1341_s12 + $0x48] sm:$0xff]  ;;  %v321_v31 = vpack.c.bf16 %v293_v26, %v292_v25 }
  0x16   : > { %1236 = vmatpush3.bf16.msra.mxu0 %v1233_v10  ;;  %v1245_v32 = vpack.c.bf16 %v285_v28, %v284_v27  ;;  %v322_v33 = vpack.c.bf16 %v295_v30, %v294_v29  ;;  %v296_v34 = vld [vmem:[%s1341_s12 + $0x50] sm:$0xff]  ;;  %v297_v35 = vld [vmem:[%s1341_s12 + $0x58] sm:$0xff]  ;;  %v298_v36 = vld [vmem:[%s1341_s12 + $0x60] sm:$0xff] }
  0x17   : > { %1141 = vmatprep.mubr.msk.bf16.mxu0 %vm347_vm1, %v320_v23  ;;  %1238 = vmatprep.subr.bf16.mxu0 %v1237_v19  ;;  %v299_v37 = vld [vmem:[%s1341_s12 + $0x68] sm:$0xff]  ;;  %v323_v39 = vpack.c.bf16 %v297_v35, %v296_v34  ;;  %v300_v44 = vld [vmem:[%s1341_s12 + $0x70] sm:$0xff]  ;;  %v301_v45 = vld [vmem:[%s1341_s12 + $0x78] sm:$0xff] }
  0x18   : > { %1254 = vmatpush3.bf16.msra.mxu1 %v1237_v19  ;;  %v324_v41 = vpack.c.bf16 %v299_v37, %v298_v36  ;;  %v302_v46 = vld [vmem:[%s1341_s12 + $0x80] sm:$0xff]  ;;  %v303_v47 = vld [vmem:[%s1341_s12 + $0x88] sm:$0xff]  ;;  %v325_v49 = vpack.c.bf16 %v301_v45, %v300_v44  ;;  %v304_v54 = vld [vmem:[%s1341_s12 + $0x90] sm:$0xff] }
  0x19   : > { %1251 = vmatprep.subr.bf16.mxu1 %v1241_v24  ;;  %v326_v51 = vpack.c.bf16 %v303_v47, %v302_v46  ;;  %v305_v55 = vld [vmem:[%s1341_s12 + $0x98] sm:$0xff]  ;;  %v306_v56 = vld [vmem:[%s1341_s12 + $0xa0] sm:$0xff]  ;;  %v307_v57 = vld [vmem:[%s1341_s12 + $0xa8] sm:$0xff] }
  0x1a   : > { %1240 = vmatpush3.bf16.msra.mxu0 %v1237_v19  ;;  %v327_v59 = vpack.c.bf16 %v305_v55, %v304_v54  ;;  %v328_v61 = vpack.c.bf16 %v307_v57, %v306_v56  ;;  %v308_v0 = vld [vmem:[%s1341_s12 + $0xb0] sm:$0xff]  ;;  %v309_v1 = vld [vmem:[%s1341_s12 + $0xb8] sm:$0xff]  ;;  %v310_v2 = vld [vmem:[%s1341_s12 + $0xc0] sm:$0xff] }
  0x1b   : > { %1242 = vmatprep.subr.bf16.mxu0 %v1241_v24  ;;  %v311_v3 = vld [vmem:[%s1341_s12 + $0xc8] sm:$0xff]  ;;  %v329_v5 = vpack.c.bf16 %v309_v1, %v308_v0  ;;  %v264_v9 = vld [vmem:[%s1642_s2 + $0x90] sm:$0xff]  ;;  %v313_v11 = vld [vmem:[%s1341_s12 + $0xd8] sm:$0xff] }
  0x1c   : > { %1255 = vmatpush3.bf16.msra.mxu1 %v1241_v24  ;;  %v330_v7 = vpack.c.bf16 %v311_v3, %v310_v2  ;;  %v263_v8 = vld [vmem:[%s1642_s2 + $0x88] sm:$0xff]  ;;  %v312_v10 = vld [vmem:[%s1341_s12 + $0xd0] sm:$0xff]  ;;  %v314_v12 = vld [vmem:[%s1341_s12 + $0xe0] sm:$0xff] }
  0x1d   : > { %1142 = vmatmul.mubr.msk.bf16.gmra.mrb[4].mxu0 %vm347_vm1, %v321_v31  ;;  %1252 = vmatprep.subr.bf16.mxu1 %v1245_v32  ;;  %v315_v13 = vld [vmem:[%s1341_s12 + $0xe8] sm:$0xff]  ;;  %v265_v14 = vld [vmem:[%s1642_s2 + $0x98] sm:$0xff]  ;;  %v331_v15 = vpack.c.bf16 %v313_v11, %v312_v10  ;;  %v266_v16 = vld [vmem:[%s1642_s2 + $0xa0] sm:$0xff] }
  0x1e   : > { %1145 = vmatprep.mubr.msk.bf16.mxu0 %vm347_vm1, %v322_v33  ;;  %1244 = vmatpush3.bf16.msra.mxu0 %v1241_v24  ;;  %v332_v17 = vpack.c.bf16 %v315_v13, %v314_v12  ;;  %v267_v18 = vld [vmem:[%s1642_s2 + $0xa8] sm:$0xff]  ;;  %v268_v19 = vld [vmem:[%s1642_s2 + $0xb0] sm:$0xff]  ;;  %v317_v21 = vld [vmem:[%s1341_s12 + $0xf8] sm:$0xff] }
  0x1f   : > { %1246 = vmatprep.subr.bf16.mxu0 %v1245_v32  ;;  %v316_v20 = vld [vmem:[%s1341_s12 + $0xf0] sm:$0xff]  ;;  %v269_v22 = vld [vmem:[%s1642_s2 + $0xb8] sm:$0xff]  ;;  %v270_v24 = vld [vmem:[%s1642_s2 + $0xc0] sm:$0xff] }
  0x20   : > { %1256 = vmatpush3.bf16.msra.mxu1 %v1245_v32  ;;  %v333_v23 = vpack.c.bf16 %v317_v21, %v316_v20  ;;  %v246_v25 = vld [vmem:[%s1642_s2] sm:$0xff]  ;;  %v271_v26 = vld [vmem:[%s1642_s2 + $0xc8] sm:$0xff]  ;;  %v272_v27 = vld [vmem:[%s1642_s2 + $0xd0] sm:$0xff] }
  0x21   : > { %v273_v28 = vld [vmem:[%s1642_s2 + $0xd8] sm:$0xff]  ;;  %v274_v29 = vld [vmem:[%s1642_s2 + $0xe0] sm:$0xff]  ;;  %v247_v30 = vld [vmem:[%s1642_s2 + $0x8] sm:$0xff] }
  0x22   : > { %1248 = vmatpush3.bf16.msra.mxu0 %v1245_v32  ;;  %v275_v31 = vld [vmem:[%s1642_s2 + $0xe8] sm:$0xff]  ;;  %v276_v32 = vld [vmem:[%s1642_s2 + $0xf0] sm:$0xff]  ;;  %v277_v33 = vld [vmem:[%s1642_s2 + $0xf8] sm:$0xff] }
  0x23   : > { %1189 = vmatmul.mubr.msk.f32.vlgmr.msra.gmra.mrb[0].mxu1 %vm589_vm0, %v249_v38  ;;  %v1530_v38 = vld [vmem:[%s1644_s4] ss:$0 sm:$0xff] }
  0x24   : > { %1191 = vmatprep.mubr.msk.f32.mxu1 %vm589_vm0, %v250_v40 }
  0x25   : > { %1146 = vmatmul.mubr.msk.bf16.gmra.mrb[8].mxu0 %vm347_vm1, %v323_v39 }
  0x26   : > { %1149 = vmatprep.mubr.msk.bf16.mxu0 %vm347_vm1, %v324_v41 }
  0x27   : > { %1192 = vmatmul.mubr.msk.f32.gmra.mrb[2].mxu1 %vm589_vm0, %v251_v42 }
  0x28   : > { %1194 = vmatprep.mubr.msk.f32.mxu1 %vm589_vm0, %v252_v43 }
  0x2b   : > { %1195 = vmatmul.mubr.msk.f32.gmra.mrb[4].mxu1 %vm589_vm0, %v253_v48 }
  0x2c   : > { %1197 = vmatprep.mubr.msk.f32.mxu1 %vm589_vm0, %v254_v50 }
  0x2d   : > { %1150 = vmatmul.mubr.msk.bf16.gmra.mrb[12].mxu0 %vm347_vm1, %v325_v49 }
  0x2e   : > { %1153 = vmatprep.mubr.msk.bf16.mxu0 %vm347_vm1, %v326_v51 }
  0x2f   : > { %1198 = vmatmul.mubr.msk.f32.gmra.mrb[6].mxu1 %vm589_vm0, %v255_v52 }
  0x30   : > { %1200 = vmatprep.mubr.msk.f32.mxu1 %vm589_vm0, %v256_v53 }
  0x33   : > { %1201 = vmatmul.mubr.msk.f32.gmra.mrb[8].mxu1 %vm589_vm0, %v257_v58 }
  0x34   : > { %1203 = vmatprep.mubr.msk.f32.mxu1 %vm589_vm0, %v258_v60 }
  0x35   : > { %1154 = vmatmul.mubr.msk.bf16.gmra.mrb[16].mxu0 %vm347_vm1, %v327_v59 }
  0x36   : > { %1157 = vmatprep.mubr.msk.bf16.mxu0 %vm347_vm1, %v328_v61 }
  0x37   : > { %1204 = vmatmul.mubr.msk.f32.gmra.mrb[10].mxu1 %vm589_vm0, %v259_v62 }
  0x38   : > { %1206 = vmatprep.mubr.msk.f32.mxu1 %vm589_vm0, %v260_v63 }
  0x3b   : > { %1207 = vmatmul.mubr.msk.f32.gmra.mrb[12].mxu1 %vm589_vm0, %v261_v4 }
  0x3c   : > { %1209 = vmatprep.mubr.msk.f32.mxu1 %vm589_vm0, %v262_v6 }
  0x3d   : > { %1158 = vmatmul.mubr.msk.bf16.gmra.mrb[20].mxu0 %vm347_vm1, %v329_v5 }
  0x3e   : > { %1161 = vmatprep.mubr.msk.bf16.mxu0 %vm347_vm1, %v330_v7 }
  0x3f   : > { %1210 = vmatmul.mubr.msk.f32.gmra.mrb[14].mxu1 %vm589_vm0, %v263_v8 }
  0x40   : > { %1212 = vmatprep.mubr.msk.f32.mxu1 %vm589_vm0, %v264_v9 }
  0x43   : > { %1213 = vmatmul.mubr.msk.f32.gmra.mrb[16].mxu1 %vm589_vm0, %v265_v14 }
  0x44   : > { %1215 = vmatprep.mubr.msk.f32.mxu1 %vm589_vm0, %v266_v16 }
  0x45   : > { %1162 = vmatmul.mubr.msk.bf16.gmra.mrb[24].mxu0 %vm347_vm1, %v331_v15 }
  0x46   : > { %1165 = vmatprep.mubr.msk.bf16.mxu0 %vm347_vm1, %v332_v17 }
  0x47   : > { %1216 = vmatmul.mubr.msk.f32.gmra.mrb[18].mxu1 %vm589_vm0, %v267_v18 }
  0x48   : > { %1218 = vmatprep.mubr.msk.f32.mxu1 %vm589_vm0, %v268_v19 }
  0x4b   : > { %1219 = vmatmul.mubr.msk.f32.gmra.mrb[20].mxu1 %vm589_vm0, %v269_v22 }
  0x4c   : > { %1221 = vmatprep.mubr.msk.f32.mxu1 %vm589_vm0, %v270_v24 }
  0x4d   : > { %1166 = vmatmul.mubr.msk.bf16.gmra.mrb[28].mxu0 %vm347_vm1, %v333_v23 }
  0x4e   : > { %1185 = vmatprep.mubr.msk.f32.mxu0 %vm589_vm0, %v246_v25 }
  0x4f   : > { %1222 = vmatmul.mubr.msk.f32.gmra.mrb[22].mxu1 %vm589_vm0, %v271_v26 }
  0x50   : > { %1224 = vmatprep.mubr.msk.f32.mxu1 %vm589_vm0, %v272_v27 }
  0x53   : > { %1225 = vmatmul.mubr.msk.f32.gmra.mrb[24].mxu1 %vm589_vm0, %v273_v28 }
  0x54   : > { %1227 = vmatprep.mubr.msk.f32.mxu1 %vm589_vm0, %v274_v29 }
  0x55   : > { %1186 = vmatmul.mubr.msk.f32.vlgmr.msra.gmra.mrb[32].mxu0 %vm589_vm0, %v247_v30 }
  0x57   : > { %1228 = vmatmul.mubr.msk.f32.gmra.mrb[26].mxu1 %vm589_vm0, %v275_v31 }
  0x58   : > { %1230 = vmatprep.mubr.msk.f32.mxu1 %vm589_vm0, %v276_v32 }
  0x5b   : > { %1231 = vmatmul.mubr.msk.f32.gmra.mrb[28].mxu1 %vm589_vm0, %v277_v33 }
  0xe8   : > { %v1139_v34 = vpop.f32.mrb[0].mxu0 }
  0xe9   : > { %v1523_v35 = vpop.f32.mrb[1].mxu0  ;;  %v439_v42 = vadd.f32 %v1139_v34, %v1530_v38 }
  0xea   : > { %v1140_v36 = vpop.f32.mrb[2].mxu0 }
  0xeb   : > { %v1525_v37 = vpop.f32.mrb[3].mxu0  ;;  %v442_v40 = vadd.f32 %v1140_v36, %v1530_v38  ;;  %v559_v48 = vmax.f32 %v439_v42, 0.0 }
  0xed   : > { %v560_v47 = vmax.f32 %v442_v40, 0.0 }
  0xf0   : > { %v1143_v39 = vpop.f32.mrb[4].mxu0 }
  0xf1   : > { %v446_v41 = vpop.f32.mrb[5].mxu0  ;;  %v455_v58 = vadd.f32 %v1143_v39, %v1530_v38 }
  0xf2   : > { %v1144_v43 = vpop.f32.mrb[6].mxu0  ;;  %v447_v45 = vadd.f32 %v1530_v38, %v446_v41 }
  0xf3   : > { %v449_v44 = vpop.f32.mrb[7].mxu0  ;;  %v458_v56 = vadd.f32 %v1144_v43, %v1530_v38  ;;  %v563_v4 = vmax.f32 %v455_v58, 0.0 }
  0xf4   : > { %v450_v46 = vadd.f32 %v1530_v38, %v449_v44  ;;  %v561_v53 = vmax.f32 %v447_v45, 0.0 }
  0xf5   : > { %v564_v3 = vmax.f32 %v458_v56, 0.0 }
  0xf6   : > { %v1190_v49 = vpop.f32.mrb[0].mxu1  ;;  %v562_v50 = vmax.f32 %v450_v46, 0.0 }
  0xf7   : > { %v768_v51 = vadd.f32 %v1190_v49, %v560_v47  ;;  %v762_v52 = vpop.f32.mrb[1].mxu1 }
  0xf8   : > { %v763_v54 = vadd.f32 %v762_v52, %v559_v48  ;;  %v1147_v55 = vpop.f32.mrb[8].mxu0 }
  0xf9   : > { %914 = vst.msk [vmem:[%s1541_s15 + $0x18] sm:$0xff] %vm589_vm0, %v768_v51  ;;  %v462_v57 = vpop.f32.mrb[9].mxu0  ;;  %v471_v14 = vadd.f32 %v1147_v55, %v1530_v38 }
  0xfa   : > { %913 = vst.msk [vmem:[%s1541_s15 + $0x10] sm:$0xff] %vm589_vm0, %v763_v54  ;;  %v1193_v59 = vpop.f32.mrb[2].mxu1  ;;  %v1148_v60 = vpop.f32.mrb[10].mxu0  ;;  %v463_v1 = vadd.f32 %v1530_v38, %v462_v57 }
  0xfb   : > { %v778_v61 = vadd.f32 %v1193_v59, %v562_v50  ;;  %v772_v62 = vpop.f32.mrb[3].mxu1  ;;  %v465_v63 = vpop.f32.mrb[11].mxu0  ;;  %v474_v12 = vadd.f32 %v1148_v60, %v1530_v38  ;;  %v567_v24 = vmax.f32 %v471_v14, 0.0 }
  0xfc   : > { %v773_v0 = vadd.f32 %v772_v62, %v561_v53  ;;  %v466_v2 = vadd.f32 %v1530_v38, %v465_v63  ;;  %v565_v9 = vmax.f32 %v463_v1, 0.0 }
  0xfd   : > { %916 = vst.msk [vmem:[%s1541_s15 + $0x28] sm:$0xff] %vm589_vm0, %v778_v61  ;;  %v568_v23 = vmax.f32 %v474_v12, 0.0 }
  0xfe   : > { %915 = vst.msk [vmem:[%s1541_s15 + $0x20] sm:$0xff] %vm589_vm0, %v773_v0  ;;  %v1196_v5 = vpop.f32.mrb[4].mxu1  ;;  %v566_v6 = vmax.f32 %v466_v2, 0.0 }
  0xff   : > { %v788_v7 = vadd.f32 %v1196_v5, %v564_v3  ;;  %v782_v8 = vpop.f32.mrb[5].mxu1 }
 0x100   : > { %v783_v10 = vadd.f32 %v782_v8, %v563_v4  ;;  %v1151_v11 = vpop.f32.mrb[12].mxu0 }
 0x101   : > { %918 = vst.msk [vmem:[%s1541_s15 + $0x38] sm:$0xff] %vm589_vm0, %v788_v7  ;;  %v478_v13 = vpop.f32.mrb[13].mxu0  ;;  %v487_v34 = vadd.f32 %v1151_v11, %v1530_v38 }
 0x102   : > { %917 = vst.msk [vmem:[%s1541_s15 + $0x30] sm:$0xff] %vm589_vm0, %v783_v10  ;;  %v1199_v15 = vpop.f32.mrb[6].mxu1  ;;  %v1152_v16 = vpop.f32.mrb[14].mxu0  ;;  %v479_v21 = vadd.f32 %v1530_v38, %v478_v13 }
 0x103   : > { %v798_v17 = vadd.f32 %v1199_v15, %v566_v6  ;;  %v792_v18 = vpop.f32.mrb[7].mxu1  ;;  %v481_v19 = vpop.f32.mrb[15].mxu0  ;;  %v490_v32 = vadd.f32 %v1152_v16, %v1530_v38  ;;  %v571_v47 = vmax.f32 %v487_v34, 0.0 }
 0x104   : > { %v793_v20 = vadd.f32 %v792_v18, %v565_v9  ;;  %v482_v22 = vadd.f32 %v1530_v38, %v481_v19  ;;  %v569_v29 = vmax.f32 %v479_v21, 0.0 }
 0x105   : > { %920 = vst.msk [vmem:[%s1541_s15 + $0x48] sm:$0xff] %vm589_vm0, %v798_v17  ;;  %v572_v46 = vmax.f32 %v490_v32, 0.0 }
 0x106   : > { %919 = vst.msk [vmem:[%s1541_s15 + $0x40] sm:$0xff] %vm589_vm0, %v793_v20  ;;  %v1202_v25 = vpop.f32.mrb[8].mxu1  ;;  %v570_v26 = vmax.f32 %v482_v22, 0.0 }
 0x107   : > { %v808_v27 = vadd.f32 %v1202_v25, %v568_v23  ;;  %v802_v28 = vpop.f32.mrb[9].mxu1 }
 0x108   : > { %v803_v30 = vadd.f32 %v802_v28, %v567_v24  ;;  %v1155_v31 = vpop.f32.mrb[16].mxu0 }
 0x109   : > { %922 = vst.msk [vmem:[%s1541_s15 + $0x58] sm:$0xff] %vm589_vm0, %v808_v27  ;;  %v494_v33 = vpop.f32.mrb[17].mxu0  ;;  %v503_v57 = vadd.f32 %v1155_v31, %v1530_v38 }
 0x10a   : > { %921 = vst.msk [vmem:[%s1541_s15 + $0x50] sm:$0xff] %vm589_vm0, %v803_v30  ;;  %v1205_v36 = vpop.f32.mrb[10].mxu1  ;;  %v1156_v39 = vpop.f32.mrb[18].mxu0  ;;  %v495_v44 = vadd.f32 %v1530_v38, %v494_v33 }
 0x10b   : > { %v818_v40 = vadd.f32 %v1205_v36, %v570_v26  ;;  %v812_v41 = vpop.f32.mrb[11].mxu1  ;;  %v497_v42 = vpop.f32.mrb[19].mxu0  ;;  %v506_v55 = vadd.f32 %v1156_v39, %v1530_v38  ;;  %v575_v3 = vmax.f32 %v503_v57, 0.0  ;;  %v434_v39 = vadd.f32 %v1530_v38, %v1525_v37 }
 0x10c   : > { %v813_v43 = vadd.f32 %v812_v41, %v569_v29  ;;  %v498_v45 = vadd.f32 %v1530_v38, %v497_v42  ;;  %v573_v52 = vmax.f32 %v495_v44, 0.0 }
 0x10d   : > { %924 = vst.msk [vmem:[%s1541_s15 + $0x68] sm:$0xff] %vm589_vm0, %v818_v40  ;;  %v576_v2 = vmax.f32 %v506_v55, 0.0 }
 0x10e   : > { %923 = vst.msk [vmem:[%s1541_s15 + $0x60] sm:$0xff] %vm589_vm0, %v813_v43  ;;  %v1208_v48 = vpop.f32.mrb[12].mxu1  ;;  %v574_v49 = vmax.f32 %v498_v45, 0.0  ;;  %v431_v43 = vadd.f32 %v1530_v38, %v1523_v35 }
 0x10f   : > { %v828_v50 = vadd.f32 %v1208_v48, %v572_v46  ;;  %v822_v51 = vpop.f32.mrb[13].mxu1 }
 0x110   : > { %v823_v53 = vadd.f32 %v822_v51, %v571_v47  ;;  %v1159_v54 = vpop.f32.mrb[20].mxu0  ;;  %v557_v35 = vmax.f32 %v431_v43, 0.0 }
 0x111   : > { %926 = vst.msk [vmem:[%s1541_s15 + $0x78] sm:$0xff] %vm589_vm0, %v828_v50  ;;  %v510_v56 = vpop.f32.mrb[21].mxu0  ;;  %v519_v13 = vadd.f32 %v1159_v54, %v1530_v38 }
 0x112   : > { %925 = vst.msk [vmem:[%s1541_s15 + $0x70] sm:$0xff] %vm589_vm0, %v823_v53  ;;  %v1211_v58 = vpop.f32.mrb[14].mxu1  ;;  %v1160_v59 = vpop.f32.mrb[22].mxu0  ;;  %v511_v0 = vadd.f32 %v1530_v38, %v510_v56 }
 0x113   : > { %v838_v60 = vadd.f32 %v1211_v58, %v574_v49  ;;  %v832_v61 = vpop.f32.mrb[15].mxu1  ;;  %v513_v62 = vpop.f32.mrb[23].mxu0  ;;  %v522_v11 = vadd.f32 %v1160_v59, %v1530_v38  ;;  %v579_v23 = vmax.f32 %v519_v13, 0.0  ;;  %v558_v49 = vmax.f32 %v434_v39, 0.0 }
 0x114   : > { %v833_v63 = vadd.f32 %v832_v61, %v573_v52  ;;  %v514_v1 = vadd.f32 %v1530_v38, %v513_v62  ;;  %v577_v8 = vmax.f32 %v511_v0, 0.0 }
 0x115   : > { %928 = vst.msk [vmem:[%s1541_s15 + $0x88] sm:$0xff] %vm589_vm0, %v838_v60  ;;  %v580_v22 = vmax.f32 %v522_v11, 0.0 }
 0x116   : > { %927 = vst.msk [vmem:[%s1541_s15 + $0x80] sm:$0xff] %vm589_vm0, %v833_v63  ;;  %v1214_v4 = vpop.f32.mrb[16].mxu1  ;;  %v578_v5 = vmax.f32 %v514_v1, 0.0 }
 0x117   : > { %v848_v6 = vadd.f32 %v1214_v4, %v576_v2  ;;  %v842_v7 = vpop.f32.mrb[17].mxu1 }
 0x118   : > { %v843_v9 = vadd.f32 %v842_v7, %v575_v3  ;;  %v1163_v10 = vpop.f32.mrb[24].mxu0 }
 0x119   : > { %930 = vst.msk [vmem:[%s1541_s15 + $0x98] sm:$0xff] %vm589_vm0, %v848_v6  ;;  %v526_v12 = vpop.f32.mrb[25].mxu0  ;;  %v535_v33 = vadd.f32 %v1163_v10, %v1530_v38 }
 0x11a   : > { %929 = vst.msk [vmem:[%s1541_s15 + $0x90] sm:$0xff] %vm589_vm0, %v843_v9  ;;  %v1217_v14 = vpop.f32.mrb[18].mxu1  ;;  %v1164_v15 = vpop.f32.mrb[26].mxu0  ;;  %v527_v20 = vadd.f32 %v1530_v38, %v526_v12 }
 0x11b   : > { %v858_v16 = vadd.f32 %v1217_v14, %v578_v5  ;;  %v852_v17 = vpop.f32.mrb[19].mxu1  ;;  %v529_v18 = vpop.f32.mrb[27].mxu0  ;;  %v538_v31 = vadd.f32 %v1164_v15, %v1530_v38  ;;  %v583_v48 = vmax.f32 %v535_v33, 0.0 }
 0x11c   : > { %v853_v19 = vadd.f32 %v852_v17, %v577_v8  ;;  %v530_v21 = vadd.f32 %v1530_v38, %v529_v18  ;;  %v581_v28 = vmax.f32 %v527_v20, 0.0 }
 0x11d   : > { %932 = vst.msk [vmem:[%s1541_s15 + $0xa8] sm:$0xff] %vm589_vm0, %v858_v16  ;;  %v584_v47 = vmax.f32 %v538_v31, 0.0 }
 0x11e   : > { %931 = vst.msk [vmem:[%s1541_s15 + $0xa0] sm:$0xff] %vm589_vm0, %v853_v19  ;;  %v1220_v24 = vpop.f32.mrb[20].mxu1  ;;  %v582_v25 = vmax.f32 %v530_v21, 0.0 }
 0x11f   : > { %v868_v26 = vadd.f32 %v1220_v24, %v580_v22  ;;  %v862_v27 = vpop.f32.mrb[21].mxu1 }
 0x120   : > { %v863_v29 = vadd.f32 %v862_v27, %v579_v23  ;;  %v1167_v30 = vpop.f32.mrb[28].mxu0 }
 0x121   : > { %934 = vst.msk [vmem:[%s1541_s15 + $0xb8] sm:$0xff] %vm589_vm0, %v868_v26  ;;  %v542_v32 = vpop.f32.mrb[29].mxu0  ;;  %v551_v59 = vadd.f32 %v1167_v30, %v1530_v38 }
 0x122   : > { %933 = vst.msk [vmem:[%s1541_s15 + $0xb0] sm:$0xff] %vm589_vm0, %v863_v29  ;;  %v1223_v34 = vpop.f32.mrb[22].mxu1  ;;  %v1168_v36 = vpop.f32.mrb[30].mxu0  ;;  %v543_v45 = vadd.f32 %v1530_v38, %v542_v32 }
 0x123   : > { %v878_v40 = vadd.f32 %v1223_v34, %v582_v25  ;;  %v872_v41 = vpop.f32.mrb[23].mxu1  ;;  %v545_v42 = vpop.f32.mrb[31].mxu0  ;;  %v554_v56 = vadd.f32 %v1168_v36, %v1530_v38  ;;  %v587_v2 = vmax.f32 %v551_v59, 0.0 }
 0x124   : > { %v873_v44 = vadd.f32 %v872_v41, %v581_v28  ;;  %v546_v46 = vadd.f32 %v1530_v38, %v545_v42  ;;  %v585_v53 = vmax.f32 %v543_v45, 0.0 }
 0x125   : > { %936 = vst.msk [vmem:[%s1541_s15 + $0xc8] sm:$0xff] %vm589_vm0, %v878_v40  ;;  %v588_v1 = vmax.f32 %v554_v56, 0.0 }
 0x126   : > { %935 = vst.msk [vmem:[%s1541_s15 + $0xc0] sm:$0xff] %vm589_vm0, %v873_v44  ;;  %v1226_v37 = vpop.f32.mrb[24].mxu1  ;;  %v586_v50 = vmax.f32 %v546_v46, 0.0 }
 0x127   : > { %v888_v51 = vadd.f32 %v1226_v37, %v584_v47  ;;  %v882_v52 = vpop.f32.mrb[25].mxu1 }
 0x128   : > { %v883_v54 = vadd.f32 %v882_v52, %v583_v48  ;;  %v1187_v55 = vpop.f32.mrb[32].mxu0 }
 0x129   : > { %938 = vst.msk [vmem:[%s1541_s15 + $0xd8] sm:$0xff] %vm589_vm0, %v888_v51  ;;  %v758_v57 = vadd.f32 %v1187_v55, %v558_v49  ;;  %v752_v58 = vpop.f32.mrb[33].mxu0 }
 0x12a   : > { %937 = vst.msk [vmem:[%s1541_s15 + $0xd0] sm:$0xff] %vm589_vm0, %v883_v54  ;;  %v753_v60 = vadd.f32 %v752_v58, %v557_v35  ;;  %v1229_v61 = vpop.f32.mrb[26].mxu1 }
 0x12b   : > { %912 = vst.msk [vmem:[%s1541_s15 + $0x8] sm:$0xff] %vm589_vm0, %v758_v57  ;;  %v898_v62 = vadd.f32 %v1229_v61, %v586_v50  ;;  %v892_v63 = vpop.f32.mrb[27].mxu1 }
 0x12c   : > { %911 = vst.msk [vmem:[%s1541_s15] sm:$0xff] %vm589_vm0, %v753_v60  ;;  %v893_v0 = vadd.f32 %v892_v63, %v585_v53 }
 0x12d   : > { %940 = vst.msk [vmem:[%s1541_s15 + $0xe8] sm:$0xff] %vm589_vm0, %v898_v62 }
 0x12e   : > { %939 = vst.msk [vmem:[%s1541_s15 + $0xe0] sm:$0xff] %vm589_vm0, %v893_v0  ;;  %v1232_v38 = vpop.f32.mrb[28].mxu1 }
 0x12f   : > { %v908_v3 = vadd.f32 %v1232_v38, %v588_v1  ;;  %v902_v4 = vpop.f32.mrb[29].mxu1 }
 0x130   : > { %v903_v5 = vadd.f32 %v902_v4, %v587_v2 }
 0x131   : > { %942 = vst.msk [vmem:[%s1541_s15 + $0xf8] sm:$0xff] %vm589_vm0, %v908_v3 }
 0x132   : > { %941 = vst.msk [vmem:[%s1541_s15 + $0xf0] sm:$0xff] %vm589_vm0, %v903_v5 }
 0x133 PF: > { %s15_s18 = sadd.s32 1, %s1271_s18  }
 0x134   : > { %p12_p4 = scmp.ge.s32.totalorder %s15_s18, 4  }
 0x136   :  { %14 = sbr.rel (!%p12_p4) target bundleno = 1 (0x1), region = 73 }

// kernel: vlt_forward.15
= control target key start
LH: loop header
LB: loop body
LE: loop exit
PB: predicated region body
PF: predicated region fallthrough
CT: control target
= control target key end

     0   :  { %s3857_s15 = smov 0   ;;  %s7076_s0 = inlined_call_operand.vmem [shape: f32[2,256,64], index: 0, kind: input, shape index: {}]   ;;  %s7077_s1 = inlined_call_operand.vmem [shape: f32[2,64], index: 1, kind: input, shape index: {}]   ;;  %s7078_s2 = inlined_call_operand.vmem [shape: f32[2,1], index: 2, kind: input, shape index: {}]   ;;  %s7079_s3 = inlined_call_operand.vmem [shape: f32[4096,256], index: 3, kind: input, shape index: {}]   ;;  %s7080_s4 = inlined_call_operand.vmem [shape: f32[2,2,4096], index: 4, kind: output, shape index: {}]  }
   0x1 LB: > { %s2747_s16 = sadd.s32 4294967295, %s3828_s15   ;;  %p2751_p0 = scmp.ge.s32.totalorder %s3828_s15, 1  ;;  %s3828_s15 = sphi %s3857_s15, %s14_s15  }
   0x2   : > { %p162_p1 = scmp.lt.s32.totalorder %s3828_s15, 3 }
   0x4   : > { %p163_p2 = pnand %p2751_p0, %p162_p1 }
   0x5   : > { %p188_p3 = scmp.lt.s32.totalorder (!%p163_p2), %s2747_s16, 1  ;;  %v247_v0 = vld [vmem:[%s7077_s1] sm:$0x3] (!%p163_p2)  ;;  %v349_v1 = vld [vmem:[%s7079_s3 + $0x8] sm:$0xff] (!%p163_p2)  ;;  %v3830_v3 = vmov (!%p163_p2), 0   ;;  %v351_v5 = vld [vmem:[%s7079_s3 + $0x18] sm:$0xff] (!%p163_p2) }
   0x6   : > { %166 = sbr.rel (%p163_p2) target bundleno = 1417 (0x589), region = 36  ;;  %v3871_v2 = vpack.c.bf16 (!%p163_p2), %v247_v0, %v247_v0  ;;  %3821 = vset.pattern.permute.xlu0 (!%p163_p2), %v3830_v3  ;;  %v249_v4 = vld [vmem:[%s7078_s2] sm:$0x3] (!%p163_p2)  ;;  %vm255_vm0 = vcmask (!%p163_p2), 523264   ;;  %v2779_v6 = vpack.c.bf16 (!%p163_p2), %v351_v5, %v349_v1  ;;  %v350_v8 = vld [vmem:[%s7079_s3 + $0x10] sm:$0xff] (!%p163_p2)  ;;  %v353_v10 = vld [vmem:[%s7079_s3 + $0x28] sm:$0xff] (!%p163_p2) }
   0x7   : > { %252 = vperm.xlu0 (!%p163_p2), %3821, %v249_v4   ;;  %v348_v7 = vld [vmem:[%s7079_s3] sm:$0xff] (!%p163_p2)  ;;  %v355_v11 = vld [vmem:[%s7079_s3 + $0x38] sm:$0xff] (!%p163_p2)  ;;  %v354_v14 = vld [vmem:[%s7079_s3 + $0x30] sm:$0xff] (!%p163_p2) }
   0x8   : > { %2777 = vmatprep.mubr.msk.bf16.mxu0 (!%p163_p2), %vm255_vm0, %v3871_v2  ;;  %v2781_v9 = vpack.c.bf16 (!%p163_p2), %v350_v8, %v348_v7  ;;  %2780 = vmatprep.subr.bf16.mxu1 (!%p163_p2), %v2779_v6  ;;  %v2783_v12 = vpack.c.bf16 (!%p163_p2), %v355_v11, %v353_v10  ;;  %v352_v13 = vld [vmem:[%s7079_s3 + $0x20] sm:$0xff] (!%p163_p2)  ;;  %v357_v35 = vld [vmem:[%s7079_s3 + $0x48] sm:$0xff] (!%p163_p2)  ;;  %v359_v36 = vld [vmem:[%s7079_s3 + $0x58] sm:$0xff] (!%p163_p2) }
   0x9   : > { %v2785_v26 = vpack.c.bf16 (!%p163_p2), %v354_v14, %v352_v13  ;;  %v2787_v37 = vpack.c.bf16 (!%p163_p2), %v359_v36, %v357_v35  ;;  %v356_v38 = vld [vmem:[%s7079_s3 + $0x40] sm:$0xff] (!%p163_p2)  ;;  %v358_v39 = vld [vmem:[%s7079_s3 + $0x50] sm:$0xff] (!%p163_p2)  ;;  %v361_v41 = vld [vmem:[%s7079_s3 + $0x68] sm:$0xff] (!%p163_p2) }
   0xa   : > { %2782 = vmatpush1.bf16.xpose.msra.mxu1 (!%p163_p2), %v2781_v9  ;;  %v2789_v40 = vpack.c.bf16 (!%p163_p2), %v358_v39, %v356_v38  ;;  %v363_v43 = vld [vmem:[%s7079_s3 + $0x78] sm:$0xff] (!%p163_p2)  ;;  %v360_v47 = vld [vmem:[%s7079_s3 + $0x60] sm:$0xff] (!%p163_p2)  ;;  %v362_v48 = vld [vmem:[%s7079_s3 + $0x70] sm:$0xff] (!%p163_p2) }
   0xb   : > { %2784 = vmatprep.subr.bf16.mxu1 (!%p163_p2), %v2783_v12  ;;  %v2791_v46 = vpack.c.bf16 (!%p163_p2), %v363_v43, %v361_v41  ;;  %v365_v49 = vld [vmem:[%s7079_s3 + $0x88] sm:$0xff] (!%p163_p2)  ;;  %v367_v50 = vld [vmem:[%s7079_s3 + $0x98] sm:$0xff] (!%p163_p2)  ;;  %v2793_v55 = vpack.c.bf16 (!%p163_p2), %v362_v48, %v360_v47  ;;  %v364_v60 = vld [vmem:[%s7079_s3 + $0x80] sm:$0xff] (!%p163_p2) }
   0xc   : > { %v2795_v56 = vpack.c.bf16 (!%p163_p2), %v367_v50, %v365_v49  ;;  %v366_v61 = vld [vmem:[%s7079_s3 + $0x90] sm:$0xff] (!%p163_p2)  ;;  %v369_v62 = vld [vmem:[%s7079_s3 + $0xa8] sm:$0xff] (!%p163_p2)  ;;  %v371_v63 = vld [vmem:[%s7079_s3 + $0xb8] sm:$0xff] (!%p163_p2) }
   0xd   : > { %s7082_s16 = smov (!%p188_p3, %s2747_s16), 1  ;;  %v2797_v5 = vpack.c.bf16 %v366_v61, %v364_v60  ;;  %v2799_v6 = vpack.c.bf16 %v371_v63, %v369_v62  ;;  %v368_v10 = vld [vmem:[%s7079_s3 + $0xa0] sm:$0xff]  ;;  %v370_v11 = vld [vmem:[%s7079_s3 + $0xb0] sm:$0xff]  ;;  %v373_v12 = vld [vmem:[%s7079_s3 + $0xc8] sm:$0xff] }
   0xe   : > { %s2759_s5 = sshll.u32 %s7082_s16, 8  ;;  %v375_v13 = vld [vmem:[%s7079_s3 + $0xd8] sm:$0xff]  ;;  %v376_v36 = vld [vmem:[%s7079_s3 + $0xe0] sm:$0xff]  ;;  %v381_v38 = vld [vmem:[%s7079_s3 + $0x108] sm:$0xff]  ;;  %s2760_s19 = sshll.u32 %s7082_s16, 6 }
   0xf   : > { %s3899_s10 = scalar_lea.vmem %s7076_s0, %s2759_s5  ;;  %v383_v39 = vld [vmem:[%s7079_s3 + $0x118] sm:$0xff]  ;;  %v413_v47 = vld [vmem:[%s7079_s3 + $0x208] sm:$0xff]  ;;  %v380_v49 = vld [vmem:[%s7079_s3 + $0x100] sm:$0xff]  ;;  %s5023_s22 = scalar_lea.vmem %s7080_s4, %s2760_s19 }
  0x10   : > { %v215_v15 = vld [vmem:[%s3899_s10 + $0x80] sm:$0xff]  ;;  %v216_v16 = vld [vmem:[%s3899_s10 + $0x88] sm:$0xff]  ;;  %v217_v20 = vld [vmem:[%s3899_s10 + $0x90] sm:$0xff] }
  0x11   : > { %v199_v17 = vld [vmem:[%s3899_s10] sm:$0xff]  ;;  %v239_v18 = vpack.c.bf16 %v216_v16, %v215_v15  ;;  %v200_v19 = vld [vmem:[%s3899_s10 + $0x8] sm:$0xff]  ;;  %v218_v21 = vld [vmem:[%s3899_s10 + $0x98] sm:$0xff] }
  0x12   : > { %v231_v22 = vpack.c.bf16 %v200_v19, %v199_v17  ;;  %v240_v23 = vpack.c.bf16 %v218_v21, %v217_v20  ;;  %v201_v24 = vld [vmem:[%s3899_s10 + $0x10] sm:$0xff]  ;;  %v202_v25 = vld [vmem:[%s3899_s10 + $0x18] sm:$0xff]  ;;  %v219_v29 = vld [vmem:[%s3899_s10 + $0xa0] sm:$0xff]  ;;  %2786 = vmatpush1.bf16.xpose.msra.mxu1 %v2785_v26  ;;  %v2803_v19 = vpack.c.bf16 %v375_v13, %v373_v12 }
  0x13   : > { %3803 = vmatprep.subr.msk.bf16.mxu0 %vm255_vm0, %v239_v18  ;;  %v232_v28 = vpack.c.bf16 %v202_v25, %v201_v24  ;;  %v220_v30 = vld [vmem:[%s3899_s10 + $0xa8] sm:$0xff]  ;;  %v203_v33 = vld [vmem:[%s3899_s10 + $0x20] sm:$0xff]  ;;  %2788 = vmatprep.subr.bf16.mxu1 %v2787_v37  ;;  %v221_v44 = vld [vmem:[%s3899_s10 + $0xb0] sm:$0xff]  ;;  %v2801_v18 = vpack.c.bf16 %v370_v11, %v368_v10 }
  0x14   : > { %v260_v27 = vsel %vm255_vm0, %v231_v22, 0  ;;  %v241_v32 = vpack.c.bf16 %v220_v30, %v219_v29  ;;  %v204_v34 = vld [vmem:[%s3899_s10 + $0x28] sm:$0xff]  ;;  %v222_v45 = vld [vmem:[%s3899_s10 + $0xb8] sm:$0xff]  ;;  %v205_v53 = vld [vmem:[%s3899_s10 + $0x30] sm:$0xff] }
  0x15   : > { %2762 = vmatpush3.bf16.xpose.msra.mxu0 %v260_v27  ;;  %v263_v31 = vsel %vm255_vm0, %v232_v28, 0  ;;  %v233_v42 = vpack.c.bf16 %v204_v34, %v203_v33  ;;  %v242_v52 = vpack.c.bf16 %v222_v45, %v221_v44  ;;  %v206_v54 = vld [vmem:[%s3899_s10 + $0x38] sm:$0xff]  ;;  %v223_v58 = vld [vmem:[%s3899_s10 + $0xc0] sm:$0xff]  ;;  %v224_v59 = vld [vmem:[%s3899_s10 + $0xc8] sm:$0xff]  ;;  %v2811_v45 = vpack.c.bf16 %v383_v39, %v381_v38 }
  0x16   : > { %3804 = vmatprep.subr.msk.bf16.mxu0 %vm255_vm0, %v240_v23  ;;  %v234_v57 = vpack.c.bf16 %v206_v54, %v205_v53  ;;  %v243_v1 = vpack.c.bf16 %v224_v59, %v223_v58  ;;  %v207_v3 = vld [vmem:[%s3899_s10 + $0x40] sm:$0xff]  ;;  %v208_v4 = vld [vmem:[%s3899_s10 + $0x48] sm:$0xff]  ;;  %v225_v8 = vld [vmem:[%s3899_s10 + $0xd0] sm:$0xff] }
  0x17   : > { %v266_v51 = vsel %vm255_vm0, %v233_v42, 0  ;;  %v235_v7 = vpack.c.bf16 %v208_v4, %v207_v3  ;;  %v226_v9 = vld [vmem:[%s3899_s10 + $0xd8] sm:$0xff]  ;;  %v209_v16 = vld [vmem:[%s3899_s10 + $0x50] sm:$0xff]  ;;  %v227_v21 = vld [vmem:[%s3899_s10 + $0xe0] sm:$0xff] }
  0x18   : > { %v269_v0 = vsel %vm255_vm0, %v234_v57, 0  ;;  %v244_v15 = vpack.c.bf16 %v226_v9, %v225_v8  ;;  %v210_v17 = vld [vmem:[%s3899_s10 + $0x58] sm:$0xff]  ;;  %v228_v22 = vld [vmem:[%s3899_s10 + $0xe8] sm:$0xff]  ;;  %v372_v23 = vld [vmem:[%s7079_s3 + $0xc0] sm:$0xff] }
  0x19   : > { %v272_v14 = vsel %vm255_vm0, %v235_v7, 0  ;;  %v236_v20 = vpack.c.bf16 %v210_v17, %v209_v16  ;;  %v374_v24 = vld [vmem:[%s7079_s3 + $0xd0] sm:$0xff]  ;;  %v377_v25 = vld [vmem:[%s7079_s3 + $0xe8] sm:$0xff]  ;;  %v379_v26 = vld [vmem:[%s7079_s3 + $0xf8] sm:$0xff]  ;;  %v245_v28 = vpack.c.bf16 %v228_v22, %v227_v21 }
  0x1a   : > { %2790 = vmatpush1.bf16.xpose.msra.mxu1 %v2789_v40  ;;  %v211_v29 = vld [vmem:[%s3899_s10 + $0x60] sm:$0xff]  ;;  %v212_v30 = vld [vmem:[%s3899_s10 + $0x68] sm:$0xff]  ;;  %v229_v34 = vld [vmem:[%s3899_s10 + $0xf0] sm:$0xff] }
  0x1b   : > { %2792 = vmatprep.subr.bf16.mxu1 %v2791_v46  ;;  %v275_v27 = vsel %vm255_vm0, %v236_v20, 0  ;;  %v237_v33 = vpack.c.bf16 %v212_v30, %v211_v29  ;;  %v230_v35 = vld [vmem:[%s3899_s10 + $0xf8] sm:$0xff]  ;;  %v378_v37 = vld [vmem:[%s7079_s3 + $0xf0] sm:$0xff]  ;;  %v412_v57 = vld [vmem:[%s7079_s3 + $0x200] sm:$0xff] }
  0x1c   : > { %v246_v41 = vpack.c.bf16 %v230_v35, %v229_v34  ;;  %v213_v42 = vld [vmem:[%s3899_s10 + $0x70] sm:$0xff]  ;;  %v214_v43 = vld [vmem:[%s3899_s10 + $0x78] sm:$0xff]  ;;  %v2809_v44 = vpack.c.bf16 %v378_v37, %v376_v36  ;;  %v417_v59 = vld [vmem:[%s7079_s3 + $0x228] sm:$0xff] }
  0x1d   : > { %2764 = vmatpush3.bf16.xpose.msra.mxu0 %v263_v31  ;;  %v2805_v31 = vpack.c.bf16 %v374_v24, %v372_v23  ;;  %v278_v40 = vsel %vm255_vm0, %v237_v33, 0  ;;  %v238_v46 = vpack.c.bf16 %v214_v43, %v213_v42  ;;  %v415_v48 = vld [vmem:[%s7079_s3 + $0x218] sm:$0xff]  ;;  %v382_v50 = vld [vmem:[%s7079_s3 + $0x110] sm:$0xff]  ;;  %v384_v61 = vld [vmem:[%s7079_s3 + $0x120] sm:$0xff] }
  0x1e   : > { %3805 = vmatprep.subr.msk.bf16.mxu0 %vm255_vm0, %v241_v32  ;;  %v2807_v32 = vpack.c.bf16 %v379_v26, %v377_v25  ;;  %v2843_v54 = vpack.c.bf16 %v415_v48, %v413_v47  ;;  %v414_v58 = vld [vmem:[%s7079_s3 + $0x210] sm:$0xff]  ;;  %v419_v60 = vld [vmem:[%s7079_s3 + $0x238] sm:$0xff]  ;;  %v421_v8 = vld [vmem:[%s7079_s3 + $0x248] sm:$0xff] }
  0x1f   : > { %v281_v53 = vsel %vm255_vm0, %v238_v46, 0  ;;  %v386_v62 = vld [vmem:[%s7079_s3 + $0x130] sm:$0xff]  ;;  %v2845_v63 = vpack.c.bf16 %v414_v58, %v412_v57  ;;  %v2847_v3 = vpack.c.bf16 %v419_v60, %v417_v59  ;;  %v423_v9 = vld [vmem:[%s7079_s3 + $0x258] sm:$0xff]  ;;  %v393_v12 = vld [vmem:[%s7079_s3 + $0x168] sm:$0xff] }
  0x20   : > { %v2817_v4 = vpack.c.bf16 %v386_v62, %v384_v61  ;;  %v418_v7 = vld [vmem:[%s7079_s3 + $0x230] sm:$0xff]  ;;  %v395_v13 = vld [vmem:[%s7079_s3 + $0x178] sm:$0xff]  ;;  %v420_v17 = vld [vmem:[%s7079_s3 + $0x240] sm:$0xff] }
  0x21   : > { %v390_v10 = vld [vmem:[%s7079_s3 + $0x150] sm:$0xff]  ;;  %v2823_v16 = vpack.c.bf16 %v395_v13, %v393_v12  ;;  %v427_v20 = vld [vmem:[%s7079_s3 + $0x278] sm:$0xff]  ;;  %v392_v21 = vld [vmem:[%s7079_s3 + $0x160] sm:$0xff] }
  0x22   : > { %2794 = vmatpush1.bf16.xpose.msra.mxu1 %v2793_v55  ;;  %v2813_v55 = vpack.c.bf16 %v382_v50, %v380_v49  ;;  %v394_v22 = vld [vmem:[%s7079_s3 + $0x170] sm:$0xff]  ;;  %v397_v24 = vld [vmem:[%s7079_s3 + $0x188] sm:$0xff]  ;;  %v399_v25 = vld [vmem:[%s7079_s3 + $0x198] sm:$0xff] }
  0x23   : > { %2796 = vmatprep.subr.bf16.mxu1 %v2795_v56  ;;  %v424_v29 = vld [vmem:[%s7079_s3 + $0x260] sm:$0xff]  ;;  %v426_v30 = vld [vmem:[%s7079_s3 + $0x270] sm:$0xff]  ;;  %v401_v36 = vld [vmem:[%s7079_s3 + $0x1a8] sm:$0xff] }
  0x24   : > { %v396_v33 = vld [vmem:[%s7079_s3 + $0x180] sm:$0xff]  ;;  %v398_v34 = vld [vmem:[%s7079_s3 + $0x190] sm:$0xff]  ;;  %v2857_v35 = vpack.c.bf16 %v426_v30, %v424_v29  ;;  %v403_v37 = vld [vmem:[%s7079_s3 + $0x1b8] sm:$0xff] }
  0x25   : > { %2766 = vmatpush3.bf16.xpose.msra.mxu0 %v266_v51  ;;  %v385_v51 = vld [vmem:[%s7079_s3 + $0x128] sm:$0xff]  ;;  %v2829_v39 = vpack.c.bf16 %v398_v34, %v396_v33  ;;  %v430_v42 = vld [vmem:[%s7079_s3 + $0x290] sm:$0xff]  ;;  %v407_v49 = vld [vmem:[%s7079_s3 + $0x1d8] sm:$0xff] }
  0x26   : > { %3806 = vmatprep.subr.msk.bf16.mxu0 %vm255_vm0, %v242_v52  ;;  %v387_v52 = vld [vmem:[%s7079_s3 + $0x138] sm:$0xff]  ;;  %v433_v43 = vld [vmem:[%s7079_s3 + $0x2a8] sm:$0xff]  ;;  %v402_v46 = vld [vmem:[%s7079_s3 + $0x1b0] sm:$0xff] }
  0x27   : > { %v2815_v56 = vpack.c.bf16 %v387_v52, %v385_v51  ;;  %v405_v48 = vld [vmem:[%s7079_s3 + $0x1c8] sm:$0xff]  ;;  %v404_v57 = vld [vmem:[%s7079_s3 + $0x1c0] sm:$0xff]  ;;  %v406_v58 = vld [vmem:[%s7079_s3 + $0x1d0] sm:$0xff] }
  0x28   : > { %v2835_v52 = vpack.c.bf16 %v407_v49, %v405_v48  ;;  %v409_v60 = vld [vmem:[%s7079_s3 + $0x1e8] sm:$0xff]  ;;  %v411_v61 = vld [vmem:[%s7079_s3 + $0x1f8] sm:$0xff]  ;;  %v454_v29 = vld [vmem:[%s7079_s3 + $0x350] sm:$0xff] }
  0x29   : > { %v445_v12 = vld [vmem:[%s7079_s3 + $0x308] sm:$0xff]  ;;  %v447_v13 = vld [vmem:[%s7079_s3 + $0x318] sm:$0xff]  ;;  %v456_v34 = vld [vmem:[%s7079_s3 + $0x360] sm:$0xff] }
  0x2a   : > { %2798 = vmatpush1.bf16.xpose.msra.mxu1 %v2797_v5  ;;  %v457_v30 = vld [vmem:[%s7079_s3 + $0x368] sm:$0xff]  ;;  %v464_v49 = vld [vmem:[%s7079_s3 + $0x3a0] sm:$0xff] }
  0x2b   : > { %2800 = vmatprep.subr.bf16.mxu1 %v2799_v6  ;;  %v416_v6 = vld [vmem:[%s7079_s3 + $0x220] sm:$0xff] }
  0x2c   : > { %v2849_v11 = vpack.c.bf16 %v418_v7, %v416_v6  ;;  %v408_v6 = vld [vmem:[%s7079_s3 + $0x1e0] sm:$0xff]  ;;  %v410_v7 = vld [vmem:[%s7079_s3 + $0x1f0] sm:$0xff] }
  0x2d   : > { %2768 = vmatpush3.bf16.xpose.msra.mxu0 %v269_v0  ;;  %v389_v0 = vld [vmem:[%s7079_s3 + $0x148] sm:$0xff] }
  0x2e   : > { %3807 = vmatprep.subr.msk.bf16.mxu0 %vm255_vm0, %v243_v1  ;;  %v391_v1 = vld [vmem:[%s7079_s3 + $0x158] sm:$0xff] }
  0x2f   : > { %v2819_v5 = vpack.c.bf16 %v391_v1, %v389_v0  ;;  %v2839_v0 = vpack.c.bf16 %v411_v61, %v409_v60  ;;  %v436_v1 = vld [vmem:[%s7079_s3 + $0x2c0] sm:$0xff] }
  0x30   : > { %v472_v61 = vld [vmem:[%s7079_s3 + $0x3e0] sm:$0xff] }
  0x32   : > { %2802 = vmatpush1.bf16.xpose.msra.mxu1 %v2801_v18  ;;  %v422_v18 = vld [vmem:[%s7079_s3 + $0x250] sm:$0xff] }
  0x33   : > { %2804 = vmatprep.subr.bf16.mxu1 %v2803_v19  ;;  %v425_v19 = vld [vmem:[%s7079_s3 + $0x268] sm:$0xff]  ;;  %v2853_v23 = vpack.c.bf16 %v422_v18, %v420_v17  ;;  %v446_v17 = vld [vmem:[%s7079_s3 + $0x310] sm:$0xff] }
  0x34   : > { %v2855_v26 = vpack.c.bf16 %v427_v20, %v425_v19  ;;  %v449_v18 = vld [vmem:[%s7079_s3 + $0x328] sm:$0xff]  ;;  %v451_v19 = vld [vmem:[%s7079_s3 + $0x338] sm:$0xff] }
  0x35   : > { %2770 = vmatpush3.bf16.xpose.msra.mxu0 %v272_v14  ;;  %v2851_v14 = vpack.c.bf16 %v423_v9, %v421_v8 }
  0x36   : > { %3808 = vmatprep.subr.msk.bf16.mxu0 %vm255_vm0, %v244_v15 }
  0x3a   : > { %2806 = vmatpush1.bf16.xpose.msra.mxu1 %v2805_v31  ;;  %v429_v31 = vld [vmem:[%s7079_s3 + $0x288] sm:$0xff] }
  0x3b   : > { %2808 = vmatprep.subr.bf16.mxu1 %v2807_v32  ;;  %v431_v32 = vld [vmem:[%s7079_s3 + $0x298] sm:$0xff] }
  0x3c   : > { %v2859_v38 = vpack.c.bf16 %v431_v32, %v429_v31  ;;  %v459_v31 = vld [vmem:[%s7079_s3 + $0x378] sm:$0xff] }
  0x3d   : > { %2772 = vmatpush3.bf16.xpose.msra.mxu0 %v275_v27  ;;  %v2825_v27 = vpack.c.bf16 %v394_v22, %v392_v21  ;;  %v2879_v21 = vpack.c.bf16 %v451_v19, %v449_v18  ;;  %v448_v22 = vld [vmem:[%s7079_s3 + $0x320] sm:$0xff]  ;;  %v2887_v33 = vpack.c.bf16 %v459_v31, %v457_v30 }
  0x3e   : > { %3809 = vmatprep.subr.msk.bf16.mxu0 %vm255_vm0, %v245_v28  ;;  %v2827_v28 = vpack.c.bf16 %v399_v25, %v397_v24  ;;  %v453_v24 = vld [vmem:[%s7079_s3 + $0x348] sm:$0xff]  ;;  %v455_v25 = vld [vmem:[%s7079_s3 + $0x358] sm:$0xff] }
  0x42   : > { %2810 = vmatpush1.bf16.xpose.msra.mxu1 %v2809_v44  ;;  %v435_v44 = vld [vmem:[%s7079_s3 + $0x2b8] sm:$0xff] }
  0x43   : > { %2812 = vmatprep.subr.bf16.mxu1 %v2811_v45  ;;  %v400_v45 = vld [vmem:[%s7079_s3 + $0x1a0] sm:$0xff]  ;;  %v2863_v50 = vpack.c.bf16 %v435_v44, %v433_v43  ;;  %v462_v44 = vld [vmem:[%s7079_s3 + $0x390] sm:$0xff] }
  0x44   : > { %v2833_v51 = vpack.c.bf16 %v402_v46, %v400_v45  ;;  %v460_v43 = vld [vmem:[%s7079_s3 + $0x380] sm:$0xff]  ;;  %v465_v45 = vld [vmem:[%s7079_s3 + $0x3a8] sm:$0xff]  ;;  %v467_v46 = vld [vmem:[%s7079_s3 + $0x3b8] sm:$0xff] }
  0x45   : > { %2774 = vmatpush3.bf16.xpose.msra.mxu0 %v278_v40  ;;  %v2831_v40 = vpack.c.bf16 %v403_v37, %v401_v36  ;;  %v461_v36 = vld [vmem:[%s7079_s3 + $0x388] sm:$0xff]  ;;  %v463_v37 = vld [vmem:[%s7079_s3 + $0x398] sm:$0xff]  ;;  %v2895_v48 = vpack.c.bf16 %v467_v46, %v465_v45  ;;  %v488_v46 = vld [vmem:[%s7079_s3 + $0x460] sm:$0xff] }
  0x46   : > { %3810 = vmatprep.subr.msk.bf16.mxu0 %vm255_vm0, %v246_v41  ;;  %v428_v41 = vld [vmem:[%s7079_s3 + $0x280] sm:$0xff] }
  0x47   : > { %v2861_v47 = vpack.c.bf16 %v430_v42, %v428_v41  ;;  %v2891_v42 = vpack.c.bf16 %v463_v37, %v461_v36  ;;  %v548_v36 = vld [vmem:[%s7079_s3 + $0x640] sm:$0xff]  ;;  %v550_v37 = vld [vmem:[%s7079_s3 + $0x650] sm:$0xff] }
  0x4a   : > { %2814 = vmatpush1.bf16.xpose.msra.mxu1 %v2813_v55  ;;  %v437_v55 = vld [vmem:[%s7079_s3 + $0x2c8] sm:$0xff] }
  0x4b   : > { %2816 = vmatprep.subr.bf16.mxu1 %v2815_v56  ;;  %v439_v56 = vld [vmem:[%s7079_s3 + $0x2d8] sm:$0xff] }
  0x4c   : > { %v2867_v62 = vpack.c.bf16 %v439_v56, %v437_v55  ;;  %v468_v55 = vld [vmem:[%s7079_s3 + $0x3c0] sm:$0xff]  ;;  %v470_v56 = vld [vmem:[%s7079_s3 + $0x3d0] sm:$0xff] }
  0x4d   : > { %2776 = vmatpush3.bf16.xpose.msra.mxu0 %v281_v53  ;;  %v432_v53 = vld [vmem:[%s7079_s3 + $0x2a0] sm:$0xff] }
  0x4e   : > { %2844 = vmatprep.subr.bf16.mxu0 %v2843_v54  ;;  %v434_v54 = vld [vmem:[%s7079_s3 + $0x2b0] sm:$0xff] }
  0x4f   : > { %v2865_v59 = vpack.c.bf16 %v434_v54, %v432_v53 }
  0x52   : > { %2818 = vmatpush1.bf16.xpose.msra.mxu1 %v2817_v4  ;;  %v441_v4 = vld [vmem:[%s7079_s3 + $0x2e8] sm:$0xff] }
  0x53   : > { %2820 = vmatprep.subr.bf16.mxu1 %v2819_v5  ;;  %v443_v5 = vld [vmem:[%s7079_s3 + $0x2f8] sm:$0xff] }
  0x54   : > { %2778 = vmatmul.mubr.msk.bf16.vlgmr.msra.gmra.mrb[0].mxu0 %vm255_vm0, %v3871_v2  ;;  %v388_v2 = vld [vmem:[%s7079_s3 + $0x140] sm:$0xff]  ;;  %v2871_v9 = vpack.c.bf16 %v443_v5, %v441_v4 }
  0x55   : > { %2846 = vmatpush1.bf16.xpose.msra.mxu0 %v2845_v63  ;;  %v2821_v15 = vpack.c.bf16 %v390_v10, %v388_v2  ;;  %v2837_v63 = vpack.c.bf16 %v406_v58, %v404_v57  ;;  %v2841_v2 = vpack.c.bf16 %v410_v7, %v408_v6  ;;  %v440_v10 = vld [vmem:[%s7079_s3 + $0x2e0] sm:$0xff]  ;;  %v473_v57 = vld [vmem:[%s7079_s3 + $0x3e8] sm:$0xff]  ;;  %v475_v58 = vld [vmem:[%s7079_s3 + $0x3f8] sm:$0xff] }
  0x56   : > { %2848 = vmatprep.subr.bf16.mxu0 %v2847_v3  ;;  %v438_v3 = vld [vmem:[%s7079_s3 + $0x2d0] sm:$0xff]  ;;  %v2903_v60 = vpack.c.bf16 %v475_v58, %v473_v57  ;;  %v476_v4 = vld [vmem:[%s7079_s3 + $0x400] sm:$0xff] }
  0x57   : > { %v2869_v8 = vpack.c.bf16 %v438_v3, %v436_v1  ;;  %v478_v6 = vld [vmem:[%s7079_s3 + $0x410] sm:$0xff]  ;;  %v540_v7 = vld [vmem:[%s7079_s3 + $0x600] sm:$0xff] }
  0x58   : > { %v492_v58 = vld [vmem:[%s7079_s3 + $0x480] sm:$0xff] }
  0x5a   : > { %2822 = vmatpush1.bf16.xpose.msra.mxu1 %v2821_v15  ;;  %v2875_v15 = vpack.c.bf16 %v447_v13, %v445_v12  ;;  %v545_v12 = vld [vmem:[%s7079_s3 + $0x628] sm:$0xff]  ;;  %v547_v13 = vld [vmem:[%s7079_s3 + $0x638] sm:$0xff] }
  0x5b   : > { %2824 = vmatprep.subr.bf16.mxu1 %v2823_v16  ;;  %v444_v16 = vld [vmem:[%s7079_s3 + $0x300] sm:$0xff] }
  0x5c   : > { %v2877_v20 = vpack.c.bf16 %v446_v17, %v444_v16  ;;  %v2909_v16 = vpack.c.bf16 %v478_v6, %v476_v4 }
  0x5d   : > { %2850 = vmatpush1.bf16.xpose.msra.mxu0 %v2849_v11  ;;  %v442_v11 = vld [vmem:[%s7079_s3 + $0x2f0] sm:$0xff] }
  0x5e   : > { %2852 = vmatprep.subr.bf16.mxu0 %v2851_v14  ;;  %v2873_v14 = vpack.c.bf16 %v442_v11, %v440_v10  ;;  %v483_v11 = vld [vmem:[%s7079_s3 + $0x438] sm:$0xff] }
  0x62   : > { %2826 = vmatpush1.bf16.xpose.msra.mxu1 %v2825_v27  ;;  %v2883_v27 = vpack.c.bf16 %v455_v25, %v453_v24  ;;  %v544_v24 = vld [vmem:[%s7079_s3 + $0x620] sm:$0xff]  ;;  %v546_v25 = vld [vmem:[%s7079_s3 + $0x630] sm:$0xff] }
  0x63   : > { %2828 = vmatprep.subr.bf16.mxu1 %v2827_v28  ;;  %v452_v28 = vld [vmem:[%s7079_s3 + $0x340] sm:$0xff]  ;;  %v2977_v31 = vpack.c.bf16 %v546_v25, %v544_v24  ;;  %v505_v24 = vld [vmem:[%s7079_s3 + $0x4e8] sm:$0xff]  ;;  %v507_v25 = vld [vmem:[%s7079_s3 + $0x4f8] sm:$0xff] }
  0x64   : > { %v2885_v32 = vpack.c.bf16 %v454_v29, %v452_v28  ;;  %v549_v28 = vld [vmem:[%s7079_s3 + $0x648] sm:$0xff]  ;;  %v551_v29 = vld [vmem:[%s7079_s3 + $0x658] sm:$0xff] }
  0x65   : > { %2854 = vmatpush1.bf16.xpose.msra.mxu0 %v2853_v23  ;;  %v450_v23 = vld [vmem:[%s7079_s3 + $0x330] sm:$0xff] }
  0x66   : > { %2856 = vmatprep.subr.bf16.mxu0 %v2855_v26  ;;  %v2881_v26 = vpack.c.bf16 %v450_v23, %v448_v22  ;;  %v480_v22 = vld [vmem:[%s7079_s3 + $0x420] sm:$0xff]  ;;  %v482_v23 = vld [vmem:[%s7079_s3 + $0x430] sm:$0xff] }
  0x67   : > { %v2913_v30 = vpack.c.bf16 %v482_v23, %v480_v22  ;;  %v564_v22 = vld [vmem:[%s7079_s3 + $0x6c0] sm:$0xff]  ;;  %v566_v23 = vld [vmem:[%s7079_s3 + $0x6d0] sm:$0xff] }
  0x6a   : > { %2830 = vmatpush1.bf16.xpose.msra.mxu1 %v2829_v39  ;;  %v479_v39 = vld [vmem:[%s7079_s3 + $0x418] sm:$0xff] }
  0x6b   : > { %2832 = vmatprep.subr.bf16.mxu1 %v2831_v40 }
  0x6d   : > { %2858 = vmatpush1.bf16.xpose.msra.mxu0 %v2857_v35  ;;  %v458_v35 = vld [vmem:[%s7079_s3 + $0x370] sm:$0xff] }
  0x6e   : > { %2860 = vmatprep.subr.bf16.mxu0 %v2859_v38  ;;  %v477_v38 = vld [vmem:[%s7079_s3 + $0x408] sm:$0xff]  ;;  %v2889_v40 = vpack.c.bf16 %v458_v35, %v456_v34  ;;  %v484_v34 = vld [vmem:[%s7079_s3 + $0x440] sm:$0xff]  ;;  %v486_v35 = vld [vmem:[%s7079_s3 + $0x450] sm:$0xff] }
  0x6f   : > { %v2907_v41 = vpack.c.bf16 %v479_v39, %v477_v38  ;;  %v489_v38 = vld [vmem:[%s7079_s3 + $0x468] sm:$0xff]  ;;  %v491_v39 = vld [vmem:[%s7079_s3 + $0x478] sm:$0xff] }
  0x72   : > { %2834 = vmatpush1.bf16.xpose.msra.mxu1 %v2833_v51  ;;  %v469_v51 = vld [vmem:[%s7079_s3 + $0x3c8] sm:$0xff] }
  0x73   : > { %2836 = vmatprep.subr.bf16.mxu1 %v2835_v52  ;;  %v471_v52 = vld [vmem:[%s7079_s3 + $0x3d8] sm:$0xff] }
  0x74   : > { %v2899_v54 = vpack.c.bf16 %v471_v52, %v469_v51  ;;  %v495_v51 = vld [vmem:[%s7079_s3 + $0x498] sm:$0xff]  ;;  %v557_v52 = vld [vmem:[%s7079_s3 + $0x688] sm:$0xff] }
  0x75   : > { %2862 = vmatpush1.bf16.xpose.msra.mxu0 %v2861_v47  ;;  %v2893_v47 = vpack.c.bf16 %v462_v44, %v460_v43  ;;  %v2981_v43 = vpack.c.bf16 %v550_v37, %v548_v36  ;;  %v2919_v44 = vpack.c.bf16 %v491_v39, %v489_v38  ;;  %v509_v36 = vld [vmem:[%s7079_s3 + $0x508] sm:$0xff]  ;;  %v511_v37 = vld [vmem:[%s7079_s3 + $0x518] sm:$0xff] }
  0x76   : > { %2864 = vmatprep.subr.bf16.mxu0 %v2863_v50  ;;  %v466_v50 = vld [vmem:[%s7079_s3 + $0x3b0] sm:$0xff]  ;;  %v573_v38 = vld [vmem:[%s7079_s3 + $0x708] sm:$0xff]  ;;  %v575_v39 = vld [vmem:[%s7079_s3 + $0x718] sm:$0xff] }
  0x77   : > { %v2897_v53 = vpack.c.bf16 %v466_v50, %v464_v49  ;;  %v554_v49 = vld [vmem:[%s7079_s3 + $0x670] sm:$0xff]  ;;  %v493_v50 = vld [vmem:[%s7079_s3 + $0x488] sm:$0xff] }
  0x7a   : > { %2838 = vmatpush1.bf16.xpose.msra.mxu1 %v2837_v63  ;;  %v541_v63 = vld [vmem:[%s7079_s3 + $0x608] sm:$0xff] }
  0x7b   : > { %2840 = vmatprep.subr.bf16.mxu1 %v2839_v0  ;;  %v543_v0 = vld [vmem:[%s7079_s3 + $0x618] sm:$0xff] }
  0x7c   : > { %v2971_v3 = vpack.c.bf16 %v543_v0, %v541_v63  ;;  %v499_v63 = vld [vmem:[%s7079_s3 + $0x4b8] sm:$0xff]  ;;  %v561_v0 = vld [vmem:[%s7079_s3 + $0x6a8] sm:$0xff] }
  0x7d   : > { %2866 = vmatpush1.bf16.xpose.msra.mxu0 %v2865_v59  ;;  %v2901_v59 = vpack.c.bf16 %v470_v56, %v468_v55  ;;  %v2923_v56 = vpack.c.bf16 %v495_v51, %v493_v50  ;;  %v577_v50 = vld [vmem:[%s7079_s3 + $0x728] sm:$0xff]  ;;  %v579_v51 = vld [vmem:[%s7079_s3 + $0x738] sm:$0xff] }
  0x7e   : > { %2868 = vmatprep.subr.bf16.mxu0 %v2867_v62  ;;  %v474_v62 = vld [vmem:[%s7079_s3 + $0x3f0] sm:$0xff] }
  0x7f   : > { %v2905_v1 = vpack.c.bf16 %v474_v62, %v472_v61  ;;  %v558_v61 = vld [vmem:[%s7079_s3 + $0x690] sm:$0xff]  ;;  %v497_v62 = vld [vmem:[%s7079_s3 + $0x4a8] sm:$0xff] }
  0x82   : > { %2842 = vmatpush1.bf16.xpose.msra.mxu1 %v2841_v2  ;;  %v481_v2 = vld [vmem:[%s7079_s3 + $0x428] sm:$0xff] }
  0x83   : > { %2908 = vmatprep.subr.bf16.mxu1 %v2907_v41  ;;  %v555_v41 = vld [vmem:[%s7079_s3 + $0x678] sm:$0xff] }
  0x85   : > { %2870 = vmatpush1.bf16.xpose.msra.mxu0 %v2869_v8  ;;  %v542_v8 = vld [vmem:[%s7079_s3 + $0x610] sm:$0xff] }
  0x86   : > { %2872 = vmatprep.subr.bf16.mxu0 %v2871_v9  ;;  %v253_v5 = vpop.permute.xlu0 %252  ;;  %v2973_v17 = vpack.c.bf16 %v542_v8, %v540_v7  ;;  %v496_v7 = vld [vmem:[%s7079_s3 + $0x4a0] sm:$0xff]  ;;  %v498_v8 = vld [vmem:[%s7079_s3 + $0x4b0] sm:$0xff] }
  0x8d   : > { %2874 = vmatpush1.bf16.xpose.msra.mxu0 %v2873_v14 }
  0x8e   : > { %2876 = vmatprep.subr.bf16.mxu0 %v2875_v15 }
  0x95   : > { %2878 = vmatpush1.bf16.xpose.msra.mxu0 %v2877_v20  ;;  %v2911_v20 = vpack.c.bf16 %v483_v11, %v481_v2  ;;  %v562_v2 = vld [vmem:[%s7079_s3 + $0x6b0] sm:$0xff]  ;;  %v503_v11 = vld [vmem:[%s7079_s3 + $0x4d8] sm:$0xff] }
  0x96   : > { %2880 = vmatprep.subr.bf16.mxu0 %v2879_v21  ;;  %v2975_v21 = vpack.c.bf16 %v547_v13, %v545_v12  ;;  %v565_v12 = vld [vmem:[%s7079_s3 + $0x6c8] sm:$0xff]  ;;  %v567_v13 = vld [vmem:[%s7079_s3 + $0x6d8] sm:$0xff] }
  0x9d   : > { %2882 = vmatpush1.bf16.xpose.msra.mxu0 %v2881_v26  ;;  %v485_v26 = vld [vmem:[%s7079_s3 + $0x448] sm:$0xff] }
  0x9e   : > { %2884 = vmatprep.subr.bf16.mxu0 %v2883_v27  ;;  %v487_v27 = vld [vmem:[%s7079_s3 + $0x458] sm:$0xff] }
  0xa5   : > { %2886 = vmatpush1.bf16.xpose.msra.mxu0 %v2885_v32  ;;  %v2915_v32 = vpack.c.bf16 %v487_v27, %v485_v26  ;;  %v569_v26 = vld [vmem:[%s7079_s3 + $0x6e8] sm:$0xff]  ;;  %v571_v27 = vld [vmem:[%s7079_s3 + $0x6f8] sm:$0xff] }
  0xa6   : > { %2888 = vmatprep.subr.bf16.mxu0 %v2887_v33  ;;  %v2979_v33 = vpack.c.bf16 %v551_v29, %v549_v28  ;;  %v2997_v29 = vpack.c.bf16 %v566_v23, %v564_v22  ;;  %v525_v22 = vld [vmem:[%s7079_s3 + $0x588] sm:$0xff]  ;;  %v527_v23 = vld [vmem:[%s7079_s3 + $0x598] sm:$0xff] }
  0xad   : > { %2890 = vmatpush1.bf16.xpose.msra.mxu0 %v2889_v40  ;;  %v553_v40 = vld [vmem:[%s7079_s3 + $0x668] sm:$0xff] }
  0xae   : > { %2892 = vmatprep.subr.bf16.mxu0 %v2891_v42  ;;  %v2917_v42 = vpack.c.bf16 %v486_v35, %v484_v34  ;;  %v2983_v45 = vpack.c.bf16 %v555_v41, %v553_v40  ;;  %v568_v34 = vld [vmem:[%s7079_s3 + $0x6e0] sm:$0xff]  ;;  %v570_v35 = vld [vmem:[%s7079_s3 + $0x6f0] sm:$0xff] }
  0xaf   : > { %v3001_v41 = vpack.c.bf16 %v570_v35, %v568_v34  ;;  %v529_v34 = vld [vmem:[%s7079_s3 + $0x5a8] sm:$0xff]  ;;  %v531_v35 = vld [vmem:[%s7079_s3 + $0x5b8] sm:$0xff] }
  0xb5   : > { %2894 = vmatpush1.bf16.xpose.msra.mxu0 %v2893_v47  ;;  %v490_v47 = vld [vmem:[%s7079_s3 + $0x470] sm:$0xff] }
  0xb6   : > { %2896 = vmatprep.subr.bf16.mxu0 %v2895_v48  ;;  %v552_v48 = vld [vmem:[%s7079_s3 + $0x660] sm:$0xff] }
  0xb7   : > { %v2985_v55 = vpack.c.bf16 %v554_v49, %v552_v48  ;;  %v513_v48 = vld [vmem:[%s7079_s3 + $0x528] sm:$0xff]  ;;  %v515_v49 = vld [vmem:[%s7079_s3 + $0x538] sm:$0xff] }
  0xbd   : > { %2898 = vmatpush1.bf16.xpose.msra.mxu0 %v2897_v53  ;;  %v559_v53 = vld [vmem:[%s7079_s3 + $0x698] sm:$0xff] }
  0xbe   : > { %2900 = vmatprep.subr.bf16.mxu0 %v2899_v54  ;;  %v2921_v54 = vpack.c.bf16 %v490_v47, %v488_v46  ;;  %v2987_v57 = vpack.c.bf16 %v559_v53, %v557_v52  ;;  %v572_v46 = vld [vmem:[%s7079_s3 + $0x700] sm:$0xff]  ;;  %v574_v47 = vld [vmem:[%s7079_s3 + $0x710] sm:$0xff] }
  0xbf   : > { %v3005_v53 = vpack.c.bf16 %v574_v47, %v572_v46  ;;  %v533_v46 = vld [vmem:[%s7079_s3 + $0x5c8] sm:$0xff]  ;;  %v535_v47 = vld [vmem:[%s7079_s3 + $0x5d8] sm:$0xff] }
  0xc5   : > { %2902 = vmatpush1.bf16.xpose.msra.mxu0 %v2901_v59  ;;  %v494_v59 = vld [vmem:[%s7079_s3 + $0x490] sm:$0xff] }
  0xc6   : > { %2904 = vmatprep.subr.bf16.mxu0 %v2903_v60  ;;  %v556_v60 = vld [vmem:[%s7079_s3 + $0x680] sm:$0xff] }
  0xc7   : > { %v2989_v4 = vpack.c.bf16 %v558_v61, %v556_v60  ;;  %v517_v60 = vld [vmem:[%s7079_s3 + $0x548] sm:$0xff]  ;;  %v519_v61 = vld [vmem:[%s7079_s3 + $0x558] sm:$0xff] }
  0xcd   : > { %2906 = vmatpush1.bf16.xpose.msra.mxu0 %v2905_v1  ;;  %v563_v1 = vld [vmem:[%s7079_s3 + $0x6b8] sm:$0xff] }
  0xce   : > { %2972 = vmatprep.subr.bf16.mxu0 %v2971_v3  ;;  %v2925_v3 = vpack.c.bf16 %v494_v59, %v492_v58  ;;  %v2991_v6 = vpack.c.bf16 %v563_v1, %v561_v0  ;;  %v576_v58 = vld [vmem:[%s7079_s3 + $0x720] sm:$0xff]  ;;  %v578_v59 = vld [vmem:[%s7079_s3 + $0x730] sm:$0xff] }
  0xcf   : > { %v3009_v1 = vpack.c.bf16 %v578_v59, %v576_v58  ;;  %v537_v58 = vld [vmem:[%s7079_s3 + $0x5e8] sm:$0xff]  ;;  %v539_v59 = vld [vmem:[%s7079_s3 + $0x5f8] sm:$0xff] }
 0x127   : > { %v341_v9 = vpop.f32.mrb[0].mxu0 }
 0x128   : > { %v343_v10 = vpop.f32.mrb[1].mxu0  ;;  %v4355_v18 = vadd.f32 %v341_v9, %v253_v5  ;;  %v560_v9 = vld [vmem:[%s7079_s3 + $0x6a0] sm:$0xff] }
 0x129   : > { %v4353_v14 = vadd.f32 %v343_v10, %v253_v5  ;;  %v345_v15 = vpop.f32.mrb[2].mxu0  ;;  %v2927_v5 = vpack.c.bf16 %v499_v63, %v497_v62  ;;  %v501_v10 = vld [vmem:[%s7079_s3 + $0x4c8] sm:$0xff]  ;;  %v583_v63 = vld [vmem:[%s7079_s3 + $0x758] sm:$0xff] }
 0x12a   : > { %v346_v19 = vpop.f32.mrb[3].mxu0  ;;  %v2929_v15 = vpack.c.bf16 %v498_v8, %v496_v7  ;;  %v581_v62 = vld [vmem:[%s7079_s3 + $0x748] sm:$0xff]  ;;  %v580_v7 = vld [vmem:[%s7079_s3 + $0x740] sm:$0xff]  ;;  %v582_v8 = vld [vmem:[%s7079_s3 + $0x750] sm:$0xff] }
 0x12b   : > { %1436 = vmatprep.mubr.f32.mxu1 %v4353_v14  ;;  %1507 = vmatprep.mubr.f32.mxu0 %v4353_v14  ;;  %v2995_v19 = vpack.c.bf16 %v567_v13, %v565_v12  ;;  %v3013_v13 = vpack.c.bf16 %v582_v8, %v580_v7  ;;  %v605_v7 = vld [vmem:[%s7079_s3 + $0x808] sm:$0xff]  ;;  %v607_v8 = vld [vmem:[%s7079_s3 + $0x818] sm:$0xff] }
 0x12c   : > { %1437 = vmatmul.mubr.f32.vlgmr.msra.gmra.mrb[0].mxu1 %v4355_v18  ;;  %1508 = vmatmul.mubr.f32.vlgmr.msra.gmra.mrb[4].mxu0 %v4355_v18 }
 0x12d   : > { %2910 = vmatpush1.bf16.xpose.msra.mxu1 %v2909_v16  ;;  %2974 = vmatpush1.bf16.xpose.msra.mxu0 %v2973_v17  ;;  %v2993_v16 = vpack.c.bf16 %v562_v2, %v560_v9  ;;  %v2931_v17 = vpack.c.bf16 %v503_v11, %v501_v10  ;;  %v521_v9 = vld [vmem:[%s7079_s3 + $0x568] sm:$0xff]  ;;  %v523_v2 = vld [vmem:[%s7079_s3 + $0x578] sm:$0xff] }
 0x12e   : > { %1578 = vmatprep.mubr.f32.mxu1 %v4353_v14  ;;  %1649 = vmatprep.mubr.f32.mxu0 %v4353_v14  ;;  %v585_v10 = vld [vmem:[%s7079_s3 + $0x768] sm:$0xff]  ;;  %v587_v11 = vld [vmem:[%s7079_s3 + $0x778] sm:$0xff] }
 0x12f   : > { %2912 = vmatprep.subr.bf16.mxu1 %v2911_v20  ;;  %2976 = vmatprep.subr.bf16.mxu0 %v2975_v21  ;;  %v500_v20 = vld [vmem:[%s7079_s3 + $0x4c0] sm:$0xff]  ;;  %v502_v21 = vld [vmem:[%s7079_s3 + $0x4d0] sm:$0xff] }
 0x130   : > { %v2933_v28 = vpack.c.bf16 %v502_v21, %v500_v20  ;;  %v584_v20 = vld [vmem:[%s7079_s3 + $0x760] sm:$0xff]  ;;  %v586_v21 = vld [vmem:[%s7079_s3 + $0x770] sm:$0xff] }
 0x135   : > { %2914 = vmatpush1.bf16.xpose.msra.mxu1 %v2913_v30  ;;  %2978 = vmatpush1.bf16.xpose.msra.mxu0 %v2977_v31  ;;  %v2935_v30 = vpack.c.bf16 %v507_v25, %v505_v24  ;;  %v2999_v31 = vpack.c.bf16 %v571_v27, %v569_v26  ;;  %v589_v24 = vld [vmem:[%s7079_s3 + $0x788] sm:$0xff]  ;;  %v591_v25 = vld [vmem:[%s7079_s3 + $0x798] sm:$0xff]  ;;  %v3017_v27 = vpack.c.bf16 %v586_v21, %v584_v20 }
 0x136   : > { %2916 = vmatprep.subr.bf16.mxu1 %v2915_v32  ;;  %2980 = vmatprep.subr.bf16.mxu0 %v2979_v33  ;;  %v504_v32 = vld [vmem:[%s7079_s3 + $0x4e0] sm:$0xff]  ;;  %v506_v33 = vld [vmem:[%s7079_s3 + $0x4f0] sm:$0xff]  ;;  %v609_v20 = vld [vmem:[%s7079_s3 + $0x828] sm:$0xff] }
 0x137   : > { %v2937_v40 = vpack.c.bf16 %v506_v33, %v504_v32  ;;  %v588_v32 = vld [vmem:[%s7079_s3 + $0x780] sm:$0xff]  ;;  %v590_v33 = vld [vmem:[%s7079_s3 + $0x790] sm:$0xff]  ;;  %v611_v21 = vld [vmem:[%s7079_s3 + $0x838] sm:$0xff] }
 0x13d   : > { %2918 = vmatpush1.bf16.xpose.msra.mxu1 %v2917_v42  ;;  %2982 = vmatpush1.bf16.xpose.msra.mxu0 %v2981_v43  ;;  %v2939_v42 = vpack.c.bf16 %v511_v37, %v509_v36  ;;  %v3003_v43 = vpack.c.bf16 %v575_v39, %v573_v38  ;;  %v593_v36 = vld [vmem:[%s7079_s3 + $0x7a8] sm:$0xff]  ;;  %v595_v37 = vld [vmem:[%s7079_s3 + $0x7b8] sm:$0xff]  ;;  %v3021_v39 = vpack.c.bf16 %v590_v33, %v588_v32 }
 0x13e   : > { %2920 = vmatprep.subr.bf16.mxu1 %v2919_v44  ;;  %2984 = vmatprep.subr.bf16.mxu0 %v2983_v45  ;;  %v508_v44 = vld [vmem:[%s7079_s3 + $0x500] sm:$0xff]  ;;  %v510_v45 = vld [vmem:[%s7079_s3 + $0x510] sm:$0xff]  ;;  %v613_v32 = vld [vmem:[%s7079_s3 + $0x848] sm:$0xff] }
 0x13f   : > { %v2941_v52 = vpack.c.bf16 %v510_v45, %v508_v44  ;;  %v592_v44 = vld [vmem:[%s7079_s3 + $0x7a0] sm:$0xff]  ;;  %v594_v45 = vld [vmem:[%s7079_s3 + $0x7b0] sm:$0xff]  ;;  %v615_v33 = vld [vmem:[%s7079_s3 + $0x858] sm:$0xff] }
 0x145   : > { %2922 = vmatpush1.bf16.xpose.msra.mxu1 %v2921_v54  ;;  %2986 = vmatpush1.bf16.xpose.msra.mxu0 %v2985_v55  ;;  %v2943_v54 = vpack.c.bf16 %v515_v49, %v513_v48  ;;  %v3007_v55 = vpack.c.bf16 %v579_v51, %v577_v50  ;;  %v597_v48 = vld [vmem:[%s7079_s3 + $0x7c8] sm:$0xff]  ;;  %v599_v49 = vld [vmem:[%s7079_s3 + $0x7d8] sm:$0xff]  ;;  %v3025_v51 = vpack.c.bf16 %v594_v45, %v592_v44 }
 0x146   : > { %2924 = vmatprep.subr.bf16.mxu1 %v2923_v56  ;;  %2988 = vmatprep.subr.bf16.mxu0 %v2987_v57  ;;  %v512_v56 = vld [vmem:[%s7079_s3 + $0x520] sm:$0xff]  ;;  %v514_v57 = vld [vmem:[%s7079_s3 + $0x530] sm:$0xff]  ;;  %v617_v44 = vld [vmem:[%s7079_s3 + $0x868] sm:$0xff] }
 0x147   : > { %v2945_v0 = vpack.c.bf16 %v514_v57, %v512_v56  ;;  %v596_v56 = vld [vmem:[%s7079_s3 + $0x7c0] sm:$0xff]  ;;  %v598_v57 = vld [vmem:[%s7079_s3 + $0x7d0] sm:$0xff]  ;;  %v619_v45 = vld [vmem:[%s7079_s3 + $0x878] sm:$0xff] }
 0x14d   : > { %2926 = vmatpush1.bf16.xpose.msra.mxu1 %v2925_v3  ;;  %2990 = vmatpush1.bf16.xpose.msra.mxu0 %v2989_v4  ;;  %v2947_v3 = vpack.c.bf16 %v519_v61, %v517_v60  ;;  %v3011_v4 = vpack.c.bf16 %v583_v63, %v581_v62  ;;  %v601_v60 = vld [vmem:[%s7079_s3 + $0x7e8] sm:$0xff]  ;;  %v603_v61 = vld [vmem:[%s7079_s3 + $0x7f8] sm:$0xff]  ;;  %v3029_v63 = vpack.c.bf16 %v598_v57, %v596_v56 }
 0x14e   : > { %2928 = vmatprep.subr.bf16.mxu1 %v2927_v5  ;;  %2992 = vmatprep.subr.bf16.mxu0 %v2991_v6  ;;  %v516_v5 = vld [vmem:[%s7079_s3 + $0x540] sm:$0xff]  ;;  %v518_v6 = vld [vmem:[%s7079_s3 + $0x550] sm:$0xff]  ;;  %v621_v56 = vld [vmem:[%s7079_s3 + $0x888] sm:$0xff] }
 0x14f   : > { %v2949_v12 = vpack.c.bf16 %v518_v6, %v516_v5  ;;  %v600_v5 = vld [vmem:[%s7079_s3 + $0x7e0] sm:$0xff]  ;;  %v602_v6 = vld [vmem:[%s7079_s3 + $0x7f0] sm:$0xff]  ;;  %v623_v57 = vld [vmem:[%s7079_s3 + $0x898] sm:$0xff] }
 0x155   : > { %2930 = vmatpush1.bf16.xpose.msra.mxu1 %v2929_v15  ;;  %2994 = vmatpush1.bf16.xpose.msra.mxu0 %v2993_v16  ;;  %v2951_v15 = vpack.c.bf16 %v523_v2, %v521_v9  ;;  %v3015_v16 = vpack.c.bf16 %v587_v11, %v585_v10  ;;  %v669_v9 = vld [vmem:[%s7079_s3 + $0xa08] sm:$0xff]  ;;  %v671_v2 = vld [vmem:[%s7079_s3 + $0xa18] sm:$0xff]  ;;  %v3033_v11 = vpack.c.bf16 %v602_v6, %v600_v5 }
 0x156   : > { %2932 = vmatprep.subr.bf16.mxu1 %v2931_v17  ;;  %2996 = vmatprep.subr.bf16.mxu0 %v2995_v19  ;;  %v520_v17 = vld [vmem:[%s7079_s3 + $0x560] sm:$0xff]  ;;  %v522_v19 = vld [vmem:[%s7079_s3 + $0x570] sm:$0xff]  ;;  %v625_v5 = vld [vmem:[%s7079_s3 + $0x8a8] sm:$0xff] }
 0x157   : > { %v2953_v26 = vpack.c.bf16 %v522_v19, %v520_v17  ;;  %v668_v17 = vld [vmem:[%s7079_s3 + $0xa00] sm:$0xff]  ;;  %v670_v19 = vld [vmem:[%s7079_s3 + $0xa10] sm:$0xff]  ;;  %v627_v6 = vld [vmem:[%s7079_s3 + $0x8b8] sm:$0xff] }
 0x15d   : > { %2934 = vmatpush1.bf16.xpose.msra.mxu1 %v2933_v28  ;;  %2998 = vmatpush1.bf16.xpose.msra.mxu0 %v2997_v29  ;;  %v2955_v28 = vpack.c.bf16 %v527_v23, %v525_v22  ;;  %v3019_v29 = vpack.c.bf16 %v591_v25, %v589_v24  ;;  %v673_v22 = vld [vmem:[%s7079_s3 + $0xa28] sm:$0xff]  ;;  %v675_v23 = vld [vmem:[%s7079_s3 + $0xa38] sm:$0xff]  ;;  %v3101_v25 = vpack.c.bf16 %v670_v19, %v668_v17 }
 0x15e   : > { %2936 = vmatprep.subr.bf16.mxu1 %v2935_v30  ;;  %3000 = vmatprep.subr.bf16.mxu0 %v2999_v31  ;;  %v524_v30 = vld [vmem:[%s7079_s3 + $0x580] sm:$0xff]  ;;  %v526_v31 = vld [vmem:[%s7079_s3 + $0x590] sm:$0xff]  ;;  %v629_v17 = vld [vmem:[%s7079_s3 + $0x8c8] sm:$0xff] }
 0x15f   : > { %v2957_v38 = vpack.c.bf16 %v526_v31, %v524_v30  ;;  %v672_v30 = vld [vmem:[%s7079_s3 + $0xa20] sm:$0xff]  ;;  %v674_v31 = vld [vmem:[%s7079_s3 + $0xa30] sm:$0xff]  ;;  %v631_v19 = vld [vmem:[%s7079_s3 + $0x8d8] sm:$0xff] }
 0x165   : > { %2938 = vmatpush1.bf16.xpose.msra.mxu1 %v2937_v40  ;;  %3002 = vmatpush1.bf16.xpose.msra.mxu0 %v3001_v41  ;;  %v2959_v40 = vpack.c.bf16 %v531_v35, %v529_v34  ;;  %v3023_v41 = vpack.c.bf16 %v595_v37, %v593_v36  ;;  %v677_v34 = vld [vmem:[%s7079_s3 + $0xa48] sm:$0xff]  ;;  %v679_v35 = vld [vmem:[%s7079_s3 + $0xa58] sm:$0xff]  ;;  %v3105_v37 = vpack.c.bf16 %v674_v31, %v672_v30 }
 0x166   : > { %2940 = vmatprep.subr.bf16.mxu1 %v2939_v42  ;;  %3004 = vmatprep.subr.bf16.mxu0 %v3003_v43  ;;  %v528_v42 = vld [vmem:[%s7079_s3 + $0x5a0] sm:$0xff]  ;;  %v530_v43 = vld [vmem:[%s7079_s3 + $0x5b0] sm:$0xff]  ;;  %v633_v30 = vld [vmem:[%s7079_s3 + $0x8e8] sm:$0xff] }
 0x167   : > { %v2961_v50 = vpack.c.bf16 %v530_v43, %v528_v42  ;;  %v676_v42 = vld [vmem:[%s7079_s3 + $0xa40] sm:$0xff]  ;;  %v678_v43 = vld [vmem:[%s7079_s3 + $0xa50] sm:$0xff]  ;;  %v635_v31 = vld [vmem:[%s7079_s3 + $0x8f8] sm:$0xff] }
 0x16d   : > { %2942 = vmatpush1.bf16.xpose.msra.mxu1 %v2941_v52  ;;  %3006 = vmatpush1.bf16.xpose.msra.mxu0 %v3005_v53  ;;  %v2963_v52 = vpack.c.bf16 %v535_v47, %v533_v46  ;;  %v3027_v53 = vpack.c.bf16 %v599_v49, %v597_v48  ;;  %v681_v46 = vld [vmem:[%s7079_s3 + $0xa68] sm:$0xff]  ;;  %v683_v47 = vld [vmem:[%s7079_s3 + $0xa78] sm:$0xff]  ;;  %v3109_v49 = vpack.c.bf16 %v678_v43, %v676_v42 }
 0x16e   : > { %2944 = vmatprep.subr.bf16.mxu1 %v2943_v54  ;;  %3008 = vmatprep.subr.bf16.mxu0 %v3007_v55  ;;  %v532_v54 = vld [vmem:[%s7079_s3 + $0x5c0] sm:$0xff]  ;;  %v534_v55 = vld [vmem:[%s7079_s3 + $0x5d0] sm:$0xff]  ;;  %v637_v42 = vld [vmem:[%s7079_s3 + $0x908] sm:$0xff] }
 0x16f   : > { %v2965_v62 = vpack.c.bf16 %v534_v55, %v532_v54  ;;  %v680_v54 = vld [vmem:[%s7079_s3 + $0xa60] sm:$0xff]  ;;  %v682_v55 = vld [vmem:[%s7079_s3 + $0xa70] sm:$0xff]  ;;  %v639_v43 = vld [vmem:[%s7079_s3 + $0x918] sm:$0xff] }
 0x175   : > { %2946 = vmatpush1.bf16.xpose.msra.mxu1 %v2945_v0  ;;  %3010 = vmatpush1.bf16.xpose.msra.mxu0 %v3009_v1  ;;  %v2967_v0 = vpack.c.bf16 %v539_v59, %v537_v58  ;;  %v3031_v1 = vpack.c.bf16 %v603_v61, %v601_v60  ;;  %v685_v58 = vld [vmem:[%s7079_s3 + $0xa88] sm:$0xff]  ;;  %v687_v59 = vld [vmem:[%s7079_s3 + $0xa98] sm:$0xff]  ;;  %v3113_v61 = vpack.c.bf16 %v682_v55, %v680_v54 }
 0x176   : > { %2948 = vmatprep.subr.bf16.mxu1 %v2947_v3  ;;  %3012 = vmatprep.subr.bf16.mxu0 %v3011_v4  ;;  %v536_v3 = vld [vmem:[%s7079_s3 + $0x5e0] sm:$0xff]  ;;  %v538_v4 = vld [vmem:[%s7079_s3 + $0x5f0] sm:$0xff]  ;;  %v641_v54 = vld [vmem:[%s7079_s3 + $0x928] sm:$0xff] }
 0x177   : > { %v2969_v10 = vpack.c.bf16 %v538_v4, %v536_v3  ;;  %v684_v3 = vld [vmem:[%s7079_s3 + $0xa80] sm:$0xff]  ;;  %v686_v4 = vld [vmem:[%s7079_s3 + $0xa90] sm:$0xff]  ;;  %v643_v55 = vld [vmem:[%s7079_s3 + $0x938] sm:$0xff] }
 0x17d   : > { %2950 = vmatpush1.bf16.xpose.msra.mxu1 %v2949_v12  ;;  %3014 = vmatpush1.bf16.xpose.msra.mxu0 %v3013_v13  ;;  %v3035_v12 = vpack.c.bf16 %v607_v8, %v605_v7  ;;  %v3099_v13 = vpack.c.bf16 %v671_v2, %v669_v9  ;;  %v689_v7 = vld [vmem:[%s7079_s3 + $0xaa8] sm:$0xff]  ;;  %v691_v8 = vld [vmem:[%s7079_s3 + $0xab8] sm:$0xff]  ;;  %v3117_v2 = vpack.c.bf16 %v686_v4, %v684_v3 }
 0x17e   : > { %2952 = vmatprep.subr.bf16.mxu1 %v2951_v15  ;;  %3016 = vmatprep.subr.bf16.mxu0 %v3015_v16  ;;  %v604_v15 = vld [vmem:[%s7079_s3 + $0x800] sm:$0xff]  ;;  %v606_v16 = vld [vmem:[%s7079_s3 + $0x810] sm:$0xff]  ;;  %v645_v3 = vld [vmem:[%s7079_s3 + $0x948] sm:$0xff] }
 0x17f   : > { %v3037_v24 = vpack.c.bf16 %v606_v16, %v604_v15  ;;  %v688_v15 = vld [vmem:[%s7079_s3 + $0xaa0] sm:$0xff]  ;;  %v690_v16 = vld [vmem:[%s7079_s3 + $0xab0] sm:$0xff]  ;;  %v647_v4 = vld [vmem:[%s7079_s3 + $0x958] sm:$0xff] }
 0x185   : > { %2954 = vmatpush1.bf16.xpose.msra.mxu1 %v2953_v26  ;;  %3018 = vmatpush1.bf16.xpose.msra.mxu0 %v3017_v27  ;;  %v3039_v26 = vpack.c.bf16 %v611_v21, %v609_v20  ;;  %v3103_v27 = vpack.c.bf16 %v675_v23, %v673_v22  ;;  %v693_v20 = vld [vmem:[%s7079_s3 + $0xac8] sm:$0xff]  ;;  %v695_v21 = vld [vmem:[%s7079_s3 + $0xad8] sm:$0xff]  ;;  %v3121_v23 = vpack.c.bf16 %v690_v16, %v688_v15  ;;  %v3831_v15 = vmov 1983009808  }
 0x186   : > { %2956 = vmatprep.subr.bf16.mxu1 %v2955_v28  ;;  %3020 = vmatprep.subr.bf16.mxu0 %v3019_v29  ;;  %v608_v28 = vld [vmem:[%s7079_s3 + $0x820] sm:$0xff]  ;;  %v610_v29 = vld [vmem:[%s7079_s3 + $0x830] sm:$0xff]  ;;  %v2543_v16 = vunpack.c.l.s4 %v3831_v15 }
 0x187   : > { %v3041_v36 = vpack.c.bf16 %v610_v29, %v608_v28  ;;  %v692_v28 = vld [vmem:[%s7079_s3 + $0xac0] sm:$0xff]  ;;  %v694_v29 = vld [vmem:[%s7079_s3 + $0xad0] sm:$0xff] }
 0x188   : > { %v726_v15 = vld [vmem:[%s7079_s3 + $0xbd0] sm:$0xff] }
 0x18d   : > { %2958 = vmatpush1.bf16.xpose.msra.mxu1 %v2957_v38  ;;  %3022 = vmatpush1.bf16.xpose.msra.mxu0 %v3021_v39  ;;  %v3043_v38 = vpack.c.bf16 %v615_v33, %v613_v32  ;;  %v3107_v39 = vpack.c.bf16 %v679_v35, %v677_v34  ;;  %v697_v32 = vld [vmem:[%s7079_s3 + $0xae8] sm:$0xff]  ;;  %v699_v33 = vld [vmem:[%s7079_s3 + $0xaf8] sm:$0xff]  ;;  %v3125_v35 = vpack.c.bf16 %v694_v29, %v692_v28  ;;  %v648_v29 = vld [vmem:[%s7079_s3 + $0x960] sm:$0xff] }
 0x18e   : > { %2960 = vmatprep.subr.bf16.mxu1 %v2959_v40  ;;  %3024 = vmatprep.subr.bf16.mxu0 %v3023_v41  ;;  %v612_v40 = vld [vmem:[%s7079_s3 + $0x840] sm:$0xff]  ;;  %v614_v41 = vld [vmem:[%s7079_s3 + $0x850] sm:$0xff] }
 0x18f   : > { %v3045_v48 = vpack.c.bf16 %v614_v41, %v612_v40  ;;  %v696_v40 = vld [vmem:[%s7079_s3 + $0xae0] sm:$0xff]  ;;  %v698_v41 = vld [vmem:[%s7079_s3 + $0xaf0] sm:$0xff] }
 0x195   : > { %2962 = vmatpush1.bf16.xpose.msra.mxu1 %v2961_v50  ;;  %3026 = vmatpush1.bf16.xpose.msra.mxu0 %v3025_v51  ;;  %v3047_v50 = vpack.c.bf16 %v619_v45, %v617_v44  ;;  %v3111_v51 = vpack.c.bf16 %v683_v47, %v681_v46  ;;  %v701_v44 = vld [vmem:[%s7079_s3 + $0xb08] sm:$0xff]  ;;  %v703_v45 = vld [vmem:[%s7079_s3 + $0xb18] sm:$0xff]  ;;  %v3129_v47 = vpack.c.bf16 %v698_v41, %v696_v40 }
 0x196   : > { %2964 = vmatprep.subr.bf16.mxu1 %v2963_v52  ;;  %3028 = vmatprep.subr.bf16.mxu0 %v3027_v53  ;;  %v616_v52 = vld [vmem:[%s7079_s3 + $0x860] sm:$0xff]  ;;  %v618_v53 = vld [vmem:[%s7079_s3 + $0x870] sm:$0xff]  ;;  %v717_v40 = vld [vmem:[%s7079_s3 + $0xb88] sm:$0xff] }
 0x197   : > { %v3049_v60 = vpack.c.bf16 %v618_v53, %v616_v52  ;;  %v700_v52 = vld [vmem:[%s7079_s3 + $0xb00] sm:$0xff]  ;;  %v702_v53 = vld [vmem:[%s7079_s3 + $0xb10] sm:$0xff]  ;;  %v719_v41 = vld [vmem:[%s7079_s3 + $0xb98] sm:$0xff] }
 0x19d   : > { %2966 = vmatpush1.bf16.xpose.msra.mxu1 %v2965_v62  ;;  %3030 = vmatpush1.bf16.xpose.msra.mxu0 %v3029_v63  ;;  %v3051_v62 = vpack.c.bf16 %v623_v57, %v621_v56  ;;  %v3115_v63 = vpack.c.bf16 %v687_v59, %v685_v58  ;;  %v705_v56 = vld [vmem:[%s7079_s3 + $0xb28] sm:$0xff]  ;;  %v707_v57 = vld [vmem:[%s7079_s3 + $0xb38] sm:$0xff]  ;;  %v3133_v59 = vpack.c.bf16 %v702_v53, %v700_v52  ;;  %v654_v52 = vld [vmem:[%s7079_s3 + $0x990] sm:$0xff] }
 0x19e   : > { %2968 = vmatprep.subr.bf16.mxu1 %v2967_v0  ;;  %3032 = vmatprep.subr.bf16.mxu0 %v3031_v1  ;;  %v620_v0 = vld [vmem:[%s7079_s3 + $0x880] sm:$0xff]  ;;  %v622_v1 = vld [vmem:[%s7079_s3 + $0x890] sm:$0xff] }
 0x19f   : > { %v3053_v9 = vpack.c.bf16 %v622_v1, %v620_v0  ;;  %v704_v0 = vld [vmem:[%s7079_s3 + $0xb20] sm:$0xff]  ;;  %v706_v1 = vld [vmem:[%s7079_s3 + $0xb30] sm:$0xff] }
 0x1a0   : > { %v716_v53 = vld [vmem:[%s7079_s3 + $0xb80] sm:$0xff] }
 0x1a5   : > { %2970 = vmatpush1.bf16.xpose.msra.mxu1 %v2969_v10  ;;  %3034 = vmatpush1.bf16.xpose.msra.mxu0 %v3033_v11  ;;  %v3055_v10 = vpack.c.bf16 %v627_v6, %v625_v5  ;;  %v3119_v11 = vpack.c.bf16 %v691_v8, %v689_v7  ;;  %v709_v5 = vld [vmem:[%s7079_s3 + $0xb48] sm:$0xff]  ;;  %v711_v6 = vld [vmem:[%s7079_s3 + $0xb58] sm:$0xff]  ;;  %v3137_v8 = vpack.c.bf16 %v706_v1, %v704_v0  ;;  %v658_v0 = vld [vmem:[%s7079_s3 + $0x9b0] sm:$0xff] }
 0x1a6   : > { %3036 = vmatprep.subr.bf16.mxu1 %v3035_v12  ;;  %3100 = vmatprep.subr.bf16.mxu0 %v3099_v13  ;;  %v624_v12 = vld [vmem:[%s7079_s3 + $0x8a0] sm:$0xff]  ;;  %v626_v13 = vld [vmem:[%s7079_s3 + $0x8b0] sm:$0xff] }
 0x1a7   : > { %v3057_v22 = vpack.c.bf16 %v626_v13, %v624_v12  ;;  %v708_v12 = vld [vmem:[%s7079_s3 + $0xb40] sm:$0xff]  ;;  %v710_v13 = vld [vmem:[%s7079_s3 + $0xb50] sm:$0xff] }
 0x1a8   : > { %v720_v1 = vld [vmem:[%s7079_s3 + $0xba0] sm:$0xff] }
 0x1ac   : > { %1579 = vmatmul.mubr.f32.vlgmr.msra.gmra.mrb[2].mxu1 %v4355_v18  ;;  %1650 = vmatmul.mubr.f32.vlgmr.msra.gmra.mrb[6].mxu0 %v4355_v18 }
 0x1ad   : > { %3038 = vmatpush1.bf16.xpose.msra.mxu1 %v3037_v24  ;;  %1720 = vmatprep.mubr.f32.mxu1 %v4353_v14  ;;  %v3059_v24 = vpack.c.bf16 %v631_v19, %v629_v17  ;;  %v2545_v17 = vlaneseq  ;;  %v649_v19 = vld [vmem:[%s7079_s3 + $0x968] sm:$0xff] }
 0x1ae   : > { %3102 = vmatpush1.bf16.xpose.msra.mxu0 %v3101_v25  ;;  %1791 = vmatprep.mubr.f32.mxu0 %v4353_v14  ;;  %v3123_v25 = vpack.c.bf16 %v695_v21, %v693_v20  ;;  %v651_v20 = vld [vmem:[%s7079_s3 + $0x978] sm:$0xff]  ;;  %v713_v21 = vld [vmem:[%s7079_s3 + $0xb68] sm:$0xff] }
 0x1af   : > { %3040 = vmatprep.subr.bf16.mxu1 %v3039_v26  ;;  %3104 = vmatprep.subr.bf16.mxu0 %v3103_v27  ;;  %v628_v26 = vld [vmem:[%s7079_s3 + $0x8c0] sm:$0xff]  ;;  %v630_v27 = vld [vmem:[%s7079_s3 + $0x8d0] sm:$0xff] }
 0x1b0   : > { %v3061_v34 = vpack.c.bf16 %v630_v27, %v628_v26  ;;  %v2544_v26 = vunpack.c.0.s8 %v2543_v16  ;;  %v2546_v27 = vshrl.u32 %v2545_v17, 7  ;;  %v665_v16 = vld [vmem:[%s7079_s3 + $0x9e8] sm:$0xff]  ;;  %v667_v17 = vld [vmem:[%s7079_s3 + $0x9f8] sm:$0xff] }
 0x1b5   : > { %3042 = vmatpush1.bf16.xpose.msra.mxu1 %v3041_v36  ;;  %v3063_v36 = vpack.c.bf16 %v635_v31, %v633_v30  ;;  %v650_v30 = vld [vmem:[%s7079_s3 + $0x970] sm:$0xff]  ;;  %v712_v31 = vld [vmem:[%s7079_s3 + $0xb60] sm:$0xff] }
 0x1b6   : > { %3106 = vmatpush1.bf16.xpose.msra.mxu0 %v3105_v37  ;;  %3044 = vmatprep.subr.bf16.mxu1 %v3043_v38  ;;  %v3127_v37 = vpack.c.bf16 %v699_v33, %v697_v32  ;;  %v632_v38 = vld [vmem:[%s7079_s3 + $0x8e0] sm:$0xff] }
 0x1b7   : > { %3108 = vmatprep.subr.bf16.mxu0 %v3107_v39  ;;  %v634_v39 = vld [vmem:[%s7079_s3 + $0x8f0] sm:$0xff] }
 0x1b8   : > { %v3065_v46 = vpack.c.bf16 %v634_v39, %v632_v38 }
 0x1bd   : > { %3046 = vmatpush1.bf16.xpose.msra.mxu1 %v3045_v48  ;;  %v3067_v48 = vpack.c.bf16 %v639_v43, %v637_v42 }
 0x1be   : > { %3110 = vmatpush1.bf16.xpose.msra.mxu0 %v3109_v49  ;;  %3048 = vmatprep.subr.bf16.mxu1 %v3047_v50  ;;  %v3131_v49 = vpack.c.bf16 %v703_v45, %v701_v44  ;;  %v636_v50 = vld [vmem:[%s7079_s3 + $0x900] sm:$0xff]  ;;  %v3081_v44 = vpack.c.bf16 %v650_v30, %v648_v29  ;;  %v733_v29 = vld [vmem:[%s7079_s3 + $0xc08] sm:$0xff]  ;;  %v735_v30 = vld [vmem:[%s7079_s3 + $0xc18] sm:$0xff] }
 0x1bf   : > { %3112 = vmatprep.subr.bf16.mxu0 %v3111_v51  ;;  %v638_v51 = vld [vmem:[%s7079_s3 + $0x910] sm:$0xff] }
 0x1c0   : > { %v3069_v58 = vpack.c.bf16 %v638_v51, %v636_v50  ;;  %v652_v51 = vld [vmem:[%s7079_s3 + $0x980] sm:$0xff] }
 0x1c5   : > { %3050 = vmatpush1.bf16.xpose.msra.mxu1 %v3049_v60  ;;  %v3071_v60 = vpack.c.bf16 %v643_v55, %v641_v54  ;;  %v718_v54 = vld [vmem:[%s7079_s3 + $0xb90] sm:$0xff]  ;;  %v657_v55 = vld [vmem:[%s7079_s3 + $0x9a8] sm:$0xff] }
 0x1c6   : > { %3114 = vmatpush1.bf16.xpose.msra.mxu0 %v3113_v61  ;;  %3052 = vmatprep.subr.bf16.mxu1 %v3051_v62  ;;  %v3135_v61 = vpack.c.bf16 %v707_v57, %v705_v56  ;;  %v640_v62 = vld [vmem:[%s7079_s3 + $0x920] sm:$0xff]  ;;  %v659_v56 = vld [vmem:[%s7079_s3 + $0x9b8] sm:$0xff]  ;;  %v721_v57 = vld [vmem:[%s7079_s3 + $0xba8] sm:$0xff] }
 0x1c7   : > { %3116 = vmatprep.subr.bf16.mxu0 %v3115_v63  ;;  %v642_v63 = vld [vmem:[%s7079_s3 + $0x930] sm:$0xff] }
 0x1c8   : > { %v3073_v7 = vpack.c.bf16 %v642_v63, %v640_v62  ;;  %v656_v63 = vld [vmem:[%s7079_s3 + $0x9a0] sm:$0xff] }
 0x1cd   : > { %3054 = vmatpush1.bf16.xpose.msra.mxu1 %v3053_v9  ;;  %v3075_v9 = vpack.c.bf16 %v647_v4, %v645_v3  ;;  %v722_v3 = vld [vmem:[%s7079_s3 + $0xbb0] sm:$0xff]  ;;  %v661_v4 = vld [vmem:[%s7079_s3 + $0x9c8] sm:$0xff] }
 0x1ce   : > { %3118 = vmatpush1.bf16.xpose.msra.mxu0 %v3117_v2  ;;  %3056 = vmatprep.subr.bf16.mxu1 %v3055_v10  ;;  %v3139_v2 = vpack.c.bf16 %v711_v6, %v709_v5  ;;  %v644_v10 = vld [vmem:[%s7079_s3 + $0x940] sm:$0xff]  ;;  %v663_v5 = vld [vmem:[%s7079_s3 + $0x9d8] sm:$0xff]  ;;  %v725_v6 = vld [vmem:[%s7079_s3 + $0xbc8] sm:$0xff] }
 0x1cf   : > { %3120 = vmatprep.subr.bf16.mxu0 %v3119_v11  ;;  %v646_v11 = vld [vmem:[%s7079_s3 + $0x950] sm:$0xff] }
 0x1d5   : > { %3058 = vmatpush1.bf16.xpose.msra.mxu1 %v3057_v22  ;;  %v715_v22 = vld [vmem:[%s7079_s3 + $0xb78] sm:$0xff] }
 0x1d6   : > { %3122 = vmatpush1.bf16.xpose.msra.mxu0 %v3121_v23  ;;  %3060 = vmatprep.subr.bf16.mxu1 %v3059_v24  ;;  %v3077_v23 = vpack.c.bf16 %v646_v11, %v644_v10  ;;  %v3141_v24 = vpack.c.bf16 %v710_v13, %v708_v12  ;;  %v3143_v28 = vpack.c.bf16 %v715_v22, %v713_v21  ;;  %v660_v11 = vld [vmem:[%s7079_s3 + $0x9c0] sm:$0xff]  ;;  %v662_v12 = vld [vmem:[%s7079_s3 + $0x9d0] sm:$0xff] }
 0x1d7   : > { %3124 = vmatprep.subr.bf16.mxu0 %v3123_v25  ;;  %v3079_v25 = vpack.c.bf16 %v651_v20, %v649_v19  ;;  %v724_v13 = vld [vmem:[%s7079_s3 + $0xbc0] sm:$0xff]  ;;  %v729_v19 = vld [vmem:[%s7079_s3 + $0xbe8] sm:$0xff]  ;;  %v731_v20 = vld [vmem:[%s7079_s3 + $0xbf8] sm:$0xff]  ;;  %v3093_v21 = vpack.c.bf16 %v662_v12, %v660_v11 }
 0x1d8   : > { %v3157_v22 = vpack.c.bf16 %v726_v15, %v724_v13  ;;  %v746_v11 = vld [vmem:[%s7079_s3 + $0xc70] sm:$0xff]  ;;  %v808_v12 = vld [vmem:[%s7079_s3 + $0xe60] sm:$0xff]  ;;  %v749_v15 = vld [vmem:[%s7079_s3 + $0xc88] sm:$0xff] }
 0x1d9   : > { %v810_v13 = vld [vmem:[%s7079_s3 + $0xe70] sm:$0xff] }
 0x1dd   : > { %3062 = vmatpush1.bf16.xpose.msra.mxu1 %v3061_v34  ;;  %v5000_v34 = vsub.s32 %v2544_v26, %v2546_v27  ;;  %v666_v26 = vld [vmem:[%s7079_s3 + $0x9f0] sm:$0xff]  ;;  %v728_v27 = vld [vmem:[%s7079_s3 + $0xbe0] sm:$0xff] }
 0x1de   : > { %3126 = vmatpush1.bf16.xpose.msra.mxu0 %v3125_v35  ;;  %3064 = vmatprep.subr.bf16.mxu1 %v3063_v36  ;;  %v714_v35 = vld [vmem:[%s7079_s3 + $0xb70] sm:$0xff]  ;;  %v653_v36 = vld [vmem:[%s7079_s3 + $0x988] sm:$0xff] }
 0x1df   : > { %3128 = vmatprep.subr.bf16.mxu0 %v3127_v37  ;;  %v655_v37 = vld [vmem:[%s7079_s3 + $0x998] sm:$0xff]  ;;  %v3145_v45 = vpack.c.bf16 %v714_v35, %v712_v31  ;;  %v797_v31 = vld [vmem:[%s7079_s3 + $0xe08] sm:$0xff] }
 0x1e5   : > { %3066 = vmatpush1.bf16.xpose.msra.mxu1 %v3065_v46  ;;  %v3083_v46 = vpack.c.bf16 %v655_v37, %v653_v36  ;;  %v3163_v36 = vpack.c.bf16 %v735_v30, %v733_v29  ;;  %v755_v29 = vld [vmem:[%s7079_s3 + $0xcb8] sm:$0xff]  ;;  %v817_v30 = vld [vmem:[%s7079_s3 + $0xea8] sm:$0xff] }
 0x1e6   : > { %3130 = vmatpush1.bf16.xpose.msra.mxu0 %v3129_v47  ;;  %3068 = vmatprep.subr.bf16.mxu1 %v3067_v48 }
 0x1e7   : > { %3132 = vmatprep.subr.bf16.mxu0 %v3131_v49  ;;  %v3147_v49 = vpack.c.bf16 %v719_v41, %v717_v40  ;;  %v796_v40 = vld [vmem:[%s7079_s3 + $0xe00] sm:$0xff]  ;;  %v798_v41 = vld [vmem:[%s7079_s3 + $0xe10] sm:$0xff] }
 0x1ed   : > { %3070 = vmatpush1.bf16.xpose.msra.mxu1 %v3069_v58  ;;  %v723_v58 = vld [vmem:[%s7079_s3 + $0xbb8] sm:$0xff] }
 0x1ee   : > { %3134 = vmatpush1.bf16.xpose.msra.mxu0 %v3133_v59  ;;  %3072 = vmatprep.subr.bf16.mxu1 %v3071_v60  ;;  %v3085_v59 = vpack.c.bf16 %v654_v52, %v652_v51  ;;  %v3149_v60 = vpack.c.bf16 %v718_v54, %v716_v53  ;;  %v3151_v62 = vpack.c.bf16 %v723_v58, %v721_v57  ;;  %v738_v51 = vld [vmem:[%s7079_s3 + $0xc30] sm:$0xff]  ;;  %v800_v52 = vld [vmem:[%s7079_s3 + $0xe20] sm:$0xff]  ;;  %v741_v54 = vld [vmem:[%s7079_s3 + $0xc48] sm:$0xff] }
 0x1ef   : > { %3136 = vmatprep.subr.bf16.mxu0 %v3135_v61  ;;  %v3087_v61 = vpack.c.bf16 %v659_v56, %v657_v55  ;;  %v802_v53 = vld [vmem:[%s7079_s3 + $0xe30] sm:$0xff]  ;;  %v743_v55 = vld [vmem:[%s7079_s3 + $0xc58] sm:$0xff]  ;;  %v805_v56 = vld [vmem:[%s7079_s3 + $0xe48] sm:$0xff] }
 0x1f0   : > { %v807_v57 = vld [vmem:[%s7079_s3 + $0xe58] sm:$0xff] }
 0x1f5   : > { %3074 = vmatpush1.bf16.xpose.msra.mxu1 %v3073_v7  ;;  %v727_v7 = vld [vmem:[%s7079_s3 + $0xbd8] sm:$0xff] }
 0x1f6   : > { %3138 = vmatpush1.bf16.xpose.msra.mxu0 %v3137_v8  ;;  %3076 = vmatprep.subr.bf16.mxu1 %v3075_v9  ;;  %v3089_v8 = vpack.c.bf16 %v658_v0, %v656_v63  ;;  %v3153_v9 = vpack.c.bf16 %v722_v3, %v720_v1  ;;  %v3155_v10 = vpack.c.bf16 %v727_v7, %v725_v6  ;;  %v742_v63 = vld [vmem:[%s7079_s3 + $0xc50] sm:$0xff]  ;;  %v804_v0 = vld [vmem:[%s7079_s3 + $0xe40] sm:$0xff]  ;;  %v745_v3 = vld [vmem:[%s7079_s3 + $0xc68] sm:$0xff] }
 0x1f7   : > { %3140 = vmatprep.subr.bf16.mxu0 %v3139_v2  ;;  %v3091_v2 = vpack.c.bf16 %v663_v5, %v661_v4  ;;  %v806_v1 = vld [vmem:[%s7079_s3 + $0xe50] sm:$0xff]  ;;  %v747_v4 = vld [vmem:[%s7079_s3 + $0xc78] sm:$0xff]  ;;  %v809_v5 = vld [vmem:[%s7079_s3 + $0xe68] sm:$0xff] }
 0x1f8   : > { %v811_v6 = vld [vmem:[%s7079_s3 + $0xe78] sm:$0xff] }
 0x1fd   : > { %3078 = vmatpush1.bf16.xpose.msra.mxu1 %v3077_v23  ;;  %v3095_v23 = vpack.c.bf16 %v667_v17, %v665_v16  ;;  %v751_v16 = vld [vmem:[%s7079_s3 + $0xc98] sm:$0xff]  ;;  %v813_v17 = vld [vmem:[%s7079_s3 + $0xe88] sm:$0xff] }
 0x1fe   : > { %3142 = vmatpush1.bf16.xpose.msra.mxu0 %v3141_v24  ;;  %3080 = vmatprep.subr.bf16.mxu1 %v3079_v25  ;;  %v3159_v24 = vpack.c.bf16 %v731_v20, %v729_v19  ;;  %v664_v25 = vld [vmem:[%s7079_s3 + $0x9e0] sm:$0xff]  ;;  %v815_v19 = vld [vmem:[%s7079_s3 + $0xe98] sm:$0xff] }
 0x1ff   : > { %v1438_v32 = vpop.f32.mrb[0].mxu1  ;;  %v1509_v33 = vpop.f32.mrb[4].mxu0  ;;  %3144 = vmatprep.subr.bf16.mxu0 %v3143_v28  ;;  %v730_v28 = vld [vmem:[%s7079_s3 + $0xbf0] sm:$0xff] }
 0x200   : > { %v1440_v38 = vpop.f32.mrb[1].mxu1  ;;  %v1511_v39 = vpop.f32.mrb[5].mxu0  ;;  %v3161_v35 = vpack.c.bf16 %v730_v28, %v728_v27  ;;  %v814_v27 = vld [vmem:[%s7079_s3 + $0xe90] sm:$0xff]  ;;  %v753_v28 = vld [vmem:[%s7079_s3 + $0xca8] sm:$0xff] }
 0x201   : > { %v2540_v42 = vcombine.low %v1438_v32, %v1440_v38  ;;  %v2541_v43 = vcombine.low %v1509_v33, %v1511_v39  ;;  %v799_v32 = vld [vmem:[%s7079_s3 + $0xe18] sm:$0xff]  ;;  %v3097_v33 = vpack.c.bf16 %v666_v26, %v664_v25  ;;  %v732_v38 = vld [vmem:[%s7079_s3 + $0xc00] sm:$0xff]  ;;  %v734_v39 = vld [vmem:[%s7079_s3 + $0xc10] sm:$0xff] }
 0x202   : > { %v3227_v37 = vpack.c.bf16 %v799_v32, %v797_v31  ;;  %v750_v25 = vld [vmem:[%s7079_s3 + $0xc90] sm:$0xff]  ;;  %v812_v26 = vld [vmem:[%s7079_s3 + $0xe80] sm:$0xff]  ;;  %v819_v31 = vld [vmem:[%s7079_s3 + $0xeb8] sm:$0xff] }
 0x203   : > { %v2548_v47 = vrot.slane %v2540_v42, %v5000_v34  ;;  %v2555_v48 = vrot.slane %v2541_v43, %v5000_v34  ;;  %v737_v42 = vld [vmem:[%s7079_s3 + $0xc28] sm:$0xff]  ;;  %v739_v43 = vld [vmem:[%s7079_s3 + $0xc38] sm:$0xff] }
 0x205   : > { %v2556_v50 = vcombine.low %v2548_v47, %v2555_v48  ;;  %3082 = vmatpush1.bf16.xpose.msra.mxu1 %v3081_v44  ;;  %v3165_v44 = vpack.c.bf16 %v734_v39, %v732_v38  ;;  %v3229_v47 = vpack.c.bf16 %v798_v41, %v796_v40  ;;  %v3167_v48 = vpack.c.bf16 %v739_v43, %v737_v42  ;;  %v754_v38 = vld [vmem:[%s7079_s3 + $0xcb0] sm:$0xff]  ;;  %v816_v39 = vld [vmem:[%s7079_s3 + $0xea0] sm:$0xff]  ;;  %v757_v41 = vld [vmem:[%s7079_s3 + $0xcc8] sm:$0xff] }
 0x206   : > { %3146 = vmatpush1.bf16.xpose.msra.mxu0 %v3145_v45  ;;  %3084 = vmatprep.subr.bf16.mxu1 %v3083_v46  ;;  %v801_v45 = vld [vmem:[%s7079_s3 + $0xe28] sm:$0xff]  ;;  %v803_v46 = vld [vmem:[%s7079_s3 + $0xe38] sm:$0xff]  ;;  %v818_v40 = vld [vmem:[%s7079_s3 + $0xeb0] sm:$0xff] }
 0x207   : > { %2684 = vst [vmem:[%s5023_s22] sm:$0xff] %v2556_v50  ;;  %3148 = vmatprep.subr.bf16.mxu0 %v3147_v49  ;;  %v3231_v49 = vpack.c.bf16 %v803_v46, %v801_v45  ;;  %v736_v50 = vld [vmem:[%s7079_s3 + $0xc20] sm:$0xff]  ;;  %v759_v42 = vld [vmem:[%s7079_s3 + $0xcd8] sm:$0xff]  ;;  %v821_v43 = vld [vmem:[%s7079_s3 + $0xec8] sm:$0xff]  ;;  %v3249_v46 = vpack.c.bf16 %v818_v40, %v816_v39 }
 0x208   : > { %v3169_v58 = vpack.c.bf16 %v738_v51, %v736_v50  ;;  %v758_v50 = vld [vmem:[%s7079_s3 + $0xcd0] sm:$0xff]  ;;  %v820_v51 = vld [vmem:[%s7079_s3 + $0xec0] sm:$0xff]  ;;  %v777_v40 = vld [vmem:[%s7079_s3 + $0xd68] sm:$0xff] }
 0x209   : > { %v838_v39 = vld [vmem:[%s7079_s3 + $0xf50] sm:$0xff] }
 0x20d   : > { %3086 = vmatpush1.bf16.xpose.msra.mxu1 %v3085_v59  ;;  %v3233_v59 = vpack.c.bf16 %v802_v53, %v800_v52  ;;  %v822_v52 = vld [vmem:[%s7079_s3 + $0xed0] sm:$0xff]  ;;  %v761_v53 = vld [vmem:[%s7079_s3 + $0xce8] sm:$0xff] }
 0x20e   : > { %3150 = vmatpush1.bf16.xpose.msra.mxu0 %v3149_v60  ;;  %3088 = vmatprep.subr.bf16.mxu1 %v3087_v61  ;;  %v3171_v60 = vpack.c.bf16 %v743_v55, %v741_v54  ;;  %v3235_v61 = vpack.c.bf16 %v807_v57, %v805_v56  ;;  %v763_v54 = vld [vmem:[%s7079_s3 + $0xcf8] sm:$0xff]  ;;  %v825_v55 = vld [vmem:[%s7079_s3 + $0xee8] sm:$0xff] }
 0x20f   : > { %3152 = vmatprep.subr.bf16.mxu0 %v3151_v62  ;;  %v740_v62 = vld [vmem:[%s7079_s3 + $0xc40] sm:$0xff]  ;;  %v827_v56 = vld [vmem:[%s7079_s3 + $0xef8] sm:$0xff] }
 0x210   : > { %v3173_v7 = vpack.c.bf16 %v742_v63, %v740_v62  ;;  %v762_v62 = vld [vmem:[%s7079_s3 + $0xcf0] sm:$0xff]  ;;  %v824_v63 = vld [vmem:[%s7079_s3 + $0xee0] sm:$0xff] }
 0x215   : > { %3090 = vmatpush1.bf16.xpose.msra.mxu1 %v3089_v8  ;;  %v3237_v8 = vpack.c.bf16 %v806_v1, %v804_v0  ;;  %v826_v0 = vld [vmem:[%s7079_s3 + $0xef0] sm:$0xff]  ;;  %v765_v1 = vld [vmem:[%s7079_s3 + $0xd08] sm:$0xff] }
 0x216   : > { %3154 = vmatpush1.bf16.xpose.msra.mxu0 %v3153_v9  ;;  %3092 = vmatprep.subr.bf16.mxu1 %v3091_v2  ;;  %v3175_v9 = vpack.c.bf16 %v747_v4, %v745_v3  ;;  %v3239_v2 = vpack.c.bf16 %v811_v6, %v809_v5  ;;  %v767_v3 = vld [vmem:[%s7079_s3 + $0xd18] sm:$0xff]  ;;  %v829_v4 = vld [vmem:[%s7079_s3 + $0xf08] sm:$0xff] }
 0x217   : > { %3156 = vmatprep.subr.bf16.mxu0 %v3155_v10  ;;  %v744_v10 = vld [vmem:[%s7079_s3 + $0xc60] sm:$0xff]  ;;  %v831_v5 = vld [vmem:[%s7079_s3 + $0xf18] sm:$0xff] }
 0x218   : > { %v3177_v20 = vpack.c.bf16 %v746_v11, %v744_v10  ;;  %v766_v10 = vld [vmem:[%s7079_s3 + $0xd10] sm:$0xff]  ;;  %v828_v11 = vld [vmem:[%s7079_s3 + $0xf00] sm:$0xff] }
 0x21d   : > { %3094 = vmatpush1.bf16.xpose.msra.mxu1 %v3093_v21  ;;  %v3241_v21 = vpack.c.bf16 %v810_v13, %v808_v12  ;;  %v830_v12 = vld [vmem:[%s7079_s3 + $0xf10] sm:$0xff]  ;;  %v769_v13 = vld [vmem:[%s7079_s3 + $0xd28] sm:$0xff] }
 0x21e   : > { %3158 = vmatpush1.bf16.xpose.msra.mxu0 %v3157_v22  ;;  %3096 = vmatprep.subr.bf16.mxu1 %v3095_v23  ;;  %v3179_v22 = vpack.c.bf16 %v751_v16, %v749_v15  ;;  %v3243_v23 = vpack.c.bf16 %v815_v19, %v813_v17  ;;  %v771_v15 = vld [vmem:[%s7079_s3 + $0xd38] sm:$0xff]  ;;  %v833_v16 = vld [vmem:[%s7079_s3 + $0xf28] sm:$0xff] }
 0x21f   : > { %3160 = vmatprep.subr.bf16.mxu0 %v3159_v24  ;;  %v748_v24 = vld [vmem:[%s7079_s3 + $0xc80] sm:$0xff]  ;;  %v835_v17 = vld [vmem:[%s7079_s3 + $0xf38] sm:$0xff] }
 0x220   : > { %v3181_v32 = vpack.c.bf16 %v750_v25, %v748_v24  ;;  %v770_v24 = vld [vmem:[%s7079_s3 + $0xd30] sm:$0xff]  ;;  %v832_v25 = vld [vmem:[%s7079_s3 + $0xf20] sm:$0xff] }
 0x225   : > { %3098 = vmatpush1.bf16.xpose.msra.mxu1 %v3097_v33  ;;  %v3245_v33 = vpack.c.bf16 %v814_v27, %v812_v26  ;;  %v834_v26 = vld [vmem:[%s7079_s3 + $0xf30] sm:$0xff]  ;;  %v773_v27 = vld [vmem:[%s7079_s3 + $0xd48] sm:$0xff] }
 0x226   : > { %3162 = vmatpush1.bf16.xpose.msra.mxu0 %v3161_v35  ;;  %3164 = vmatprep.subr.bf16.mxu1 %v3163_v36  ;;  %v3183_v35 = vpack.c.bf16 %v755_v29, %v753_v28  ;;  %v3247_v36 = vpack.c.bf16 %v819_v31, %v817_v30  ;;  %v775_v28 = vld [vmem:[%s7079_s3 + $0xd58] sm:$0xff]  ;;  %v837_v29 = vld [vmem:[%s7079_s3 + $0xf48] sm:$0xff] }
 0x227   : > { %3228 = vmatprep.subr.bf16.mxu0 %v3227_v37  ;;  %v752_v37 = vld [vmem:[%s7079_s3 + $0xca0] sm:$0xff]  ;;  %v839_v30 = vld [vmem:[%s7079_s3 + $0xf58] sm:$0xff] }
 0x228   : > { %v3185_v45 = vpack.c.bf16 %v754_v38, %v752_v37  ;;  %v774_v37 = vld [vmem:[%s7079_s3 + $0xd50] sm:$0xff]  ;;  %v836_v38 = vld [vmem:[%s7079_s3 + $0xf40] sm:$0xff] }
 0x22c   : > { %1721 = vmatmul.mubr.f32.vlgmr.msra.gmra.mrb[4].mxu1 %v4355_v18 }
 0x22d   : > { %1792 = vmatmul.mubr.f32.vlgmr.msra.gmra.mrb[8].mxu0 %v4355_v18  ;;  %3166 = vmatpush1.bf16.xpose.msra.mxu1 %v3165_v44  ;;  %v823_v44 = vld [vmem:[%s7079_s3 + $0xed8] sm:$0xff] }
 0x22e   : > { %1862 = vmatprep.mubr.f32.mxu1 %v4353_v14  ;;  %3230 = vmatpush1.bf16.xpose.msra.mxu0 %v3229_v47  ;;  %v3187_v47 = vpack.c.bf16 %v759_v42, %v757_v41  ;;  %v779_v41 = vld [vmem:[%s7079_s3 + $0xd78] sm:$0xff]  ;;  %v841_v42 = vld [vmem:[%s7079_s3 + $0xf68] sm:$0xff] }
 0x22f   : > { %1933 = vmatprep.mubr.f32.mxu0 %v4353_v14  ;;  %3168 = vmatprep.subr.bf16.mxu1 %v3167_v48  ;;  %v3251_v48 = vpack.c.bf16 %v823_v44, %v821_v43  ;;  %v843_v43 = vld [vmem:[%s7079_s3 + $0xf78] sm:$0xff] }
 0x230   : > { %3232 = vmatprep.subr.bf16.mxu0 %v3231_v49  ;;  %v756_v49 = vld [vmem:[%s7079_s3 + $0xcc0] sm:$0xff] }
 0x231   : > { %v3189_v57 = vpack.c.bf16 %v758_v50, %v756_v49  ;;  %v778_v49 = vld [vmem:[%s7079_s3 + $0xd70] sm:$0xff]  ;;  %v840_v50 = vld [vmem:[%s7079_s3 + $0xf60] sm:$0xff] }
 0x235   : > { %3170 = vmatpush1.bf16.xpose.msra.mxu1 %v3169_v58  ;;  %v3253_v58 = vpack.c.bf16 %v822_v52, %v820_v51 }
 0x236   : > { %3234 = vmatpush1.bf16.xpose.msra.mxu0 %v3233_v59  ;;  %3172 = vmatprep.subr.bf16.mxu1 %v3171_v60  ;;  %v3191_v59 = vpack.c.bf16 %v763_v54, %v761_v53  ;;  %v3255_v60 = vpack.c.bf16 %v827_v56, %v825_v55  ;;  %v842_v53 = vld [vmem:[%s7079_s3 + $0xf70] sm:$0xff]  ;;  %v781_v54 = vld [vmem:[%s7079_s3 + $0xd88] sm:$0xff]  ;;  %v783_v55 = vld [vmem:[%s7079_s3 + $0xd98] sm:$0xff] }
 0x237   : > { %3236 = vmatprep.subr.bf16.mxu0 %v3235_v61  ;;  %v760_v61 = vld [vmem:[%s7079_s3 + $0xce0] sm:$0xff] }
 0x238   : > { %v3193_v6 = vpack.c.bf16 %v762_v62, %v760_v61 }
 0x23d   : > { %3174 = vmatpush1.bf16.xpose.msra.mxu1 %v3173_v7  ;;  %v3257_v7 = vpack.c.bf16 %v826_v0, %v824_v63  ;;  %v3273_v63 = vpack.c.bf16 %v842_v53, %v840_v50  ;;  %v3211_v0 = vpack.c.bf16 %v783_v55, %v781_v54  ;;  %v925_v50 = vld [vmem:[%s7079_s3 + $0x1208] sm:$0xff] }
 0x23e   : > { %3238 = vmatpush1.bf16.xpose.msra.mxu0 %v3237_v8  ;;  %3176 = vmatprep.subr.bf16.mxu1 %v3175_v9  ;;  %v3195_v8 = vpack.c.bf16 %v767_v3, %v765_v1  ;;  %v3259_v9 = vpack.c.bf16 %v831_v5, %v829_v4 }
 0x23f   : > { %3240 = vmatprep.subr.bf16.mxu0 %v3239_v2  ;;  %v764_v2 = vld [vmem:[%s7079_s3 + $0xd00] sm:$0xff] }
 0x240   : > { %v3197_v19 = vpack.c.bf16 %v766_v10, %v764_v2  ;;  %v785_v2 = vld [vmem:[%s7079_s3 + $0xda8] sm:$0xff]  ;;  %v787_v10 = vld [vmem:[%s7079_s3 + $0xdb8] sm:$0xff] }
 0x245   : > { %3178 = vmatpush1.bf16.xpose.msra.mxu1 %v3177_v20  ;;  %v3261_v20 = vpack.c.bf16 %v830_v12, %v828_v11  ;;  %v849_v11 = vld [vmem:[%s7079_s3 + $0xfa8] sm:$0xff]  ;;  %v851_v12 = vld [vmem:[%s7079_s3 + $0xfb8] sm:$0xff] }
 0x246   : > { %3242 = vmatpush1.bf16.xpose.msra.mxu0 %v3241_v21  ;;  %3180 = vmatprep.subr.bf16.mxu1 %v3179_v22  ;;  %v3199_v21 = vpack.c.bf16 %v771_v15, %v769_v13  ;;  %v3263_v22 = vpack.c.bf16 %v835_v17, %v833_v16  ;;  %v3215_v16 = vpack.c.bf16 %v787_v10, %v785_v2  ;;  %v871_v2 = vld [vmem:[%s7079_s3 + $0x1058] sm:$0xff]  ;;  %v933_v10 = vld [vmem:[%s7079_s3 + $0x1248] sm:$0xff] }
 0x247   : > { %3244 = vmatprep.subr.bf16.mxu0 %v3243_v23  ;;  %v768_v23 = vld [vmem:[%s7079_s3 + $0xd20] sm:$0xff]  ;;  %v3279_v17 = vpack.c.bf16 %v851_v12, %v849_v11  ;;  %v935_v11 = vld [vmem:[%s7079_s3 + $0x1258] sm:$0xff] }
 0x248   : > { %v3201_v31 = vpack.c.bf16 %v770_v24, %v768_v23  ;;  %v789_v23 = vld [vmem:[%s7079_s3 + $0xdc8] sm:$0xff]  ;;  %v791_v24 = vld [vmem:[%s7079_s3 + $0xdd8] sm:$0xff] }
 0x24d   : > { %3182 = vmatpush1.bf16.xpose.msra.mxu1 %v3181_v32  ;;  %v3265_v32 = vpack.c.bf16 %v834_v26, %v832_v25  ;;  %v853_v25 = vld [vmem:[%s7079_s3 + $0xfc8] sm:$0xff]  ;;  %v855_v26 = vld [vmem:[%s7079_s3 + $0xfd8] sm:$0xff] }
 0x24e   : > { %3246 = vmatpush1.bf16.xpose.msra.mxu0 %v3245_v33  ;;  %3184 = vmatprep.subr.bf16.mxu1 %v3183_v35  ;;  %v3203_v33 = vpack.c.bf16 %v775_v28, %v773_v27  ;;  %v3267_v35 = vpack.c.bf16 %v839_v30, %v837_v29  ;;  %v3219_v29 = vpack.c.bf16 %v791_v24, %v789_v23  ;;  %v875_v23 = vld [vmem:[%s7079_s3 + $0x1078] sm:$0xff]  ;;  %v937_v24 = vld [vmem:[%s7079_s3 + $0x1268] sm:$0xff] }
 0x24f   : > { %3248 = vmatprep.subr.bf16.mxu0 %v3247_v36  ;;  %v772_v36 = vld [vmem:[%s7079_s3 + $0xd40] sm:$0xff]  ;;  %v3283_v30 = vpack.c.bf16 %v855_v26, %v853_v25  ;;  %v939_v25 = vld [vmem:[%s7079_s3 + $0x1278] sm:$0xff] }
 0x250   : > { %v3205_v44 = vpack.c.bf16 %v774_v37, %v772_v36  ;;  %v793_v36 = vld [vmem:[%s7079_s3 + $0xde8] sm:$0xff]  ;;  %v795_v37 = vld [vmem:[%s7079_s3 + $0xdf8] sm:$0xff] }
 0x255   : > { %3186 = vmatpush1.bf16.xpose.msra.mxu1 %v3185_v45  ;;  %v3269_v45 = vpack.c.bf16 %v838_v39, %v836_v38  ;;  %v857_v38 = vld [vmem:[%s7079_s3 + $0xfe8] sm:$0xff]  ;;  %v859_v39 = vld [vmem:[%s7079_s3 + $0xff8] sm:$0xff] }
 0x256   : > { %3250 = vmatpush1.bf16.xpose.msra.mxu0 %v3249_v46  ;;  %3188 = vmatprep.subr.bf16.mxu1 %v3187_v47  ;;  %v3207_v46 = vpack.c.bf16 %v779_v41, %v777_v40  ;;  %v3271_v47 = vpack.c.bf16 %v843_v43, %v841_v42  ;;  %v3223_v42 = vpack.c.bf16 %v795_v37, %v793_v36  ;;  %v879_v36 = vld [vmem:[%s7079_s3 + $0x1098] sm:$0xff]  ;;  %v941_v37 = vld [vmem:[%s7079_s3 + $0x1288] sm:$0xff] }
 0x257   : > { %3252 = vmatprep.subr.bf16.mxu0 %v3251_v48  ;;  %v776_v48 = vld [vmem:[%s7079_s3 + $0xd60] sm:$0xff]  ;;  %v3287_v43 = vpack.c.bf16 %v859_v39, %v857_v38  ;;  %v943_v38 = vld [vmem:[%s7079_s3 + $0x1298] sm:$0xff] }
 0x258   : > { %v3209_v62 = vpack.c.bf16 %v778_v49, %v776_v48  ;;  %v861_v48 = vld [vmem:[%s7079_s3 + $0x1008] sm:$0xff]  ;;  %v863_v49 = vld [vmem:[%s7079_s3 + $0x1018] sm:$0xff] }
 0x259   : > { %v3291_v54 = vpack.c.bf16 %v863_v49, %v861_v48  ;;  %v883_v48 = vld [vmem:[%s7079_s3 + $0x10b8] sm:$0xff]  ;;  %v945_v49 = vld [vmem:[%s7079_s3 + $0x12a8] sm:$0xff] }
 0x25d   : > { %3190 = vmatpush1.bf16.xpose.msra.mxu1 %v3189_v57 }
 0x25e   : > { %3254 = vmatpush1.bf16.xpose.msra.mxu0 %v3253_v58  ;;  %3192 = vmatprep.subr.bf16.mxu1 %v3191_v59  ;;  %v845_v58 = vld [vmem:[%s7079_s3 + $0xf88] sm:$0xff]  ;;  %v847_v59 = vld [vmem:[%s7079_s3 + $0xf98] sm:$0xff] }
 0x25f   : > { %3256 = vmatprep.subr.bf16.mxu0 %v3255_v60  ;;  %v3275_v4 = vpack.c.bf16 %v847_v59, %v845_v58  ;;  %v924_v58 = vld [vmem:[%s7079_s3 + $0x1200] sm:$0xff]  ;;  %v926_v59 = vld [vmem:[%s7079_s3 + $0x1210] sm:$0xff] }
 0x265   : > { %3194 = vmatpush1.bf16.xpose.msra.mxu1 %v3193_v6  ;;  %v780_v6 = vld [vmem:[%s7079_s3 + $0xd80] sm:$0xff] }
 0x266   : > { %3258 = vmatpush1.bf16.xpose.msra.mxu0 %v3257_v7  ;;  %3196 = vmatprep.subr.bf16.mxu1 %v3195_v8  ;;  %v782_v7 = vld [vmem:[%s7079_s3 + $0xd90] sm:$0xff]  ;;  %v844_v8 = vld [vmem:[%s7079_s3 + $0xf80] sm:$0xff] }
 0x267   : > { %3260 = vmatprep.subr.bf16.mxu0 %v3259_v9  ;;  %v846_v9 = vld [vmem:[%s7079_s3 + $0xf90] sm:$0xff]  ;;  %v3213_v13 = vpack.c.bf16 %v782_v7, %v780_v6  ;;  %v928_v7 = vld [vmem:[%s7079_s3 + $0x1220] sm:$0xff] }
 0x268   : > { %v3277_v15 = vpack.c.bf16 %v846_v9, %v844_v8  ;;  %v866_v6 = vld [vmem:[%s7079_s3 + $0x1030] sm:$0xff]  ;;  %v869_v9 = vld [vmem:[%s7079_s3 + $0x1048] sm:$0xff] }
 0x269   : > { %v930_v8 = vld [vmem:[%s7079_s3 + $0x1230] sm:$0xff] }
 0x26d   : > { %3198 = vmatpush1.bf16.xpose.msra.mxu1 %v3197_v19  ;;  %v784_v19 = vld [vmem:[%s7079_s3 + $0xda0] sm:$0xff] }
 0x26e   : > { %3262 = vmatpush1.bf16.xpose.msra.mxu0 %v3261_v20  ;;  %3200 = vmatprep.subr.bf16.mxu1 %v3199_v21  ;;  %v786_v20 = vld [vmem:[%s7079_s3 + $0xdb0] sm:$0xff]  ;;  %v848_v21 = vld [vmem:[%s7079_s3 + $0xfa0] sm:$0xff] }
 0x26f   : > { %3264 = vmatprep.subr.bf16.mxu0 %v3263_v22  ;;  %v850_v22 = vld [vmem:[%s7079_s3 + $0xfb0] sm:$0xff]  ;;  %v3217_v27 = vpack.c.bf16 %v786_v20, %v784_v19  ;;  %v932_v20 = vld [vmem:[%s7079_s3 + $0x1240] sm:$0xff] }
 0x270   : > { %v3281_v28 = vpack.c.bf16 %v850_v22, %v848_v21  ;;  %v870_v19 = vld [vmem:[%s7079_s3 + $0x1050] sm:$0xff]  ;;  %v873_v22 = vld [vmem:[%s7079_s3 + $0x1068] sm:$0xff] }
 0x271   : > { %v934_v21 = vld [vmem:[%s7079_s3 + $0x1250] sm:$0xff] }
 0x275   : > { %3202 = vmatpush1.bf16.xpose.msra.mxu1 %v3201_v31  ;;  %v788_v31 = vld [vmem:[%s7079_s3 + $0xdc0] sm:$0xff] }
 0x276   : > { %3266 = vmatpush1.bf16.xpose.msra.mxu0 %v3265_v32  ;;  %3204 = vmatprep.subr.bf16.mxu1 %v3203_v33  ;;  %v790_v32 = vld [vmem:[%s7079_s3 + $0xdd0] sm:$0xff]  ;;  %v852_v33 = vld [vmem:[%s7079_s3 + $0xfc0] sm:$0xff] }
 0x277   : > { %3268 = vmatprep.subr.bf16.mxu0 %v3267_v35  ;;  %v854_v35 = vld [vmem:[%s7079_s3 + $0xfd0] sm:$0xff]  ;;  %v3221_v40 = vpack.c.bf16 %v790_v32, %v788_v31  ;;  %v936_v32 = vld [vmem:[%s7079_s3 + $0x1260] sm:$0xff] }
 0x278   : > { %v3285_v41 = vpack.c.bf16 %v854_v35, %v852_v33  ;;  %v874_v31 = vld [vmem:[%s7079_s3 + $0x1070] sm:$0xff]  ;;  %v877_v35 = vld [vmem:[%s7079_s3 + $0x1088] sm:$0xff] }
 0x279   : > { %v938_v33 = vld [vmem:[%s7079_s3 + $0x1270] sm:$0xff] }
 0x27d   : > { %3206 = vmatpush1.bf16.xpose.msra.mxu1 %v3205_v44  ;;  %v792_v44 = vld [vmem:[%s7079_s3 + $0xde0] sm:$0xff] }
 0x27e   : > { %3270 = vmatpush1.bf16.xpose.msra.mxu0 %v3269_v45  ;;  %3208 = vmatprep.subr.bf16.mxu1 %v3207_v46  ;;  %v794_v45 = vld [vmem:[%s7079_s3 + $0xdf0] sm:$0xff]  ;;  %v856_v46 = vld [vmem:[%s7079_s3 + $0xfe0] sm:$0xff] }
 0x27f   : > { %v1580_v51 = vpop.f32.mrb[2].mxu1  ;;  %v1651_v52 = vpop.f32.mrb[6].mxu0  ;;  %3272 = vmatprep.subr.bf16.mxu0 %v3271_v47  ;;  %v858_v47 = vld [vmem:[%s7079_s3 + $0xff0] sm:$0xff] }
 0x280   : > { %v1582_v56 = vpop.f32.mrb[3].mxu1  ;;  %v1653_v57 = vpop.f32.mrb[7].mxu0  ;;  %v3289_v53 = vpack.c.bf16 %v858_v47, %v856_v46  ;;  %v942_v46 = vld [vmem:[%s7079_s3 + $0x1290] sm:$0xff]  ;;  %v881_v47 = vld [vmem:[%s7079_s3 + $0x10a8] sm:$0xff] }
 0x281   : > { %v2557_v60 = vcombine.low %v1580_v51, %v1582_v56  ;;  %v2558_v61 = vcombine.low %v1651_v52, %v1653_v57  ;;  %v927_v51 = vld [vmem:[%s7079_s3 + $0x1218] sm:$0xff]  ;;  %v3225_v52 = vpack.c.bf16 %v794_v45, %v792_v44  ;;  %v860_v56 = vld [vmem:[%s7079_s3 + $0x1000] sm:$0xff]  ;;  %v862_v57 = vld [vmem:[%s7079_s3 + $0x1010] sm:$0xff] }
 0x282   : > { %v3355_v55 = vpack.c.bf16 %v927_v51, %v925_v50  ;;  %v878_v44 = vld [vmem:[%s7079_s3 + $0x1090] sm:$0xff]  ;;  %v940_v45 = vld [vmem:[%s7079_s3 + $0x1280] sm:$0xff]  ;;  %v947_v50 = vld [vmem:[%s7079_s3 + $0x12b8] sm:$0xff] }
 0x283   : > { %v2565_v1 = vrot.slane %v2557_v60, %v5000_v34  ;;  %v2572_v3 = vrot.slane %v2558_v61, %v5000_v34  ;;  %v865_v60 = vld [vmem:[%s7079_s3 + $0x1028] sm:$0xff]  ;;  %v867_v61 = vld [vmem:[%s7079_s3 + $0x1038] sm:$0xff] }
 0x285   : > { %v2573_v5 = vcombine.low %v2565_v1, %v2572_v3  ;;  %3210 = vmatpush1.bf16.xpose.msra.mxu1 %v3209_v62  ;;  %v3293_v62 = vpack.c.bf16 %v862_v57, %v860_v56  ;;  %v3357_v1 = vpack.c.bf16 %v926_v59, %v924_v58  ;;  %v3295_v3 = vpack.c.bf16 %v867_v61, %v865_v60  ;;  %v882_v56 = vld [vmem:[%s7079_s3 + $0x10b0] sm:$0xff]  ;;  %v944_v57 = vld [vmem:[%s7079_s3 + $0x12a0] sm:$0xff]  ;;  %v885_v59 = vld [vmem:[%s7079_s3 + $0x10c8] sm:$0xff] }
 0x286   : > { %3274 = vmatpush1.bf16.xpose.msra.mxu0 %v3273_v63  ;;  %3212 = vmatprep.subr.bf16.mxu1 %v3211_v0  ;;  %v929_v63 = vld [vmem:[%s7079_s3 + $0x1228] sm:$0xff]  ;;  %v931_v0 = vld [vmem:[%s7079_s3 + $0x1238] sm:$0xff]  ;;  %v946_v58 = vld [vmem:[%s7079_s3 + $0x12b0] sm:$0xff] }
 0x287   : > { %2685 = vst [vmem:[%s5023_s22 + $0x8] sm:$0xff] %v2573_v5  ;;  %3276 = vmatprep.subr.bf16.mxu0 %v3275_v4  ;;  %v3359_v4 = vpack.c.bf16 %v931_v0, %v929_v63  ;;  %v864_v5 = vld [vmem:[%s7079_s3 + $0x1020] sm:$0xff]  ;;  %v887_v60 = vld [vmem:[%s7079_s3 + $0x10d8] sm:$0xff]  ;;  %v949_v61 = vld [vmem:[%s7079_s3 + $0x12c8] sm:$0xff]  ;;  %v3377_v0 = vpack.c.bf16 %v946_v58, %v944_v57 }
 0x288   : > { %v3297_v12 = vpack.c.bf16 %v866_v6, %v864_v5  ;;  %v886_v5 = vld [vmem:[%s7079_s3 + $0x10d0] sm:$0xff]  ;;  %v948_v6 = vld [vmem:[%s7079_s3 + $0x12c0] sm:$0xff]  ;;  %v905_v58 = vld [vmem:[%s7079_s3 + $0x1168] sm:$0xff] }
 0x289   : > { %v966_v57 = vld [vmem:[%s7079_s3 + $0x1350] sm:$0xff] }
 0x28d   : > { %3214 = vmatpush1.bf16.xpose.msra.mxu1 %v3213_v13  ;;  %v3361_v13 = vpack.c.bf16 %v930_v8, %v928_v7  ;;  %v950_v7 = vld [vmem:[%s7079_s3 + $0x12d0] sm:$0xff]  ;;  %v889_v8 = vld [vmem:[%s7079_s3 + $0x10e8] sm:$0xff] }
 0x28e   : > { %3278 = vmatpush1.bf16.xpose.msra.mxu0 %v3277_v15  ;;  %3216 = vmatprep.subr.bf16.mxu1 %v3215_v16  ;;  %v3299_v15 = vpack.c.bf16 %v871_v2, %v869_v9  ;;  %v3363_v16 = vpack.c.bf16 %v935_v11, %v933_v10  ;;  %v891_v9 = vld [vmem:[%s7079_s3 + $0x10f8] sm:$0xff]  ;;  %v953_v2 = vld [vmem:[%s7079_s3 + $0x12e8] sm:$0xff] }
 0x28f   : > { %3280 = vmatprep.subr.bf16.mxu0 %v3279_v17  ;;  %v868_v17 = vld [vmem:[%s7079_s3 + $0x1040] sm:$0xff]  ;;  %v955_v10 = vld [vmem:[%s7079_s3 + $0x12f8] sm:$0xff] }
 0x290   : > { %v3301_v26 = vpack.c.bf16 %v870_v19, %v868_v17  ;;  %v890_v17 = vld [vmem:[%s7079_s3 + $0x10f0] sm:$0xff]  ;;  %v952_v19 = vld [vmem:[%s7079_s3 + $0x12e0] sm:$0xff] }
 0x295   : > { %3218 = vmatpush1.bf16.xpose.msra.mxu1 %v3217_v27  ;;  %v3365_v27 = vpack.c.bf16 %v934_v21, %v932_v20  ;;  %v954_v20 = vld [vmem:[%s7079_s3 + $0x12f0] sm:$0xff]  ;;  %v893_v21 = vld [vmem:[%s7079_s3 + $0x1108] sm:$0xff] }
 0x296   : > { %3282 = vmatpush1.bf16.xpose.msra.mxu0 %v3281_v28  ;;  %3220 = vmatprep.subr.bf16.mxu1 %v3219_v29  ;;  %v3303_v28 = vpack.c.bf16 %v875_v23, %v873_v22  ;;  %v3367_v29 = vpack.c.bf16 %v939_v25, %v937_v24  ;;  %v895_v22 = vld [vmem:[%s7079_s3 + $0x1118] sm:$0xff]  ;;  %v957_v23 = vld [vmem:[%s7079_s3 + $0x1308] sm:$0xff] }
 0x297   : > { %3284 = vmatprep.subr.bf16.mxu0 %v3283_v30  ;;  %v872_v30 = vld [vmem:[%s7079_s3 + $0x1060] sm:$0xff]  ;;  %v959_v24 = vld [vmem:[%s7079_s3 + $0x1318] sm:$0xff] }
 0x298   : > { %v3305_v39 = vpack.c.bf16 %v874_v31, %v872_v30  ;;  %v894_v30 = vld [vmem:[%s7079_s3 + $0x1110] sm:$0xff]  ;;  %v956_v31 = vld [vmem:[%s7079_s3 + $0x1300] sm:$0xff] }
 0x29d   : > { %3222 = vmatpush1.bf16.xpose.msra.mxu1 %v3221_v40  ;;  %v3369_v40 = vpack.c.bf16 %v938_v33, %v936_v32  ;;  %v958_v32 = vld [vmem:[%s7079_s3 + $0x1310] sm:$0xff]  ;;  %v897_v33 = vld [vmem:[%s7079_s3 + $0x1128] sm:$0xff] }
 0x29e   : > { %3286 = vmatpush1.bf16.xpose.msra.mxu0 %v3285_v41  ;;  %3224 = vmatprep.subr.bf16.mxu1 %v3223_v42  ;;  %v3307_v41 = vpack.c.bf16 %v879_v36, %v877_v35  ;;  %v3371_v42 = vpack.c.bf16 %v943_v38, %v941_v37  ;;  %v899_v35 = vld [vmem:[%s7079_s3 + $0x1138] sm:$0xff]  ;;  %v961_v36 = vld [vmem:[%s7079_s3 + $0x1328] sm:$0xff] }
 0x29f   : > { %3288 = vmatprep.subr.bf16.mxu0 %v3287_v43  ;;  %v876_v43 = vld [vmem:[%s7079_s3 + $0x1080] sm:$0xff]  ;;  %v963_v37 = vld [vmem:[%s7079_s3 + $0x1338] sm:$0xff] }
 0x2a0   : > { %v3309_v51 = vpack.c.bf16 %v878_v44, %v876_v43  ;;  %v898_v43 = vld [vmem:[%s7079_s3 + $0x1130] sm:$0xff]  ;;  %v960_v44 = vld [vmem:[%s7079_s3 + $0x1320] sm:$0xff] }
 0x2a5   : > { %3226 = vmatpush1.bf16.xpose.msra.mxu1 %v3225_v52  ;;  %v3373_v52 = vpack.c.bf16 %v942_v46, %v940_v45  ;;  %v962_v45 = vld [vmem:[%s7079_s3 + $0x1330] sm:$0xff]  ;;  %v901_v46 = vld [vmem:[%s7079_s3 + $0x1148] sm:$0xff] }
 0x2a6   : > { %3290 = vmatpush1.bf16.xpose.msra.mxu0 %v3289_v53  ;;  %3292 = vmatprep.subr.bf16.mxu1 %v3291_v54  ;;  %v3311_v53 = vpack.c.bf16 %v883_v48, %v881_v47  ;;  %v3375_v54 = vpack.c.bf16 %v947_v50, %v945_v49  ;;  %v903_v47 = vld [vmem:[%s7079_s3 + $0x1158] sm:$0xff]  ;;  %v965_v48 = vld [vmem:[%s7079_s3 + $0x1348] sm:$0xff] }
 0x2a7   : > { %3356 = vmatprep.subr.bf16.mxu0 %v3355_v55  ;;  %v880_v55 = vld [vmem:[%s7079_s3 + $0x10a0] sm:$0xff]  ;;  %v967_v49 = vld [vmem:[%s7079_s3 + $0x1358] sm:$0xff] }
 0x2a8   : > { %v3313_v63 = vpack.c.bf16 %v882_v56, %v880_v55  ;;  %v902_v55 = vld [vmem:[%s7079_s3 + $0x1150] sm:$0xff]  ;;  %v964_v56 = vld [vmem:[%s7079_s3 + $0x1340] sm:$0xff] }
 0x2ac   : > { %1863 = vmatmul.mubr.f32.vlgmr.msra.gmra.mrb[6].mxu1 %v4355_v18 }
 0x2ad   : > { %1934 = vmatmul.mubr.f32.vlgmr.msra.gmra.mrb[10].mxu0 %v4355_v18  ;;  %3294 = vmatpush1.bf16.xpose.msra.mxu1 %v3293_v62  ;;  %v951_v62 = vld [vmem:[%s7079_s3 + $0x12d8] sm:$0xff] }
 0x2ae   : > { %2004 = vmatprep.mubr.f32.mxu1 %v4353_v14  ;;  %3358 = vmatpush1.bf16.xpose.msra.mxu0 %v3357_v1  ;;  %v3315_v1 = vpack.c.bf16 %v887_v60, %v885_v59  ;;  %v907_v59 = vld [vmem:[%s7079_s3 + $0x1178] sm:$0xff]  ;;  %v969_v60 = vld [vmem:[%s7079_s3 + $0x1368] sm:$0xff] }
 0x2af   : > { %2075 = vmatprep.mubr.f32.mxu0 %v4353_v14  ;;  %3296 = vmatprep.subr.bf16.mxu1 %v3295_v3  ;;  %v3379_v3 = vpack.c.bf16 %v951_v62, %v949_v61  ;;  %v971_v61 = vld [vmem:[%s7079_s3 + $0x1378] sm:$0xff] }
 0x2b0   : > { %3360 = vmatprep.subr.bf16.mxu0 %v3359_v4  ;;  %v884_v4 = vld [vmem:[%s7079_s3 + $0x10c0] sm:$0xff] }
 0x2b1   : > { %v3317_v11 = vpack.c.bf16 %v886_v5, %v884_v4  ;;  %v906_v4 = vld [vmem:[%s7079_s3 + $0x1170] sm:$0xff]  ;;  %v968_v5 = vld [vmem:[%s7079_s3 + $0x1360] sm:$0xff] }
 0x2b5   : > { %3298 = vmatpush1.bf16.xpose.msra.mxu1 %v3297_v12  ;;  %v3381_v12 = vpack.c.bf16 %v950_v7, %v948_v6  ;;  %v970_v7 = vld [vmem:[%s7079_s3 + $0x1370] sm:$0xff] }
 0x2b6   : > { %3362 = vmatpush1.bf16.xpose.msra.mxu0 %v3361_v13  ;;  %3300 = vmatprep.subr.bf16.mxu1 %v3299_v15  ;;  %v3319_v13 = vpack.c.bf16 %v891_v9, %v889_v8  ;;  %v3383_v15 = vpack.c.bf16 %v955_v10, %v953_v2  ;;  %v909_v8 = vld [vmem:[%s7079_s3 + $0x1188] sm:$0xff]  ;;  %v911_v9 = vld [vmem:[%s7079_s3 + $0x1198] sm:$0xff] }
 0x2b7   : > { %3364 = vmatprep.subr.bf16.mxu0 %v3363_v16  ;;  %v888_v16 = vld [vmem:[%s7079_s3 + $0x10e0] sm:$0xff] }
 0x2b8   : > { %v3321_v25 = vpack.c.bf16 %v890_v17, %v888_v16 }
 0x2bd   : > { %3302 = vmatpush1.bf16.xpose.msra.mxu1 %v3301_v26  ;;  %v3385_v26 = vpack.c.bf16 %v954_v20, %v952_v19  ;;  %v3401_v19 = vpack.c.bf16 %v970_v7, %v968_v5  ;;  %v3339_v20 = vpack.c.bf16 %v911_v9, %v909_v8  ;;  %v1053_v5 = vld [vmem:[%s7079_s3 + $0x1608] sm:$0xff] }
 0x2be   : > { %3366 = vmatpush1.bf16.xpose.msra.mxu0 %v3365_v27  ;;  %3304 = vmatprep.subr.bf16.mxu1 %v3303_v28  ;;  %v3323_v27 = vpack.c.bf16 %v895_v22, %v893_v21  ;;  %v3387_v28 = vpack.c.bf16 %v959_v24, %v957_v23 }
 0x2bf   : > { %3368 = vmatprep.subr.bf16.mxu0 %v3367_v29  ;;  %v892_v29 = vld [vmem:[%s7079_s3 + $0x1100] sm:$0xff] }
 0x2c0   : > { %v3325_v38 = vpack.c.bf16 %v894_v30, %v892_v29  ;;  %v913_v29 = vld [vmem:[%s7079_s3 + $0x11a8] sm:$0xff]  ;;  %v915_v30 = vld [vmem:[%s7079_s3 + $0x11b8] sm:$0xff] }
 0x2c5   : > { %3306 = vmatpush1.bf16.xpose.msra.mxu1 %v3305_v39  ;;  %v3389_v39 = vpack.c.bf16 %v958_v32, %v956_v31  ;;  %v977_v31 = vld [vmem:[%s7079_s3 + $0x13a8] sm:$0xff]  ;;  %v979_v32 = vld [vmem:[%s7079_s3 + $0x13b8] sm:$0xff] }
 0x2c6   : > { %3370 = vmatpush1.bf16.xpose.msra.mxu0 %v3369_v40  ;;  %3308 = vmatprep.subr.bf16.mxu1 %v3307_v41  ;;  %v3327_v40 = vpack.c.bf16 %v899_v35, %v897_v33  ;;  %v3391_v41 = vpack.c.bf16 %v963_v37, %v961_v36  ;;  %v3343_v36 = vpack.c.bf16 %v915_v30, %v913_v29  ;;  %v999_v29 = vld [vmem:[%s7079_s3 + $0x1458] sm:$0xff]  ;;  %v1061_v30 = vld [vmem:[%s7079_s3 + $0x1648] sm:$0xff] }
 0x2c7   : > { %3372 = vmatprep.subr.bf16.mxu0 %v3371_v42  ;;  %v896_v42 = vld [vmem:[%s7079_s3 + $0x1120] sm:$0xff]  ;;  %v3407_v37 = vpack.c.bf16 %v979_v32, %v977_v31  ;;  %v1063_v31 = vld [vmem:[%s7079_s3 + $0x1658] sm:$0xff] }
 0x2c8   : > { %v3329_v50 = vpack.c.bf16 %v898_v43, %v896_v42  ;;  %v917_v42 = vld [vmem:[%s7079_s3 + $0x11c8] sm:$0xff]  ;;  %v919_v43 = vld [vmem:[%s7079_s3 + $0x11d8] sm:$0xff] }
 0x2cd   : > { %3310 = vmatpush1.bf16.xpose.msra.mxu1 %v3309_v51  ;;  %v3393_v51 = vpack.c.bf16 %v962_v45, %v960_v44  ;;  %v981_v44 = vld [vmem:[%s7079_s3 + $0x13c8] sm:$0xff]  ;;  %v983_v45 = vld [vmem:[%s7079_s3 + $0x13d8] sm:$0xff] }
 0x2ce   : > { %3374 = vmatpush1.bf16.xpose.msra.mxu0 %v3373_v52  ;;  %3312 = vmatprep.subr.bf16.mxu1 %v3311_v53  ;;  %v3331_v52 = vpack.c.bf16 %v903_v47, %v901_v46  ;;  %v3395_v53 = vpack.c.bf16 %v967_v49, %v965_v48  ;;  %v3347_v48 = vpack.c.bf16 %v919_v43, %v917_v42  ;;  %v1003_v42 = vld [vmem:[%s7079_s3 + $0x1478] sm:$0xff]  ;;  %v1065_v43 = vld [vmem:[%s7079_s3 + $0x1668] sm:$0xff] }
 0x2cf   : > { %3376 = vmatprep.subr.bf16.mxu0 %v3375_v54  ;;  %v900_v54 = vld [vmem:[%s7079_s3 + $0x1140] sm:$0xff]  ;;  %v3411_v49 = vpack.c.bf16 %v983_v45, %v981_v44  ;;  %v1067_v44 = vld [vmem:[%s7079_s3 + $0x1678] sm:$0xff] }
 0x2d0   : > { %v3333_v62 = vpack.c.bf16 %v902_v55, %v900_v54  ;;  %v921_v54 = vld [vmem:[%s7079_s3 + $0x11e8] sm:$0xff]  ;;  %v923_v55 = vld [vmem:[%s7079_s3 + $0x11f8] sm:$0xff] }
 0x2d5   : > { %3314 = vmatpush1.bf16.xpose.msra.mxu1 %v3313_v63  ;;  %v3397_v63 = vpack.c.bf16 %v966_v57, %v964_v56  ;;  %v985_v56 = vld [vmem:[%s7079_s3 + $0x13e8] sm:$0xff]  ;;  %v987_v57 = vld [vmem:[%s7079_s3 + $0x13f8] sm:$0xff] }
 0x2d6   : > { %3378 = vmatpush1.bf16.xpose.msra.mxu0 %v3377_v0  ;;  %3316 = vmatprep.subr.bf16.mxu1 %v3315_v1  ;;  %v3335_v0 = vpack.c.bf16 %v907_v59, %v905_v58  ;;  %v3399_v1 = vpack.c.bf16 %v971_v61, %v969_v60  ;;  %v3351_v60 = vpack.c.bf16 %v923_v55, %v921_v54  ;;  %v1007_v54 = vld [vmem:[%s7079_s3 + $0x1498] sm:$0xff]  ;;  %v1069_v55 = vld [vmem:[%s7079_s3 + $0x1688] sm:$0xff] }
 0x2d7   : > { %3380 = vmatprep.subr.bf16.mxu0 %v3379_v3  ;;  %v904_v3 = vld [vmem:[%s7079_s3 + $0x1160] sm:$0xff]  ;;  %v3415_v61 = vpack.c.bf16 %v987_v57, %v985_v56  ;;  %v1071_v56 = vld [vmem:[%s7079_s3 + $0x1698] sm:$0xff] }
 0x2d8   : > { %v3337_v16 = vpack.c.bf16 %v906_v4, %v904_v3  ;;  %v989_v3 = vld [vmem:[%s7079_s3 + $0x1408] sm:$0xff]  ;;  %v991_v4 = vld [vmem:[%s7079_s3 + $0x1418] sm:$0xff] }
 0x2d9   : > { %v3419_v9 = vpack.c.bf16 %v991_v4, %v989_v3  ;;  %v1011_v3 = vld [vmem:[%s7079_s3 + $0x14b8] sm:$0xff]  ;;  %v1073_v4 = vld [vmem:[%s7079_s3 + $0x16a8] sm:$0xff] }
 0x2dd   : > { %3318 = vmatpush1.bf16.xpose.msra.mxu1 %v3317_v11  ;;  %v973_v11 = vld [vmem:[%s7079_s3 + $0x1388] sm:$0xff] }
 0x2de   : > { %3382 = vmatpush1.bf16.xpose.msra.mxu0 %v3381_v12  ;;  %3320 = vmatprep.subr.bf16.mxu1 %v3319_v13  ;;  %v975_v12 = vld [vmem:[%s7079_s3 + $0x1398] sm:$0xff] }
 0x2df   : > { %3384 = vmatprep.subr.bf16.mxu0 %v3383_v15  ;;  %v3403_v22 = vpack.c.bf16 %v975_v12, %v973_v11  ;;  %v990_v11 = vld [vmem:[%s7079_s3 + $0x1410] sm:$0xff]  ;;  %v1052_v12 = vld [vmem:[%s7079_s3 + $0x1600] sm:$0xff] }
 0x2e5   : > { %3322 = vmatpush1.bf16.xpose.msra.mxu1 %v3321_v25  ;;  %v908_v25 = vld [vmem:[%s7079_s3 + $0x1180] sm:$0xff] }
 0x2e6   : > { %3386 = vmatpush1.bf16.xpose.msra.mxu0 %v3385_v26  ;;  %3324 = vmatprep.subr.bf16.mxu1 %v3323_v27  ;;  %v910_v26 = vld [vmem:[%s7079_s3 + $0x1190] sm:$0xff]  ;;  %v972_v27 = vld [vmem:[%s7079_s3 + $0x1380] sm:$0xff] }
 0x2e7   : > { %3388 = vmatprep.subr.bf16.mxu0 %v3387_v28  ;;  %v974_v28 = vld [vmem:[%s7079_s3 + $0x1390] sm:$0xff]  ;;  %v3341_v33 = vpack.c.bf16 %v910_v26, %v908_v25  ;;  %v1056_v26 = vld [vmem:[%s7079_s3 + $0x1620] sm:$0xff] }
 0x2e8   : > { %v3405_v35 = vpack.c.bf16 %v974_v28, %v972_v27  ;;  %v994_v25 = vld [vmem:[%s7079_s3 + $0x1430] sm:$0xff]  ;;  %v997_v28 = vld [vmem:[%s7079_s3 + $0x1448] sm:$0xff] }
 0x2e9   : > { %v1058_v27 = vld [vmem:[%s7079_s3 + $0x1630] sm:$0xff] }
 0x2ed   : > { %3326 = vmatpush1.bf16.xpose.msra.mxu1 %v3325_v38  ;;  %v912_v38 = vld [vmem:[%s7079_s3 + $0x11a0] sm:$0xff] }
 0x2ee   : > { %3390 = vmatpush1.bf16.xpose.msra.mxu0 %v3389_v39  ;;  %3328 = vmatprep.subr.bf16.mxu1 %v3327_v40  ;;  %v914_v39 = vld [vmem:[%s7079_s3 + $0x11b0] sm:$0xff]  ;;  %v976_v40 = vld [vmem:[%s7079_s3 + $0x13a0] sm:$0xff] }
 0x2ef   : > { %3392 = vmatprep.subr.bf16.mxu0 %v3391_v41  ;;  %v978_v41 = vld [vmem:[%s7079_s3 + $0x13b0] sm:$0xff]  ;;  %v3345_v46 = vpack.c.bf16 %v914_v39, %v912_v38  ;;  %v1060_v39 = vld [vmem:[%s7079_s3 + $0x1640] sm:$0xff] }
 0x2f0   : > { %v3409_v47 = vpack.c.bf16 %v978_v41, %v976_v40  ;;  %v998_v38 = vld [vmem:[%s7079_s3 + $0x1450] sm:$0xff]  ;;  %v1001_v41 = vld [vmem:[%s7079_s3 + $0x1468] sm:$0xff] }
 0x2f1   : > { %v1062_v40 = vld [vmem:[%s7079_s3 + $0x1650] sm:$0xff] }
 0x2f5   : > { %3330 = vmatpush1.bf16.xpose.msra.mxu1 %v3329_v50  ;;  %v916_v50 = vld [vmem:[%s7079_s3 + $0x11c0] sm:$0xff] }
 0x2f6   : > { %3394 = vmatpush1.bf16.xpose.msra.mxu0 %v3393_v51  ;;  %3332 = vmatprep.subr.bf16.mxu1 %v3331_v52  ;;  %v918_v51 = vld [vmem:[%s7079_s3 + $0x11d0] sm:$0xff]  ;;  %v980_v52 = vld [vmem:[%s7079_s3 + $0x13c0] sm:$0xff] }
 0x2f7   : > { %3396 = vmatprep.subr.bf16.mxu0 %v3395_v53  ;;  %v982_v53 = vld [vmem:[%s7079_s3 + $0x13d0] sm:$0xff]  ;;  %v3349_v58 = vpack.c.bf16 %v918_v51, %v916_v50  ;;  %v1064_v51 = vld [vmem:[%s7079_s3 + $0x1660] sm:$0xff] }
 0x2f8   : > { %v3413_v59 = vpack.c.bf16 %v982_v53, %v980_v52  ;;  %v1002_v50 = vld [vmem:[%s7079_s3 + $0x1470] sm:$0xff]  ;;  %v1005_v53 = vld [vmem:[%s7079_s3 + $0x1488] sm:$0xff] }
 0x2f9   : > { %v1066_v52 = vld [vmem:[%s7079_s3 + $0x1670] sm:$0xff] }
 0x2fd   : > { %3334 = vmatpush1.bf16.xpose.msra.mxu1 %v3333_v62  ;;  %v920_v62 = vld [vmem:[%s7079_s3 + $0x11e0] sm:$0xff] }
 0x2fe   : > { %3398 = vmatpush1.bf16.xpose.msra.mxu0 %v3397_v63  ;;  %3336 = vmatprep.subr.bf16.mxu1 %v3335_v0  ;;  %v922_v63 = vld [vmem:[%s7079_s3 + $0x11f0] sm:$0xff]  ;;  %v984_v0 = vld [vmem:[%s7079_s3 + $0x13e0] sm:$0xff] }
 0x2ff   : > { %v1722_v6 = vpop.f32.mrb[4].mxu1  ;;  %3400 = vmatprep.subr.bf16.mxu0 %v3399_v1  ;;  %v986_v1 = vld [vmem:[%s7079_s3 + $0x13f0] sm:$0xff]  ;;  %v3353_v7 = vpack.c.bf16 %v922_v63, %v920_v62  ;;  %v1068_v63 = vld [vmem:[%s7079_s3 + $0x1680] sm:$0xff] }
 0x300   : > { %v1793_v2 = vpop.f32.mrb[8].mxu0  ;;  %v1724_v10 = vpop.f32.mrb[5].mxu1  ;;  %v3417_v8 = vpack.c.bf16 %v986_v1, %v984_v0  ;;  %v1006_v62 = vld [vmem:[%s7079_s3 + $0x1490] sm:$0xff]  ;;  %v1009_v1 = vld [vmem:[%s7079_s3 + $0x14a8] sm:$0xff] }
 0x301   : > { %v2574_v13 = vcombine.low %v1722_v6, %v1724_v10  ;;  %v1795_v15 = vpop.f32.mrb[9].mxu0  ;;  %v1055_v6 = vld [vmem:[%s7079_s3 + $0x1618] sm:$0xff]  ;;  %v988_v10 = vld [vmem:[%s7079_s3 + $0x1400] sm:$0xff]  ;;  %v1070_v0 = vld [vmem:[%s7079_s3 + $0x1690] sm:$0xff] }
 0x302   : > { %v2575_v17 = vcombine.low %v1793_v2, %v1795_v15  ;;  %v3483_v2 = vpack.c.bf16 %v1055_v6, %v1053_v5  ;;  %v993_v15 = vld [vmem:[%s7079_s3 + $0x1428] sm:$0xff]  ;;  %v1075_v5 = vld [vmem:[%s7079_s3 + $0x16b8] sm:$0xff] }
 0x303   : > { %v2582_v21 = vrot.slane %v2574_v13, %v5000_v34  ;;  %v1054_v13 = vld [vmem:[%s7079_s3 + $0x1610] sm:$0xff] }
 0x304   : > { %v2589_v23 = vrot.slane %v2575_v17, %v5000_v34  ;;  %v3421_v17 = vpack.c.bf16 %v990_v11, %v988_v10  ;;  %v1010_v10 = vld [vmem:[%s7079_s3 + $0x14b0] sm:$0xff]  ;;  %v1072_v11 = vld [vmem:[%s7079_s3 + $0x16a0] sm:$0xff] }
 0x305   : > { %3338 = vmatpush1.bf16.xpose.msra.mxu1 %v3337_v16  ;;  %v995_v16 = vld [vmem:[%s7079_s3 + $0x1438] sm:$0xff] }
 0x306   : > { %v2590_v24 = vcombine.low %v2582_v21, %v2589_v23  ;;  %3402 = vmatpush1.bf16.xpose.msra.mxu0 %v3401_v19  ;;  %3340 = vmatprep.subr.bf16.mxu1 %v3339_v20  ;;  %v1057_v19 = vld [vmem:[%s7079_s3 + $0x1628] sm:$0xff]  ;;  %v1059_v20 = vld [vmem:[%s7079_s3 + $0x1638] sm:$0xff]  ;;  %v3485_v21 = vpack.c.bf16 %v1054_v13, %v1052_v12  ;;  %v1074_v12 = vld [vmem:[%s7079_s3 + $0x16b0] sm:$0xff] }
 0x307   : > { %3404 = vmatprep.subr.bf16.mxu0 %v3403_v22  ;;  %v3423_v22 = vpack.c.bf16 %v995_v16, %v993_v15  ;;  %v3487_v23 = vpack.c.bf16 %v1059_v20, %v1057_v19  ;;  %v1013_v13 = vld [vmem:[%s7079_s3 + $0x14c8] sm:$0xff]  ;;  %v1015_v15 = vld [vmem:[%s7079_s3 + $0x14d8] sm:$0xff]  ;;  %v3505_v20 = vpack.c.bf16 %v1074_v12, %v1072_v11  ;;  %v1094_v11 = vld [vmem:[%s7079_s3 + $0x1750] sm:$0xff] }
 0x308   : > { %2686 = vst [vmem:[%s5023_s22 + $0x10] sm:$0xff] %v2590_v24  ;;  %v992_v24 = vld [vmem:[%s7079_s3 + $0x1420] sm:$0xff]  ;;  %v1077_v16 = vld [vmem:[%s7079_s3 + $0x16c8] sm:$0xff] }
 0x309   : > { %v3425_v32 = vpack.c.bf16 %v994_v25, %v992_v24  ;;  %v1014_v24 = vld [vmem:[%s7079_s3 + $0x14d0] sm:$0xff]  ;;  %v1076_v25 = vld [vmem:[%s7079_s3 + $0x16c0] sm:$0xff]  ;;  %v1033_v12 = vld [vmem:[%s7079_s3 + $0x1568] sm:$0xff] }
 0x30d   : > { %3342 = vmatpush1.bf16.xpose.msra.mxu1 %v3341_v33  ;;  %v3489_v33 = vpack.c.bf16 %v1058_v27, %v1056_v26  ;;  %v1078_v26 = vld [vmem:[%s7079_s3 + $0x16d0] sm:$0xff]  ;;  %v1017_v27 = vld [vmem:[%s7079_s3 + $0x14e8] sm:$0xff] }
 0x30e   : > { %3406 = vmatpush1.bf16.xpose.msra.mxu0 %v3405_v35  ;;  %3344 = vmatprep.subr.bf16.mxu1 %v3343_v36  ;;  %v3427_v35 = vpack.c.bf16 %v999_v29, %v997_v28  ;;  %v3491_v36 = vpack.c.bf16 %v1063_v31, %v1061_v30  ;;  %v1019_v28 = vld [vmem:[%s7079_s3 + $0x14f8] sm:$0xff]  ;;  %v1081_v29 = vld [vmem:[%s7079_s3 + $0x16e8] sm:$0xff] }
 0x30f   : > { %3408 = vmatprep.subr.bf16.mxu0 %v3407_v37  ;;  %v996_v37 = vld [vmem:[%s7079_s3 + $0x1440] sm:$0xff]  ;;  %v1083_v30 = vld [vmem:[%s7079_s3 + $0x16f8] sm:$0xff] }
 0x310   : > { %v3429_v45 = vpack.c.bf16 %v998_v38, %v996_v37  ;;  %v1018_v37 = vld [vmem:[%s7079_s3 + $0x14f0] sm:$0xff]  ;;  %v1080_v38 = vld [vmem:[%s7079_s3 + $0x16e0] sm:$0xff] }
 0x315   : > { %3346 = vmatpush1.bf16.xpose.msra.mxu1 %v3345_v46  ;;  %v3493_v46 = vpack.c.bf16 %v1062_v40, %v1060_v39  ;;  %v1082_v39 = vld [vmem:[%s7079_s3 + $0x16f0] sm:$0xff]  ;;  %v1021_v40 = vld [vmem:[%s7079_s3 + $0x1508] sm:$0xff] }
 0x316   : > { %3410 = vmatpush1.bf16.xpose.msra.mxu0 %v3409_v47  ;;  %3348 = vmatprep.subr.bf16.mxu1 %v3347_v48  ;;  %v3431_v47 = vpack.c.bf16 %v1003_v42, %v1001_v41  ;;  %v3495_v48 = vpack.c.bf16 %v1067_v44, %v1065_v43  ;;  %v1023_v41 = vld [vmem:[%s7079_s3 + $0x1518] sm:$0xff]  ;;  %v1085_v42 = vld [vmem:[%s7079_s3 + $0x1708] sm:$0xff] }
 0x317   : > { %3412 = vmatprep.subr.bf16.mxu0 %v3411_v49  ;;  %v1000_v49 = vld [vmem:[%s7079_s3 + $0x1460] sm:$0xff]  ;;  %v1087_v43 = vld [vmem:[%s7079_s3 + $0x1718] sm:$0xff] }
 0x318   : > { %v3433_v57 = vpack.c.bf16 %v1002_v50, %v1000_v49  ;;  %v1022_v49 = vld [vmem:[%s7079_s3 + $0x1510] sm:$0xff]  ;;  %v1084_v50 = vld [vmem:[%s7079_s3 + $0x1700] sm:$0xff] }
 0x31d   : > { %3350 = vmatpush1.bf16.xpose.msra.mxu1 %v3349_v58  ;;  %v3497_v58 = vpack.c.bf16 %v1066_v52, %v1064_v51  ;;  %v1086_v51 = vld [vmem:[%s7079_s3 + $0x1710] sm:$0xff]  ;;  %v1025_v52 = vld [vmem:[%s7079_s3 + $0x1528] sm:$0xff] }
 0x31e   : > { %3414 = vmatpush1.bf16.xpose.msra.mxu0 %v3413_v59  ;;  %3352 = vmatprep.subr.bf16.mxu1 %v3351_v60  ;;  %v3435_v59 = vpack.c.bf16 %v1007_v54, %v1005_v53  ;;  %v3499_v60 = vpack.c.bf16 %v1071_v56, %v1069_v55  ;;  %v1027_v53 = vld [vmem:[%s7079_s3 + $0x1538] sm:$0xff]  ;;  %v1089_v54 = vld [vmem:[%s7079_s3 + $0x1728] sm:$0xff] }
 0x31f   : > { %3416 = vmatprep.subr.bf16.mxu0 %v3415_v61  ;;  %v1004_v61 = vld [vmem:[%s7079_s3 + $0x1480] sm:$0xff]  ;;  %v1091_v55 = vld [vmem:[%s7079_s3 + $0x1738] sm:$0xff] }
 0x320   : > { %v3437_v6 = vpack.c.bf16 %v1006_v62, %v1004_v61  ;;  %v1026_v61 = vld [vmem:[%s7079_s3 + $0x1530] sm:$0xff]  ;;  %v1088_v62 = vld [vmem:[%s7079_s3 + $0x1720] sm:$0xff] }
 0x325   : > { %3354 = vmatpush1.bf16.xpose.msra.mxu1 %v3353_v7  ;;  %v3501_v7 = vpack.c.bf16 %v1070_v0, %v1068_v63  ;;  %v1090_v63 = vld [vmem:[%s7079_s3 + $0x1730] sm:$0xff]  ;;  %v1029_v0 = vld [vmem:[%s7079_s3 + $0x1548] sm:$0xff] }
 0x326   : > { %3418 = vmatpush1.bf16.xpose.msra.mxu0 %v3417_v8  ;;  %3420 = vmatprep.subr.bf16.mxu1 %v3419_v9  ;;  %v3439_v8 = vpack.c.bf16 %v1011_v3, %v1009_v1  ;;  %v3503_v9 = vpack.c.bf16 %v1075_v5, %v1073_v4  ;;  %v1031_v1 = vld [vmem:[%s7079_s3 + $0x1558] sm:$0xff]  ;;  %v1093_v3 = vld [vmem:[%s7079_s3 + $0x1748] sm:$0xff] }
 0x327   : > { %3484 = vmatprep.subr.bf16.mxu0 %v3483_v2  ;;  %v1008_v2 = vld [vmem:[%s7079_s3 + $0x14a0] sm:$0xff]  ;;  %v1095_v4 = vld [vmem:[%s7079_s3 + $0x1758] sm:$0xff] }
 0x328   : > { %v3441_v19 = vpack.c.bf16 %v1010_v10, %v1008_v2  ;;  %v1030_v2 = vld [vmem:[%s7079_s3 + $0x1550] sm:$0xff]  ;;  %v1092_v10 = vld [vmem:[%s7079_s3 + $0x1740] sm:$0xff] }
 0x32c   : > { %2005 = vmatmul.mubr.f32.vlgmr.msra.gmra.mrb[8].mxu1 %v4355_v18 }
 0x32d   : > { %2076 = vmatmul.mubr.f32.vlgmr.msra.gmra.mrb[12].mxu0 %v4355_v18  ;;  %3422 = vmatpush1.bf16.xpose.msra.mxu1 %v3421_v17  ;;  %v1079_v17 = vld [vmem:[%s7079_s3 + $0x16d8] sm:$0xff] }
 0x32e   : > { %2146 = vmatprep.mubr.f32.mxu1 %v4353_v14  ;;  %3486 = vmatpush1.bf16.xpose.msra.mxu0 %v3485_v21  ;;  %v3443_v21 = vpack.c.bf16 %v1015_v15, %v1013_v13  ;;  %v1035_v13 = vld [vmem:[%s7079_s3 + $0x1578] sm:$0xff]  ;;  %v1097_v15 = vld [vmem:[%s7079_s3 + $0x1768] sm:$0xff] }
 0x32f   : > { %2217 = vmatprep.mubr.f32.mxu0 %v4353_v14  ;;  %3424 = vmatprep.subr.bf16.mxu1 %v3423_v22  ;;  %v3507_v22 = vpack.c.bf16 %v1079_v17, %v1077_v16  ;;  %v1099_v16 = vld [vmem:[%s7079_s3 + $0x1778] sm:$0xff] }
 0x330   : > { %3488 = vmatprep.subr.bf16.mxu0 %v3487_v23  ;;  %v1012_v23 = vld [vmem:[%s7079_s3 + $0x14c0] sm:$0xff] }
 0x331   : > { %v3445_v31 = vpack.c.bf16 %v1014_v24, %v1012_v23  ;;  %v1034_v23 = vld [vmem:[%s7079_s3 + $0x1570] sm:$0xff]  ;;  %v1096_v24 = vld [vmem:[%s7079_s3 + $0x1760] sm:$0xff] }
 0x335   : > { %3426 = vmatpush1.bf16.xpose.msra.mxu1 %v3425_v32  ;;  %v3509_v32 = vpack.c.bf16 %v1078_v26, %v1076_v25  ;;  %v1098_v26 = vld [vmem:[%s7079_s3 + $0x1770] sm:$0xff] }
 0x336   : > { %3490 = vmatpush1.bf16.xpose.msra.mxu0 %v3489_v33  ;;  %3428 = vmatprep.subr.bf16.mxu1 %v3427_v35  ;;  %v3447_v33 = vpack.c.bf16 %v1019_v28, %v1017_v27  ;;  %v3511_v35 = vpack.c.bf16 %v1083_v30, %v1081_v29  ;;  %v1037_v27 = vld [vmem:[%s7079_s3 + $0x1588] sm:$0xff]  ;;  %v1039_v28 = vld [vmem:[%s7079_s3 + $0x1598] sm:$0xff] }
 0x337   : > { %3492 = vmatprep.subr.bf16.mxu0 %v3491_v36  ;;  %v1016_v36 = vld [vmem:[%s7079_s3 + $0x14e0] sm:$0xff] }
 0x338   : > { %v3449_v44 = vpack.c.bf16 %v1018_v37, %v1016_v36 }
 0x33d   : > { %3430 = vmatpush1.bf16.xpose.msra.mxu1 %v3429_v45  ;;  %v3513_v45 = vpack.c.bf16 %v1082_v39, %v1080_v38  ;;  %v3529_v38 = vpack.c.bf16 %v1098_v26, %v1096_v24  ;;  %v3467_v39 = vpack.c.bf16 %v1039_v28, %v1037_v27  ;;  %v1181_v24 = vld [vmem:[%s7079_s3 + $0x1a08] sm:$0xff] }
 0x33e   : > { %3494 = vmatpush1.bf16.xpose.msra.mxu0 %v3493_v46  ;;  %3432 = vmatprep.subr.bf16.mxu1 %v3431_v47  ;;  %v3451_v46 = vpack.c.bf16 %v1023_v41, %v1021_v40  ;;  %v3515_v47 = vpack.c.bf16 %v1087_v43, %v1085_v42 }
 0x33f   : > { %3496 = vmatprep.subr.bf16.mxu0 %v3495_v48  ;;  %v1020_v48 = vld [vmem:[%s7079_s3 + $0x1500] sm:$0xff] }
 0x340   : > { %v3453_v56 = vpack.c.bf16 %v1022_v49, %v1020_v48  ;;  %v1041_v48 = vld [vmem:[%s7079_s3 + $0x15a8] sm:$0xff]  ;;  %v1043_v49 = vld [vmem:[%s7079_s3 + $0x15b8] sm:$0xff] }
 0x345   : > { %3434 = vmatpush1.bf16.xpose.msra.mxu1 %v3433_v57  ;;  %v3517_v57 = vpack.c.bf16 %v1086_v51, %v1084_v50  ;;  %v1105_v50 = vld [vmem:[%s7079_s3 + $0x17a8] sm:$0xff]  ;;  %v1107_v51 = vld [vmem:[%s7079_s3 + $0x17b8] sm:$0xff] }
 0x346   : > { %3498 = vmatpush1.bf16.xpose.msra.mxu0 %v3497_v58  ;;  %3436 = vmatprep.subr.bf16.mxu1 %v3435_v59  ;;  %v3455_v58 = vpack.c.bf16 %v1027_v53, %v1025_v52  ;;  %v3519_v59 = vpack.c.bf16 %v1091_v55, %v1089_v54  ;;  %v3471_v54 = vpack.c.bf16 %v1043_v49, %v1041_v48  ;;  %v1127_v48 = vld [vmem:[%s7079_s3 + $0x1858] sm:$0xff]  ;;  %v1189_v49 = vld [vmem:[%s7079_s3 + $0x1a48] sm:$0xff] }
 0x347   : > { %3500 = vmatprep.subr.bf16.mxu0 %v3499_v60  ;;  %v1024_v60 = vld [vmem:[%s7079_s3 + $0x1520] sm:$0xff]  ;;  %v3535_v55 = vpack.c.bf16 %v1107_v51, %v1105_v50  ;;  %v1191_v50 = vld [vmem:[%s7079_s3 + $0x1a58] sm:$0xff] }
 0x348   : > { %v3457_v5 = vpack.c.bf16 %v1026_v61, %v1024_v60  ;;  %v1045_v60 = vld [vmem:[%s7079_s3 + $0x15c8] sm:$0xff]  ;;  %v1047_v61 = vld [vmem:[%s7079_s3 + $0x15d8] sm:$0xff] }
 0x34d   : > { %3438 = vmatpush1.bf16.xpose.msra.mxu1 %v3437_v6  ;;  %v3521_v6 = vpack.c.bf16 %v1090_v63, %v1088_v62  ;;  %v1109_v62 = vld [vmem:[%s7079_s3 + $0x17c8] sm:$0xff]  ;;  %v1111_v63 = vld [vmem:[%s7079_s3 + $0x17d8] sm:$0xff] }
 0x34e   : > { %3502 = vmatpush1.bf16.xpose.msra.mxu0 %v3501_v7  ;;  %3440 = vmatprep.subr.bf16.mxu1 %v3439_v8  ;;  %v3459_v7 = vpack.c.bf16 %v1031_v1, %v1029_v0  ;;  %v3523_v8 = vpack.c.bf16 %v1095_v4, %v1093_v3  ;;  %v3475_v3 = vpack.c.bf16 %v1047_v61, %v1045_v60  ;;  %v1131_v60 = vld [vmem:[%s7079_s3 + $0x1878] sm:$0xff]  ;;  %v1193_v61 = vld [vmem:[%s7079_s3 + $0x1a68] sm:$0xff] }
 0x34f   : > { %3504 = vmatprep.subr.bf16.mxu0 %v3503_v9  ;;  %v1028_v9 = vld [vmem:[%s7079_s3 + $0x1540] sm:$0xff]  ;;  %v3539_v4 = vpack.c.bf16 %v1111_v63, %v1109_v62  ;;  %v1195_v62 = vld [vmem:[%s7079_s3 + $0x1a78] sm:$0xff] }
 0x350   : > { %v3461_v17 = vpack.c.bf16 %v1030_v2, %v1028_v9  ;;  %v1049_v9 = vld [vmem:[%s7079_s3 + $0x15e8] sm:$0xff]  ;;  %v1051_v2 = vld [vmem:[%s7079_s3 + $0x15f8] sm:$0xff] }
 0x355   : > { %3442 = vmatpush1.bf16.xpose.msra.mxu1 %v3441_v19  ;;  %v3525_v19 = vpack.c.bf16 %v1094_v11, %v1092_v10  ;;  %v1113_v10 = vld [vmem:[%s7079_s3 + $0x17e8] sm:$0xff]  ;;  %v1115_v11 = vld [vmem:[%s7079_s3 + $0x17f8] sm:$0xff] }
 0x356   : > { %3506 = vmatpush1.bf16.xpose.msra.mxu0 %v3505_v20  ;;  %3444 = vmatprep.subr.bf16.mxu1 %v3443_v21  ;;  %v3463_v20 = vpack.c.bf16 %v1035_v13, %v1033_v12  ;;  %v3527_v21 = vpack.c.bf16 %v1099_v16, %v1097_v15  ;;  %v3479_v15 = vpack.c.bf16 %v1051_v2, %v1049_v9  ;;  %v1135_v9 = vld [vmem:[%s7079_s3 + $0x1898] sm:$0xff]  ;;  %v1197_v2 = vld [vmem:[%s7079_s3 + $0x1a88] sm:$0xff] }
 0x357   : > { %3508 = vmatprep.subr.bf16.mxu0 %v3507_v22  ;;  %v1032_v22 = vld [vmem:[%s7079_s3 + $0x1560] sm:$0xff]  ;;  %v3543_v16 = vpack.c.bf16 %v1115_v11, %v1113_v10  ;;  %v1199_v10 = vld [vmem:[%s7079_s3 + $0x1a98] sm:$0xff] }
 0x358   : > { %v3465_v36 = vpack.c.bf16 %v1034_v23, %v1032_v22  ;;  %v1117_v22 = vld [vmem:[%s7079_s3 + $0x1808] sm:$0xff]  ;;  %v1119_v23 = vld [vmem:[%s7079_s3 + $0x1818] sm:$0xff] }
 0x359   : > { %v3547_v28 = vpack.c.bf16 %v1119_v23, %v1117_v22  ;;  %v1139_v22 = vld [vmem:[%s7079_s3 + $0x18b8] sm:$0xff]  ;;  %v1201_v23 = vld [vmem:[%s7079_s3 + $0x1aa8] sm:$0xff] }
 0x35d   : > { %3446 = vmatpush1.bf16.xpose.msra.mxu1 %v3445_v31  ;;  %v1101_v31 = vld [vmem:[%s7079_s3 + $0x1788] sm:$0xff] }
 0x35e   : > { %3510 = vmatpush1.bf16.xpose.msra.mxu0 %v3509_v32  ;;  %3448 = vmatprep.subr.bf16.mxu1 %v3447_v33  ;;  %v1103_v32 = vld [vmem:[%s7079_s3 + $0x1798] sm:$0xff] }
 0x35f   : > { %3512 = vmatprep.subr.bf16.mxu0 %v3511_v35  ;;  %v3531_v41 = vpack.c.bf16 %v1103_v32, %v1101_v31  ;;  %v1118_v31 = vld [vmem:[%s7079_s3 + $0x1810] sm:$0xff]  ;;  %v1180_v32 = vld [vmem:[%s7079_s3 + $0x1a00] sm:$0xff] }
 0x365   : > { %3450 = vmatpush1.bf16.xpose.msra.mxu1 %v3449_v44  ;;  %v1036_v44 = vld [vmem:[%s7079_s3 + $0x1580] sm:$0xff] }
 0x366   : > { %3514 = vmatpush1.bf16.xpose.msra.mxu0 %v3513_v45  ;;  %3452 = vmatprep.subr.bf16.mxu1 %v3451_v46  ;;  %v1038_v45 = vld [vmem:[%s7079_s3 + $0x1590] sm:$0xff]  ;;  %v1100_v46 = vld [vmem:[%s7079_s3 + $0x1780] sm:$0xff] }
 0x367   : > { %3516 = vmatprep.subr.bf16.mxu0 %v3515_v47  ;;  %v1102_v47 = vld [vmem:[%s7079_s3 + $0x1790] sm:$0xff]  ;;  %v3469_v52 = vpack.c.bf16 %v1038_v45, %v1036_v44  ;;  %v1184_v45 = vld [vmem:[%s7079_s3 + $0x1a20] sm:$0xff] }
 0x368   : > { %v3533_v53 = vpack.c.bf16 %v1102_v47, %v1100_v46  ;;  %v1122_v44 = vld [vmem:[%s7079_s3 + $0x1830] sm:$0xff]  ;;  %v1125_v47 = vld [vmem:[%s7079_s3 + $0x1848] sm:$0xff] }
 0x369   : > { %v1186_v46 = vld [vmem:[%s7079_s3 + $0x1a30] sm:$0xff] }
 0x36d   : > { %3454 = vmatpush1.bf16.xpose.msra.mxu1 %v3453_v56  ;;  %v1040_v56 = vld [vmem:[%s7079_s3 + $0x15a0] sm:$0xff] }
 0x36e   : > { %3518 = vmatpush1.bf16.xpose.msra.mxu0 %v3517_v57  ;;  %3456 = vmatprep.subr.bf16.mxu1 %v3455_v58  ;;  %v1042_v57 = vld [vmem:[%s7079_s3 + $0x15b0] sm:$0xff]  ;;  %v1104_v58 = vld [vmem:[%s7079_s3 + $0x17a0] sm:$0xff] }
 0x36f   : > { %3520 = vmatprep.subr.bf16.mxu0 %v3519_v59  ;;  %v1106_v59 = vld [vmem:[%s7079_s3 + $0x17b0] sm:$0xff]  ;;  %v3473_v0 = vpack.c.bf16 %v1042_v57, %v1040_v56  ;;  %v1188_v57 = vld [vmem:[%s7079_s3 + $0x1a40] sm:$0xff] }
 0x370   : > { %v3537_v1 = vpack.c.bf16 %v1106_v59, %v1104_v58  ;;  %v1126_v56 = vld [vmem:[%s7079_s3 + $0x1850] sm:$0xff]  ;;  %v1129_v59 = vld [vmem:[%s7079_s3 + $0x1868] sm:$0xff] }
 0x371   : > { %v1190_v58 = vld [vmem:[%s7079_s3 + $0x1a50] sm:$0xff] }
 0x375   : > { %3458 = vmatpush1.bf16.xpose.msra.mxu1 %v3457_v5  ;;  %v1044_v5 = vld [vmem:[%s7079_s3 + $0x15c0] sm:$0xff] }
 0x376   : > { %3522 = vmatpush1.bf16.xpose.msra.mxu0 %v3521_v6  ;;  %3460 = vmatprep.subr.bf16.mxu1 %v3459_v7  ;;  %v1046_v6 = vld [vmem:[%s7079_s3 + $0x15d0] sm:$0xff]  ;;  %v1108_v7 = vld [vmem:[%s7079_s3 + $0x17c0] sm:$0xff] }
 0x377   : > { %3524 = vmatprep.subr.bf16.mxu0 %v3523_v8  ;;  %v1110_v8 = vld [vmem:[%s7079_s3 + $0x17d0] sm:$0xff]  ;;  %v3477_v12 = vpack.c.bf16 %v1046_v6, %v1044_v5  ;;  %v1192_v6 = vld [vmem:[%s7079_s3 + $0x1a60] sm:$0xff] }
 0x378   : > { %v3541_v13 = vpack.c.bf16 %v1110_v8, %v1108_v7  ;;  %v1130_v5 = vld [vmem:[%s7079_s3 + $0x1870] sm:$0xff]  ;;  %v1133_v8 = vld [vmem:[%s7079_s3 + $0x1888] sm:$0xff] }
 0x379   : > { %v1194_v7 = vld [vmem:[%s7079_s3 + $0x1a70] sm:$0xff] }
 0x37d   : > { %3462 = vmatpush1.bf16.xpose.msra.mxu1 %v3461_v17  ;;  %v1048_v17 = vld [vmem:[%s7079_s3 + $0x15e0] sm:$0xff] }
 0x37e   : > { %3526 = vmatpush1.bf16.xpose.msra.mxu0 %v3525_v19  ;;  %3464 = vmatprep.subr.bf16.mxu1 %v3463_v20  ;;  %v1050_v19 = vld [vmem:[%s7079_s3 + $0x15f0] sm:$0xff]  ;;  %v1112_v20 = vld [vmem:[%s7079_s3 + $0x17e0] sm:$0xff] }
 0x37f   : > { %v1864_v25 = vpop.f32.mrb[6].mxu1  ;;  %3528 = vmatprep.subr.bf16.mxu0 %v3527_v21  ;;  %v1114_v21 = vld [vmem:[%s7079_s3 + $0x17f0] sm:$0xff]  ;;  %v3481_v26 = vpack.c.bf16 %v1050_v19, %v1048_v17  ;;  %v1196_v19 = vld [vmem:[%s7079_s3 + $0x1a80] sm:$0xff] }
 0x380   : > { %v1935_v29 = vpop.f32.mrb[10].mxu0  ;;  %v1866_v30 = vpop.f32.mrb[7].mxu1  ;;  %v3545_v27 = vpack.c.bf16 %v1114_v21, %v1112_v20  ;;  %v1134_v17 = vld [vmem:[%s7079_s3 + $0x1890] sm:$0xff]  ;;  %v1137_v21 = vld [vmem:[%s7079_s3 + $0x18a8] sm:$0xff] }
 0x381   : > { %v2591_v33 = vcombine.low %v1864_v25, %v1866_v30  ;;  %v1937_v35 = vpop.f32.mrb[11].mxu0  ;;  %v1183_v25 = vld [vmem:[%s7079_s3 + $0x1a18] sm:$0xff]  ;;  %v1116_v30 = vld [vmem:[%s7079_s3 + $0x1800] sm:$0xff]  ;;  %v1198_v20 = vld [vmem:[%s7079_s3 + $0x1a90] sm:$0xff] }
 0x382   : > { %v2592_v37 = vcombine.low %v1935_v29, %v1937_v35  ;;  %v3611_v29 = vpack.c.bf16 %v1183_v25, %v1181_v24  ;;  %v1121_v35 = vld [vmem:[%s7079_s3 + $0x1828] sm:$0xff]  ;;  %v1203_v24 = vld [vmem:[%s7079_s3 + $0x1ab8] sm:$0xff] }
 0x383   : > { %v2599_v40 = vrot.slane %v2591_v33, %v5000_v34  ;;  %v1182_v33 = vld [vmem:[%s7079_s3 + $0x1a10] sm:$0xff] }
 0x384   : > { %v2606_v42 = vrot.slane %v2592_v37, %v5000_v34  ;;  %v3549_v37 = vpack.c.bf16 %v1118_v31, %v1116_v30  ;;  %v1138_v30 = vld [vmem:[%s7079_s3 + $0x18b0] sm:$0xff]  ;;  %v1200_v31 = vld [vmem:[%s7079_s3 + $0x1aa0] sm:$0xff] }
 0x385   : > { %3466 = vmatpush1.bf16.xpose.msra.mxu1 %v3465_v36  ;;  %v1123_v36 = vld [vmem:[%s7079_s3 + $0x1838] sm:$0xff] }
 0x386   : > { %v2607_v43 = vcombine.low %v2599_v40, %v2606_v42  ;;  %3530 = vmatpush1.bf16.xpose.msra.mxu0 %v3529_v38  ;;  %3468 = vmatprep.subr.bf16.mxu1 %v3467_v39  ;;  %v1185_v38 = vld [vmem:[%s7079_s3 + $0x1a28] sm:$0xff]  ;;  %v1187_v39 = vld [vmem:[%s7079_s3 + $0x1a38] sm:$0xff]  ;;  %v3613_v40 = vpack.c.bf16 %v1182_v33, %v1180_v32  ;;  %v1202_v32 = vld [vmem:[%s7079_s3 + $0x1ab0] sm:$0xff] }
 0x387   : > { %3532 = vmatprep.subr.bf16.mxu0 %v3531_v41  ;;  %v3551_v41 = vpack.c.bf16 %v1123_v36, %v1121_v35  ;;  %v3615_v42 = vpack.c.bf16 %v1187_v39, %v1185_v38  ;;  %v1141_v33 = vld [vmem:[%s7079_s3 + $0x18c8] sm:$0xff]  ;;  %v1143_v35 = vld [vmem:[%s7079_s3 + $0x18d8] sm:$0xff]  ;;  %v3633_v39 = vpack.c.bf16 %v1202_v32, %v1200_v31  ;;  %v1222_v31 = vld [vmem:[%s7079_s3 + $0x1b50] sm:$0xff] }
 0x388   : > { %2687 = vst [vmem:[%s5023_s22 + $0x18] sm:$0xff] %v2607_v43  ;;  %v1120_v43 = vld [vmem:[%s7079_s3 + $0x1820] sm:$0xff]  ;;  %v1205_v36 = vld [vmem:[%s7079_s3 + $0x1ac8] sm:$0xff] }
 0x389   : > { %v3553_v51 = vpack.c.bf16 %v1122_v44, %v1120_v43  ;;  %v1142_v43 = vld [vmem:[%s7079_s3 + $0x18d0] sm:$0xff]  ;;  %v1204_v44 = vld [vmem:[%s7079_s3 + $0x1ac0] sm:$0xff]  ;;  %v1161_v32 = vld [vmem:[%s7079_s3 + $0x1968] sm:$0xff] }
 0x38d   : > { %3470 = vmatpush1.bf16.xpose.msra.mxu1 %v3469_v52  ;;  %v3617_v52 = vpack.c.bf16 %v1186_v46, %v1184_v45  ;;  %v1206_v45 = vld [vmem:[%s7079_s3 + $0x1ad0] sm:$0xff]  ;;  %v1145_v46 = vld [vmem:[%s7079_s3 + $0x18e8] sm:$0xff] }
 0x38e   : > { %3534 = vmatpush1.bf16.xpose.msra.mxu0 %v3533_v53  ;;  %3472 = vmatprep.subr.bf16.mxu1 %v3471_v54  ;;  %v3555_v53 = vpack.c.bf16 %v1127_v48, %v1125_v47  ;;  %v3619_v54 = vpack.c.bf16 %v1191_v50, %v1189_v49  ;;  %v1147_v47 = vld [vmem:[%s7079_s3 + $0x18f8] sm:$0xff]  ;;  %v1209_v48 = vld [vmem:[%s7079_s3 + $0x1ae8] sm:$0xff] }
 0x38f   : > { %3536 = vmatprep.subr.bf16.mxu0 %v3535_v55  ;;  %v1124_v55 = vld [vmem:[%s7079_s3 + $0x1840] sm:$0xff]  ;;  %v1211_v49 = vld [vmem:[%s7079_s3 + $0x1af8] sm:$0xff] }
 0x390   : > { %v3557_v63 = vpack.c.bf16 %v1126_v56, %v1124_v55  ;;  %v1146_v55 = vld [vmem:[%s7079_s3 + $0x18f0] sm:$0xff]  ;;  %v1208_v56 = vld [vmem:[%s7079_s3 + $0x1ae0] sm:$0xff] }
 0x395   : > { %3474 = vmatpush1.bf16.xpose.msra.mxu1 %v3473_v0  ;;  %v3621_v0 = vpack.c.bf16 %v1190_v58, %v1188_v57  ;;  %v1210_v57 = vld [vmem:[%s7079_s3 + $0x1af0] sm:$0xff]  ;;  %v1149_v58 = vld [vmem:[%s7079_s3 + $0x1908] sm:$0xff] }
 0x396   : > { %3538 = vmatpush1.bf16.xpose.msra.mxu0 %v3537_v1  ;;  %3476 = vmatprep.subr.bf16.mxu1 %v3475_v3  ;;  %v3559_v1 = vpack.c.bf16 %v1131_v60, %v1129_v59  ;;  %v3623_v3 = vpack.c.bf16 %v1195_v62, %v1193_v61  ;;  %v1151_v59 = vld [vmem:[%s7079_s3 + $0x1918] sm:$0xff]  ;;  %v1213_v60 = vld [vmem:[%s7079_s3 + $0x1b08] sm:$0xff] }
 0x397   : > { %3540 = vmatprep.subr.bf16.mxu0 %v3539_v4  ;;  %v1128_v4 = vld [vmem:[%s7079_s3 + $0x1860] sm:$0xff]  ;;  %v1215_v61 = vld [vmem:[%s7079_s3 + $0x1b18] sm:$0xff] }
 0x398   : > { %v3561_v11 = vpack.c.bf16 %v1130_v5, %v1128_v4  ;;  %v1150_v4 = vld [vmem:[%s7079_s3 + $0x1910] sm:$0xff]  ;;  %v1212_v5 = vld [vmem:[%s7079_s3 + $0x1b00] sm:$0xff] }
 0x39d   : > { %3478 = vmatpush1.bf16.xpose.msra.mxu1 %v3477_v12  ;;  %v3625_v12 = vpack.c.bf16 %v1194_v7, %v1192_v6  ;;  %v1214_v6 = vld [vmem:[%s7079_s3 + $0x1b10] sm:$0xff]  ;;  %v1153_v7 = vld [vmem:[%s7079_s3 + $0x1928] sm:$0xff] }
 0x39e   : > { %3542 = vmatpush1.bf16.xpose.msra.mxu0 %v3541_v13  ;;  %3480 = vmatprep.subr.bf16.mxu1 %v3479_v15  ;;  %v3563_v13 = vpack.c.bf16 %v1135_v9, %v1133_v8  ;;  %v3627_v15 = vpack.c.bf16 %v1199_v10, %v1197_v2  ;;  %v1155_v8 = vld [vmem:[%s7079_s3 + $0x1938] sm:$0xff]  ;;  %v1217_v9 = vld [vmem:[%s7079_s3 + $0x1b28] sm:$0xff] }
 0x39f   : > { %3544 = vmatprep.subr.bf16.mxu0 %v3543_v16  ;;  %v1132_v16 = vld [vmem:[%s7079_s3 + $0x1880] sm:$0xff]  ;;  %v1219_v2 = vld [vmem:[%s7079_s3 + $0x1b38] sm:$0xff] }
 0x3a0   : > { %v3565_v25 = vpack.c.bf16 %v1134_v17, %v1132_v16  ;;  %v1154_v16 = vld [vmem:[%s7079_s3 + $0x1930] sm:$0xff]  ;;  %v1216_v17 = vld [vmem:[%s7079_s3 + $0x1b20] sm:$0xff] }
 0x3a5   : > { %3482 = vmatpush1.bf16.xpose.msra.mxu1 %v3481_v26  ;;  %v3629_v26 = vpack.c.bf16 %v1198_v20, %v1196_v19  ;;  %v1218_v19 = vld [vmem:[%s7079_s3 + $0x1b30] sm:$0xff]  ;;  %v1157_v20 = vld [vmem:[%s7079_s3 + $0x1948] sm:$0xff] }
 0x3a6   : > { %3546 = vmatpush1.bf16.xpose.msra.mxu0 %v3545_v27  ;;  %3548 = vmatprep.subr.bf16.mxu1 %v3547_v28  ;;  %v3567_v27 = vpack.c.bf16 %v1139_v22, %v1137_v21  ;;  %v3631_v28 = vpack.c.bf16 %v1203_v24, %v1201_v23  ;;  %v1159_v21 = vld [vmem:[%s7079_s3 + $0x1958] sm:$0xff]  ;;  %v1221_v22 = vld [vmem:[%s7079_s3 + $0x1b48] sm:$0xff] }
 0x3a7   : > { %3612 = vmatprep.subr.bf16.mxu0 %v3611_v29  ;;  %v1136_v29 = vld [vmem:[%s7079_s3 + $0x18a0] sm:$0xff]  ;;  %v1223_v23 = vld [vmem:[%s7079_s3 + $0x1b58] sm:$0xff] }
 0x3a8   : > { %v3569_v38 = vpack.c.bf16 %v1138_v30, %v1136_v29  ;;  %v1158_v29 = vld [vmem:[%s7079_s3 + $0x1950] sm:$0xff]  ;;  %v1220_v30 = vld [vmem:[%s7079_s3 + $0x1b40] sm:$0xff] }
 0x3ac   : > { %2147 = vmatmul.mubr.f32.vlgmr.msra.gmra.mrb[10].mxu1 %v4355_v18 }
 0x3ad   : > { %2218 = vmatmul.mubr.f32.vlgmr.msra.gmra.mrb[14].mxu0 %v4355_v18  ;;  %3550 = vmatpush1.bf16.xpose.msra.mxu1 %v3549_v37  ;;  %v1207_v37 = vld [vmem:[%s7079_s3 + $0x1ad8] sm:$0xff] }
 0x3ae   : > { %2288 = vmatprep.mubr.f32.mxu1 %v4353_v14  ;;  %3614 = vmatpush1.bf16.xpose.msra.mxu0 %v3613_v40  ;;  %v3571_v40 = vpack.c.bf16 %v1143_v35, %v1141_v33  ;;  %v1163_v33 = vld [vmem:[%s7079_s3 + $0x1978] sm:$0xff]  ;;  %v1225_v35 = vld [vmem:[%s7079_s3 + $0x1b68] sm:$0xff] }
 0x3af   : > { %2359 = vmatprep.mubr.f32.mxu0 %v4353_v14  ;;  %3552 = vmatprep.subr.bf16.mxu1 %v3551_v41  ;;  %v3635_v41 = vpack.c.bf16 %v1207_v37, %v1205_v36  ;;  %v1227_v36 = vld [vmem:[%s7079_s3 + $0x1b78] sm:$0xff] }
 0x3b0   : > { %3616 = vmatprep.subr.bf16.mxu0 %v3615_v42  ;;  %v1140_v42 = vld [vmem:[%s7079_s3 + $0x18c0] sm:$0xff] }
 0x3b1   : > { %v3573_v50 = vpack.c.bf16 %v1142_v43, %v1140_v42  ;;  %v1162_v42 = vld [vmem:[%s7079_s3 + $0x1970] sm:$0xff]  ;;  %v1224_v43 = vld [vmem:[%s7079_s3 + $0x1b60] sm:$0xff] }
 0x3b5   : > { %3554 = vmatpush1.bf16.xpose.msra.mxu1 %v3553_v51  ;;  %v3637_v51 = vpack.c.bf16 %v1206_v45, %v1204_v44  ;;  %v1226_v45 = vld [vmem:[%s7079_s3 + $0x1b70] sm:$0xff] }
 0x3b6   : > { %3618 = vmatpush1.bf16.xpose.msra.mxu0 %v3617_v52  ;;  %3556 = vmatprep.subr.bf16.mxu1 %v3555_v53  ;;  %v3575_v52 = vpack.c.bf16 %v1147_v47, %v1145_v46  ;;  %v3639_v53 = vpack.c.bf16 %v1211_v49, %v1209_v48  ;;  %v1165_v46 = vld [vmem:[%s7079_s3 + $0x1988] sm:$0xff]  ;;  %v1167_v47 = vld [vmem:[%s7079_s3 + $0x1998] sm:$0xff] }
 0x3b7   : > { %3620 = vmatprep.subr.bf16.mxu0 %v3619_v54  ;;  %v1144_v54 = vld [vmem:[%s7079_s3 + $0x18e0] sm:$0xff] }
 0x3b8   : > { %v3577_v62 = vpack.c.bf16 %v1146_v55, %v1144_v54 }
 0x3bd   : > { %3558 = vmatpush1.bf16.xpose.msra.mxu1 %v3557_v63  ;;  %v3641_v63 = vpack.c.bf16 %v1210_v57, %v1208_v56  ;;  %v3657_v56 = vpack.c.bf16 %v1226_v45, %v1224_v43  ;;  %v3595_v57 = vpack.c.bf16 %v1167_v47, %v1165_v46  ;;  %v1309_v43 = vld [vmem:[%s7079_s3 + $0x1e08] sm:$0xff] }
 0x3be   : > { %3622 = vmatpush1.bf16.xpose.msra.mxu0 %v3621_v0  ;;  %3560 = vmatprep.subr.bf16.mxu1 %v3559_v1  ;;  %v3579_v0 = vpack.c.bf16 %v1151_v59, %v1149_v58  ;;  %v3643_v1 = vpack.c.bf16 %v1215_v61, %v1213_v60 }
 0x3bf   : > { %3624 = vmatprep.subr.bf16.mxu0 %v3623_v3  ;;  %v1148_v3 = vld [vmem:[%s7079_s3 + $0x1900] sm:$0xff] }
 0x3c0   : > { %v3581_v10 = vpack.c.bf16 %v1150_v4, %v1148_v3  ;;  %v1169_v3 = vld [vmem:[%s7079_s3 + $0x19a8] sm:$0xff]  ;;  %v1171_v4 = vld [vmem:[%s7079_s3 + $0x19b8] sm:$0xff] }
 0x3c5   : > { %3562 = vmatpush1.bf16.xpose.msra.mxu1 %v3561_v11  ;;  %v3645_v11 = vpack.c.bf16 %v1214_v6, %v1212_v5  ;;  %v1233_v5 = vld [vmem:[%s7079_s3 + $0x1ba8] sm:$0xff]  ;;  %v1235_v6 = vld [vmem:[%s7079_s3 + $0x1bb8] sm:$0xff] }
 0x3c6   : > { %3626 = vmatpush1.bf16.xpose.msra.mxu0 %v3625_v12  ;;  %3564 = vmatprep.subr.bf16.mxu1 %v3563_v13  ;;  %v3583_v12 = vpack.c.bf16 %v1155_v8, %v1153_v7  ;;  %v3647_v13 = vpack.c.bf16 %v1219_v2, %v1217_v9  ;;  %v3599_v9 = vpack.c.bf16 %v1171_v4, %v1169_v3  ;;  %v1255_v3 = vld [vmem:[%s7079_s3 + $0x1c58] sm:$0xff]  ;;  %v1317_v4 = vld [vmem:[%s7079_s3 + $0x1e48] sm:$0xff] }
 0x3c7   : > { %3628 = vmatprep.subr.bf16.mxu0 %v3627_v15  ;;  %v1152_v15 = vld [vmem:[%s7079_s3 + $0x1920] sm:$0xff]  ;;  %v3663_v2 = vpack.c.bf16 %v1235_v6, %v1233_v5 }
 0x3c8   : > { %v3585_v24 = vpack.c.bf16 %v1154_v16, %v1152_v15  ;;  %v1173_v15 = vld [vmem:[%s7079_s3 + $0x19c8] sm:$0xff]  ;;  %v1175_v16 = vld [vmem:[%s7079_s3 + $0x19d8] sm:$0xff] }
 0x3cd   : > { %3566 = vmatpush1.bf16.xpose.msra.mxu1 %v3565_v25  ;;  %v3649_v25 = vpack.c.bf16 %v1218_v19, %v1216_v17  ;;  %v1237_v17 = vld [vmem:[%s7079_s3 + $0x1bc8] sm:$0xff]  ;;  %v1239_v19 = vld [vmem:[%s7079_s3 + $0x1bd8] sm:$0xff] }
 0x3ce   : > { %3630 = vmatpush1.bf16.xpose.msra.mxu0 %v3629_v26  ;;  %3568 = vmatprep.subr.bf16.mxu1 %v3567_v27  ;;  %v3587_v26 = vpack.c.bf16 %v1159_v21, %v1157_v20  ;;  %v3651_v27 = vpack.c.bf16 %v1223_v23, %v1221_v22  ;;  %v3603_v22 = vpack.c.bf16 %v1175_v16, %v1173_v15  ;;  %v1321_v15 = vld [vmem:[%s7079_s3 + $0x1e68] sm:$0xff]  ;;  %v1323_v16 = vld [vmem:[%s7079_s3 + $0x1e78] sm:$0xff] }
 0x3cf   : > { %3632 = vmatprep.subr.bf16.mxu0 %v3631_v28  ;;  %v1156_v28 = vld [vmem:[%s7079_s3 + $0x1940] sm:$0xff]  ;;  %v3667_v23 = vpack.c.bf16 %v1239_v19, %v1237_v17 }
 0x3d0   : > { %v3589_v37 = vpack.c.bf16 %v1158_v29, %v1156_v28  ;;  %v1177_v28 = vld [vmem:[%s7079_s3 + $0x19e8] sm:$0xff]  ;;  %v1179_v29 = vld [vmem:[%s7079_s3 + $0x19f8] sm:$0xff] }
 0x3d5   : > { %3570 = vmatpush1.bf16.xpose.msra.mxu1 %v3569_v38  ;;  %v3653_v38 = vpack.c.bf16 %v1222_v31, %v1220_v30  ;;  %v1241_v30 = vld [vmem:[%s7079_s3 + $0x1be8] sm:$0xff]  ;;  %v1243_v31 = vld [vmem:[%s7079_s3 + $0x1bf8] sm:$0xff] }
 0x3d6   : > { %3634 = vmatpush1.bf16.xpose.msra.mxu0 %v3633_v39  ;;  %3572 = vmatprep.subr.bf16.mxu1 %v3571_v40  ;;  %v3591_v39 = vpack.c.bf16 %v1163_v33, %v1161_v32  ;;  %v3655_v40 = vpack.c.bf16 %v1227_v36, %v1225_v35  ;;  %v3607_v35 = vpack.c.bf16 %v1179_v29, %v1177_v28  ;;  %v1325_v28 = vld [vmem:[%s7079_s3 + $0x1e88] sm:$0xff]  ;;  %v1327_v29 = vld [vmem:[%s7079_s3 + $0x1e98] sm:$0xff] }
 0x3d7   : > { %3636 = vmatprep.subr.bf16.mxu0 %v3635_v41  ;;  %v1160_v41 = vld [vmem:[%s7079_s3 + $0x1960] sm:$0xff]  ;;  %v3671_v36 = vpack.c.bf16 %v1243_v31, %v1241_v30 }
 0x3d8   : > { %v3593_v54 = vpack.c.bf16 %v1162_v42, %v1160_v41  ;;  %v1245_v41 = vld [vmem:[%s7079_s3 + $0x1c08] sm:$0xff]  ;;  %v1247_v42 = vld [vmem:[%s7079_s3 + $0x1c18] sm:$0xff] }
 0x3d9   : > { %v3675_v47 = vpack.c.bf16 %v1247_v42, %v1245_v41  ;;  %v1329_v41 = vld [vmem:[%s7079_s3 + $0x1ea8] sm:$0xff]  ;;  %v1331_v42 = vld [vmem:[%s7079_s3 + $0x1eb8] sm:$0xff] }
 0x3dd   : > { %3574 = vmatpush1.bf16.xpose.msra.mxu1 %v3573_v50  ;;  %v1229_v50 = vld [vmem:[%s7079_s3 + $0x1b88] sm:$0xff] }
 0x3de   : > { %3638 = vmatpush1.bf16.xpose.msra.mxu0 %v3637_v51  ;;  %3576 = vmatprep.subr.bf16.mxu1 %v3575_v52  ;;  %v1231_v51 = vld [vmem:[%s7079_s3 + $0x1b98] sm:$0xff] }
 0x3df   : > { %3640 = vmatprep.subr.bf16.mxu0 %v3639_v53  ;;  %v3659_v59 = vpack.c.bf16 %v1231_v51, %v1229_v50  ;;  %v1246_v50 = vld [vmem:[%s7079_s3 + $0x1c10] sm:$0xff]  ;;  %v1308_v51 = vld [vmem:[%s7079_s3 + $0x1e00] sm:$0xff] }
 0x3e5   : > { %3578 = vmatpush1.bf16.xpose.msra.mxu1 %v3577_v62  ;;  %v1164_v62 = vld [vmem:[%s7079_s3 + $0x1980] sm:$0xff] }
 0x3e6   : > { %3642 = vmatpush1.bf16.xpose.msra.mxu0 %v3641_v63  ;;  %3580 = vmatprep.subr.bf16.mxu1 %v3579_v0  ;;  %v1166_v63 = vld [vmem:[%s7079_s3 + $0x1990] sm:$0xff]  ;;  %v1228_v0 = vld [vmem:[%s7079_s3 + $0x1b80] sm:$0xff] }
 0x3e7   : > { %3644 = vmatprep.subr.bf16.mxu0 %v3643_v1  ;;  %v1230_v1 = vld [vmem:[%s7079_s3 + $0x1b90] sm:$0xff]  ;;  %v3597_v7 = vpack.c.bf16 %v1166_v63, %v1164_v62  ;;  %v1312_v63 = vld [vmem:[%s7079_s3 + $0x1e20] sm:$0xff] }
 0x3e8   : > { %v3661_v8 = vpack.c.bf16 %v1230_v1, %v1228_v0  ;;  %v1250_v62 = vld [vmem:[%s7079_s3 + $0x1c30] sm:$0xff]  ;;  %v1253_v1 = vld [vmem:[%s7079_s3 + $0x1c48] sm:$0xff] }
 0x3e9   : > { %v1314_v0 = vld [vmem:[%s7079_s3 + $0x1e30] sm:$0xff] }
 0x3ea   : > { %v3745_v6 = vpack.c.bf16 %v1314_v0, %v1312_v63  ;;  %v1273_v63 = vld [vmem:[%s7079_s3 + $0x1ce8] sm:$0xff]  ;;  %v1275_v0 = vld [vmem:[%s7079_s3 + $0x1cf8] sm:$0xff] }
 0x3ed   : > { %3582 = vmatpush1.bf16.xpose.msra.mxu1 %v3581_v10  ;;  %v1168_v10 = vld [vmem:[%s7079_s3 + $0x19a0] sm:$0xff] }
 0x3ee   : > { %3646 = vmatpush1.bf16.xpose.msra.mxu0 %v3645_v11  ;;  %3584 = vmatprep.subr.bf16.mxu1 %v3583_v12  ;;  %v1170_v11 = vld [vmem:[%s7079_s3 + $0x19b0] sm:$0xff]  ;;  %v1232_v12 = vld [vmem:[%s7079_s3 + $0x1ba0] sm:$0xff] }
 0x3ef   : > { %3648 = vmatprep.subr.bf16.mxu0 %v3647_v13  ;;  %v1234_v13 = vld [vmem:[%s7079_s3 + $0x1bb0] sm:$0xff]  ;;  %v3601_v20 = vpack.c.bf16 %v1170_v11, %v1168_v10  ;;  %v1316_v10 = vld [vmem:[%s7079_s3 + $0x1e40] sm:$0xff] }
 0x3f0   : > { %v3665_v21 = vpack.c.bf16 %v1234_v13, %v1232_v12  ;;  %v1318_v11 = vld [vmem:[%s7079_s3 + $0x1e50] sm:$0xff]  ;;  %v1257_v12 = vld [vmem:[%s7079_s3 + $0x1c68] sm:$0xff]  ;;  %v1259_v13 = vld [vmem:[%s7079_s3 + $0x1c78] sm:$0xff] }
 0x3f1   : > { %v3749_v19 = vpack.c.bf16 %v1318_v11, %v1316_v10  ;;  %v1277_v10 = vld [vmem:[%s7079_s3 + $0x1d08] sm:$0xff]  ;;  %v1279_v11 = vld [vmem:[%s7079_s3 + $0x1d18] sm:$0xff] }
 0x3f5   : > { %3586 = vmatpush1.bf16.xpose.msra.mxu1 %v3585_v24  ;;  %v1172_v24 = vld [vmem:[%s7079_s3 + $0x19c0] sm:$0xff] }
 0x3f6   : > { %3650 = vmatpush1.bf16.xpose.msra.mxu0 %v3649_v25  ;;  %3588 = vmatprep.subr.bf16.mxu1 %v3587_v26  ;;  %v1174_v25 = vld [vmem:[%s7079_s3 + $0x19d0] sm:$0xff]  ;;  %v1236_v26 = vld [vmem:[%s7079_s3 + $0x1bc0] sm:$0xff] }
 0x3f7   : > { %3652 = vmatprep.subr.bf16.mxu0 %v3651_v27  ;;  %v1238_v27 = vld [vmem:[%s7079_s3 + $0x1bd0] sm:$0xff]  ;;  %v3605_v32 = vpack.c.bf16 %v1174_v25, %v1172_v24  ;;  %v1320_v24 = vld [vmem:[%s7079_s3 + $0x1e60] sm:$0xff] }
 0x3f8   : > { %v3669_v33 = vpack.c.bf16 %v1238_v27, %v1236_v26  ;;  %v1322_v25 = vld [vmem:[%s7079_s3 + $0x1e70] sm:$0xff]  ;;  %v1261_v26 = vld [vmem:[%s7079_s3 + $0x1c88] sm:$0xff]  ;;  %v1263_v27 = vld [vmem:[%s7079_s3 + $0x1c98] sm:$0xff] }
 0x3f9   : > { %v3753_v31 = vpack.c.bf16 %v1322_v25, %v1320_v24  ;;  %v1281_v24 = vld [vmem:[%s7079_s3 + $0x1d28] sm:$0xff]  ;;  %v1283_v25 = vld [vmem:[%s7079_s3 + $0x1d38] sm:$0xff] }
 0x3fd   : > { %3590 = vmatpush1.bf16.xpose.msra.mxu1 %v3589_v37  ;;  %v1176_v37 = vld [vmem:[%s7079_s3 + $0x19e0] sm:$0xff] }
 0x3fe   : > { %3654 = vmatpush1.bf16.xpose.msra.mxu0 %v3653_v38  ;;  %3592 = vmatprep.subr.bf16.mxu1 %v3591_v39  ;;  %v1178_v38 = vld [vmem:[%s7079_s3 + $0x19f0] sm:$0xff]  ;;  %v1240_v39 = vld [vmem:[%s7079_s3 + $0x1be0] sm:$0xff] }
 0x3ff   : > { %v2006_v44 = vpop.f32.mrb[8].mxu1  ;;  %3656 = vmatprep.subr.bf16.mxu0 %v3655_v40  ;;  %v1242_v40 = vld [vmem:[%s7079_s3 + $0x1bf0] sm:$0xff]  ;;  %v3609_v45 = vpack.c.bf16 %v1178_v38, %v1176_v37  ;;  %v1324_v37 = vld [vmem:[%s7079_s3 + $0x1e80] sm:$0xff] }
 0x400   : > { %v2077_v48 = vpop.f32.mrb[12].mxu0  ;;  %v2008_v49 = vpop.f32.mrb[9].mxu1  ;;  %v3673_v46 = vpack.c.bf16 %v1242_v40, %v1240_v39  ;;  %v1326_v38 = vld [vmem:[%s7079_s3 + $0x1e90] sm:$0xff]  ;;  %v1265_v39 = vld [vmem:[%s7079_s3 + $0x1ca8] sm:$0xff]  ;;  %v1267_v40 = vld [vmem:[%s7079_s3 + $0x1cb8] sm:$0xff] }
 0x401   : > { %v2608_v52 = vcombine.low %v2006_v44, %v2008_v49  ;;  %v2079_v53 = vpop.f32.mrb[13].mxu0  ;;  %v1311_v44 = vld [vmem:[%s7079_s3 + $0x1e18] sm:$0xff]  ;;  %v1244_v49 = vld [vmem:[%s7079_s3 + $0x1c00] sm:$0xff] }
 0x402   : > { %v2609_v55 = vcombine.low %v2077_v48, %v2079_v53  ;;  %v3739_v48 = vpack.c.bf16 %v1311_v44, %v1309_v43  ;;  %v1249_v53 = vld [vmem:[%s7079_s3 + $0x1c28] sm:$0xff]  ;;  %v3757_v44 = vpack.c.bf16 %v1326_v38, %v1324_v37  ;;  %v1287_v38 = vld [vmem:[%s7079_s3 + $0x1d58] sm:$0xff] }
 0x403   : > { %v2616_v58 = vrot.slane %v2608_v52, %v5000_v34  ;;  %v1310_v52 = vld [vmem:[%s7079_s3 + $0x1e10] sm:$0xff]  ;;  %v1285_v37 = vld [vmem:[%s7079_s3 + $0x1d48] sm:$0xff] }
 0x404   : > { %v2623_v60 = vrot.slane %v2609_v55, %v5000_v34  ;;  %v3677_v55 = vpack.c.bf16 %v1246_v50, %v1244_v49  ;;  %v1328_v49 = vld [vmem:[%s7079_s3 + $0x1ea0] sm:$0xff]  ;;  %v1330_v50 = vld [vmem:[%s7079_s3 + $0x1eb0] sm:$0xff] }
 0x405   : > { %3594 = vmatpush1.bf16.xpose.msra.mxu1 %v3593_v54  ;;  %v1251_v54 = vld [vmem:[%s7079_s3 + $0x1c38] sm:$0xff] }
 0x406   : > { %v2624_v61 = vcombine.low %v2616_v58, %v2623_v60  ;;  %3658 = vmatpush1.bf16.xpose.msra.mxu0 %v3657_v56  ;;  %3596 = vmatprep.subr.bf16.mxu1 %v3595_v57  ;;  %v1313_v56 = vld [vmem:[%s7079_s3 + $0x1e28] sm:$0xff]  ;;  %v1315_v57 = vld [vmem:[%s7079_s3 + $0x1e38] sm:$0xff]  ;;  %v3741_v58 = vpack.c.bf16 %v1310_v52, %v1308_v51 }
 0x407   : > { %3660 = vmatprep.subr.bf16.mxu0 %v3659_v59  ;;  %v3679_v59 = vpack.c.bf16 %v1251_v54, %v1249_v53  ;;  %v3743_v60 = vpack.c.bf16 %v1315_v57, %v1313_v56  ;;  %v1269_v51 = vld [vmem:[%s7079_s3 + $0x1cc8] sm:$0xff]  ;;  %v1271_v52 = vld [vmem:[%s7079_s3 + $0x1cd8] sm:$0xff]  ;;  %v3761_v56 = vpack.c.bf16 %v1330_v50, %v1328_v49 }
 0x408   : > { %2688 = vst [vmem:[%s5023_s22 + $0x20] sm:$0xff] %v2624_v61  ;;  %v1248_v61 = vld [vmem:[%s7079_s3 + $0x1c20] sm:$0xff]  ;;  %v1333_v53 = vld [vmem:[%s7079_s3 + $0x1ec8] sm:$0xff]  ;;  %v1335_v54 = vld [vmem:[%s7079_s3 + $0x1ed8] sm:$0xff]  ;;  %v3699_v57 = vpack.c.bf16 %v1271_v52, %v1269_v51 }
 0x409   : > { %v3681_v5 = vpack.c.bf16 %v1250_v62, %v1248_v61  ;;  %v1332_v61 = vld [vmem:[%s7079_s3 + $0x1ec0] sm:$0xff]  ;;  %v1334_v62 = vld [vmem:[%s7079_s3 + $0x1ed0] sm:$0xff]  ;;  %v1289_v49 = vld [vmem:[%s7079_s3 + $0x1d68] sm:$0xff] }
 0x40a   : > { %v1291_v50 = vld [vmem:[%s7079_s3 + $0x1d78] sm:$0xff]  ;;  %v1353_v51 = vld [vmem:[%s7079_s3 + $0x1f68] sm:$0xff] }
 0x40b   : > { %v1355_v52 = vld [vmem:[%s7079_s3 + $0x1f78] sm:$0xff] }
 0x40d   : > { %3598 = vmatpush1.bf16.xpose.msra.mxu1 %v3597_v7  ;;  %v3683_v7 = vpack.c.bf16 %v1255_v3, %v1253_v1  ;;  %v1337_v1 = vld [vmem:[%s7079_s3 + $0x1ee8] sm:$0xff]  ;;  %v1339_v3 = vld [vmem:[%s7079_s3 + $0x1ef8] sm:$0xff] }
 0x40e   : > { %3662 = vmatpush1.bf16.xpose.msra.mxu0 %v3661_v8  ;;  %3600 = vmatprep.subr.bf16.mxu1 %v3599_v9  ;;  %v1252_v9 = vld [vmem:[%s7079_s3 + $0x1c40] sm:$0xff] }
 0x40f   : > { %3664 = vmatprep.subr.bf16.mxu0 %v3663_v2  ;;  %v1254_v2 = vld [vmem:[%s7079_s3 + $0x1c50] sm:$0xff] }
 0x410   : > { %v3685_v17 = vpack.c.bf16 %v1254_v2, %v1252_v9  ;;  %v1336_v9 = vld [vmem:[%s7079_s3 + $0x1ee0] sm:$0xff]  ;;  %v1338_v2 = vld [vmem:[%s7079_s3 + $0x1ef0] sm:$0xff] }
 0x415   : > { %3602 = vmatpush1.bf16.xpose.msra.mxu1 %v3601_v20  ;;  %v3687_v20 = vpack.c.bf16 %v1259_v13, %v1257_v12  ;;  %v1341_v12 = vld [vmem:[%s7079_s3 + $0x1f08] sm:$0xff]  ;;  %v1343_v13 = vld [vmem:[%s7079_s3 + $0x1f18] sm:$0xff] }
 0x416   : > { %3666 = vmatpush1.bf16.xpose.msra.mxu0 %v3665_v21  ;;  %3604 = vmatprep.subr.bf16.mxu1 %v3603_v22  ;;  %v3751_v21 = vpack.c.bf16 %v1323_v16, %v1321_v15  ;;  %v1256_v22 = vld [vmem:[%s7079_s3 + $0x1c60] sm:$0xff]  ;;  %v3769_v16 = vpack.c.bf16 %v1338_v2, %v1336_v9 }
 0x417   : > { %3668 = vmatprep.subr.bf16.mxu0 %v3667_v23  ;;  %v1258_v23 = vld [vmem:[%s7079_s3 + $0x1c70] sm:$0xff] }
 0x418   : > { %v3689_v30 = vpack.c.bf16 %v1258_v23, %v1256_v22  ;;  %v1340_v22 = vld [vmem:[%s7079_s3 + $0x1f00] sm:$0xff]  ;;  %v1342_v23 = vld [vmem:[%s7079_s3 + $0x1f10] sm:$0xff] }
 0x41d   : > { %3606 = vmatpush1.bf16.xpose.msra.mxu1 %v3605_v32  ;;  %v3691_v32 = vpack.c.bf16 %v1263_v27, %v1261_v26  ;;  %v1345_v26 = vld [vmem:[%s7079_s3 + $0x1f28] sm:$0xff]  ;;  %v1347_v27 = vld [vmem:[%s7079_s3 + $0x1f38] sm:$0xff] }
 0x41e   : > { %3670 = vmatpush1.bf16.xpose.msra.mxu0 %v3669_v33  ;;  %3608 = vmatprep.subr.bf16.mxu1 %v3607_v35  ;;  %v3755_v33 = vpack.c.bf16 %v1327_v29, %v1325_v28  ;;  %v1260_v35 = vld [vmem:[%s7079_s3 + $0x1c80] sm:$0xff]  ;;  %v3773_v29 = vpack.c.bf16 %v1342_v23, %v1340_v22  ;;  %v1363_v22 = vld [vmem:[%s7079_s3 + $0x1fb8] sm:$0xff] }
 0x41f   : > { %3672 = vmatprep.subr.bf16.mxu0 %v3671_v36  ;;  %v1262_v36 = vld [vmem:[%s7079_s3 + $0x1c90] sm:$0xff] }
 0x420   : > { %v3693_v43 = vpack.c.bf16 %v1262_v36, %v1260_v35  ;;  %v1344_v35 = vld [vmem:[%s7079_s3 + $0x1f20] sm:$0xff]  ;;  %v1346_v36 = vld [vmem:[%s7079_s3 + $0x1f30] sm:$0xff] }
 0x425   : > { %3610 = vmatpush1.bf16.xpose.msra.mxu1 %v3609_v45  ;;  %v3695_v45 = vpack.c.bf16 %v1267_v40, %v1265_v39  ;;  %v1349_v39 = vld [vmem:[%s7079_s3 + $0x1f48] sm:$0xff]  ;;  %v1351_v40 = vld [vmem:[%s7079_s3 + $0x1f58] sm:$0xff] }
 0x426   : > { %3674 = vmatpush1.bf16.xpose.msra.mxu0 %v3673_v46  ;;  %3676 = vmatprep.subr.bf16.mxu1 %v3675_v47  ;;  %v3759_v46 = vpack.c.bf16 %v1331_v42, %v1329_v41  ;;  %v1264_v47 = vld [vmem:[%s7079_s3 + $0x1ca0] sm:$0xff]  ;;  %v3777_v42 = vpack.c.bf16 %v1346_v36, %v1344_v35  ;;  %v1367_v35 = vld [vmem:[%s7079_s3 + $0x1fd8] sm:$0xff] }
 0x427   : > { %3740 = vmatprep.subr.bf16.mxu0 %v3739_v48  ;;  %v1266_v48 = vld [vmem:[%s7079_s3 + $0x1cb0] sm:$0xff] }
 0x42c   : > { %2289 = vmatmul.mubr.f32.vlgmr.msra.gmra.mrb[12].mxu1 %v4355_v18 }
 0x42d   : > { %2360 = vmatmul.mubr.f32.vlgmr.msra.gmra.mrb[16].mxu0 %v4355_v18  ;;  %3678 = vmatpush1.bf16.xpose.msra.mxu1 %v3677_v55  ;;  %v3697_v55 = vpack.c.bf16 %v1266_v48, %v1264_v47  ;;  %v1348_v47 = vld [vmem:[%s7079_s3 + $0x1f40] sm:$0xff]  ;;  %v1350_v48 = vld [vmem:[%s7079_s3 + $0x1f50] sm:$0xff] }
 0x42e   : > { %2430 = vmatprep.mubr.f32.mxu1 %v4353_v14  ;;  %3742 = vmatpush1.bf16.xpose.msra.mxu0 %v3741_v58  ;;  %v3763_v58 = vpack.c.bf16 %v1335_v54, %v1333_v53  ;;  %v3781_v54 = vpack.c.bf16 %v1350_v48, %v1348_v47  ;;  %v1371_v47 = vld [vmem:[%s7079_s3 + $0x1ff8] sm:$0xff] }
 0x42f   : > { %2501 = vmatprep.mubr.f32.mxu0 %v4353_v14  ;;  %3680 = vmatprep.subr.bf16.mxu1 %v3679_v59  ;;  %v1319_v14 = vld [vmem:[%s7079_s3 + $0x1e58] sm:$0xff]  ;;  %v1268_v59 = vld [vmem:[%s7079_s3 + $0x1cc0] sm:$0xff] }
 0x430   : > { %3744 = vmatprep.subr.bf16.mxu0 %v3743_v60  ;;  %v3747_v8 = vpack.c.bf16 %v1319_v14, %v1317_v4  ;;  %v1270_v60 = vld [vmem:[%s7079_s3 + $0x1cd0] sm:$0xff]  ;;  %v3765_v14 = vpack.c.bf16 %v1334_v62, %v1332_v61  ;;  %v1293_v62 = vld [vmem:[%s7079_s3 + $0x1d88] sm:$0xff] }
 0x431   : > { %v3701_v4 = vpack.c.bf16 %v1270_v60, %v1268_v59  ;;  %v1352_v59 = vld [vmem:[%s7079_s3 + $0x1f60] sm:$0xff]  ;;  %v1354_v61 = vld [vmem:[%s7079_s3 + $0x1f70] sm:$0xff] }
 0x435   : > { %3682 = vmatpush1.bf16.xpose.msra.mxu1 %v3681_v5  ;;  %v3703_v5 = vpack.c.bf16 %v1275_v0, %v1273_v63  ;;  %v1295_v63 = vld [vmem:[%s7079_s3 + $0x1d98] sm:$0xff] }
 0x436   : > { %3746 = vmatpush1.bf16.xpose.msra.mxu0 %v3745_v6  ;;  %3684 = vmatprep.subr.bf16.mxu1 %v3683_v7  ;;  %v3767_v6 = vpack.c.bf16 %v1339_v3, %v1337_v1  ;;  %v1272_v7 = vld [vmem:[%s7079_s3 + $0x1ce0] sm:$0xff]  ;;  %v1357_v3 = vld [vmem:[%s7079_s3 + $0x1f88] sm:$0xff]  ;;  %v3723_v9 = vpack.c.bf16 %v1295_v63, %v1293_v62 }
 0x437   : > { %3748 = vmatprep.subr.bf16.mxu0 %v3747_v8  ;;  %v1274_v8 = vld [vmem:[%s7079_s3 + $0x1cf0] sm:$0xff] }
 0x438   : > { %v3705_v15 = vpack.c.bf16 %v1274_v8, %v1272_v7  ;;  %v3785_v8 = vpack.c.bf16 %v1354_v61, %v1352_v59 }
 0x43d   : > { %3686 = vmatpush1.bf16.xpose.msra.mxu1 %v3685_v17  ;;  %v3707_v17 = vpack.c.bf16 %v1279_v11, %v1277_v10 }
 0x43e   : > { %3750 = vmatpush1.bf16.xpose.msra.mxu0 %v3749_v19  ;;  %3688 = vmatprep.subr.bf16.mxu1 %v3687_v20  ;;  %v3771_v19 = vpack.c.bf16 %v1343_v13, %v1341_v12  ;;  %v1276_v20 = vld [vmem:[%s7079_s3 + $0x1d00] sm:$0xff] }
 0x43f   : > { %3752 = vmatprep.subr.bf16.mxu0 %v3751_v21  ;;  %v1278_v21 = vld [vmem:[%s7079_s3 + $0x1d10] sm:$0xff]  ;;  %v1292_v13 = vld [vmem:[%s7079_s3 + $0x1d80] sm:$0xff] }
 0x440   : > { %v3709_v28 = vpack.c.bf16 %v1278_v21, %v1276_v20  ;;  %v1299_v20 = vld [vmem:[%s7079_s3 + $0x1db8] sm:$0xff]  ;;  %v1361_v21 = vld [vmem:[%s7079_s3 + $0x1fa8] sm:$0xff] }
 0x445   : > { %3690 = vmatpush1.bf16.xpose.msra.mxu1 %v3689_v30  ;;  %v3711_v30 = vpack.c.bf16 %v1283_v25, %v1281_v24 }
 0x446   : > { %3754 = vmatpush1.bf16.xpose.msra.mxu0 %v3753_v31  ;;  %3692 = vmatprep.subr.bf16.mxu1 %v3691_v32  ;;  %v3775_v31 = vpack.c.bf16 %v1347_v27, %v1345_v26  ;;  %v1280_v32 = vld [vmem:[%s7079_s3 + $0x1d20] sm:$0xff]  ;;  %v3791_v26 = vpack.c.bf16 %v1363_v22, %v1361_v21 }
 0x447   : > { %3756 = vmatprep.subr.bf16.mxu0 %v3755_v33  ;;  %v1282_v33 = vld [vmem:[%s7079_s3 + $0x1d30] sm:$0xff]  ;;  %v1296_v27 = vld [vmem:[%s7079_s3 + $0x1da0] sm:$0xff] }
 0x448   : > { %v3713_v41 = vpack.c.bf16 %v1282_v33, %v1280_v32  ;;  %v1303_v32 = vld [vmem:[%s7079_s3 + $0x1dd8] sm:$0xff]  ;;  %v1365_v33 = vld [vmem:[%s7079_s3 + $0x1fc8] sm:$0xff] }
 0x44d   : > { %3694 = vmatpush1.bf16.xpose.msra.mxu1 %v3693_v43  ;;  %v3715_v43 = vpack.c.bf16 %v1287_v38, %v1285_v37 }
 0x44e   : > { %3758 = vmatpush1.bf16.xpose.msra.mxu0 %v3757_v44  ;;  %3696 = vmatprep.subr.bf16.mxu1 %v3695_v45  ;;  %v3779_v44 = vpack.c.bf16 %v1351_v40, %v1349_v39  ;;  %v1284_v45 = vld [vmem:[%s7079_s3 + $0x1d40] sm:$0xff]  ;;  %v3795_v39 = vpack.c.bf16 %v1367_v35, %v1365_v33 }
 0x44f   : > { %3760 = vmatprep.subr.bf16.mxu0 %v3759_v46  ;;  %v1286_v46 = vld [vmem:[%s7079_s3 + $0x1d50] sm:$0xff]  ;;  %v1300_v40 = vld [vmem:[%s7079_s3 + $0x1dc0] sm:$0xff] }
 0x450   : > { %v3717_v53 = vpack.c.bf16 %v1286_v46, %v1284_v45  ;;  %v1307_v45 = vld [vmem:[%s7079_s3 + $0x1df8] sm:$0xff]  ;;  %v1369_v46 = vld [vmem:[%s7079_s3 + $0x1fe8] sm:$0xff] }
 0x455   : > { %3698 = vmatpush1.bf16.xpose.msra.mxu1 %v3697_v55  ;;  %v3719_v55 = vpack.c.bf16 %v1291_v50, %v1289_v49 }
 0x456   : > { %3762 = vmatpush1.bf16.xpose.msra.mxu0 %v3761_v56  ;;  %3700 = vmatprep.subr.bf16.mxu1 %v3699_v57  ;;  %v3783_v56 = vpack.c.bf16 %v1355_v52, %v1353_v51  ;;  %v1288_v57 = vld [vmem:[%s7079_s3 + $0x1d60] sm:$0xff]  ;;  %v3799_v51 = vpack.c.bf16 %v1371_v47, %v1369_v46 }
 0x457   : > { %3764 = vmatprep.subr.bf16.mxu0 %v3763_v58  ;;  %v1290_v58 = vld [vmem:[%s7079_s3 + $0x1d70] sm:$0xff]  ;;  %v1304_v52 = vld [vmem:[%s7079_s3 + $0x1de0] sm:$0xff] }
 0x45d   : > { %3702 = vmatpush1.bf16.xpose.msra.mxu1 %v3701_v4  ;;  %v1359_v4 = vld [vmem:[%s7079_s3 + $0x1f98] sm:$0xff] }
 0x45e   : > { %3766 = vmatpush1.bf16.xpose.msra.mxu0 %v3765_v14  ;;  %3704 = vmatprep.subr.bf16.mxu1 %v3703_v5  ;;  %v3787_v10 = vpack.c.bf16 %v1359_v4, %v1357_v3 }
 0x45f   : > { %3768 = vmatprep.subr.bf16.mxu0 %v3767_v6  ;;  %v3721_v6 = vpack.c.bf16 %v1290_v58, %v1288_v57 }
 0x465   : > { %3706 = vmatpush1.bf16.xpose.msra.mxu1 %v3705_v15  ;;  %v1294_v15 = vld [vmem:[%s7079_s3 + $0x1d90] sm:$0xff] }
 0x466   : > { %3770 = vmatpush1.bf16.xpose.msra.mxu0 %v3769_v16  ;;  %3708 = vmatprep.subr.bf16.mxu1 %v3707_v17  ;;  %v1356_v16 = vld [vmem:[%s7079_s3 + $0x1f80] sm:$0xff]  ;;  %v1358_v17 = vld [vmem:[%s7079_s3 + $0x1f90] sm:$0xff]  ;;  %v3725_v23 = vpack.c.bf16 %v1294_v15, %v1292_v13 }
 0x467   : > { %3772 = vmatprep.subr.bf16.mxu0 %v3771_v19  ;;  %v1297_v19 = vld [vmem:[%s7079_s3 + $0x1da8] sm:$0xff]  ;;  %v3789_v24 = vpack.c.bf16 %v1358_v17, %v1356_v16 }
 0x468   : > { %v3727_v25 = vpack.c.bf16 %v1299_v20, %v1297_v19 }
 0x46d   : > { %3710 = vmatpush1.bf16.xpose.msra.mxu1 %v3709_v28  ;;  %v1298_v28 = vld [vmem:[%s7079_s3 + $0x1db0] sm:$0xff] }
 0x46e   : > { %3774 = vmatpush1.bf16.xpose.msra.mxu0 %v3773_v29  ;;  %3712 = vmatprep.subr.bf16.mxu1 %v3711_v30  ;;  %v1360_v29 = vld [vmem:[%s7079_s3 + $0x1fa0] sm:$0xff]  ;;  %v1362_v30 = vld [vmem:[%s7079_s3 + $0x1fb0] sm:$0xff]  ;;  %v3729_v36 = vpack.c.bf16 %v1298_v28, %v1296_v27 }
 0x46f   : > { %3776 = vmatprep.subr.bf16.mxu0 %v3775_v31  ;;  %v1301_v31 = vld [vmem:[%s7079_s3 + $0x1dc8] sm:$0xff]  ;;  %v3793_v37 = vpack.c.bf16 %v1362_v30, %v1360_v29 }
 0x470   : > { %v3731_v38 = vpack.c.bf16 %v1303_v32, %v1301_v31 }
 0x475   : > { %3714 = vmatpush1.bf16.xpose.msra.mxu1 %v3713_v41  ;;  %v1302_v41 = vld [vmem:[%s7079_s3 + $0x1dd0] sm:$0xff] }
 0x476   : > { %3778 = vmatpush1.bf16.xpose.msra.mxu0 %v3777_v42  ;;  %3716 = vmatprep.subr.bf16.mxu1 %v3715_v43  ;;  %v1364_v42 = vld [vmem:[%s7079_s3 + $0x1fc0] sm:$0xff]  ;;  %v1366_v43 = vld [vmem:[%s7079_s3 + $0x1fd0] sm:$0xff]  ;;  %v3733_v48 = vpack.c.bf16 %v1302_v41, %v1300_v40 }
 0x477   : > { %3780 = vmatprep.subr.bf16.mxu0 %v3779_v44  ;;  %v1305_v44 = vld [vmem:[%s7079_s3 + $0x1de8] sm:$0xff]  ;;  %v3797_v49 = vpack.c.bf16 %v1366_v43, %v1364_v42 }
 0x478   : > { %v3735_v50 = vpack.c.bf16 %v1307_v45, %v1305_v44 }
 0x47d   : > { %3718 = vmatpush1.bf16.xpose.msra.mxu1 %v3717_v53  ;;  %v1306_v53 = vld [vmem:[%s7079_s3 + $0x1df0] sm:$0xff] }
 0x47e   : > { %3782 = vmatpush1.bf16.xpose.msra.mxu0 %v3781_v54  ;;  %3720 = vmatprep.subr.bf16.mxu1 %v3719_v55  ;;  %v1368_v54 = vld [vmem:[%s7079_s3 + $0x1fe0] sm:$0xff]  ;;  %v1370_v55 = vld [vmem:[%s7079_s3 + $0x1ff0] sm:$0xff] }
 0x47f   : > { %v2148_v60 = vpop.f32.mrb[10].mxu1  ;;  %3784 = vmatprep.subr.bf16.mxu0 %v3783_v56  ;;  %v3737_v56 = vpack.c.bf16 %v1306_v53, %v1304_v52  ;;  %v3801_v57 = vpack.c.bf16 %v1370_v55, %v1368_v54 }
 0x480   : > { %v2219_v0 = vpop.f32.mrb[14].mxu0  ;;  %v2150_v1 = vpop.f32.mrb[11].mxu1 }
 0x481   : > { %v2625_v14 = vcombine.low %v2148_v60, %v2150_v1  ;;  %v2221_v5 = vpop.f32.mrb[15].mxu0 }
 0x482   : > { %v2626_v7 = vcombine.low %v2219_v0, %v2221_v5 }
 0x483   : > { %v2633_v2 = vrot.slane %v2625_v14, %v5000_v34 }
 0x484   : > { %v2640_v11 = vrot.slane %v2626_v7, %v5000_v34 }
 0x485   : > { %3722 = vmatpush1.bf16.xpose.msra.mxu1 %v3721_v6 }
 0x486   : > { %v2641_v12 = vcombine.low %v2633_v2, %v2640_v11  ;;  %3786 = vmatpush1.bf16.xpose.msra.mxu0 %v3785_v8  ;;  %3724 = vmatprep.subr.bf16.mxu1 %v3723_v9 }
 0x487   : > { %3788 = vmatprep.subr.bf16.mxu0 %v3787_v10 }
 0x488   : > { %2689 = vst [vmem:[%s5023_s22 + $0x28] sm:$0xff] %v2641_v12 }
 0x48d   : > { %3726 = vmatpush1.bf16.xpose.msra.mxu1 %v3725_v23 }
 0x48e   : > { %3790 = vmatpush1.bf16.xpose.msra.mxu0 %v3789_v24  ;;  %3728 = vmatprep.subr.bf16.mxu1 %v3727_v25 }
 0x48f   : > { %3792 = vmatprep.subr.bf16.mxu0 %v3791_v26 }
 0x495   : > { %3730 = vmatpush1.bf16.xpose.msra.mxu1 %v3729_v36 }
 0x496   : > { %3794 = vmatpush1.bf16.xpose.msra.mxu0 %v3793_v37  ;;  %3732 = vmatprep.subr.bf16.mxu1 %v3731_v38 }
 0x497   : > { %3796 = vmatprep.subr.bf16.mxu0 %v3795_v39 }
 0x49d   : > { %3734 = vmatpush1.bf16.xpose.msra.mxu1 %v3733_v48 }
 0x49e   : > { %3798 = vmatpush1.bf16.xpose.msra.mxu0 %v3797_v49  ;;  %3736 = vmatprep.subr.bf16.mxu1 %v3735_v50 }
 0x49f   : > { %3800 = vmatprep.subr.bf16.mxu0 %v3799_v51 }
 0x4a5   : > { %3738 = vmatpush1.bf16.xpose.msra.mxu1 %v3737_v56 }
 0x4a6   : > { %3802 = vmatpush1.bf16.xpose.msra.mxu0 %v3801_v57 }
 0x4ac   : > { %2431 = vmatmul.mubr.f32.vlgmr.msra.gmra.mrb[14].mxu1 %v4355_v18 }
 0x4ad   : > { %2502 = vmatmul.mubr.f32.vlgmr.msra.gmra.mrb[18].mxu0 %v4355_v18 }
 0x4ff   : > { %v2290_v58 = vpop.f32.mrb[12].mxu1 }
 0x500   : > { %v2361_v59 = vpop.f32.mrb[16].mxu0  ;;  %v2292_v60 = vpop.f32.mrb[13].mxu1 }
 0x501   : > { %v2642_v61 = vcombine.low %v2290_v58, %v2292_v60  ;;  %v2363_v62 = vpop.f32.mrb[17].mxu0 }
 0x502   : > { %v2643_v63 = vcombine.low %v2361_v59, %v2363_v62 }
 0x503   : > { %v2650_v0 = vrot.slane %v2642_v61, %v5000_v34 }
 0x504   : > { %v2657_v1 = vrot.slane %v2643_v63, %v5000_v34 }
 0x506   : > { %v2658_v3 = vcombine.low %v2650_v0, %v2657_v1 }
 0x508   : > { %2690 = vst [vmem:[%s5023_s22 + $0x30] sm:$0xff] %v2658_v3 }
 0x57f   : > { %v2432_v4 = vpop.f32.mrb[14].mxu1 }
 0x580   : > { %v2503_v14 = vpop.f32.mrb[18].mxu0  ;;  %v2434_v5 = vpop.f32.mrb[15].mxu1 }
 0x581   : > { %v2659_v6 = vcombine.low %v2432_v4, %v2434_v5  ;;  %v2505_v7 = vpop.f32.mrb[19].mxu0 }
 0x582   : > { %v2660_v8 = vcombine.low %v2503_v14, %v2505_v7 }
 0x583   : > { %v2667_v18 = vrot.slane %v2659_v6, %v5000_v34 }
 0x584   : > { %v2674_v9 = vrot.slane %v2660_v8, %v5000_v34 }
 0x586   : > { %v2675_v2 = vcombine.low %v2667_v18, %v2674_v9 }
 0x588   : > { %2691 = vst [vmem:[%s5023_s22 + $0x38] sm:$0xff] %v2675_v2 }
 0x589 PF: > { %s14_s15 = sadd.s32 1, %s3828_s15  }
 0x58a   : > { %p11_p4 = scmp.ge.s32.totalorder %s14_s15, 4  }
 0x58c   :  { %13 = sbr.rel (!%p11_p4) target bundleno = 1 (0x1), region = 66 }

</bundles_post_ra>
